<compile_context>
chip_gen: v6e
topology: v6e:2x2x1
jax: 0.10.0
libtpu: 0.0.40
codegen_flags: <defaults>
</compile_context>

<pallas_src>
import jax
import jax.numpy as jnp
from jax.experimental import pallas as pl
from jax.experimental.pallas import tpu as pltpu

EPS = 1e-5

_MAX_TILE_M = 1024                  # rows per grid step (multiple of 8)
_VMEM_LIMIT_BYTES = 32 * 1024 * 1024  # sized for v7x (64 MiB phys / 32 MiB scoped)


# ----------------------------- Pallas kernels -------------------------------


def _conv_epilogue_kernel(x_ref, w_ref, s_ref, b_ref, m_ref, o_ref):
    # conv-as-matmul on the MXU (bf16 operands, f32 accumulate),
    # fused per-channel affine (BN x gate) and per-column ReLU mask.
    acc = jnp.dot(x_ref[...], w_ref[...], preferred_element_type=jnp.float32)
    y = acc * s_ref[...] + b_ref[...]
    o_ref[...] = jnp.where(m_ref[...] > 0.0, jnp.maximum(y, 0.0), y)


def _conv_residual_kernel(x_ref, w_ref, s_ref, b_ref, r_ref, g_ref, o_ref):
    # conv2 epilogue of a BasicBlock:
    #   out = (bn2(conv2(h)) * g2 + res) * g2   (g2 folded into s_ref/b_ref)
    acc = jnp.dot(x_ref[...], w_ref[...], preferred_element_type=jnp.float32)
    o_ref[...] = (acc * s_ref[...] + b_ref[...] + r_ref[...]) * g_ref[...]


# ----------------------------- Pallas wrappers -------------------------------


def _round_up(x, m):
    return ((x + m - 1) // m) * m


def _tiling(m):
    """Pick (tile_m, padded_m): tile is a multiple of 8 and divides padded_m."""
    m8 = _round_up(m, 8)
    if m8 <= _MAX_TILE_M:
        return m8, m8
    return _MAX_TILE_M, _round_up(m, _MAX_TILE_M)


def _pad_rows(a, m_pad):
    m = a.shape[0]
    if m_pad == m:
        return a
    return jnp.pad(a, ((0, m_pad - m), (0, 0)))


def _compiler_params():
    return pltpu.CompilerParams(
        dimension_semantics=("parallel",),      # M-rows are independent (2 TCs on v7x)
        vmem_limit_bytes=_VMEM_LIMIT_BYTES,
    )


def _fused_conv(cols, w2d, scale, bias, relu_mask):
    """y = relu_mask? relu(cols @ w2d * scale + bias) : (cols @ w2d * scale + bias)."""
    M, K = cols.shape
    N = w2d.shape[1]
    tile, m_pad = _tiling(M)
    x = _pad_rows(cols, m_pad)
    cost = pl.CostEstimate(
        flops=2 * m_pad * K * N,
        transcendentals=0,
        bytes_accessed=m_pad * K * 2 + K * N * 2 + m_pad * N * 4,
    )
    out = pl.pallas_call(
        _conv_epilogue_kernel,
        out_shape=jax.ShapeDtypeStruct((m_pad, N), jnp.float32),
        grid=(m_pad // tile,),
        in_specs=[
            pl.BlockSpec((tile, K), lambda i: (i, 0)),   # activation tile (streamed)
            pl.BlockSpec((K, N), lambda i: (0, 0)),      # weights (resident)
            pl.BlockSpec((1, N), lambda i: (0, 0)),      # scale
            pl.BlockSpec((1, N), lambda i: (0, 0)),      # bias
            pl.BlockSpec((1, N), lambda i: (0, 0)),      # relu mask
        ],
        out_specs=pl.BlockSpec((tile, N), lambda i: (i, 0)),
        compiler_params=_compiler_params(),
        cost_estimate=cost,
    )(x, w2d, scale, bias, relu_mask)
    return out[:M] if m_pad != M else out


def _fused_conv_residual(cols, w2d, scale, bias, res, gate):
    """y = (cols @ w2d * scale + bias + res) * gate."""
    M, K = cols.shape
    N = w2d.shape[1]
    tile, m_pad = _tiling(M)
    x = _pad_rows(cols, m_pad)
    r = _pad_rows(res, m_pad)
    cost = pl.CostEstimate(
        flops=2 * m_pad * K * N,
        transcendentals=0,
        bytes_accessed=m_pad * K * 2 + K * N * 2 + 2 * m_pad * N * 4,
    )
    out = pl.pallas_call(
        _conv_residual_kernel,
        out_shape=jax.ShapeDtypeStruct((m_pad, N), jnp.float32),
        grid=(m_pad // tile,),
        in_specs=[
            pl.BlockSpec((tile, K), lambda i: (i, 0)),   # im2col tile (streamed)
            pl.BlockSpec((K, N), lambda i: (0, 0)),      # weights (resident)
            pl.BlockSpec((1, N), lambda i: (0, 0)),      # scale (bn2*g2)
            pl.BlockSpec((1, N), lambda i: (0, 0)),      # bias  (bn2*g2)
            pl.BlockSpec((tile, N), lambda i: (i, 0)),   # residual tile (streamed)
            pl.BlockSpec((1, N), lambda i: (0, 0)),      # gate2
        ],
        out_specs=pl.BlockSpec((tile, N), lambda i: (i, 0)),
        compiler_params=_compiler_params(),
        cost_estimate=cost,
    )(x, w2d, scale, bias, r, gate)
    return out[:M] if m_pad != M else out


# ------------------------------- JAX glue ------------------------------------


def _im2col(x_nhwc, kh, kw, stride, pad):
    N, H, W, C = x_nhwc.shape
    xp = jnp.pad(x_nhwc, ((0, 0), (pad, pad), (pad, pad), (0, 0)))
    Ho = (H + 2 * pad - kh) // stride + 1
    Wo = (W + 2 * pad - kw) // stride + 1
    cols = []
    for i in range(kh):
        for j in range(kw):
            patch = xp[:, i:i + (Ho - 1) * stride + 1:stride,
                       j:j + (Wo - 1) * stride + 1:stride, :]
            cols.append(patch)
    col = jnp.concatenate(cols, axis=-1)  # (N, Ho, Wo, kh*kw*C)
    return col.reshape(N * Ho * Wo, kh * kw * C), (N, Ho, Wo)


def _fold_bn(bn):
    s = bn["gamma"] / jnp.sqrt(bn["var"] + EPS)
    b = bn["beta"] - bn["mean"] * s
    return s, b


def _w3x3_to_2d(w_oihw):
    Cout, Cin, KH, KW = w_oihw.shape
    return jnp.transpose(w_oihw, (2, 3, 1, 0)).reshape(KH * KW * Cin, Cout)


def conv_bn_act(x_nhwc, w_oihw, scale_c, bias_c, stride, pad, relu):
    """Generic conv + folded-BN/gate affine + optional ReLU (used for the stem)."""
    Cout, Cin, KH, KW = w_oihw.shape
    cols, (N, Ho, Wo) = _im2col(x_nhwc.astype(jnp.bfloat16), KH, KW, stride, pad)
    w2 = _w3x3_to_2d(w_oihw).astype(jnp.bfloat16)
    rmask = jnp.full((1, Cout), 1.0 if relu else 0.0, jnp.float32)
    y = _fused_conv(cols, w2,
                    scale_c.reshape(1, Cout).astype(jnp.float32),
                    bias_c.reshape(1, Cout).astype(jnp.float32),
                    rmask)
    return y.reshape(N, Ho, Wo, Cout)


def maxpool_3x3_s2_p1(x_nhwc):
    # Left to XLA fusion per perf review (tiny op; a Pallas kernel adds no value
    # over the materialisation cost of the taps).
    N, H, W, C = x_nhwc.shape
    xp = jnp.pad(x_nhwc, ((0, 0), (1, 1), (1, 1), (0, 0)),
                 constant_values=-jnp.inf)
    Ho = (H + 2 - 3) // 2 + 1
    Wo = (W + 2 - 3) // 2 + 1
    out = None
    for i in range(3):
        for j in range(3):
            tap = xp[:, i:i + 2 * (Ho - 1) + 1:2, j:j + 2 * (Wo - 1) + 1:2, :]
            out = tap if out is None else jnp.maximum(out, tap)
    return out


def basic_block(x_nhwc, p, stride):
    Cout, Cin, _, _ = p["w1"].shape

    s1, b1 = _fold_bn(p["bn1"])
    g1 = p["g1"]
    ssc, bsc = _fold_bn(p["sc_bn"])
    s2, b2 = _fold_bn(p["bn2"])
    g2 = p["g2"]

    # --- conv1 (3x3) + shortcut (1x1) packed into ONE matmul (N = 2*Cout) ----
    # The 1x1/stride-s shortcut reads exactly the centre im2col tap of the
    # 3x3/stride-s/pad-1 conv, so its weights slot into rows [4*Cin, 5*Cin).
    w1_2d = _w3x3_to_2d(p["w1"])                     # (9*Cin, Cout)
    wsc_2d = p["sc_w"].reshape(Cout, Cin).T          # (Cin, Cout)
    w_pack = jnp.zeros((9 * Cin, 2 * Cout), jnp.float32)
    w_pack = w_pack.at[:, :Cout].set(w1_2d)
    w_pack = w_pack.at[4 * Cin:5 * Cin, Cout:].set(wsc_2d)

    scale = jnp.concatenate([s1 * g1, ssc]).reshape(1, 2 * Cout).astype(jnp.float32)
    bias = jnp.concatenate([b1 * g1, bsc]).reshape(1, 2 * Cout).astype(jnp.float32)
    rmask = jnp.concatenate([jnp.ones((Cout,), jnp.float32),
                             jnp.zeros((Cout,), jnp.float32)]).reshape(1, 2 * Cout)

    cols, (N, Ho, Wo) = _im2col(x_nhwc.astype(jnp.bfloat16), 3, 3, stride, 1)
    y = _fused_conv(cols, w_pack.astype(jnp.bfloat16), scale, bias, rmask)
    h = y[:, :Cout]          # relu(gate1 * bn1(conv1(x)))
    res = y[:, Cout:]        # bn_sc(conv_sc(x))

    # --- conv2 (3x3, s=1) + bn2 + gate2, residual add + final gate fused -----
    h_nhwc = h.reshape(N, Ho, Wo, Cout).astype(jnp.bfloat16)
    cols2, _ = _im2col(h_nhwc, 3, 3, 1, 1)
    w2_2d = _w3x3_to_2d(p["w2"]).astype(jnp.bfloat16)
    out = _fused_conv_residual(
        cols2, w2_2d,
        (s2 * g2).reshape(1, Cout).astype(jnp.float32),
        (b2 * g2).reshape(1, Cout).astype(jnp.float32),
        res,
        g2.reshape(1, Cout).astype(jnp.float32),
    )
    return out.reshape(N, Ho, Wo, Cout)


# ---------------------------- model definition --------------------------------

# 17-entry channel config (small, ResNet-18-like structure) and branch point.
CONFIG = [8, 8, 8, 8, 16, 16, 16, 16, 32, 32, 32, 32, 32, 32, 64, 64, 64]
BRANCH_POINT = 8
NUM_SHARED = BRANCH_POINT // 2 + 1

STRIDES = [1] * 17
STRIDES[0] = 2
STRIDES[4] = 2
STRIDES[8] = 2
STRIDES[14] = 2


def _init_bn(key, c):
    k1, k2, k3, k4 = jax.random.split(key, 4)
    return dict(
        gamma=1.0 + 0.1 * jax.random.normal(k1, (c,), jnp.float32),
        beta=0.1 * jax.random.normal(k2, (c,), jnp.float32),
        mean=0.1 * jax.random.normal(k3, (c,), jnp.float32),
        var=0.5 + jax.random.uniform(k4, (c,), jnp.float32),
    )


def _init_block(key, cin, cout):
    keys = jax.random.split(key, 8)
    return dict(
        w1=0.1 * jax.random.normal(keys[0], (cout, cin, 3, 3), jnp.float32),
        bn1=_init_bn(keys[1], cout),
        g1=1.0 + 0.05 * jax.random.normal(keys[2], (cout,), jnp.float32),
        w2=0.1 * jax.random.normal(keys[3], (cout, cout, 3, 3), jnp.float32),
        bn2=_init_bn(keys[4], cout),
        g2=1.0 + 0.05 * jax.random.normal(keys[5], (cout,), jnp.float32),
        sc_w=0.1 * jax.random.normal(keys[6], (cout, cin, 1, 1), jnp.float32),
        sc_bn=_init_bn(keys[7], cout),
    )


def init_params(key):
    keys = jax.random.split(key, 4 + 16 + 2 * 16)
    params = dict(
        conv1_w=0.1 * jax.random.normal(keys[0], (CONFIG[0], 3, 7, 7),
                                        jnp.float32),
        bn1=_init_bn(keys[1], CONFIG[0]),
        conv_gate2=1.0 + 0.05 * jax.random.normal(keys[2], (CONFIG[0],),
                                                  jnp.float32),
    )
    kidx = 4
    shared = []
    for i in range(1, NUM_SHARED):
        shared.append(_init_block(keys[kidx], CONFIG[i - 1], CONFIG[i]))
        kidx += 1
    params["shared"] = shared
    for branch in ("left", "right"):
        blks = []
        for i in range(NUM_SHARED, 17):
            blks.append(_init_block(keys[kidx], CONFIG[i - 1], CONFIG[i]))
            kidx += 1
        params[branch] = blks
    return params


def forward(params, x_nchw):
    # PyTorch NCHW input -> NHWC internal layout
    x = jnp.transpose(x_nchw, (0, 2, 3, 1)).astype(jnp.float32)

    # stem: conv1 (7x7 s2 p3) + bn1 + conv_gate2 + relu
    s1, b1 = _fold_bn(params["bn1"])
    g = params["conv_gate2"]
    x = conv_bn_act(x, params["conv1_w"], s1 * g, b1 * g, stride=2, pad=3,
                    relu=True)
    # maxpool 3x3 s2 p1
    x = maxpool_3x3_s2_p1(x)

    # shared blocks (indices 1 .. NUM_SHARED-1)
    for bi, p in enumerate(params["shared"]):
        x = basic_block(x, p, STRIDES[1 + bi])

    # branches (indices NUM_SHARED .. 16)
    def run_branch(blocks, xb):
        for bi, p in enumerate(blocks):
            xb = basic_block(xb, p, STRIDES[NUM_SHARED + bi])
        return xb

    left_x = run_branch(params["left"], x)
    right_x = run_branch(params["right"], x)

    to_nchw = lambda t: jnp.transpose(t, (0, 3, 1, 2))
    return {
        "segment_semantic": to_nchw(left_x),
        "normal": to_nchw(right_x),
        "depth_zbuffer": to_nchw(right_x),
    }


# --------------------------------- main ---------------------------------------

if __name__ == "__main__":
    key = jax.random.PRNGKey(0)
    k_params, k_x = jax.random.split(key)
    params = init_params(k_params)
    x = jax.random.normal(k_x, (2, 3, 64, 64), jnp.float32)  # NCHW like PyTorch

    fwd = jax.jit(forward)
    out = fwd(params, x)
    jax.block_until_ready(out)

    assert out["segment_semantic"].shape[1] == CONFIG[16]
    assert out["normal"].shape == out["depth_zbuffer"].shape
    print("KERNEL_OK")
</pallas_src>

<mosaic_0001>
module attributes {stable_mosaic.version = 11 : i64} {
  func.func @_conv_epilogue_kernel(%arg0: i32, %arg1: memref<1024x147xbf16, #tpu.memory_space<vmem>>, %arg2: memref<147x8xbf16, #tpu.memory_space<vmem>>, %arg3: memref<1x8xf32, #tpu.memory_space<vmem>>, %arg4: memref<1x8xf32, #tpu.memory_space<vmem>>, %arg5: memref<1x8xf32, #tpu.memory_space<vmem>>, %arg6: memref<1024x8xf32, #tpu.memory_space<vmem>>) attributes {dimension_semantics = [#tpu.dimension_semantics<parallel>], iteration_bounds = array<i64: 2>, scalar_prefetch = 0 : i64, scratch_operands = 0 : i64, tpu.core_type = #tpu.core_type<tc>, window_params = [{transform_indices = @transform_0, window_bounds = array<i64: 1024, 147>}, {pipeline_mode = #tpu.pipeline_mode<synchronous>, transform_indices = @transform_1, window_bounds = array<i64: 147, 8>}, {pipeline_mode = #tpu.pipeline_mode<synchronous>, transform_indices = @transform_2, window_bounds = array<i64: 1, 8>}, {pipeline_mode = #tpu.pipeline_mode<synchronous>, transform_indices = @transform_3, window_bounds = array<i64: 1, 8>}, {pipeline_mode = #tpu.pipeline_mode<synchronous>, transform_indices = @transform_4, window_bounds = array<i64: 1, 8>}, {transform_indices = @transform_5, window_bounds = array<i64: 1024, 8>}]} {
    %c0 = arith.constant 0 : index
    %c0_0 = arith.constant 0 : index
    %0 = vector.load %arg1[%c0, %c0_0] : memref<1024x147xbf16, #tpu.memory_space<vmem>>, vector<1024x147xbf16>
    %c0_1 = arith.constant 0 : index
    %c0_2 = arith.constant 0 : index
    %1 = vector.load %arg2[%c0_1, %c0_2] : memref<147x8xbf16, #tpu.memory_space<vmem>>, vector<147x8xbf16>
    %cst = arith.constant dense<0.000000e+00> : vector<1024x8xf32>
    %2 = tpu.matmul %0, %1, %cst {dimension_numbers = #tpu.dot_dimension_numbers<[1], [0], [0], [1], [0, 0, 1, 1], [], []>} : vector<1024x147xbf16>, vector<147x8xbf16>, vector<1024x8xf32> -> vector<1024x8xf32>
    %c0_3 = arith.constant 0 : index
    %c0_4 = arith.constant 0 : index
    %3 = vector.load %arg3[%c0_3, %c0_4] : memref<1x8xf32, #tpu.memory_space<vmem>>, vector<1x8xf32>
    %4 = vector.broadcast %3 : vector<1x8xf32> to vector<1024x8xf32>
    %5 = arith.mulf %2, %4 : vector<1024x8xf32>
    %c0_5 = arith.constant 0 : index
    %c0_6 = arith.constant 0 : index
    %6 = vector.load %arg4[%c0_5, %c0_6] : memref<1x8xf32, #tpu.memory_space<vmem>>, vector<1x8xf32>
    %7 = vector.broadcast %6 : vector<1x8xf32> to vector<1024x8xf32>
    %8 = arith.addf %5, %7 : vector<1024x8xf32>
    %c0_7 = arith.constant 0 : index
    %c0_8 = arith.constant 0 : index
    %9 = vector.load %arg5[%c0_7, %c0_8] : memref<1x8xf32, #tpu.memory_space<vmem>>, vector<1x8xf32>
    %cst_9 = arith.constant 0.000000e+00 : f32
    %10 = vector.broadcast %cst_9 : f32 to vector<1x8xf32>
    %11 = arith.cmpf ogt, %9, %10 : vector<1x8xf32>
    %cst_10 = arith.constant 0.000000e+00 : f32
    %12 = vector.broadcast %cst_10 : f32 to vector<1024x8xf32>
    %13 = arith.maximumf %8, %12 : vector<1024x8xf32>
    %14 = vector.shape_cast %11 : vector<1x8xi1> to vector<1x8xi1>
    %15 = vector.broadcast %14 : vector<1x8xi1> to vector<1024x8xi1>
    %16 = arith.select %15, %13, %8 : vector<1024x8xi1>, vector<1024x8xf32>
    %c0_11 = arith.constant 0 : index
    %c0_12 = arith.constant 0 : index
    %17 = vector.load %arg6[%c0_11, %c0_12] : memref<1024x8xf32, #tpu.memory_space<vmem>>, vector<1024x8xf32>
    tpu.vector_store %arg6[%c0_11, %c0_12], %16 {strides = array<i32>} : memref<1024x8xf32, #tpu.memory_space<vmem>>, vector<1024x8xf32>,
    return
  }
  func.func @transform_0(%arg0: i32) -> (i32, i32) {
    %c0_i32 = arith.constant 0 : i32
    %c0_i32_0 = arith.constant 0 : i32
    return %arg0, %c0_i32 : i32, i32
  }
  func.func @transform_1(%arg0: i32) -> (i32, i32) {
    %c0_i32 = arith.constant 0 : i32
    %c0_i32_0 = arith.constant 0 : i32
    %c0_i32_1 = arith.constant 0 : i32
    return %c0_i32, %c0_i32_0 : i32, i32
  }
  func.func @transform_2(%arg0: i32) -> (i32, i32) {
    %c0_i32 = arith.constant 0 : i32
    %c0_i32_0 = arith.constant 0 : i32
    %c0_i32_1 = arith.constant 0 : i32
    return %c0_i32, %c0_i32_0 : i32, i32
  }
  func.func @transform_3(%arg0: i32) -> (i32, i32) {
    %c0_i32 = arith.constant 0 : i32
    %c0_i32_0 = arith.constant 0 : i32
    %c0_i32_1 = arith.constant 0 : i32
    return %c0_i32, %c0_i32_0 : i32, i32
  }
  func.func @transform_4(%arg0: i32) -> (i32, i32) {
    %c0_i32 = arith.constant 0 : i32
    %c0_i32_0 = arith.constant 0 : i32
    %c0_i32_1 = arith.constant 0 : i32
    return %c0_i32, %c0_i32_0 : i32, i32
  }
  func.func @transform_5(%arg0: i32) -> (i32, i32) {
    %c0_i32 = arith.constant 0 : i32
    %c0_i32_0 = arith.constant 0 : i32
    return %arg0, %c0_i32 : i32, i32
  }
}

module attributes {stable_mosaic.version = 11 : i64} {
  func.func @_conv_epilogue_kernel(%arg0: i32, %arg1: memref<512x72xbf16, #tpu.memory_space<vmem>>, %arg2: memref<72x16xbf16, #tpu.memory_space<vmem>>, %arg3: memref<1x16xf32, #tpu.memory_space<vmem>>, %arg4: memref<1x16xf32, #tpu.memory_space<vmem>>, %arg5: memref<1x16xf32, #tpu.memory_space<vmem>>, %arg6: memref<512x16xf32, #tpu.memory_space<vmem>>) attributes {dimension_semantics = [#tpu.dimension_semantics<parallel>], iteration_bounds = array<i64: 1>, scalar_prefetch = 0 : i64, scratch_operands = 0 : i64, tpu.core_type = #tpu.core_type<tc>, window_params = [{transform_indices = @transform_0, window_bounds = array<i64: 512, 72>}, {pipeline_mode = #tpu.pipeline_mode<synchronous>, transform_indices = @transform_1, window_bounds = array<i64: 72, 16>}, {pipeline_mode = #tpu.pipeline_mode<synchronous>, transform_indices = @transform_2, window_bounds = array<i64: 1, 16>}, {pipeline_mode = #tpu.pipeline_mode<synchronous>, transform_indices = @transform_3, window_bounds = array<i64: 1, 16>}, {pipeline_mode = #tpu.pipeline_mode<synchronous>, transform_indices = @transform_4, window_bounds = array<i64: 1, 16>}, {transform_indices = @transform_5, window_bounds = array<i64: 512, 16>}]} {
    %c0 = arith.constant 0 : index
    %c0_0 = arith.constant 0 : index
    %0 = vector.load %arg1[%c0, %c0_0] : memref<512x72xbf16, #tpu.memory_space<vmem>>, vector<512x72xbf16>
    %c0_1 = arith.constant 0 : index
    %c0_2 = arith.constant 0 : index
    %1 = vector.load %arg2[%c0_1, %c0_2] : memref<72x16xbf16, #tpu.memory_space<vmem>>, vector<72x16xbf16>
    %cst = arith.constant dense<0.000000e+00> : vector<512x16xf32>
    %2 = tpu.matmul %0, %1, %cst {dimension_numbers = #tpu.dot_dimension_numbers<[1], [0], [0], [1], [0, 0, 1, 1], [], []>} : vector<512x72xbf16>, vector<72x16xbf16>, vector<512x16xf32> -> vector<512x16xf32>
    %c0_3 = arith.constant 0 : index
    %c0_4 = arith.constant 0 : index
    %3 = vector.load %arg3[%c0_3, %c0_4] : memref<1x16xf32, #tpu.memory_space<vmem>>, vector<1x16xf32>
    %4 = vector.broadcast %3 : vector<1x16xf32> to vector<512x16xf32>
    %5 = arith.mulf %2, %4 : vector<512x16xf32>
    %c0_5 = arith.constant 0 : index
    %c0_6 = arith.constant 0 : index
    %6 = vector.load %arg4[%c0_5, %c0_6] : memref<1x16xf32, #tpu.memory_space<vmem>>, vector<1x16xf32>
    %7 = vector.broadcast %6 : vector<1x16xf32> to vector<512x16xf32>
    %8 = arith.addf %5, %7 : vector<512x16xf32>
    %c0_7 = arith.constant 0 : index
    %c0_8 = arith.constant 0 : index
    %9 = vector.load %arg5[%c0_7, %c0_8] : memref<1x16xf32, #tpu.memory_space<vmem>>, vector<1x16xf32>
    %cst_9 = arith.constant 0.000000e+00 : f32
    %10 = vector.broadcast %cst_9 : f32 to vector<1x16xf32>
    %11 = arith.cmpf ogt, %9, %10 : vector<1x16xf32>
    %cst_10 = arith.constant 0.000000e+00 : f32
    %12 = vector.broadcast %cst_10 : f32 to vector<512x16xf32>
    %13 = arith.maximumf %8, %12 : vector<512x16xf32>
    %14 = vector.shape_cast %11 : vector<1x16xi1> to vector<1x16xi1>
    %15 = vector.broadcast %14 : vector<1x16xi1> to vector<512x16xi1>
    %16 = arith.select %15, %13, %8 : vector<512x16xi1>, vector<512x16xf32>
    %c0_11 = arith.constant 0 : index
    %c0_12 = arith.constant 0 : index
    %17 = vector.load %arg6[%c0_11, %c0_12] : memref<512x16xf32, #tpu.memory_space<vmem>>, vector<512x16xf32>
    tpu.vector_store %arg6[%c0_11, %c0_12], %16 {strides = array<i32>} : memref<512x16xf32, #tpu.memory_space<vmem>>, vector<512x16xf32>,
    return
  }
  func.func @transform_0(%arg0: i32) -> (i32, i32) {
    %c0_i32 = arith.constant 0 : i32
    %c0_i32_0 = arith.constant 0 : i32
    return %arg0, %c0_i32 : i32, i32
  }
  func.func @transform_1(%arg0: i32) -> (i32, i32) {
    %c0_i32 = arith.constant 0 : i32
    %c0_i32_0 = arith.constant 0 : i32
    %c0_i32_1 = arith.constant 0 : i32
    return %c0_i32, %c0_i32_0 : i32, i32
  }
  func.func @transform_2(%arg0: i32) -> (i32, i32) {
    %c0_i32 = arith.constant 0 : i32
    %c0_i32_0 = arith.constant 0 : i32
    %c0_i32_1 = arith.constant 0 : i32
    return %c0_i32, %c0_i32_0 : i32, i32
  }
  func.func @transform_3(%arg0: i32) -> (i32, i32) {
    %c0_i32 = arith.constant 0 : i32
    %c0_i32_0 = arith.constant 0 : i32
    %c0_i32_1 = arith.constant 0 : i32
    return %c0_i32, %c0_i32_0 : i32, i32
  }
  func.func @transform_4(%arg0: i32) -> (i32, i32) {
    %c0_i32 = arith.constant 0 : i32
    %c0_i32_0 = arith.constant 0 : i32
    %c0_i32_1 = arith.constant 0 : i32
    return %c0_i32, %c0_i32_0 : i32, i32
  }
  func.func @transform_5(%arg0: i32) -> (i32, i32) {
    %c0_i32 = arith.constant 0 : i32
    %c0_i32_0 = arith.constant 0 : i32
    return %arg0, %c0_i32 : i32, i32
  }
}

module attributes {stable_mosaic.version = 11 : i64} {
  func.func @_conv_residual_kernel(%arg0: i32, %arg1: memref<512x72xbf16, #tpu.memory_space<vmem>>, %arg2: memref<72x8xbf16, #tpu.memory_space<vmem>>, %arg3: memref<1x8xf32, #tpu.memory_space<vmem>>, %arg4: memref<1x8xf32, #tpu.memory_space<vmem>>, %arg5: memref<512x8xf32, #tpu.memory_space<vmem>>, %arg6: memref<1x8xf32, #tpu.memory_space<vmem>>, %arg7: memref<512x8xf32, #tpu.memory_space<vmem>>) attributes {dimension_semantics = [#tpu.dimension_semantics<parallel>], iteration_bounds = array<i64: 1>, scalar_prefetch = 0 : i64, scratch_operands = 0 : i64, tpu.core_type = #tpu.core_type<tc>, window_params = [{transform_indices = @transform_0, window_bounds = array<i64: 512, 72>}, {pipeline_mode = #tpu.pipeline_mode<synchronous>, transform_indices = @transform_1, window_bounds = array<i64: 72, 8>}, {pipeline_mode = #tpu.pipeline_mode<synchronous>, transform_indices = @transform_2, window_bounds = array<i64: 1, 8>}, {pipeline_mode = #tpu.pipeline_mode<synchronous>, transform_indices = @transform_3, window_bounds = array<i64: 1, 8>}, {transform_indices = @transform_4, window_bounds = array<i64: 512, 8>}, {pipeline_mode = #tpu.pipeline_mode<synchronous>, transform_indices = @transform_5, window_bounds = array<i64: 1, 8>}, {transform_indices = @transform_6, window_bounds = array<i64: 512, 8>}]} {
    %c0 = arith.constant 0 : index
    %c0_0 = arith.constant 0 : index
    %0 = vector.load %arg1[%c0, %c0_0] : memref<512x72xbf16, #tpu.memory_space<vmem>>, vector<512x72xbf16>
    %c0_1 = arith.constant 0 : index
    %c0_2 = arith.constant 0 : index
    %1 = vector.load %arg2[%c0_1, %c0_2] : memref<72x8xbf16, #tpu.memory_space<vmem>>, vector<72x8xbf16>
    %cst = arith.constant dense<0.000000e+00> : vector<512x8xf32>
    %2 = tpu.matmul %0, %1, %cst {dimension_numbers = #tpu.dot_dimension_numbers<[1], [0], [0], [1], [0, 0, 1, 1], [], []>} : vector<512x72xbf16>, vector<72x8xbf16>, vector<512x8xf32> -> vector<512x8xf32>
    %c0_3 = arith.constant 0 : index
    %c0_4 = arith.constant 0 : index
    %3 = vector.load %arg3[%c0_3, %c0_4] : memref<1x8xf32, #tpu.memory_space<vmem>>, vector<1x8xf32>
    %4 = vector.broadcast %3 : vector<1x8xf32> to vector<512x8xf32>
    %5 = arith.mulf %2, %4 : vector<512x8xf32>
    %c0_5 = arith.constant 0 : index
    %c0_6 = arith.constant 0 : index
    %6 = vector.load %arg4[%c0_5, %c0_6] : memref<1x8xf32, #tpu.memory_space<vmem>>, vector<1x8xf32>
    %7 = vector.broadcast %6 : vector<1x8xf32> to vector<512x8xf32>
    %8 = arith.addf %5, %7 : vector<512x8xf32>
    %c0_7 = arith.constant 0 : index
    %c0_8 = arith.constant 0 : index
    %9 = vector.load %arg5[%c0_7, %c0_8] : memref<512x8xf32, #tpu.memory_space<vmem>>, vector<512x8xf32>
    %10 = arith.addf %8, %9 : vector<512x8xf32>
    %c0_9 = arith.constant 0 : index
    %c0_10 = arith.constant 0 : index
    %11 = vector.load %arg6[%c0_9, %c0_10] : memref<1x8xf32, #tpu.memory_space<vmem>>, vector<1x8xf32>
    %12 = vector.broadcast %11 : vector<1x8xf32> to vector<512x8xf32>
    %13 = arith.mulf %10, %12 : vector<512x8xf32>
    %c0_11 = arith.constant 0 : index
    %c0_12 = arith.constant 0 : index
    %14 = vector.load %arg7[%c0_11, %c0_12] : memref<512x8xf32, #tpu.memory_space<vmem>>, vector<512x8xf32>
    tpu.vector_store %arg7[%c0_11, %c0_12], %13 {strides = array<i32>} : memref<512x8xf32, #tpu.memory_space<vmem>>, vector<512x8xf32>,
    return
  }
  func.func @transform_0(%arg0: i32) -> (i32, i32) {
    %c0_i32 = arith.constant 0 : i32
    %c0_i32_0 = arith.constant 0 : i32
    return %arg0, %c0_i32 : i32, i32
  }
  func.func @transform_1(%arg0: i32) -> (i32, i32) {
    %c0_i32 = arith.constant 0 : i32
    %c0_i32_0 = arith.constant 0 : i32
    %c0_i32_1 = arith.constant 0 : i32
    return %c0_i32, %c0_i32_0 : i32, i32
  }
  func.func @transform_2(%arg0: i32) -> (i32, i32) {
    %c0_i32 = arith.constant 0 : i32
    %c0_i32_0 = arith.constant 0 : i32
    %c0_i32_1 = arith.constant 0 : i32
    return %c0_i32, %c0_i32_0 : i32, i32
  }
  func.func @transform_3(%arg0: i32) -> (i32, i32) {
    %c0_i32 = arith.constant 0 : i32
    %c0_i32_0 = arith.constant 0 : i32
    %c0_i32_1 = arith.constant 0 : i32
    return %c0_i32, %c0_i32_0 : i32, i32
  }
  func.func @transform_4(%arg0: i32) -> (i32, i32) {
    %c0_i32 = arith.constant 0 : i32
    %c0_i32_0 = arith.constant 0 : i32
    return %arg0, %c0_i32 : i32, i32
  }
  func.func @transform_5(%arg0: i32) -> (i32, i32) {
    %c0_i32 = arith.constant 0 : i32
    %c0_i32_0 = arith.constant 0 : i32
    %c0_i32_1 = arith.constant 0 : i32
    return %c0_i32, %c0_i32_0 : i32, i32
  }
  func.func @transform_6(%arg0: i32) -> (i32, i32) {
    %c0_i32 = arith.constant 0 : i32
    %c0_i32_0 = arith.constant 0 : i32
    return %arg0, %c0_i32 : i32, i32
  }
}

module attributes {stable_mosaic.version = 11 : i64} {
  func.func @_conv_epilogue_kernel(%arg0: i32, %arg1: memref<128x72xbf16, #tpu.memory_space<vmem>>, %arg2: memref<72x32xbf16, #tpu.memory_space<vmem>>, %arg3: memref<1x32xf32, #tpu.memory_space<vmem>>, %arg4: memref<1x32xf32, #tpu.memory_space<vmem>>, %arg5: memref<1x32xf32, #tpu.memory_space<vmem>>, %arg6: memref<128x32xf32, #tpu.memory_space<vmem>>) attributes {dimension_semantics = [#tpu.dimension_semantics<parallel>], iteration_bounds = array<i64: 1>, scalar_prefetch = 0 : i64, scratch_operands = 0 : i64, tpu.core_type = #tpu.core_type<tc>, window_params = [{transform_indices = @transform_0, window_bounds = array<i64: 128, 72>}, {pipeline_mode = #tpu.pipeline_mode<synchronous>, transform_indices = @transform_1, window_bounds = array<i64: 72, 32>}, {pipeline_mode = #tpu.pipeline_mode<synchronous>, transform_indices = @transform_2, window_bounds = array<i64: 1, 32>}, {pipeline_mode = #tpu.pipeline_mode<synchronous>, transform_indices = @transform_3, window_bounds = array<i64: 1, 32>}, {pipeline_mode = #tpu.pipeline_mode<synchronous>, transform_indices = @transform_4, window_bounds = array<i64: 1, 32>}, {transform_indices = @transform_5, window_bounds = array<i64: 128, 32>}]} {
    %c0 = arith.constant 0 : index
    %c0_0 = arith.constant 0 : index
    %0 = vector.load %arg1[%c0, %c0_0] : memref<128x72xbf16, #tpu.memory_space<vmem>>, vector<128x72xbf16>
    %c0_1 = arith.constant 0 : index
    %c0_2 = arith.constant 0 : index
    %1 = vector.load %arg2[%c0_1, %c0_2] : memref<72x32xbf16, #tpu.memory_space<vmem>>, vector<72x32xbf16>
    %cst = arith.constant dense<0.000000e+00> : vector<128x32xf32>
    %2 = tpu.matmul %0, %1, %cst {dimension_numbers = #tpu.dot_dimension_numbers<[1], [0], [0], [1], [0, 0, 1, 1], [], []>} : vector<128x72xbf16>, vector<72x32xbf16>, vector<128x32xf32> -> vector<128x32xf32>
    %c0_3 = arith.constant 0 : index
    %c0_4 = arith.constant 0 : index
    %3 = vector.load %arg3[%c0_3, %c0_4] : memref<1x32xf32, #tpu.memory_space<vmem>>, vector<1x32xf32>
    %4 = vector.broadcast %3 : vector<1x32xf32> to vector<128x32xf32>
    %5 = arith.mulf %2, %4 : vector<128x32xf32>
    %c0_5 = arith.constant 0 : index
    %c0_6 = arith.constant 0 : index
    %6 = vector.load %arg4[%c0_5, %c0_6] : memref<1x32xf32, #tpu.memory_space<vmem>>, vector<1x32xf32>
    %7 = vector.broadcast %6 : vector<1x32xf32> to vector<128x32xf32>
    %8 = arith.addf %5, %7 : vector<128x32xf32>
    %c0_7 = arith.constant 0 : index
    %c0_8 = arith.constant 0 : index
    %9 = vector.load %arg5[%c0_7, %c0_8] : memref<1x32xf32, #tpu.memory_space<vmem>>, vector<1x32xf32>
    %cst_9 = arith.constant 0.000000e+00 : f32
    %10 = vector.broadcast %cst_9 : f32 to vector<1x32xf32>
    %11 = arith.cmpf ogt, %9, %10 : vector<1x32xf32>
    %cst_10 = arith.constant 0.000000e+00 : f32
    %12 = vector.broadcast %cst_10 : f32 to vector<128x32xf32>
    %13 = arith.maximumf %8, %12 : vector<128x32xf32>
    %14 = vector.shape_cast %11 : vector<1x32xi1> to vector<1x32xi1>
    %15 = vector.broadcast %14 : vector<1x32xi1> to vector<128x32xi1>
    %16 = arith.select %15, %13, %8 : vector<128x32xi1>, vector<128x32xf32>
    %c0_11 = arith.constant 0 : index
    %c0_12 = arith.constant 0 : index
    %17 = vector.load %arg6[%c0_11, %c0_12] : memref<128x32xf32, #tpu.memory_space<vmem>>, vector<128x32xf32>
    tpu.vector_store %arg6[%c0_11, %c0_12], %16 {strides = array<i32>} : memref<128x32xf32, #tpu.memory_space<vmem>>, vector<128x32xf32>,
    return
  }
  func.func @transform_0(%arg0: i32) -> (i32, i32) {
    %c0_i32 = arith.constant 0 : i32
    %c0_i32_0 = arith.constant 0 : i32
    return %arg0, %c0_i32 : i32, i32
  }
  func.func @transform_1(%arg0: i32) -> (i32, i32) {
    %c0_i32 = arith.constant 0 : i32
    %c0_i32_0 = arith.constant 0 : i32
    %c0_i32_1 = arith.constant 0 : i32
    return %c0_i32, %c0_i32_0 : i32, i32
  }
  func.func @transform_2(%arg0: i32) -> (i32, i32) {
    %c0_i32 = arith.constant 0 : i32
    %c0_i32_0 = arith.constant 0 : i32
    %c0_i32_1 = arith.constant 0 : i32
    return %c0_i32, %c0_i32_0 : i32, i32
  }
  func.func @transform_3(%arg0: i32) -> (i32, i32) {
    %c0_i32 = arith.constant 0 : i32
    %c0_i32_0 = arith.constant 0 : i32
    %c0_i32_1 = arith.constant 0 : i32
    return %c0_i32, %c0_i32_0 : i32, i32
  }
  func.func @transform_4(%arg0: i32) -> (i32, i32) {
    %c0_i32 = arith.constant 0 : i32
    %c0_i32_0 = arith.constant 0 : i32
    %c0_i32_1 = arith.constant 0 : i32
    return %c0_i32, %c0_i32_0 : i32, i32
  }
  func.func @transform_5(%arg0: i32) -> (i32, i32) {
    %c0_i32 = arith.constant 0 : i32
    %c0_i32_0 = arith.constant 0 : i32
    return %arg0, %c0_i32 : i32, i32
  }
}

module attributes {stable_mosaic.version = 11 : i64} {
  func.func @_conv_residual_kernel(%arg0: i32, %arg1: memref<128x144xbf16, #tpu.memory_space<vmem>>, %arg2: memref<144x16xbf16, #tpu.memory_space<vmem>>, %arg3: memref<1x16xf32, #tpu.memory_space<vmem>>, %arg4: memref<1x16xf32, #tpu.memory_space<vmem>>, %arg5: memref<128x16xf32, #tpu.memory_space<vmem>>, %arg6: memref<1x16xf32, #tpu.memory_space<vmem>>, %arg7: memref<128x16xf32, #tpu.memory_space<vmem>>) attributes {dimension_semantics = [#tpu.dimension_semantics<parallel>], iteration_bounds = array<i64: 1>, scalar_prefetch = 0 : i64, scratch_operands = 0 : i64, tpu.core_type = #tpu.core_type<tc>, window_params = [{transform_indices = @transform_0, window_bounds = array<i64: 128, 144>}, {pipeline_mode = #tpu.pipeline_mode<synchronous>, transform_indices = @transform_1, window_bounds = array<i64: 144, 16>}, {pipeline_mode = #tpu.pipeline_mode<synchronous>, transform_indices = @transform_2, window_bounds = array<i64: 1, 16>}, {pipeline_mode = #tpu.pipeline_mode<synchronous>, transform_indices = @transform_3, window_bounds = array<i64: 1, 16>}, {transform_indices = @transform_4, window_bounds = array<i64: 128, 16>}, {pipeline_mode = #tpu.pipeline_mode<synchronous>, transform_indices = @transform_5, window_bounds = array<i64: 1, 16>}, {transform_indices = @transform_6, window_bounds = array<i64: 128, 16>}]} {
    %c0 = arith.constant 0 : index
    %c0_0 = arith.constant 0 : index
    %0 = vector.load %arg1[%c0, %c0_0] : memref<128x144xbf16, #tpu.memory_space<vmem>>, vector<128x144xbf16>
    %c0_1 = arith.constant 0 : index
    %c0_2 = arith.constant 0 : index
    %1 = vector.load %arg2[%c0_1, %c0_2] : memref<144x16xbf16, #tpu.memory_space<vmem>>, vector<144x16xbf16>
    %cst = arith.constant dense<0.000000e+00> : vector<128x16xf32>
    %2 = tpu.matmul %0, %1, %cst {dimension_numbers = #tpu.dot_dimension_numbers<[1], [0], [0], [1], [0, 0, 1, 1], [], []>} : vector<128x144xbf16>, vector<144x16xbf16>, vector<128x16xf32> -> vector<128x16xf32>
    %c0_3 = arith.constant 0 : index
    %c0_4 = arith.constant 0 : index
    %3 = vector.load %arg3[%c0_3, %c0_4] : memref<1x16xf32, #tpu.memory_space<vmem>>, vector<1x16xf32>
    %4 = vector.broadcast %3 : vector<1x16xf32> to vector<128x16xf32>
    %5 = arith.mulf %2, %4 : vector<128x16xf32>
    %c0_5 = arith.constant 0 : index
    %c0_6 = arith.constant 0 : index
    %6 = vector.load %arg4[%c0_5, %c0_6] : memref<1x16xf32, #tpu.memory_space<vmem>>, vector<1x16xf32>
    %7 = vector.broadcast %6 : vector<1x16xf32> to vector<128x16xf32>
    %8 = arith.addf %5, %7 : vector<128x16xf32>
    %c0_7 = arith.constant 0 : index
    %c0_8 = arith.constant 0 : index
    %9 = vector.load %arg5[%c0_7, %c0_8] : memref<128x16xf32, #tpu.memory_space<vmem>>, vector<128x16xf32>
    %10 = arith.addf %8, %9 : vector<128x16xf32>
    %c0_9 = arith.constant 0 : index
    %c0_10 = arith.constant 0 : index
    %11 = vector.load %arg6[%c0_9, %c0_10] : memref<1x16xf32, #tpu.memory_space<vmem>>, vector<1x16xf32>
    %12 = vector.broadcast %11 : vector<1x16xf32> to vector<128x16xf32>
    %13 = arith.mulf %10, %12 : vector<128x16xf32>
    %c0_11 = arith.constant 0 : index
    %c0_12 = arith.constant 0 : index
    %14 = vector.load %arg7[%c0_11, %c0_12] : memref<128x16xf32, #tpu.memory_space<vmem>>, vector<128x16xf32>
    tpu.vector_store %arg7[%c0_11, %c0_12], %13 {strides = array<i32>} : memref<128x16xf32, #tpu.memory_space<vmem>>, vector<128x16xf32>,
    return
  }
  func.func @transform_0(%arg0: i32) -> (i32, i32) {
    %c0_i32 = arith.constant 0 : i32
    %c0_i32_0 = arith.constant 0 : i32
    return %arg0, %c0_i32 : i32, i32
  }
  func.func @transform_1(%arg0: i32) -> (i32, i32) {
    %c0_i32 = arith.constant 0 : i32
    %c0_i32_0 = arith.constant 0 : i32
    %c0_i32_1 = arith.constant 0 : i32
    return %c0_i32, %c0_i32_0 : i32, i32
  }
  func.func @transform_2(%arg0: i32) -> (i32, i32) {
    %c0_i32 = arith.constant 0 : i32
    %c0_i32_0 = arith.constant 0 : i32
    %c0_i32_1 = arith.constant 0 : i32
    return %c0_i32, %c0_i32_0 : i32, i32
  }
  func.func @transform_3(%arg0: i32) -> (i32, i32) {
    %c0_i32 = arith.constant 0 : i32
    %c0_i32_0 = arith.constant 0 : i32
    %c0_i32_1 = arith.constant 0 : i32
    return %c0_i32, %c0_i32_0 : i32, i32
  }
  func.func @transform_4(%arg0: i32) -> (i32, i32) {
    %c0_i32 = arith.constant 0 : i32
    %c0_i32_0 = arith.constant 0 : i32
    return %arg0, %c0_i32 : i32, i32
  }
  func.func @transform_5(%arg0: i32) -> (i32, i32) {
    %c0_i32 = arith.constant 0 : i32
    %c0_i32_0 = arith.constant 0 : i32
    %c0_i32_1 = arith.constant 0 : i32
    return %c0_i32, %c0_i32_0 : i32, i32
  }
  func.func @transform_6(%arg0: i32) -> (i32, i32) {
    %c0_i32 = arith.constant 0 : i32
    %c0_i32_0 = arith.constant 0 : i32
    return %arg0, %c0_i32 : i32, i32
  }
}

module attributes {stable_mosaic.version = 11 : i64} {
  func.func @_conv_epilogue_kernel(%arg0: i32, %arg1: memref<128x144xbf16, #tpu.memory_space<vmem>>, %arg2: memref<144x32xbf16, #tpu.memory_space<vmem>>, %arg3: memref<1x32xf32, #tpu.memory_space<vmem>>, %arg4: memref<1x32xf32, #tpu.memory_space<vmem>>, %arg5: memref<1x32xf32, #tpu.memory_space<vmem>>, %arg6: memref<128x32xf32, #tpu.memory_space<vmem>>) attributes {dimension_semantics = [#tpu.dimension_semantics<parallel>], iteration_bounds = array<i64: 1>, scalar_prefetch = 0 : i64, scratch_operands = 0 : i64, tpu.core_type = #tpu.core_type<tc>, window_params = [{transform_indices = @transform_0, window_bounds = array<i64: 128, 144>}, {pipeline_mode = #tpu.pipeline_mode<synchronous>, transform_indices = @transform_1, window_bounds = array<i64: 144, 32>}, {pipeline_mode = #tpu.pipeline_mode<synchronous>, transform_indices = @transform_2, window_bounds = array<i64: 1, 32>}, {pipeline_mode = #tpu.pipeline_mode<synchronous>, transform_indices = @transform_3, window_bounds = array<i64: 1, 32>}, {pipeline_mode = #tpu.pipeline_mode<synchronous>, transform_indices = @transform_4, window_bounds = array<i64: 1, 32>}, {transform_indices = @transform_5, window_bounds = array<i64: 128, 32>}]} {
    %c0 = arith.constant 0 : index
    %c0_0 = arith.constant 0 : index
    %0 = vector.load %arg1[%c0, %c0_0] : memref<128x144xbf16, #tpu.memory_space<vmem>>, vector<128x144xbf16>
    %c0_1 = arith.constant 0 : index
    %c0_2 = arith.constant 0 : index
    %1 = vector.load %arg2[%c0_1, %c0_2] : memref<144x32xbf16, #tpu.memory_space<vmem>>, vector<144x32xbf16>
    %cst = arith.constant dense<0.000000e+00> : vector<128x32xf32>
    %2 = tpu.matmul %0, %1, %cst {dimension_numbers = #tpu.dot_dimension_numbers<[1], [0], [0], [1], [0, 0, 1, 1], [], []>} : vector<128x144xbf16>, vector<144x32xbf16>, vector<128x32xf32> -> vector<128x32xf32>
    %c0_3 = arith.constant 0 : index
    %c0_4 = arith.constant 0 : index
    %3 = vector.load %arg3[%c0_3, %c0_4] : memref<1x32xf32, #tpu.memory_space<vmem>>, vector<1x32xf32>
    %4 = vector.broadcast %3 : vector<1x32xf32> to vector<128x32xf32>
    %5 = arith.mulf %2, %4 : vector<128x32xf32>
    %c0_5 = arith.constant 0 : index
    %c0_6 = arith.constant 0 : index
    %6 = vector.load %arg4[%c0_5, %c0_6] : memref<1x32xf32, #tpu.memory_space<vmem>>, vector<1x32xf32>
    %7 = vector.broadcast %6 : vector<1x32xf32> to vector<128x32xf32>
    %8 = arith.addf %5, %7 : vector<128x32xf32>
    %c0_7 = arith.constant 0 : index
    %c0_8 = arith.constant 0 : index
    %9 = vector.load %arg5[%c0_7, %c0_8] : memref<1x32xf32, #tpu.memory_space<vmem>>, vector<1x32xf32>
    %cst_9 = arith.constant 0.000000e+00 : f32
    %10 = vector.broadcast %cst_9 : f32 to vector<1x32xf32>
    %11 = arith.cmpf ogt, %9, %10 : vector<1x32xf32>
    %cst_10 = arith.constant 0.000000e+00 : f32
    %12 = vector.broadcast %cst_10 : f32 to vector<128x32xf32>
    %13 = arith.maximumf %8, %12 : vector<128x32xf32>
    %14 = vector.shape_cast %11 : vector<1x32xi1> to vector<1x32xi1>
    %15 = vector.broadcast %14 : vector<1x32xi1> to vector<128x32xi1>
    %16 = arith.select %15, %13, %8 : vector<128x32xi1>, vector<128x32xf32>
    %c0_11 = arith.constant 0 : index
    %c0_12 = arith.constant 0 : index
    %17 = vector.load %arg6[%c0_11, %c0_12] : memref<128x32xf32, #tpu.memory_space<vmem>>, vector<128x32xf32>
    tpu.vector_store %arg6[%c0_11, %c0_12], %16 {strides = array<i32>} : memref<128x32xf32, #tpu.memory_space<vmem>>, vector<128x32xf32>,
    return
  }
  func.func @transform_0(%arg0: i32) -> (i32, i32) {
    %c0_i32 = arith.constant 0 : i32
    %c0_i32_0 = arith.constant 0 : i32
    return %arg0, %c0_i32 : i32, i32
  }
  func.func @transform_1(%arg0: i32) -> (i32, i32) {
    %c0_i32 = arith.constant 0 : i32
    %c0_i32_0 = arith.constant 0 : i32
    %c0_i32_1 = arith.constant 0 : i32
    return %c0_i32, %c0_i32_0 : i32, i32
  }
  func.func @transform_2(%arg0: i32) -> (i32, i32) {
    %c0_i32 = arith.constant 0 : i32
    %c0_i32_0 = arith.constant 0 : i32
    %c0_i32_1 = arith.constant 0 : i32
    return %c0_i32, %c0_i32_0 : i32, i32
  }
  func.func @transform_3(%arg0: i32) -> (i32, i32) {
    %c0_i32 = arith.constant 0 : i32
    %c0_i32_0 = arith.constant 0 : i32
    %c0_i32_1 = arith.constant 0 : i32
    return %c0_i32, %c0_i32_0 : i32, i32
  }
  func.func @transform_4(%arg0: i32) -> (i32, i32) {
    %c0_i32 = arith.constant 0 : i32
    %c0_i32_0 = arith.constant 0 : i32
    %c0_i32_1 = arith.constant 0 : i32
    return %c0_i32, %c0_i32_0 : i32, i32
  }
  func.func @transform_5(%arg0: i32) -> (i32, i32) {
    %c0_i32 = arith.constant 0 : i32
    %c0_i32_0 = arith.constant 0 : i32
    return %arg0, %c0_i32 : i32, i32
  }
}

module attributes {stable_mosaic.version = 11 : i64} {
  func.func @_conv_epilogue_kernel(%arg0: i32, %arg1: memref<32x144xbf16, #tpu.memory_space<vmem>>, %arg2: memref<144x64xbf16, #tpu.memory_space<vmem>>, %arg3: memref<1x64xf32, #tpu.memory_space<vmem>>, %arg4: memref<1x64xf32, #tpu.memory_space<vmem>>, %arg5: memref<1x64xf32, #tpu.memory_space<vmem>>, %arg6: memref<32x64xf32, #tpu.memory_space<vmem>>) attributes {dimension_semantics = [#tpu.dimension_semantics<parallel>], iteration_bounds = array<i64: 1>, scalar_prefetch = 0 : i64, scratch_operands = 0 : i64, tpu.core_type = #tpu.core_type<tc>, window_params = [{transform_indices = @transform_0, window_bounds = array<i64: 32, 144>}, {pipeline_mode = #tpu.pipeline_mode<synchronous>, transform_indices = @transform_1, window_bounds = array<i64: 144, 64>}, {pipeline_mode = #tpu.pipeline_mode<synchronous>, transform_indices = @transform_2, window_bounds = array<i64: 1, 64>}, {pipeline_mode = #tpu.pipeline_mode<synchronous>, transform_indices = @transform_3, window_bounds = array<i64: 1, 64>}, {pipeline_mode = #tpu.pipeline_mode<synchronous>, transform_indices = @transform_4, window_bounds = array<i64: 1, 64>}, {transform_indices = @transform_5, window_bounds = array<i64: 32, 64>}]} {
    %c0 = arith.constant 0 : index
    %c0_0 = arith.constant 0 : index
    %0 = vector.load %arg1[%c0, %c0_0] : memref<32x144xbf16, #tpu.memory_space<vmem>>, vector<32x144xbf16>
    %c0_1 = arith.constant 0 : index
    %c0_2 = arith.constant 0 : index
    %1 = vector.load %arg2[%c0_1, %c0_2] : memref<144x64xbf16, #tpu.memory_space<vmem>>, vector<144x64xbf16>
    %cst = arith.constant dense<0.000000e+00> : vector<32x64xf32>
    %2 = tpu.matmul %0, %1, %cst {dimension_numbers = #tpu.dot_dimension_numbers<[1], [0], [0], [1], [0, 0, 1, 1], [], []>} : vector<32x144xbf16>, vector<144x64xbf16>, vector<32x64xf32> -> vector<32x64xf32>
    %c0_3 = arith.constant 0 : index
    %c0_4 = arith.constant 0 : index
    %3 = vector.load %arg3[%c0_3, %c0_4] : memref<1x64xf32, #tpu.memory_space<vmem>>, vector<1x64xf32>
    %4 = vector.broadcast %3 : vector<1x64xf32> to vector<32x64xf32>
    %5 = arith.mulf %2, %4 : vector<32x64xf32>
    %c0_5 = arith.constant 0 : index
    %c0_6 = arith.constant 0 : index
    %6 = vector.load %arg4[%c0_5, %c0_6] : memref<1x64xf32, #tpu.memory_space<vmem>>, vector<1x64xf32>
    %7 = vector.broadcast %6 : vector<1x64xf32> to vector<32x64xf32>
    %8 = arith.addf %5, %7 : vector<32x64xf32>
    %c0_7 = arith.constant 0 : index
    %c0_8 = arith.constant 0 : index
    %9 = vector.load %arg5[%c0_7, %c0_8] : memref<1x64xf32, #tpu.memory_space<vmem>>, vector<1x64xf32>
    %cst_9 = arith.constant 0.000000e+00 : f32
    %10 = vector.broadcast %cst_9 : f32 to vector<1x64xf32>
    %11 = arith.cmpf ogt, %9, %10 : vector<1x64xf32>
    %cst_10 = arith.constant 0.000000e+00 : f32
    %12 = vector.broadcast %cst_10 : f32 to vector<32x64xf32>
    %13 = arith.maximumf %8, %12 : vector<32x64xf32>
    %14 = vector.shape_cast %11 : vector<1x64xi1> to vector<1x64xi1>
    %15 = vector.broadcast %14 : vector<1x64xi1> to vector<32x64xi1>
    %16 = arith.select %15, %13, %8 : vector<32x64xi1>, vector<32x64xf32>
    %c0_11 = arith.constant 0 : index
    %c0_12 = arith.constant 0 : index
    %17 = vector.load %arg6[%c0_11, %c0_12] : memref<32x64xf32, #tpu.memory_space<vmem>>, vector<32x64xf32>
    tpu.vector_store %arg6[%c0_11, %c0_12], %16 {strides = array<i32>} : memref<32x64xf32, #tpu.memory_space<vmem>>, vector<32x64xf32>,
    return
  }
  func.func @transform_0(%arg0: i32) -> (i32, i32) {
    %c0_i32 = arith.constant 0 : i32
    %c0_i32_0 = arith.constant 0 : i32
    return %arg0, %c0_i32 : i32, i32
  }
  func.func @transform_1(%arg0: i32) -> (i32, i32) {
    %c0_i32 = arith.constant 0 : i32
    %c0_i32_0 = arith.constant 0 : i32
    %c0_i32_1 = arith.constant 0 : i32
    return %c0_i32, %c0_i32_0 : i32, i32
  }
  func.func @transform_2(%arg0: i32) -> (i32, i32) {
    %c0_i32 = arith.constant 0 : i32
    %c0_i32_0 = arith.constant 0 : i32
    %c0_i32_1 = arith.constant 0 : i32
    return %c0_i32, %c0_i32_0 : i32, i32
  }
  func.func @transform_3(%arg0: i32) -> (i32, i32) {
    %c0_i32 = arith.constant 0 : i32
    %c0_i32_0 = arith.constant 0 : i32
    %c0_i32_1 = arith.constant 0 : i32
    return %c0_i32, %c0_i32_0 : i32, i32
  }
  func.func @transform_4(%arg0: i32) -> (i32, i32) {
    %c0_i32 = arith.constant 0 : i32
    %c0_i32_0 = arith.constant 0 : i32
    %c0_i32_1 = arith.constant 0 : i32
    return %c0_i32, %c0_i32_0 : i32, i32
  }
  func.func @transform_5(%arg0: i32) -> (i32, i32) {
    %c0_i32 = arith.constant 0 : i32
    %c0_i32_0 = arith.constant 0 : i32
    return %arg0, %c0_i32 : i32, i32
  }
}

module attributes {stable_mosaic.version = 11 : i64} {
  func.func @_conv_residual_kernel(%arg0: i32, %arg1: memref<32x288xbf16, #tpu.memory_space<vmem>>, %arg2: memref<288x32xbf16, #tpu.memory_space<vmem>>, %arg3: memref<1x32xf32, #tpu.memory_space<vmem>>, %arg4: memref<1x32xf32, #tpu.memory_space<vmem>>, %arg5: memref<32x32xf32, #tpu.memory_space<vmem>>, %arg6: memref<1x32xf32, #tpu.memory_space<vmem>>, %arg7: memref<32x32xf32, #tpu.memory_space<vmem>>) attributes {dimension_semantics = [#tpu.dimension_semantics<parallel>], iteration_bounds = array<i64: 1>, scalar_prefetch = 0 : i64, scratch_operands = 0 : i64, tpu.core_type = #tpu.core_type<tc>, window_params = [{transform_indices = @transform_0, window_bounds = array<i64: 32, 288>}, {pipeline_mode = #tpu.pipeline_mode<synchronous>, transform_indices = @transform_1, window_bounds = array<i64: 288, 32>}, {pipeline_mode = #tpu.pipeline_mode<synchronous>, transform_indices = @transform_2, window_bounds = array<i64: 1, 32>}, {pipeline_mode = #tpu.pipeline_mode<synchronous>, transform_indices = @transform_3, window_bounds = array<i64: 1, 32>}, {transform_indices = @transform_4, window_bounds = array<i64: 32, 32>}, {pipeline_mode = #tpu.pipeline_mode<synchronous>, transform_indices = @transform_5, window_bounds = array<i64: 1, 32>}, {transform_indices = @transform_6, window_bounds = array<i64: 32, 32>}]} {
    %c0 = arith.constant 0 : index
    %c0_0 = arith.constant 0 : index
    %0 = vector.load %arg1[%c0, %c0_0] : memref<32x288xbf16, #tpu.memory_space<vmem>>, vector<32x288xbf16>
    %c0_1 = arith.constant 0 : index
    %c0_2 = arith.constant 0 : index
    %1 = vector.load %arg2[%c0_1, %c0_2] : memref<288x32xbf16, #tpu.memory_space<vmem>>, vector<288x32xbf16>
    %cst = arith.constant dense<0.000000e+00> : vector<32x32xf32>
    %2 = tpu.matmul %0, %1, %cst {dimension_numbers = #tpu.dot_dimension_numbers<[1], [0], [0], [1], [0, 0, 1, 1], [], []>} : vector<32x288xbf16>, vector<288x32xbf16>, vector<32x32xf32> -> vector<32x32xf32>
    %c0_3 = arith.constant 0 : index
    %c0_4 = arith.constant 0 : index
    %3 = vector.load %arg3[%c0_3, %c0_4] : memref<1x32xf32, #tpu.memory_space<vmem>>, vector<1x32xf32>
    %4 = vector.broadcast %3 : vector<1x32xf32> to vector<32x32xf32>
    %5 = arith.mulf %2, %4 : vector<32x32xf32>
    %c0_5 = arith.constant 0 : index
    %c0_6 = arith.constant 0 : index
    %6 = vector.load %arg4[%c0_5, %c0_6] : memref<1x32xf32, #tpu.memory_space<vmem>>, vector<1x32xf32>
    %7 = vector.broadcast %6 : vector<1x32xf32> to vector<32x32xf32>
    %8 = arith.addf %5, %7 : vector<32x32xf32>
    %c0_7 = arith.constant 0 : index
    %c0_8 = arith.constant 0 : index
    %9 = vector.load %arg5[%c0_7, %c0_8] : memref<32x32xf32, #tpu.memory_space<vmem>>, vector<32x32xf32>
    %10 = arith.addf %8, %9 : vector<32x32xf32>
    %c0_9 = arith.constant 0 : index
    %c0_10 = arith.constant 0 : index
    %11 = vector.load %arg6[%c0_9, %c0_10] : memref<1x32xf32, #tpu.memory_space<vmem>>, vector<1x32xf32>
    %12 = vector.broadcast %11 : vector<1x32xf32> to vector<32x32xf32>
    %13 = arith.mulf %10, %12 : vector<32x32xf32>
    %c0_11 = arith.constant 0 : index
    %c0_12 = arith.constant 0 : index
    %14 = vector.load %arg7[%c0_11, %c0_12] : memref<32x32xf32, #tpu.memory_space<vmem>>, vector<32x32xf32>
    tpu.vector_store %arg7[%c0_11, %c0_12], %13 {strides = array<i32>} : memref<32x32xf32, #tpu.memory_space<vmem>>, vector<32x32xf32>,
    return
  }
  func.func @transform_0(%arg0: i32) -> (i32, i32) {
    %c0_i32 = arith.constant 0 : i32
    %c0_i32_0 = arith.constant 0 : i32
    return %arg0, %c0_i32 : i32, i32
  }
  func.func @transform_1(%arg0: i32) -> (i32, i32) {
    %c0_i32 = arith.constant 0 : i32
    %c0_i32_0 = arith.constant 0 : i32
    %c0_i32_1 = arith.constant 0 : i32
    return %c0_i32, %c0_i32_0 : i32, i32
  }
  func.func @transform_2(%arg0: i32) -> (i32, i32) {
    %c0_i32 = arith.constant 0 : i32
    %c0_i32_0 = arith.constant 0 : i32
    %c0_i32_1 = arith.constant 0 : i32
    return %c0_i32, %c0_i32_0 : i32, i32
  }
  func.func @transform_3(%arg0: i32) -> (i32, i32) {
    %c0_i32 = arith.constant 0 : i32
    %c0_i32_0 = arith.constant 0 : i32
    %c0_i32_1 = arith.constant 0 : i32
    return %c0_i32, %c0_i32_0 : i32, i32
  }
  func.func @transform_4(%arg0: i32) -> (i32, i32) {
    %c0_i32 = arith.constant 0 : i32
    %c0_i32_0 = arith.constant 0 : i32
    return %arg0, %c0_i32 : i32, i32
  }
  func.func @transform_5(%arg0: i32) -> (i32, i32) {
    %c0_i32 = arith.constant 0 : i32
    %c0_i32_0 = arith.constant 0 : i32
    %c0_i32_1 = arith.constant 0 : i32
    return %c0_i32, %c0_i32_0 : i32, i32
  }
  func.func @transform_6(%arg0: i32) -> (i32, i32) {
    %c0_i32 = arith.constant 0 : i32
    %c0_i32_0 = arith.constant 0 : i32
    return %arg0, %c0_i32 : i32, i32
  }
}

module attributes {stable_mosaic.version = 11 : i64} {
  func.func @_conv_epilogue_kernel(%arg0: i32, %arg1: memref<32x288xbf16, #tpu.memory_space<vmem>>, %arg2: memref<288x64xbf16, #tpu.memory_space<vmem>>, %arg3: memref<1x64xf32, #tpu.memory_space<vmem>>, %arg4: memref<1x64xf32, #tpu.memory_space<vmem>>, %arg5: memref<1x64xf32, #tpu.memory_space<vmem>>, %arg6: memref<32x64xf32, #tpu.memory_space<vmem>>) attributes {dimension_semantics = [#tpu.dimension_semantics<parallel>], iteration_bounds = array<i64: 1>, scalar_prefetch = 0 : i64, scratch_operands = 0 : i64, tpu.core_type = #tpu.core_type<tc>, window_params = [{transform_indices = @transform_0, window_bounds = array<i64: 32, 288>}, {pipeline_mode = #tpu.pipeline_mode<synchronous>, transform_indices = @transform_1, window_bounds = array<i64: 288, 64>}, {pipeline_mode = #tpu.pipeline_mode<synchronous>, transform_indices = @transform_2, window_bounds = array<i64: 1, 64>}, {pipeline_mode = #tpu.pipeline_mode<synchronous>, transform_indices = @transform_3, window_bounds = array<i64: 1, 64>}, {pipeline_mode = #tpu.pipeline_mode<synchronous>, transform_indices = @transform_4, window_bounds = array<i64: 1, 64>}, {transform_indices = @transform_5, window_bounds = array<i64: 32, 64>}]} {
    %c0 = arith.constant 0 : index
    %c0_0 = arith.constant 0 : index
    %0 = vector.load %arg1[%c0, %c0_0] : memref<32x288xbf16, #tpu.memory_space<vmem>>, vector<32x288xbf16>
    %c0_1 = arith.constant 0 : index
    %c0_2 = arith.constant 0 : index
    %1 = vector.load %arg2[%c0_1, %c0_2] : memref<288x64xbf16, #tpu.memory_space<vmem>>, vector<288x64xbf16>
    %cst = arith.constant dense<0.000000e+00> : vector<32x64xf32>
    %2 = tpu.matmul %0, %1, %cst {dimension_numbers = #tpu.dot_dimension_numbers<[1], [0], [0], [1], [0, 0, 1, 1], [], []>} : vector<32x288xbf16>, vector<288x64xbf16>, vector<32x64xf32> -> vector<32x64xf32>
    %c0_3 = arith.constant 0 : index
    %c0_4 = arith.constant 0 : index
    %3 = vector.load %arg3[%c0_3, %c0_4] : memref<1x64xf32, #tpu.memory_space<vmem>>, vector<1x64xf32>
    %4 = vector.broadcast %3 : vector<1x64xf32> to vector<32x64xf32>
    %5 = arith.mulf %2, %4 : vector<32x64xf32>
    %c0_5 = arith.constant 0 : index
    %c0_6 = arith.constant 0 : index
    %6 = vector.load %arg4[%c0_5, %c0_6] : memref<1x64xf32, #tpu.memory_space<vmem>>, vector<1x64xf32>
    %7 = vector.broadcast %6 : vector<1x64xf32> to vector<32x64xf32>
    %8 = arith.addf %5, %7 : vector<32x64xf32>
    %c0_7 = arith.constant 0 : index
    %c0_8 = arith.constant 0 : index
    %9 = vector.load %arg5[%c0_7, %c0_8] : memref<1x64xf32, #tpu.memory_space<vmem>>, vector<1x64xf32>
    %cst_9 = arith.constant 0.000000e+00 : f32
    %10 = vector.broadcast %cst_9 : f32 to vector<1x64xf32>
    %11 = arith.cmpf ogt, %9, %10 : vector<1x64xf32>
    %cst_10 = arith.constant 0.000000e+00 : f32
    %12 = vector.broadcast %cst_10 : f32 to vector<32x64xf32>
    %13 = arith.maximumf %8, %12 : vector<32x64xf32>
    %14 = vector.shape_cast %11 : vector<1x64xi1> to vector<1x64xi1>
    %15 = vector.broadcast %14 : vector<1x64xi1> to vector<32x64xi1>
    %16 = arith.select %15, %13, %8 : vector<32x64xi1>, vector<32x64xf32>
    %c0_11 = arith.constant 0 : index
    %c0_12 = arith.constant 0 : index
    %17 = vector.load %arg6[%c0_11, %c0_12] : memref<32x64xf32, #tpu.memory_space<vmem>>, vector<32x64xf32>
    tpu.vector_store %arg6[%c0_11, %c0_12], %16 {strides = array<i32>} : memref<32x64xf32, #tpu.memory_space<vmem>>, vector<32x64xf32>,
    return
  }
  func.func @transform_0(%arg0: i32) -> (i32, i32) {
    %c0_i32 = arith.constant 0 : i32
    %c0_i32_0 = arith.constant 0 : i32
    return %arg0, %c0_i32 : i32, i32
  }
  func.func @transform_1(%arg0: i32) -> (i32, i32) {
    %c0_i32 = arith.constant 0 : i32
    %c0_i32_0 = arith.constant 0 : i32
    %c0_i32_1 = arith.constant 0 : i32
    return %c0_i32, %c0_i32_0 : i32, i32
  }
  func.func @transform_2(%arg0: i32) -> (i32, i32) {
    %c0_i32 = arith.constant 0 : i32
    %c0_i32_0 = arith.constant 0 : i32
    %c0_i32_1 = arith.constant 0 : i32
    return %c0_i32, %c0_i32_0 : i32, i32
  }
  func.func @transform_3(%arg0: i32) -> (i32, i32) {
    %c0_i32 = arith.constant 0 : i32
    %c0_i32_0 = arith.constant 0 : i32
    %c0_i32_1 = arith.constant 0 : i32
    return %c0_i32, %c0_i32_0 : i32, i32
  }
  func.func @transform_4(%arg0: i32) -> (i32, i32) {
    %c0_i32 = arith.constant 0 : i32
    %c0_i32_0 = arith.constant 0 : i32
    %c0_i32_1 = arith.constant 0 : i32
    return %c0_i32, %c0_i32_0 : i32, i32
  }
  func.func @transform_5(%arg0: i32) -> (i32, i32) {
    %c0_i32 = arith.constant 0 : i32
    %c0_i32_0 = arith.constant 0 : i32
    return %arg0, %c0_i32 : i32, i32
  }
}

module attributes {stable_mosaic.version = 11 : i64} {
  func.func @_conv_epilogue_kernel(%arg0: i32, %arg1: memref<8x288xbf16, #tpu.memory_space<vmem>>, %arg2: memref<288x128xbf16, #tpu.memory_space<vmem>>, %arg3: memref<1x128xf32, #tpu.memory_space<vmem>>, %arg4: memref<1x128xf32, #tpu.memory_space<vmem>>, %arg5: memref<1x128xf32, #tpu.memory_space<vmem>>, %arg6: memref<8x128xf32, #tpu.memory_space<vmem>>) attributes {dimension_semantics = [#tpu.dimension_semantics<parallel>], iteration_bounds = array<i64: 1>, scalar_prefetch = 0 : i64, scratch_operands = 0 : i64, tpu.core_type = #tpu.core_type<tc>, window_params = [{transform_indices = @transform_0, window_bounds = array<i64: 8, 288>}, {pipeline_mode = #tpu.pipeline_mode<synchronous>, transform_indices = @transform_1, window_bounds = array<i64: 288, 128>}, {pipeline_mode = #tpu.pipeline_mode<synchronous>, transform_indices = @transform_2, window_bounds = array<i64: 1, 128>}, {pipeline_mode = #tpu.pipeline_mode<synchronous>, transform_indices = @transform_3, window_bounds = array<i64: 1, 128>}, {pipeline_mode = #tpu.pipeline_mode<synchronous>, transform_indices = @transform_4, window_bounds = array<i64: 1, 128>}, {transform_indices = @transform_5, window_bounds = array<i64: 8, 128>}]} {
    %c0 = arith.constant 0 : index
    %c0_0 = arith.constant 0 : index
    %0 = vector.load %arg1[%c0, %c0_0] : memref<8x288xbf16, #tpu.memory_space<vmem>>, vector<8x288xbf16>
    %c0_1 = arith.constant 0 : index
    %c0_2 = arith.constant 0 : index
    %1 = vector.load %arg2[%c0_1, %c0_2] : memref<288x128xbf16, #tpu.memory_space<vmem>>, vector<288x128xbf16>
    %cst = arith.constant dense<0.000000e+00> : vector<8x128xf32>
    %2 = tpu.matmul %0, %1, %cst {dimension_numbers = #tpu.dot_dimension_numbers<[1], [0], [0], [1], [0, 0, 1, 1], [], []>} : vector<8x288xbf16>, vector<288x128xbf16>, vector<8x128xf32> -> vector<8x128xf32>
    %c0_3 = arith.constant 0 : index
    %c0_4 = arith.constant 0 : index
    %3 = vector.load %arg3[%c0_3, %c0_4] : memref<1x128xf32, #tpu.memory_space<vmem>>, vector<1x128xf32>
    %4 = vector.broadcast %3 : vector<1x128xf32> to vector<8x128xf32>
    %5 = arith.mulf %2, %4 : vector<8x128xf32>
    %c0_5 = arith.constant 0 : index
    %c0_6 = arith.constant 0 : index
    %6 = vector.load %arg4[%c0_5, %c0_6] : memref<1x128xf32, #tpu.memory_space<vmem>>, vector<1x128xf32>
    %7 = vector.broadcast %6 : vector<1x128xf32> to vector<8x128xf32>
    %8 = arith.addf %5, %7 : vector<8x128xf32>
    %c0_7 = arith.constant 0 : index
    %c0_8 = arith.constant 0 : index
    %9 = vector.load %arg5[%c0_7, %c0_8] : memref<1x128xf32, #tpu.memory_space<vmem>>, vector<1x128xf32>
    %cst_9 = arith.constant 0.000000e+00 : f32
    %10 = vector.broadcast %cst_9 : f32 to vector<1x128xf32>
    %11 = arith.cmpf ogt, %9, %10 : vector<1x128xf32>
    %cst_10 = arith.constant 0.000000e+00 : f32
    %12 = vector.broadcast %cst_10 : f32 to vector<8x128xf32>
    %13 = arith.maximumf %8, %12 : vector<8x128xf32>
    %14 = vector.shape_cast %11 : vector<1x128xi1> to vector<1x128xi1>
    %15 = vector.broadcast %14 : vector<1x128xi1> to vector<8x128xi1>
    %16 = arith.select %15, %13, %8 : vector<8x128xi1>, vector<8x128xf32>
    %c0_11 = arith.constant 0 : index
    %c0_12 = arith.constant 0 : index
    %17 = vector.load %arg6[%c0_11, %c0_12] : memref<8x128xf32, #tpu.memory_space<vmem>>, vector<8x128xf32>
    tpu.vector_store %arg6[%c0_11, %c0_12], %16 {strides = array<i32>} : memref<8x128xf32, #tpu.memory_space<vmem>>, vector<8x128xf32>,
    return
  }
  func.func @transform_0(%arg0: i32) -> (i32, i32) {
    %c0_i32 = arith.constant 0 : i32
    %c0_i32_0 = arith.constant 0 : i32
    return %arg0, %c0_i32 : i32, i32
  }
  func.func @transform_1(%arg0: i32) -> (i32, i32) {
    %c0_i32 = arith.constant 0 : i32
    %c0_i32_0 = arith.constant 0 : i32
    %c0_i32_1 = arith.constant 0 : i32
    return %c0_i32, %c0_i32_0 : i32, i32
  }
  func.func @transform_2(%arg0: i32) -> (i32, i32) {
    %c0_i32 = arith.constant 0 : i32
    %c0_i32_0 = arith.constant 0 : i32
    %c0_i32_1 = arith.constant 0 : i32
    return %c0_i32, %c0_i32_0 : i32, i32
  }
  func.func @transform_3(%arg0: i32) -> (i32, i32) {
    %c0_i32 = arith.constant 0 : i32
    %c0_i32_0 = arith.constant 0 : i32
    %c0_i32_1 = arith.constant 0 : i32
    return %c0_i32, %c0_i32_0 : i32, i32
  }
  func.func @transform_4(%arg0: i32) -> (i32, i32) {
    %c0_i32 = arith.constant 0 : i32
    %c0_i32_0 = arith.constant 0 : i32
    %c0_i32_1 = arith.constant 0 : i32
    return %c0_i32, %c0_i32_0 : i32, i32
  }
  func.func @transform_5(%arg0: i32) -> (i32, i32) {
    %c0_i32 = arith.constant 0 : i32
    %c0_i32_0 = arith.constant 0 : i32
    return %arg0, %c0_i32 : i32, i32
  }
}

module attributes {stable_mosaic.version = 11 : i64} {
  func.func @_conv_residual_kernel(%arg0: i32, %arg1: memref<8x576xbf16, #tpu.memory_space<vmem>>, %arg2: memref<576x64xbf16, #tpu.memory_space<vmem>>, %arg3: memref<1x64xf32, #tpu.memory_space<vmem>>, %arg4: memref<1x64xf32, #tpu.memory_space<vmem>>, %arg5: memref<8x64xf32, #tpu.memory_space<vmem>>, %arg6: memref<1x64xf32, #tpu.memory_space<vmem>>, %arg7: memref<8x64xf32, #tpu.memory_space<vmem>>) attributes {dimension_semantics = [#tpu.dimension_semantics<parallel>], iteration_bounds = array<i64: 1>, scalar_prefetch = 0 : i64, scratch_operands = 0 : i64, tpu.core_type = #tpu.core_type<tc>, window_params = [{transform_indices = @transform_0, window_bounds = array<i64: 8, 576>}, {pipeline_mode = #tpu.pipeline_mode<synchronous>, transform_indices = @transform_1, window_bounds = array<i64: 576, 64>}, {pipeline_mode = #tpu.pipeline_mode<synchronous>, transform_indices = @transform_2, window_bounds = array<i64: 1, 64>}, {pipeline_mode = #tpu.pipeline_mode<synchronous>, transform_indices = @transform_3, window_bounds = array<i64: 1, 64>}, {transform_indices = @transform_4, window_bounds = array<i64: 8, 64>}, {pipeline_mode = #tpu.pipeline_mode<synchronous>, transform_indices = @transform_5, window_bounds = array<i64: 1, 64>}, {transform_indices = @transform_6, window_bounds = array<i64: 8, 64>}]} {
    %c0 = arith.constant 0 : index
    %c0_0 = arith.constant 0 : index
    %0 = vector.load %arg1[%c0, %c0_0] : memref<8x576xbf16, #tpu.memory_space<vmem>>, vector<8x576xbf16>
    %c0_1 = arith.constant 0 : index
    %c0_2 = arith.constant 0 : index
    %1 = vector.load %arg2[%c0_1, %c0_2] : memref<576x64xbf16, #tpu.memory_space<vmem>>, vector<576x64xbf16>
    %cst = arith.constant dense<0.000000e+00> : vector<8x64xf32>
    %2 = tpu.matmul %0, %1, %cst {dimension_numbers = #tpu.dot_dimension_numbers<[1], [0], [0], [1], [0, 0, 1, 1], [], []>} : vector<8x576xbf16>, vector<576x64xbf16>, vector<8x64xf32> -> vector<8x64xf32>
    %c0_3 = arith.constant 0 : index
    %c0_4 = arith.constant 0 : index
    %3 = vector.load %arg3[%c0_3, %c0_4] : memref<1x64xf32, #tpu.memory_space<vmem>>, vector<1x64xf32>
    %4 = vector.broadcast %3 : vector<1x64xf32> to vector<8x64xf32>
    %5 = arith.mulf %2, %4 : vector<8x64xf32>
    %c0_5 = arith.constant 0 : index
    %c0_6 = arith.constant 0 : index
    %6 = vector.load %arg4[%c0_5, %c0_6] : memref<1x64xf32, #tpu.memory_space<vmem>>, vector<1x64xf32>
    %7 = vector.broadcast %6 : vector<1x64xf32> to vector<8x64xf32>
    %8 = arith.addf %5, %7 : vector<8x64xf32>
    %c0_7 = arith.constant 0 : index
    %c0_8 = arith.constant 0 : index
    %9 = vector.load %arg5[%c0_7, %c0_8] : memref<8x64xf32, #tpu.memory_space<vmem>>, vector<8x64xf32>
    %10 = arith.addf %8, %9 : vector<8x64xf32>
    %c0_9 = arith.constant 0 : index
    %c0_10 = arith.constant 0 : index
    %11 = vector.load %arg6[%c0_9, %c0_10] : memref<1x64xf32, #tpu.memory_space<vmem>>, vector<1x64xf32>
    %12 = vector.broadcast %11 : vector<1x64xf32> to vector<8x64xf32>
    %13 = arith.mulf %10, %12 : vector<8x64xf32>
    %c0_11 = arith.constant 0 : index
    %c0_12 = arith.constant 0 : index
    %14 = vector.load %arg7[%c0_11, %c0_12] : memref<8x64xf32, #tpu.memory_space<vmem>>, vector<8x64xf32>
    tpu.vector_store %arg7[%c0_11, %c0_12], %13 {strides = array<i32>} : memref<8x64xf32, #tpu.memory_space<vmem>>, vector<8x64xf32>,
    return
  }
  func.func @transform_0(%arg0: i32) -> (i32, i32) {
    %c0_i32 = arith.constant 0 : i32
    %c0_i32_0 = arith.constant 0 : i32
    return %arg0, %c0_i32 : i32, i32
  }
  func.func @transform_1(%arg0: i32) -> (i32, i32) {
    %c0_i32 = arith.constant 0 : i32
    %c0_i32_0 = arith.constant 0 : i32
    %c0_i32_1 = arith.constant 0 : i32
    return %c0_i32, %c0_i32_0 : i32, i32
  }
  func.func @transform_2(%arg0: i32) -> (i32, i32) {
    %c0_i32 = arith.constant 0 : i32
    %c0_i32_0 = arith.constant 0 : i32
    %c0_i32_1 = arith.constant 0 : i32
    return %c0_i32, %c0_i32_0 : i32, i32
  }
  func.func @transform_3(%arg0: i32) -> (i32, i32) {
    %c0_i32 = arith.constant 0 : i32
    %c0_i32_0 = arith.constant 0 : i32
    %c0_i32_1 = arith.constant 0 : i32
    return %c0_i32, %c0_i32_0 : i32, i32
  }
  func.func @transform_4(%arg0: i32) -> (i32, i32) {
    %c0_i32 = arith.constant 0 : i32
    %c0_i32_0 = arith.constant 0 : i32
    return %arg0, %c0_i32 : i32, i32
  }
  func.func @transform_5(%arg0: i32) -> (i32, i32) {
    %c0_i32 = arith.constant 0 : i32
    %c0_i32_0 = arith.constant 0 : i32
    %c0_i32_1 = arith.constant 0 : i32
    return %c0_i32, %c0_i32_0 : i32, i32
  }
  func.func @transform_6(%arg0: i32) -> (i32, i32) {
    %c0_i32 = arith.constant 0 : i32
    %c0_i32_0 = arith.constant 0 : i32
    return %arg0, %c0_i32 : i32, i32
  }
}

module attributes {stable_mosaic.version = 11 : i64} {
  func.func @_conv_epilogue_kernel(%arg0: i32, %arg1: memref<8x576xbf16, #tpu.memory_space<vmem>>, %arg2: memref<576x128xbf16, #tpu.memory_space<vmem>>, %arg3: memref<1x128xf32, #tpu.memory_space<vmem>>, %arg4: memref<1x128xf32, #tpu.memory_space<vmem>>, %arg5: memref<1x128xf32, #tpu.memory_space<vmem>>, %arg6: memref<8x128xf32, #tpu.memory_space<vmem>>) attributes {dimension_semantics = [#tpu.dimension_semantics<parallel>], iteration_bounds = array<i64: 1>, scalar_prefetch = 0 : i64, scratch_operands = 0 : i64, tpu.core_type = #tpu.core_type<tc>, window_params = [{transform_indices = @transform_0, window_bounds = array<i64: 8, 576>}, {pipeline_mode = #tpu.pipeline_mode<synchronous>, transform_indices = @transform_1, window_bounds = array<i64: 576, 128>}, {pipeline_mode = #tpu.pipeline_mode<synchronous>, transform_indices = @transform_2, window_bounds = array<i64: 1, 128>}, {pipeline_mode = #tpu.pipeline_mode<synchronous>, transform_indices = @transform_3, window_bounds = array<i64: 1, 128>}, {pipeline_mode = #tpu.pipeline_mode<synchronous>, transform_indices = @transform_4, window_bounds = array<i64: 1, 128>}, {transform_indices = @transform_5, window_bounds = array<i64: 8, 128>}]} {
    %c0 = arith.constant 0 : index
    %c0_0 = arith.constant 0 : index
    %0 = vector.load %arg1[%c0, %c0_0] : memref<8x576xbf16, #tpu.memory_space<vmem>>, vector<8x576xbf16>
    %c0_1 = arith.constant 0 : index
    %c0_2 = arith.constant 0 : index
    %1 = vector.load %arg2[%c0_1, %c0_2] : memref<576x128xbf16, #tpu.memory_space<vmem>>, vector<576x128xbf16>
    %cst = arith.constant dense<0.000000e+00> : vector<8x128xf32>
    %2 = tpu.matmul %0, %1, %cst {dimension_numbers = #tpu.dot_dimension_numbers<[1], [0], [0], [1], [0, 0, 1, 1], [], []>} : vector<8x576xbf16>, vector<576x128xbf16>, vector<8x128xf32> -> vector<8x128xf32>
    %c0_3 = arith.constant 0 : index
    %c0_4 = arith.constant 0 : index
    %3 = vector.load %arg3[%c0_3, %c0_4] : memref<1x128xf32, #tpu.memory_space<vmem>>, vector<1x128xf32>
    %4 = vector.broadcast %3 : vector<1x128xf32> to vector<8x128xf32>
    %5 = arith.mulf %2, %4 : vector<8x128xf32>
    %c0_5 = arith.constant 0 : index
    %c0_6 = arith.constant 0 : index
    %6 = vector.load %arg4[%c0_5, %c0_6] : memref<1x128xf32, #tpu.memory_space<vmem>>, vector<1x128xf32>
    %7 = vector.broadcast %6 : vector<1x128xf32> to vector<8x128xf32>
    %8 = arith.addf %5, %7 : vector<8x128xf32>
    %c0_7 = arith.constant 0 : index
    %c0_8 = arith.constant 0 : index
    %9 = vector.load %arg5[%c0_7, %c0_8] : memref<1x128xf32, #tpu.memory_space<vmem>>, vector<1x128xf32>
    %cst_9 = arith.constant 0.000000e+00 : f32
    %10 = vector.broadcast %cst_9 : f32 to vector<1x128xf32>
    %11 = arith.cmpf ogt, %9, %10 : vector<1x128xf32>
    %cst_10 = arith.constant 0.000000e+00 : f32
    %12 = vector.broadcast %cst_10 : f32 to vector<8x128xf32>
    %13 = arith.maximumf %8, %12 : vector<8x128xf32>
    %14 = vector.shape_cast %11 : vector<1x128xi1> to vector<1x128xi1>
    %15 = vector.broadcast %14 : vector<1x128xi1> to vector<8x128xi1>
    %16 = arith.select %15, %13, %8 : vector<8x128xi1>, vector<8x128xf32>
    %c0_11 = arith.constant 0 : index
    %c0_12 = arith.constant 0 : index
    %17 = vector.load %arg6[%c0_11, %c0_12] : memref<8x128xf32, #tpu.memory_space<vmem>>, vector<8x128xf32>
    tpu.vector_store %arg6[%c0_11, %c0_12], %16 {strides = array<i32>} : memref<8x128xf32, #tpu.memory_space<vmem>>, vector<8x128xf32>,
    return
  }
  func.func @transform_0(%arg0: i32) -> (i32, i32) {
    %c0_i32 = arith.constant 0 : i32
    %c0_i32_0 = arith.constant 0 : i32
    return %arg0, %c0_i32 : i32, i32
  }
  func.func @transform_1(%arg0: i32) -> (i32, i32) {
    %c0_i32 = arith.constant 0 : i32
    %c0_i32_0 = arith.constant 0 : i32
    %c0_i32_1 = arith.constant 0 : i32
    return %c0_i32, %c0_i32_0 : i32, i32
  }
  func.func @transform_2(%arg0: i32) -> (i32, i32) {
    %c0_i32 = arith.constant 0 : i32
    %c0_i32_0 = arith.constant 0 : i32
    %c0_i32_1 = arith.constant 0 : i32
    return %c0_i32, %c0_i32_0 : i32, i32
  }
  func.func @transform_3(%arg0: i32) -> (i32, i32) {
    %c0_i32 = arith.constant 0 : i32
    %c0_i32_0 = arith.constant 0 : i32
    %c0_i32_1 = arith.constant 0 : i32
    return %c0_i32, %c0_i32_0 : i32, i32
  }
  func.func @transform_4(%arg0: i32) -> (i32, i32) {
    %c0_i32 = arith.constant 0 : i32
    %c0_i32_0 = arith.constant 0 : i32
    %c0_i32_1 = arith.constant 0 : i32
    return %c0_i32, %c0_i32_0 : i32, i32
  }
  func.func @transform_5(%arg0: i32) -> (i32, i32) {
    %c0_i32 = arith.constant 0 : i32
    %c0_i32_0 = arith.constant 0 : i32
    return %arg0, %c0_i32 : i32, i32
  }
}

module attributes {stable_mosaic.version = 11 : i64} {
  func.func @_conv_residual_kernel(%arg0: i32, %arg1: memref<8x576xbf16, #tpu.memory_space<vmem>>, %arg2: memref<576x64xbf16, #tpu.memory_space<vmem>>, %arg3: memref<1x64xf32, #tpu.memory_space<vmem>>, %arg4: memref<1x64xf32, #tpu.memory_space<vmem>>, %arg5: memref<8x64xf32, #tpu.memory_space<vmem>>, %arg6: memref<1x64xf32, #tpu.memory_space<vmem>>, %arg7: memref<8x64xf32, #tpu.memory_space<vmem>>) attributes {dimension_semantics = [#tpu.dimension_semantics<parallel>], iteration_bounds = array<i64: 1>, scalar_prefetch = 0 : i64, scratch_operands = 0 : i64, tpu.core_type = #tpu.core_type<tc>, window_params = [{transform_indices = @transform_0, window_bounds = array<i64: 8, 576>}, {pipeline_mode = #tpu.pipeline_mode<synchronous>, transform_indices = @transform_1, window_bounds = array<i64: 576, 64>}, {pipeline_mode = #tpu.pipeline_mode<synchronous>, transform_indices = @transform_2, window_bounds = array<i64: 1, 64>}, {pipeline_mode = #tpu.pipeline_mode<synchronous>, transform_indices = @transform_3, window_bounds = array<i64: 1, 64>}, {transform_indices = @transform_4, window_bounds = array<i64: 8, 64>}, {pipeline_mode = #tpu.pipeline_mode<synchronous>, transform_indices = @transform_5, window_bounds = array<i64: 1, 64>}, {transform_indices = @transform_6, window_bounds = array<i64: 8, 64>}]} {
    %c0 = arith.constant 0 : index
    %c0_0 = arith.constant 0 : index
    %0 = vector.load %arg1[%c0, %c0_0] : memref<8x576xbf16, #tpu.memory_space<vmem>>, vector<8x576xbf16>
    %c0_1 = arith.constant 0 : index
    %c0_2 = arith.constant 0 : index
    %1 = vector.load %arg2[%c0_1, %c0_2] : memref<576x64xbf16, #tpu.memory_space<vmem>>, vector<576x64xbf16>
    %cst = arith.constant dense<0.000000e+00> : vector<8x64xf32>
    %2 = tpu.matmul %0, %1, %cst {dimension_numbers = #tpu.dot_dimension_numbers<[1], [0], [0], [1], [0, 0, 1, 1], [], []>} : vector<8x576xbf16>, vector<576x64xbf16>, vector<8x64xf32> -> vector<8x64xf32>
    %c0_3 = arith.constant 0 : index
    %c0_4 = arith.constant 0 : index
    %3 = vector.load %arg3[%c0_3, %c0_4] : memref<1x64xf32, #tpu.memory_space<vmem>>, vector<1x64xf32>
    %4 = vector.broadcast %3 : vector<1x64xf32> to vector<8x64xf32>
    %5 = arith.mulf %2, %4 : vector<8x64xf32>
    %c0_5 = arith.constant 0 : index
    %c0_6 = arith.constant 0 : index
    %6 = vector.load %arg4[%c0_5, %c0_6] : memref<1x64xf32, #tpu.memory_space<vmem>>, vector<1x64xf32>
    %7 = vector.broadcast %6 : vector<1x64xf32> to vector<8x64xf32>
    %8 = arith.addf %5, %7 : vector<8x64xf32>
    %c0_7 = arith.constant 0 : index
    %c0_8 = arith.constant 0 : index
    %9 = vector.load %arg5[%c0_7, %c0_8] : memref<8x64xf32, #tpu.memory_space<vmem>>, vector<8x64xf32>
    %10 = arith.addf %8, %9 : vector<8x64xf32>
    %c0_9 = arith.constant 0 : index
    %c0_10 = arith.constant 0 : index
    %11 = vector.load %arg6[%c0_9, %c0_10] : memref<1x64xf32, #tpu.memory_space<vmem>>, vector<1x64xf32>
    %12 = vector.broadcast %11 : vector<1x64xf32> to vector<8x64xf32>
    %13 = arith.mulf %10, %12 : vector<8x64xf32>
    %c0_11 = arith.constant 0 : index
    %c0_12 = arith.constant 0 : index
    %14 = vector.load %arg7[%c0_11, %c0_12] : memref<8x64xf32, #tpu.memory_space<vmem>>, vector<8x64xf32>
    tpu.vector_store %arg7[%c0_11, %c0_12], %13 {strides = array<i32>} : memref<8x64xf32, #tpu.memory_space<vmem>>, vector<8x64xf32>,
    return
  }
  func.func @transform_0(%arg0: i32) -> (i32, i32) {
    %c0_i32 = arith.constant 0 : i32
    %c0_i32_0 = arith.constant 0 : i32
    return %arg0, %c0_i32 : i32, i32
  }
  func.func @transform_1(%arg0: i32) -> (i32, i32) {
    %c0_i32 = arith.constant 0 : i32
    %c0_i32_0 = arith.constant 0 : i32
    %c0_i32_1 = arith.constant 0 : i32
    return %c0_i32, %c0_i32_0 : i32, i32
  }
  func.func @transform_2(%arg0: i32) -> (i32, i32) {
    %c0_i32 = arith.constant 0 : i32
    %c0_i32_0 = arith.constant 0 : i32
    %c0_i32_1 = arith.constant 0 : i32
    return %c0_i32, %c0_i32_0 : i32, i32
  }
  func.func @transform_3(%arg0: i32) -> (i32, i32) {
    %c0_i32 = arith.constant 0 : i32
    %c0_i32_0 = arith.constant 0 : i32
    %c0_i32_1 = arith.constant 0 : i32
    return %c0_i32, %c0_i32_0 : i32, i32
  }
  func.func @transform_4(%arg0: i32) -> (i32, i32) {
    %c0_i32 = arith.constant 0 : i32
    %c0_i32_0 = arith.constant 0 : i32
    return %arg0, %c0_i32 : i32, i32
  }
  func.func @transform_5(%arg0: i32) -> (i32, i32) {
    %c0_i32 = arith.constant 0 : i32
    %c0_i32_0 = arith.constant 0 : i32
    %c0_i32_1 = arith.constant 0 : i32
    return %c0_i32, %c0_i32_0 : i32, i32
  }
  func.func @transform_6(%arg0: i32) -> (i32, i32) {
    %c0_i32 = arith.constant 0 : i32
    %c0_i32_0 = arith.constant 0 : i32
    return %arg0, %c0_i32 : i32, i32
  }
}

</mosaic_0001>

<bundles_post_ra>
// kernel: forward.57
= control target key start
LH: loop header
LB: loop body
LE: loop exit
PB: predicated region body
PF: predicated region fallthrough
CT: control target
= control target key end

     0   :  { %s2951_s18 = smov 0   ;;  %s4032_s0 = inlined_call_operand.vmem [shape: bf16[2048,147], index: 0, kind: input, shape index: {}]   ;;  %s4033_s1 = inlined_call_operand.vmem [shape: bf16[147,8], index: 1, kind: input, shape index: {}]   ;;  %s4034_s2 = inlined_call_operand.vmem [shape: f32[1,8], index: 2, kind: input, shape index: {}]   ;;  %s4035_s3 = inlined_call_operand.vmem [shape: f32[1,8], index: 3, kind: input, shape index: {}]   ;;  %s4036_s4 = inlined_call_operand.vmem [shape: f32[1,8], index: 4, kind: input, shape index: {}]   ;;  %s4037_s5 = inlined_call_operand.vmem [shape: f32[2048,8], index: 5, kind: output, shape index: {}]  }
   0x1 LB: > { %s2476_s19 = sadd.s32 4294967295, %s2917_s18   ;;  %p2480_p0 = scmp.ge.s32.totalorder %s2917_s18, 1  ;;  %s2917_s18 = sphi %s2951_s18, %s15_s18  }
   0x2   : > { %p189_p1 = scmp.lt.s32.totalorder %s2917_s18, 3 }
   0x4   : > { %p190_p2 = pnand %p2480_p0, %p189_p1 }
   0x5   : > { %s2481_s26 = sshll.u32 (!%p190_p2), %s2476_s19, 7 }
   0x6   : > { %193 = sbr.rel (%p190_p2) target bundleno = 505 (0x1f9), region = 40  ;;  %p219_p3 = scmp.lt.s32.totalorder (!%p190_p2), %s2481_s26, 255 }
   0xb   : > { %v2723_v0 = vld [vmem:[%s4033_s1 + $0x38] sm:$0xff]   ;;  %v2919_v1 = vmov 0   ;;  %v2724_v2 = vld [vmem:[%s4033_s1 + $0x30] sm:$0xff]   ;;  %v2725_v3 = vld [vmem:[%s4033_s1 + $0x28] sm:$0xff]   ;;  %s4039_s26 = smov (!%p219_p3, %s2481_s26), 255  ;;  %vm1012_vm0 = vcmask 154624  }
   0xc   : > { %1212 = vmatprep.subr.bf16.mxu0 %v2919_v1  ;;  %2693 = vmatprep.subr.bf16.mxu1 %v2919_v1  ;;  %v2726_v4 = vld [vmem:[%s4033_s1 + $0x20] sm:$0xff]   ;;  %s2692_s29 = sshll.u32 %s4039_s26, 3  ;;  %v2727_v5 = vld [vmem:[%s4033_s1 + $0x18] sm:$0xff]   ;;  %v2728_v8 = vld [vmem:[%s4033_s1 + $0x10] sm:$0xff]   ;;  %vm1205_vm1 = vcmask 1040384   ;;  %vm1206_vm2 = vcmask 1041408  }
   0xd   : > { %1213 = vmatpush1.bf16.msra.mxu0 %v2723_v0  ;;  %2703 = vmatpush1.bf16.msra.mxu1 %v2723_v0  ;;  %s2987_s7 = scalar_lea.vmem %s4032_s0, %s2692_s29  ;;  %v2729_v9 = vld [vmem:[%s4033_s1 + $0x8] sm:$0xff]   ;;  %v2920_v10 = vmov 65535   ;;  %v2730_v12 = vld [vmem:[%s4033_s1] sm:$0xff]   ;;  %vm2291_vm5 = vcmask 64512   ;;  %s3205_s6 = scalar_lea.vmem %s4037_s5, %s2692_s29 }
   0xe   : > { %1214 = vmatprep.subr.bf16.mxu0 %v2919_v1  ;;  %2694 = vmatprep.subr.bf16.mxu1 %v2919_v1  ;;  %v2735_v6 = vld [vmem:[%s2987_s7 + $0x4] ss:$8 sps:$4 sm:$0xff]   ;;  %v1207_v11 = vsel %vm1205_vm1, 4294967295, %v2920_v10  ;;  %v2731_v13 = vld [vmem:[%s4033_s1 + $0x48] ss:$0 sps:$4 sm:$0x33]  }
   0xf   : > { %v2738_v7 = vld [vmem:[%s2987_s7 + $0x204] ss:$8 sps:$4 sm:$0xff]   ;;  %2624 = vmatprep.mubr.msk.bf16.mxu0 %vm1012_vm0, %v2735_v6  ;;  %v1208_v14 = vsel %vm1206_vm2, %v1207_v11, 0  ;;  %v2733_v17 = vld [vmem:[%s2987_s7] ss:$8 sps:$4 sm:$0xff]  }
  0x10   : > { %2656 = vmatprep.mubr.msk.bf16.mxu1 %vm1012_vm0, %v2738_v7  ;;  %v1210_v15 = vand.u32 %v2731_v13, %v1208_v14  ;;  %v2732_v16 = vld [vmem:[%s4033_s1 + $0x40] sm:$0xff]   ;;  %v2739_v19 = vld [vmem:[%s2987_s7 + $0x14] ss:$8 sps:$4 sm:$0xff]   ;;  %v2743_v21 = vld [vmem:[%s2987_s7 + $0x10] ss:$8 sps:$4 sm:$0xff]  }
  0x11   : > { %1215 = vmatpush1.bf16.msra.mxu0 %v2724_v2  ;;  %2704 = vmatpush1.bf16.msra.mxu1 %v2724_v2  ;;  %v2736_v18 = vld [vmem:[%s2987_s7 + $0x200] ss:$8 sps:$4 sm:$0xff]   ;;  %v2741_v20 = vld [vmem:[%s2987_s7 + $0x214] ss:$8 sps:$4 sm:$0xff]   ;;  %v2744_v22 = vld [vmem:[%s2987_s7 + $0x210] ss:$8 sps:$4 sm:$0xff]  }
  0x12   : > { %1216 = vmatprep.subr.bf16.mxu0 %v2919_v1  ;;  %2695 = vmatprep.subr.bf16.mxu1 %v2919_v1  ;;  %v2745_v23 = vld [vmem:[%s2987_s7 + $0x24] ss:$8 sps:$4 sm:$0xff]   ;;  %v2749_v25 = vld [vmem:[%s2987_s7 + $0x20] ss:$8 sps:$4 sm:$0xff]   ;;  %v2751_v27 = vld [vmem:[%s2987_s7 + $0x34] ss:$8 sps:$4 sm:$0xff]  }
  0x13   : > { %v2747_v24 = vld [vmem:[%s2987_s7 + $0x224] ss:$8 sps:$4 sm:$0xff]   ;;  %v2750_v26 = vld [vmem:[%s2987_s7 + $0x220] ss:$8 sps:$4 sm:$0xff]   ;;  %v2753_v28 = vld [vmem:[%s2987_s7 + $0x234] ss:$8 sps:$4 sm:$0xff]  }
  0x14   : > { %v2755_v29 = vld [vmem:[%s2987_s7 + $0x30] ss:$8 sps:$4 sm:$0xff]   ;;  %v2757_v31 = vld [vmem:[%s2987_s7 + $0x44] ss:$8 sps:$4 sm:$0xff]   ;;  %v2761_v33 = vld [vmem:[%s2987_s7 + $0x40] ss:$8 sps:$4 sm:$0xff]  }
  0x15   : > { %1217 = vmatpush1.bf16.msra.mxu0 %v2725_v3  ;;  %2705 = vmatpush1.bf16.msra.mxu1 %v2725_v3  ;;  %v2756_v30 = vld [vmem:[%s2987_s7 + $0x230] ss:$8 sps:$4 sm:$0xff]   ;;  %v2759_v32 = vld [vmem:[%s2987_s7 + $0x244] ss:$8 sps:$4 sm:$0xff]   ;;  %v2762_v34 = vld [vmem:[%s2987_s7 + $0x240] ss:$8 sps:$4 sm:$0xff]  }
  0x16   : > { %1218 = vmatprep.subr.bf16.mxu0 %v2919_v1  ;;  %2696 = vmatprep.subr.bf16.mxu1 %v2919_v1  ;;  %v2763_v35 = vld [vmem:[%s2987_s7 + $0x54] ss:$8 sps:$4 sm:$0xff]   ;;  %v2767_v37 = vld [vmem:[%s2987_s7 + $0x50] ss:$8 sps:$4 sm:$0xff]   ;;  %v2769_v39 = vld [vmem:[%s2987_s7 + $0x64] ss:$8 sps:$4 sm:$0xff]  }
  0x17   : > { %v2765_v36 = vld [vmem:[%s2987_s7 + $0x254] ss:$8 sps:$4 sm:$0xff]   ;;  %v2768_v38 = vld [vmem:[%s2987_s7 + $0x250] ss:$8 sps:$4 sm:$0xff]   ;;  %v2771_v40 = vld [vmem:[%s2987_s7 + $0x264] ss:$8 sps:$4 sm:$0xff]  }
  0x18   : > { %v2773_v41 = vld [vmem:[%s2987_s7 + $0x60] ss:$8 sps:$4 sm:$0xff]   ;;  %v2775_v43 = vld [vmem:[%s2987_s7 + $0x74] ss:$8 sps:$4 sm:$0xff]   ;;  %v2779_v45 = vld [vmem:[%s2987_s7 + $0x70] ss:$8 sps:$4 sm:$0xff]  }
  0x19   : > { %1219 = vmatpush1.bf16.msra.mxu0 %v2726_v4  ;;  %2706 = vmatpush1.bf16.msra.mxu1 %v2726_v4  ;;  %v2774_v42 = vld [vmem:[%s2987_s7 + $0x260] ss:$8 sps:$4 sm:$0xff]   ;;  %v2777_v44 = vld [vmem:[%s2987_s7 + $0x274] ss:$8 sps:$4 sm:$0xff]   ;;  %v2780_v46 = vld [vmem:[%s2987_s7 + $0x270] ss:$8 sps:$4 sm:$0xff]  }
  0x1a   : > { %1220 = vmatprep.subr.bf16.mxu0 %v2919_v1  ;;  %2697 = vmatprep.subr.bf16.mxu1 %v2919_v1  ;;  %v2781_v47 = vld [vmem:[%s2987_s7 + $0x84] ss:$8 sps:$4 sm:$0xff]   ;;  %v2785_v49 = vld [vmem:[%s2987_s7 + $0x80] ss:$8 sps:$4 sm:$0xff]   ;;  %v2787_v51 = vld [vmem:[%s2987_s7 + $0x94] ss:$8 sps:$4 sm:$0xff]  }
  0x1b   : > { %v2783_v48 = vld [vmem:[%s2987_s7 + $0x284] ss:$8 sps:$4 sm:$0xff]   ;;  %v2786_v50 = vld [vmem:[%s2987_s7 + $0x280] ss:$8 sps:$4 sm:$0xff]   ;;  %v2789_v52 = vld [vmem:[%s2987_s7 + $0x294] ss:$8 sps:$4 sm:$0xff]  }
  0x1c   : > { %v2791_v53 = vld [vmem:[%s2987_s7 + $0x90] ss:$8 sps:$4 sm:$0xff]   ;;  %v2793_v55 = vld [vmem:[%s2987_s7 + $0xa4] ss:$8 sps:$4 sm:$0xff]   ;;  %v2797_v57 = vld [vmem:[%s2987_s7 + $0xa0] ss:$8 sps:$4 sm:$0xff]  }
  0x1d   : > { %1221 = vmatpush1.bf16.msra.mxu0 %v2727_v5  ;;  %2707 = vmatpush1.bf16.msra.mxu1 %v2727_v5  ;;  %v2792_v54 = vld [vmem:[%s2987_s7 + $0x290] ss:$8 sps:$4 sm:$0xff]   ;;  %v2795_v56 = vld [vmem:[%s2987_s7 + $0x2a4] ss:$8 sps:$4 sm:$0xff]   ;;  %v2798_v58 = vld [vmem:[%s2987_s7 + $0x2a0] ss:$8 sps:$4 sm:$0xff]  }
  0x1e   : > { %1222 = vmatprep.subr.bf16.mxu0 %v2919_v1  ;;  %2698 = vmatprep.subr.bf16.mxu1 %v2919_v1  ;;  %v2799_v59 = vld [vmem:[%s2987_s7 + $0xb4] ss:$8 sps:$4 sm:$0xff]   ;;  %v2803_v61 = vld [vmem:[%s2987_s7 + $0xb0] ss:$8 sps:$4 sm:$0xff]   ;;  %v2805_v63 = vld [vmem:[%s2987_s7 + $0xc4] ss:$8 sps:$4 sm:$0xff]  }
  0x1f   : > { %v2801_v60 = vld [vmem:[%s2987_s7 + $0x2b4] ss:$8 sps:$4 sm:$0xff]   ;;  %v2804_v62 = vld [vmem:[%s2987_s7 + $0x2b0] ss:$8 sps:$4 sm:$0xff]   ;;  %v2807_v0 = vld [vmem:[%s2987_s7 + $0x2c4] ss:$8 sps:$4 sm:$0xff]  }
  0x20   : > { %v2809_v2 = vld [vmem:[%s2987_s7 + $0xc0] ss:$8 sps:$4 sm:$0xff]   ;;  %v2811_v4 = vld [vmem:[%s2987_s7 + $0xd4] ss:$8 sps:$4 sm:$0xff]   ;;  %v2815_v6 = vld [vmem:[%s2987_s7 + $0xd0] ss:$8 sps:$4 sm:$0xff]  }
  0x21   : > { %1223 = vmatpush1.bf16.msra.mxu0 %v2728_v8  ;;  %2708 = vmatpush1.bf16.msra.mxu1 %v2728_v8  ;;  %v2810_v3 = vld [vmem:[%s2987_s7 + $0x2c0] ss:$8 sps:$4 sm:$0xff]   ;;  %v2813_v5 = vld [vmem:[%s2987_s7 + $0x2d4] ss:$8 sps:$4 sm:$0xff]   ;;  %v2816_v7 = vld [vmem:[%s2987_s7 + $0x2d0] ss:$8 sps:$4 sm:$0xff]  }
  0x22   : > { %1224 = vmatprep.subr.bf16.mxu0 %v2919_v1  ;;  %2699 = vmatprep.subr.bf16.mxu1 %v2919_v1  ;;  %v2817_v8 = vld [vmem:[%s2987_s7 + $0xe4] ss:$8 sps:$4 sm:$0xff]   ;;  %v2821_v10 = vld [vmem:[%s2987_s7 + $0xe0] ss:$8 sps:$4 sm:$0xff]   ;;  %v2825_v13 = vld [vmem:[%s2987_s7 + $0x2f4] ss:$8 sps:$4 sm:$0xff]  }
  0x23   : > { %v2822_v11 = vld [vmem:[%s2987_s7 + $0x2e0] ss:$8 sps:$4 sm:$0xff]   ;;  %v2827_v14 = vld [vmem:[%s2987_s7 + $0xf0] ss:$8 sps:$4 sm:$0xff]  }
  0x25   : > { %1225 = vmatpush1.bf16.msra.mxu0 %v2729_v9  ;;  %2709 = vmatpush1.bf16.msra.mxu1 %v2729_v9  ;;  %v2819_v9 = vld [vmem:[%s2987_s7 + $0x2e4] ss:$8 sps:$4 sm:$0xff]  }
  0x26   : > { %1226 = vmatprep.subr.bf16.mxu0 %v2919_v1  ;;  %2700 = vmatprep.subr.bf16.mxu1 %v2919_v1 }
  0x29   : > { %1227 = vmatpush1.bf16.msra.mxu0 %v2730_v12  ;;  %2710 = vmatpush1.bf16.msra.mxu1 %v2730_v12  ;;  %v2823_v12 = vld [vmem:[%s2987_s7 + $0xf4] ss:$8 sps:$4 sm:$0xff]  }
  0x2a   : > { %1240 = vmatprep.subr.bf16.mxu0 %v2919_v1  ;;  %2701 = vmatprep.subr.bf16.mxu1 %v2919_v1 }
  0x2d   : > { %1241 = vmatpush2.bf16.msra.mxu0 %v1210_v15  ;;  %2711 = vmatpush2.bf16.msra.mxu1 %v1210_v15  ;;  %v2828_v15 = vld [vmem:[%s2987_s7 + $0x2f0] ss:$8 sps:$4 sm:$0xff]  }
  0x2e   : > { %1242 = vmatprep.subr.bf16.mxu0 %v2919_v1  ;;  %2702 = vmatprep.subr.bf16.mxu1 %v2919_v1 }
  0x31   : > { %1243 = vmatpush2.bf16.msra.mxu0 %v2732_v16  ;;  %2712 = vmatpush2.bf16.msra.mxu1 %v2732_v16  ;;  %v2829_v16 = vld [vmem:[%s2987_s7 + $0x104] ss:$8 sps:$4 sm:$0xff]  }
  0x34   : > { %1245 = vmatmul.mubr.bf16.vlgmr.msra.gmra.mxu0 %v2733_v17  ;;  %1501 = vmatmul.mubr.bf16.vlgmr.msra.gmra.mxu1 %v2736_v18  ;;  %v2831_v17 = vld [vmem:[%s2987_s7 + $0x304] ss:$8 sps:$4 sm:$0xff]   ;;  %v2833_v18 = vld [vmem:[%s2987_s7 + $0x100] ss:$8 sps:$4 sm:$0xff]  }
  0x35   : > { %2625 = vmatprep.mubr.msk.bf16.mxu0 %vm1012_vm0, %v2739_v19  ;;  %2657 = vmatprep.mubr.msk.bf16.mxu1 %vm1012_vm0, %v2741_v20  ;;  %v2834_v19 = vld [vmem:[%s2987_s7 + $0x300] ss:$8 sps:$4 sm:$0xff]   ;;  %v2835_v20 = vld [vmem:[%s2987_s7 + $0x114] ss:$8 sps:$4 sm:$0xff]  }
  0x3c   : > { %1253 = vmatmul.mubr.bf16.gmra.mxu0 %v2743_v21  ;;  %1509 = vmatmul.mubr.bf16.gmra.mxu1 %v2744_v22  ;;  %v2837_v21 = vld [vmem:[%s2987_s7 + $0x314] ss:$8 sps:$4 sm:$0xff]   ;;  %v2839_v22 = vld [vmem:[%s2987_s7 + $0x110] ss:$8 sps:$4 sm:$0xff]  }
  0x3d   : > { %2626 = vmatprep.mubr.msk.bf16.mxu0 %vm1012_vm0, %v2745_v23  ;;  %2658 = vmatprep.mubr.msk.bf16.mxu1 %vm1012_vm0, %v2747_v24  ;;  %v2840_v23 = vld [vmem:[%s2987_s7 + $0x310] ss:$8 sps:$4 sm:$0xff]   ;;  %v2841_v24 = vld [vmem:[%s2987_s7 + $0x124] ss:$8 sps:$4 sm:$0xff]  }
  0x44   : > { %1261 = vmatmul.mubr.bf16.gmra.mxu0 %v2749_v25  ;;  %1517 = vmatmul.mubr.bf16.gmra.mxu1 %v2750_v26  ;;  %v2843_v25 = vld [vmem:[%s2987_s7 + $0x324] ss:$8 sps:$4 sm:$0xff]   ;;  %v2845_v26 = vld [vmem:[%s2987_s7 + $0x120] ss:$8 sps:$4 sm:$0xff]  }
  0x45   : > { %2627 = vmatprep.mubr.msk.bf16.mxu0 %vm1012_vm0, %v2751_v27  ;;  %2659 = vmatprep.mubr.msk.bf16.mxu1 %vm1012_vm0, %v2753_v28  ;;  %v2846_v27 = vld [vmem:[%s2987_s7 + $0x320] ss:$8 sps:$4 sm:$0xff]   ;;  %v2847_v28 = vld [vmem:[%s2987_s7 + $0x134] ss:$8 sps:$4 sm:$0xff]  }
  0x4c   : > { %1269 = vmatmul.mubr.bf16.gmra.mxu0 %v2755_v29  ;;  %1525 = vmatmul.mubr.bf16.gmra.mxu1 %v2756_v30  ;;  %v2849_v29 = vld [vmem:[%s2987_s7 + $0x334] ss:$8 sps:$4 sm:$0xff]   ;;  %v2851_v30 = vld [vmem:[%s2987_s7 + $0x130] ss:$8 sps:$4 sm:$0xff]  }
  0x4d   : > { %2628 = vmatprep.mubr.msk.bf16.mxu0 %vm1012_vm0, %v2757_v31  ;;  %2660 = vmatprep.mubr.msk.bf16.mxu1 %vm1012_vm0, %v2759_v32  ;;  %v2852_v31 = vld [vmem:[%s2987_s7 + $0x330] ss:$8 sps:$4 sm:$0xff]   ;;  %v2853_v32 = vld [vmem:[%s2987_s7 + $0x144] ss:$8 sps:$4 sm:$0xff]  }
  0x54   : > { %1277 = vmatmul.mubr.bf16.gmra.mxu0 %v2761_v33  ;;  %1533 = vmatmul.mubr.bf16.gmra.mxu1 %v2762_v34  ;;  %v2855_v33 = vld [vmem:[%s2987_s7 + $0x344] ss:$8 sps:$4 sm:$0xff]   ;;  %v2857_v34 = vld [vmem:[%s2987_s7 + $0x140] ss:$8 sps:$4 sm:$0xff]  }
  0x55   : > { %2629 = vmatprep.mubr.msk.bf16.mxu0 %vm1012_vm0, %v2763_v35  ;;  %2661 = vmatprep.mubr.msk.bf16.mxu1 %vm1012_vm0, %v2765_v36  ;;  %v2858_v35 = vld [vmem:[%s2987_s7 + $0x340] ss:$8 sps:$4 sm:$0xff]   ;;  %v2859_v36 = vld [vmem:[%s2987_s7 + $0x154] ss:$8 sps:$4 sm:$0xff]  }
  0x5c   : > { %1285 = vmatmul.mubr.bf16.gmra.mxu0 %v2767_v37  ;;  %1541 = vmatmul.mubr.bf16.gmra.mxu1 %v2768_v38  ;;  %v2861_v37 = vld [vmem:[%s2987_s7 + $0x354] ss:$8 sps:$4 sm:$0xff]   ;;  %v2863_v38 = vld [vmem:[%s2987_s7 + $0x150] ss:$8 sps:$4 sm:$0xff]  }
  0x5d   : > { %2630 = vmatprep.mubr.msk.bf16.mxu0 %vm1012_vm0, %v2769_v39  ;;  %2662 = vmatprep.mubr.msk.bf16.mxu1 %vm1012_vm0, %v2771_v40  ;;  %v2864_v39 = vld [vmem:[%s2987_s7 + $0x350] ss:$8 sps:$4 sm:$0xff]   ;;  %v2865_v40 = vld [vmem:[%s2987_s7 + $0x164] ss:$8 sps:$4 sm:$0xff]  }
  0x64   : > { %1293 = vmatmul.mubr.bf16.gmra.mxu0 %v2773_v41  ;;  %1549 = vmatmul.mubr.bf16.gmra.mxu1 %v2774_v42  ;;  %v2867_v41 = vld [vmem:[%s2987_s7 + $0x364] ss:$8 sps:$4 sm:$0xff]   ;;  %v2869_v42 = vld [vmem:[%s2987_s7 + $0x160] ss:$8 sps:$4 sm:$0xff]  }
  0x65   : > { %2631 = vmatprep.mubr.msk.bf16.mxu0 %vm1012_vm0, %v2775_v43  ;;  %2663 = vmatprep.mubr.msk.bf16.mxu1 %vm1012_vm0, %v2777_v44  ;;  %v2870_v43 = vld [vmem:[%s2987_s7 + $0x360] ss:$8 sps:$4 sm:$0xff]   ;;  %v2871_v44 = vld [vmem:[%s2987_s7 + $0x174] ss:$8 sps:$4 sm:$0xff]  }
  0x6c   : > { %1301 = vmatmul.mubr.bf16.gmra.mxu0 %v2779_v45  ;;  %1557 = vmatmul.mubr.bf16.gmra.mxu1 %v2780_v46  ;;  %v2873_v45 = vld [vmem:[%s2987_s7 + $0x374] ss:$8 sps:$4 sm:$0xff]   ;;  %v2875_v46 = vld [vmem:[%s2987_s7 + $0x170] ss:$8 sps:$4 sm:$0xff]  }
  0x6d   : > { %2632 = vmatprep.mubr.msk.bf16.mxu0 %vm1012_vm0, %v2781_v47  ;;  %2664 = vmatprep.mubr.msk.bf16.mxu1 %vm1012_vm0, %v2783_v48  ;;  %v2876_v47 = vld [vmem:[%s2987_s7 + $0x370] ss:$8 sps:$4 sm:$0xff]   ;;  %v2158_v48 = vlaneseq }
  0x74   : > { %1309 = vmatmul.mubr.bf16.gmra.mxu0 %v2785_v49  ;;  %1565 = vmatmul.mubr.bf16.gmra.mxu1 %v2786_v50  ;;  %v2877_v49 = vld [vmem:[%s2987_s7 + $0x184] ss:$8 sps:$4 sm:$0xff]  }
  0x75   : > { %2633 = vmatprep.mubr.msk.bf16.mxu0 %vm1012_vm0, %v2787_v51  ;;  %2665 = vmatprep.mubr.msk.bf16.mxu1 %vm1012_vm0, %v2789_v52  ;;  %v2879_v50 = vld [vmem:[%s2987_s7 + $0x384] ss:$8 sps:$4 sm:$0xff]   ;;  %v2027_v51 = vld [vmem:[%s4036_s4] sm:$0x1] }
  0x76   : > { %v280_v52 = vld [vmem:[%s2987_s7 + $0x180] sm:$0xff]  ;;  %vm2028_vm3 = vcmp.gt.f32.partialorder %v2027_v51, 0.0 }
  0x7c   : > { %1317 = vmatmul.mubr.bf16.gmra.mxu0 %v2791_v53  ;;  %1573 = vmatmul.mubr.bf16.gmra.mxu1 %v2792_v54  ;;  %v2159_v53 = vshrl.u32 %v2158_v48, 7  ;;  %v281_v54 = vld [vmem:[%s2987_s7 + $0x188] sm:$0xff] }
  0x7d   : > { %2634 = vmatprep.mubr.msk.bf16.mxu0 %vm1012_vm0, %v2793_v55  ;;  %2666 = vmatprep.mubr.msk.bf16.mxu1 %vm1012_vm0, %v2795_v56  ;;  %v344_v55 = vld [vmem:[%s2987_s7 + $0x380] sm:$0xff]  ;;  %v345_v56 = vld [vmem:[%s2987_s7 + $0x388] sm:$0xff] }
  0x84   : > { %1325 = vmatmul.mubr.bf16.gmra.mxu0 %v2797_v57  ;;  %1581 = vmatmul.mubr.bf16.gmra.mxu1 %v2798_v58  ;;  %v2160_v57 = vsub.s32 0, %v2159_v53  ;;  %v2534_v58 = vcombine.low %v280_v52, %v281_v54  ;;  %v2889_v54 = vld [vmem:[%s2987_s7 + $0x1b4] ss:$8 sps:$4 sm:$0xff]  }
  0x85   : > { %2635 = vmatprep.mubr.msk.bf16.mxu0 %vm1012_vm0, %v2799_v59  ;;  %2667 = vmatprep.mubr.msk.bf16.mxu1 %vm1012_vm0, %v2801_v60  ;;  %v2598_v59 = vcombine.low %v344_v55, %v345_v56  ;;  %v2157_v60 = vsel %vm2028_vm3, 1, %v2919_v1  ;;  %v282_v1 = vld [vmem:[%s2987_s7 + $0x190] sm:$0xff] }
  0x86   : > { %v2891_v55 = vld [vmem:[%s2987_s7 + $0x3b4] ss:$8 sps:$4 sm:$0xff]  }
  0x8c   : > { %1333 = vmatmul.mubr.bf16.gmra.mxu0 %v2803_v61  ;;  %1589 = vmatmul.mubr.bf16.gmra.mxu1 %v2804_v62  ;;  %v2881_v61 = vld [vmem:[%s2987_s7 + $0x194] ss:$8 sps:$4 sm:$0xff]  }
  0x8d   : > { %2636 = vmatprep.mubr.msk.bf16.mxu0 %vm1012_vm0, %v2805_v63  ;;  %2668 = vmatprep.mubr.msk.bf16.mxu1 %vm1012_vm0, %v2807_v0  ;;  %v2883_v62 = vld [vmem:[%s2987_s7 + $0x394] ss:$8 sps:$4 sm:$0xff]   ;;  %v3180_v63 = vld [vmem:[%s4034_s2] ss:$0 sm:$0xff] }
  0x94   : > { %1341 = vmatmul.mubr.bf16.gmra.mxu0 %v2809_v2  ;;  %1597 = vmatmul.mubr.bf16.gmra.mxu1 %v2810_v3  ;;  %v3185_v2 = vld [vmem:[%s4035_s3] ss:$0 sm:$0xff]  ;;  %v3187_v3 = vrot.slane %v2157_v60, %v2160_v57 }
  0x95   : > { %2637 = vmatprep.mubr.msk.bf16.mxu0 %vm1012_vm0, %v2811_v4  ;;  %2669 = vmatprep.mubr.msk.bf16.mxu1 %vm1012_vm0, %v2813_v5 }
  0x96   : > { %vm2162_vm4 = vcmp.eq.s32.totalorder %v3187_v3, 1 }
  0x9c   : > { %1349 = vmatmul.mubr.bf16.gmra.mxu0 %v2815_v6  ;;  %1605 = vmatmul.mubr.bf16.gmra.mxu1 %v2816_v7  ;;  %v283_v7 = vld [vmem:[%s2987_s7 + $0x198] sm:$0xff] }
  0x9d   : > { %2638 = vmatprep.mubr.msk.bf16.mxu0 %vm1012_vm0, %v2817_v8  ;;  %2670 = vmatprep.mubr.msk.bf16.mxu1 %vm1012_vm0, %v2819_v9  ;;  %v346_v8 = vld [vmem:[%s2987_s7 + $0x390] sm:$0xff]  ;;  %v347_v9 = vld [vmem:[%s2987_s7 + $0x398] sm:$0xff] }
  0xa4   : > { %1357 = vmatmul.mubr.bf16.gmra.mxu0 %v2821_v10  ;;  %1613 = vmatmul.mubr.bf16.gmra.mxu1 %v2822_v11 }
  0xa5   : > { %2639 = vmatprep.mubr.msk.bf16.mxu0 %vm1012_vm0, %v2823_v12  ;;  %2671 = vmatprep.mubr.msk.bf16.mxu1 %vm1012_vm0, %v2825_v13 }
  0xac   : > { %1365 = vmatmul.mubr.bf16.gmra.mxu0 %v2827_v14  ;;  %1621 = vmatmul.mubr.bf16.gmra.mxu1 %v2828_v15 }
  0xad   : > { %2640 = vmatprep.mubr.msk.bf16.mxu0 %vm1012_vm0, %v2829_v16  ;;  %2672 = vmatprep.mubr.msk.bf16.mxu1 %vm1012_vm0, %v2831_v17  ;;  %v2536_v16 = vcombine.low %v282_v1, %v283_v7  ;;  %v2600_v17 = vcombine.low %v346_v8, %v347_v9  ;;  %v287_v8 = vld [vmem:[%s2987_s7 + $0x1b8] sm:$0xff]  ;;  %v350_v9 = vld [vmem:[%s2987_s7 + $0x3b0] sm:$0xff] }
  0xb4   : > { %1373 = vmatmul.mubr.bf16.gmra.mxu0 %v2833_v18  ;;  %1629 = vmatmul.mubr.bf16.gmra.mxu1 %v2834_v19 }
  0xb5   : > { %2641 = vmatprep.mubr.msk.bf16.mxu0 %vm1012_vm0, %v2835_v20  ;;  %2673 = vmatprep.mubr.msk.bf16.mxu1 %vm1012_vm0, %v2837_v21 }
  0xbc   : > { %1381 = vmatmul.mubr.bf16.gmra.mxu0 %v2839_v22  ;;  %1637 = vmatmul.mubr.bf16.gmra.mxu1 %v2840_v23  ;;  %v2885_v22 = vld [vmem:[%s2987_s7 + $0x1a4] ss:$8 sps:$4 sm:$0xff]  }
  0xbd   : > { %2642 = vmatprep.mubr.msk.bf16.mxu0 %vm1012_vm0, %v2841_v24  ;;  %2674 = vmatprep.mubr.msk.bf16.mxu1 %vm1012_vm0, %v2843_v25  ;;  %v2887_v23 = vld [vmem:[%s2987_s7 + $0x3a4] ss:$8 sps:$4 sm:$0xff]  }
  0xc4   : > { %1389 = vmatmul.mubr.bf16.gmra.mxu0 %v2845_v26  ;;  %1645 = vmatmul.mubr.bf16.gmra.mxu1 %v2846_v27 }
  0xc5   : > { %2643 = vmatprep.mubr.msk.bf16.mxu0 %vm1012_vm0, %v2847_v28  ;;  %2675 = vmatprep.mubr.msk.bf16.mxu1 %vm1012_vm0, %v2849_v29 }
  0xcc   : > { %1397 = vmatmul.mubr.bf16.gmra.mxu0 %v2851_v30  ;;  %1653 = vmatmul.mubr.bf16.gmra.mxu1 %v2852_v31 }
  0xcd   : > { %2644 = vmatprep.mubr.msk.bf16.mxu0 %vm1012_vm0, %v2853_v32  ;;  %2676 = vmatprep.mubr.msk.bf16.mxu1 %vm1012_vm0, %v2855_v33  ;;  %v284_v32 = vld [vmem:[%s2987_s7 + $0x1a0] sm:$0xff] }
  0xd4   : > { %1405 = vmatmul.mubr.bf16.gmra.mxu0 %v2857_v34  ;;  %1661 = vmatmul.mubr.bf16.gmra.mxu1 %v2858_v35 }
  0xd5   : > { %2645 = vmatprep.mubr.msk.bf16.mxu0 %vm1012_vm0, %v2859_v36  ;;  %2677 = vmatprep.mubr.msk.bf16.mxu1 %vm1012_vm0, %v2861_v37  ;;  %v285_v37 = vld [vmem:[%s2987_s7 + $0x1a8] sm:$0xff] }
  0xd6   : > { %v2538_v48 = vcombine.low %v284_v32, %v285_v37 }
  0xdc   : > { %1413 = vmatmul.mubr.bf16.gmra.mxu0 %v2863_v38  ;;  %1669 = vmatmul.mubr.bf16.gmra.mxu1 %v2864_v39  ;;  %v348_v38 = vld [vmem:[%s2987_s7 + $0x3a0] sm:$0xff]  ;;  %v349_v39 = vld [vmem:[%s2987_s7 + $0x3a8] sm:$0xff] }
  0xdd   : > { %2646 = vmatprep.mubr.msk.bf16.mxu0 %vm1012_vm0, %v2865_v40  ;;  %2678 = vmatprep.mubr.msk.bf16.mxu1 %vm1012_vm0, %v2867_v41 }
  0xe4   : > { %1421 = vmatmul.mubr.bf16.gmra.mxu0 %v2869_v42  ;;  %1677 = vmatmul.mubr.bf16.gmra.mxu1 %v2870_v43 }
  0xe5   : > { %2647 = vmatprep.mubr.msk.bf16.mxu0 %vm1012_vm0, %v2871_v44  ;;  %2679 = vmatprep.mubr.msk.bf16.mxu1 %vm1012_vm0, %v2873_v45 }
  0xec   : > { %1429 = vmatmul.mubr.bf16.gmra.mxu0 %v2875_v46  ;;  %1685 = vmatmul.mubr.bf16.gmra.mxu1 %v2876_v47 }
  0xed   : > { %2648 = vmatprep.mubr.msk.bf16.mxu0 %vm1012_vm0, %v2877_v49  ;;  %2680 = vmatprep.mubr.msk.bf16.mxu1 %vm1012_vm0, %v2879_v50  ;;  %v2602_v49 = vcombine.low %v348_v38, %v349_v39 }
  0xf4   : > { %v1246_v0 = vpop.f32.mrf.mxu0  ;;  %1437 = vmatmul.mubr.bf16.gmra.mxu0 %v2534_v58  ;;  %v1502_v4 = vpop.f32.mrf.mxu1  ;;  %1693 = vmatmul.mubr.bf16.gmra.mxu1 %v2598_v59 }
  0xf5   : > { %v1764_v5 = vmul.f32 %v3180_v63, %v1246_v0  ;;  %v1828_v6 = vmul.f32 %v3180_v63, %v1502_v4  ;;  %2649 = vmatprep.mubr.msk.bf16.mxu0 %vm1012_vm0, %v2881_v61  ;;  %2681 = vmatprep.mubr.msk.bf16.mxu1 %vm1012_vm0, %v2883_v62  ;;  %v286_v4 = vld [vmem:[%s2987_s7 + $0x1b0] sm:$0xff] }
  0xf6   : > { %v1248_v10 = vpop.f32.mrf.mxu0  ;;  %v1504_v11 = vpop.f32.mrf.mxu1 }
  0xf7   : > { %v1899_v12 = vadd.f32 %v3185_v2, %v1764_v5  ;;  %v1963_v13 = vadd.f32 %v3185_v2, %v1828_v6  ;;  %v351_v10 = vld [vmem:[%s2987_s7 + $0x3b8] sm:$0xff] }
  0xf8   : > { %v1249_v14 = vpop.f32.mrf.mxu0  ;;  %v1505_v15 = vpop.f32.mrf.mxu1 }
  0xf9   : > { %v2029_v18 = vmax.f32 %v1899_v12, 0.0  ;;  %v2093_v19 = vmax.f32 %v1963_v13, 0.0  ;;  %v1765_v20 = vmul.f32 %v3180_v63, %v1249_v14  ;;  %v1829_v21 = vmul.f32 %v3180_v63, %v1505_v15 }
  0xfa   : > { %v1251_v24 = vpop.f32.mrf.mxu0  ;;  %v1507_v25 = vpop.f32.mrf.mxu1 }
  0xfb   : > { %v2163_v26 = vsel %vm2162_vm4, %v2029_v18, %v1899_v12  ;;  %v2227_v27 = vsel %vm2162_vm4, %v2093_v19, %v1963_v13  ;;  %v1900_v28 = vadd.f32 %v3185_v2, %v1765_v20  ;;  %v1964_v29 = vadd.f32 %v3185_v2, %v1829_v21  ;;  %v2893_v25 = vld [vmem:[%s2987_s7 + $0x1c4] ss:$8 sps:$4 sm:$0xff]  }
  0xfc   : > { %2292 = vst.msk [vmem:[%s3205_s6] sm:$0xff] %vm2291_vm5, %v2163_v26  ;;  %2356 = vst.msk [vmem:[%s3205_s6 + $0x200] sm:$0xff] %vm2291_vm5, %v2227_v27  ;;  %v1254_v30 = vpop.f32.mrf.mxu0  ;;  %1445 = vmatmul.mubr.bf16.gmra.mxu0 %v2536_v16  ;;  %v1510_v31 = vpop.f32.mrf.mxu1  ;;  %1701 = vmatmul.mubr.bf16.gmra.mxu1 %v2600_v17  ;;  %v2540_v19 = vcombine.low %v286_v4, %v287_v8  ;;  %v2604_v20 = vcombine.low %v350_v9, %v351_v10  ;;  %v2895_v26 = vld [vmem:[%s2987_s7 + $0x3c4] ss:$8 sps:$4 sm:$0xff]  }
  0xfd   : > { %v2030_v33 = vmax.f32 %v1900_v28, 0.0  ;;  %v2094_v34 = vmax.f32 %v1964_v29, 0.0  ;;  %v1766_v35 = vmul.f32 %v3180_v63, %v1254_v30  ;;  %v1830_v36 = vmul.f32 %v3180_v63, %v1510_v31  ;;  %2650 = vmatprep.mubr.msk.bf16.mxu0 %vm1012_vm0, %v2885_v22  ;;  %2682 = vmatprep.mubr.msk.bf16.mxu1 %vm1012_vm0, %v2887_v23 }
  0xfe   : > { %v1256_v40 = vpop.f32.mrf.mxu0  ;;  %v1512_v41 = vpop.f32.mrf.mxu1 }
  0xff   : > { %v2164_v42 = vsel %vm2162_vm4, %v2030_v33, %v1900_v28  ;;  %v2228_v43 = vsel %vm2162_vm4, %v2094_v34, %v1964_v29  ;;  %v1901_v44 = vadd.f32 %v3185_v2, %v1766_v35  ;;  %v1965_v45 = vadd.f32 %v3185_v2, %v1830_v36  ;;  %v288_v35 = vld [vmem:[%s2987_s7 + $0x1c0] sm:$0xff]  ;;  %v289_v40 = vld [vmem:[%s2987_s7 + $0x1c8] sm:$0xff] }
 0x100   : > { %2293 = vst.msk [vmem:[%s3205_s6 + $0x8] sm:$0xff] %vm2291_vm5, %v2164_v42  ;;  %2357 = vst.msk [vmem:[%s3205_s6 + $0x208] sm:$0xff] %vm2291_vm5, %v2228_v43  ;;  %v1257_v46 = vpop.f32.mrf.mxu0  ;;  %v1513_v47 = vpop.f32.mrf.mxu1  ;;  %v352_v41 = vld [vmem:[%s2987_s7 + $0x3c0] sm:$0xff]  ;;  %v353_v42 = vld [vmem:[%s2987_s7 + $0x3c8] sm:$0xff] }
 0x101   : > { %v2031_v50 = vmax.f32 %v1901_v44, 0.0  ;;  %v2095_v51 = vmax.f32 %v1965_v45, 0.0  ;;  %v1767_v52 = vmul.f32 %v3180_v63, %v1257_v46  ;;  %v1831_v53 = vmul.f32 %v3180_v63, %v1513_v47 }
 0x102   : > { %v1259_v56 = vpop.f32.mrf.mxu0  ;;  %v1515_v57 = vpop.f32.mrf.mxu1 }
 0x103   : > { %v2165_v58 = vsel %vm2162_vm4, %v2031_v50, %v1901_v44  ;;  %v2229_v59 = vsel %vm2162_vm4, %v2095_v51, %v1965_v45  ;;  %v1902_v60 = vadd.f32 %v3185_v2, %v1767_v52  ;;  %v1966_v61 = vadd.f32 %v3185_v2, %v1831_v53  ;;  %v2897_v57 = vld [vmem:[%s2987_s7 + $0x1d4] ss:$8 sps:$4 sm:$0xff]  }
 0x104   : > { %2294 = vst.msk [vmem:[%s3205_s6 + $0x10] sm:$0xff] %vm2291_vm5, %v2165_v58  ;;  %2358 = vst.msk [vmem:[%s3205_s6 + $0x210] sm:$0xff] %vm2291_vm5, %v2229_v59  ;;  %v1262_v62 = vpop.f32.mrf.mxu0  ;;  %1453 = vmatmul.mubr.bf16.gmra.mxu0 %v2538_v48  ;;  %v1518_v0 = vpop.f32.mrf.mxu1  ;;  %1709 = vmatmul.mubr.bf16.gmra.mxu1 %v2602_v49  ;;  %v2542_v51 = vcombine.low %v288_v35, %v289_v40  ;;  %v2606_v52 = vcombine.low %v352_v41, %v353_v42  ;;  %v2899_v58 = vld [vmem:[%s2987_s7 + $0x3d4] ss:$8 sps:$4 sm:$0xff]  }
 0x105   : > { %v2032_v1 = vmax.f32 %v1902_v60, 0.0  ;;  %v2096_v5 = vmax.f32 %v1966_v61, 0.0  ;;  %v1768_v6 = vmul.f32 %v3180_v63, %v1262_v62  ;;  %v1832_v7 = vmul.f32 %v3180_v63, %v1518_v0  ;;  %2651 = vmatprep.mubr.msk.bf16.mxu0 %vm1012_vm0, %v2889_v54  ;;  %2683 = vmatprep.mubr.msk.bf16.mxu1 %vm1012_vm0, %v2891_v55 }
 0x106   : > { %v1264_v11 = vpop.f32.mrf.mxu0  ;;  %v1520_v12 = vpop.f32.mrf.mxu1 }
 0x107   : > { %v2166_v13 = vsel %vm2162_vm4, %v2032_v1, %v1902_v60  ;;  %v2230_v14 = vsel %vm2162_vm4, %v2096_v5, %v1966_v61  ;;  %v1903_v15 = vadd.f32 %v3185_v2, %v1768_v6  ;;  %v1967_v16 = vadd.f32 %v3185_v2, %v1832_v7  ;;  %v290_v6 = vld [vmem:[%s2987_s7 + $0x1d0] sm:$0xff]  ;;  %v291_v11 = vld [vmem:[%s2987_s7 + $0x1d8] sm:$0xff] }
 0x108   : > { %2295 = vst.msk [vmem:[%s3205_s6 + $0x18] sm:$0xff] %vm2291_vm5, %v2166_v13  ;;  %2359 = vst.msk [vmem:[%s3205_s6 + $0x218] sm:$0xff] %vm2291_vm5, %v2230_v14  ;;  %v1265_v17 = vpop.f32.mrf.mxu0  ;;  %v1521_v18 = vpop.f32.mrf.mxu1  ;;  %v354_v12 = vld [vmem:[%s2987_s7 + $0x3d0] sm:$0xff]  ;;  %v355_v13 = vld [vmem:[%s2987_s7 + $0x3d8] sm:$0xff] }
 0x109   : > { %v2033_v21 = vmax.f32 %v1903_v15, 0.0  ;;  %v2097_v22 = vmax.f32 %v1967_v16, 0.0  ;;  %v1769_v23 = vmul.f32 %v3180_v63, %v1265_v17  ;;  %v1833_v24 = vmul.f32 %v3180_v63, %v1521_v18 }
 0x10a   : > { %v1267_v27 = vpop.f32.mrf.mxu0  ;;  %v1523_v28 = vpop.f32.mrf.mxu1 }
 0x10b   : > { %v2167_v29 = vsel %vm2162_vm4, %v2033_v21, %v1903_v15  ;;  %v2231_v30 = vsel %vm2162_vm4, %v2097_v22, %v1967_v16  ;;  %v1904_v31 = vadd.f32 %v3185_v2, %v1769_v23  ;;  %v1968_v32 = vadd.f32 %v3185_v2, %v1833_v24  ;;  %v2901_v28 = vld [vmem:[%s2987_s7 + $0x1e4] ss:$8 sps:$4 sm:$0xff]  }
 0x10c   : > { %2296 = vst.msk [vmem:[%s3205_s6 + $0x20] sm:$0xff] %vm2291_vm5, %v2167_v29  ;;  %2360 = vst.msk [vmem:[%s3205_s6 + $0x220] sm:$0xff] %vm2291_vm5, %v2231_v30  ;;  %v1270_v33 = vpop.f32.mrf.mxu0  ;;  %1461 = vmatmul.mubr.bf16.gmra.mxu0 %v2540_v19  ;;  %v1526_v34 = vpop.f32.mrf.mxu1  ;;  %1717 = vmatmul.mubr.bf16.gmra.mxu1 %v2604_v20  ;;  %v2544_v22 = vcombine.low %v290_v6, %v291_v11  ;;  %v2608_v23 = vcombine.low %v354_v12, %v355_v13  ;;  %v2903_v29 = vld [vmem:[%s2987_s7 + $0x3e4] ss:$8 sps:$4 sm:$0xff]  }
 0x10d   : > { %v2034_v36 = vmax.f32 %v1904_v31, 0.0  ;;  %v2098_v37 = vmax.f32 %v1968_v32, 0.0  ;;  %v1770_v38 = vmul.f32 %v3180_v63, %v1270_v33  ;;  %v1834_v39 = vmul.f32 %v3180_v63, %v1526_v34  ;;  %2652 = vmatprep.mubr.msk.bf16.mxu0 %vm1012_vm0, %v2893_v25  ;;  %2684 = vmatprep.mubr.msk.bf16.mxu1 %vm1012_vm0, %v2895_v26 }
 0x10e   : > { %v1272_v43 = vpop.f32.mrf.mxu0  ;;  %v1528_v44 = vpop.f32.mrf.mxu1 }
 0x10f   : > { %v2168_v45 = vsel %vm2162_vm4, %v2034_v36, %v1904_v31  ;;  %v2232_v46 = vsel %vm2162_vm4, %v2098_v37, %v1968_v32  ;;  %v1905_v47 = vadd.f32 %v3185_v2, %v1770_v38  ;;  %v1969_v48 = vadd.f32 %v3185_v2, %v1834_v39  ;;  %v292_v38 = vld [vmem:[%s2987_s7 + $0x1e0] sm:$0xff]  ;;  %v293_v43 = vld [vmem:[%s2987_s7 + $0x1e8] sm:$0xff] }
 0x110   : > { %2297 = vst.msk [vmem:[%s3205_s6 + $0x28] sm:$0xff] %vm2291_vm5, %v2168_v45  ;;  %2361 = vst.msk [vmem:[%s3205_s6 + $0x228] sm:$0xff] %vm2291_vm5, %v2232_v46  ;;  %v1273_v49 = vpop.f32.mrf.mxu0  ;;  %v1529_v50 = vpop.f32.mrf.mxu1  ;;  %v356_v44 = vld [vmem:[%s2987_s7 + $0x3e0] sm:$0xff]  ;;  %v357_v45 = vld [vmem:[%s2987_s7 + $0x3e8] sm:$0xff] }
 0x111   : > { %v2035_v53 = vmax.f32 %v1905_v47, 0.0  ;;  %v2099_v54 = vmax.f32 %v1969_v48, 0.0  ;;  %v1771_v55 = vmul.f32 %v3180_v63, %v1273_v49  ;;  %v1835_v56 = vmul.f32 %v3180_v63, %v1529_v50 }
 0x112   : > { %v1275_v59 = vpop.f32.mrf.mxu0  ;;  %v1531_v60 = vpop.f32.mrf.mxu1 }
 0x113   : > { %v2169_v61 = vsel %vm2162_vm4, %v2035_v53, %v1905_v47  ;;  %v2233_v62 = vsel %vm2162_vm4, %v2099_v54, %v1969_v48  ;;  %v1906_v0 = vadd.f32 %v3185_v2, %v1771_v55  ;;  %v1970_v4 = vadd.f32 %v3185_v2, %v1835_v56  ;;  %v2905_v60 = vld [vmem:[%s2987_s7 + $0x1f4] ss:$8 sps:$4 sm:$0xff]  }
 0x114   : > { %2298 = vst.msk [vmem:[%s3205_s6 + $0x30] sm:$0xff] %vm2291_vm5, %v2169_v61  ;;  %2362 = vst.msk [vmem:[%s3205_s6 + $0x230] sm:$0xff] %vm2291_vm5, %v2233_v62  ;;  %v1278_v1 = vpop.f32.mrf.mxu0  ;;  %1469 = vmatmul.mubr.bf16.gmra.mxu0 %v2542_v51  ;;  %v1534_v5 = vpop.f32.mrf.mxu1  ;;  %1725 = vmatmul.mubr.bf16.gmra.mxu1 %v2606_v52  ;;  %v2546_v54 = vcombine.low %v292_v38, %v293_v43  ;;  %v2610_v55 = vcombine.low %v356_v44, %v357_v45  ;;  %v2907_v61 = vld [vmem:[%s2987_s7 + $0x3f4] ss:$8 sps:$4 sm:$0xff]  }
 0x115   : > { %v2036_v7 = vmax.f32 %v1906_v0, 0.0  ;;  %v2100_v8 = vmax.f32 %v1970_v4, 0.0  ;;  %v1772_v9 = vmul.f32 %v3180_v63, %v1278_v1  ;;  %v1836_v10 = vmul.f32 %v3180_v63, %v1534_v5  ;;  %2653 = vmatprep.mubr.msk.bf16.mxu0 %vm1012_vm0, %v2897_v57  ;;  %2685 = vmatprep.mubr.msk.bf16.mxu1 %vm1012_vm0, %v2899_v58 }
 0x116   : > { %v1280_v14 = vpop.f32.mrf.mxu0  ;;  %v1536_v15 = vpop.f32.mrf.mxu1 }
 0x117   : > { %v2170_v16 = vsel %vm2162_vm4, %v2036_v7, %v1906_v0  ;;  %v2234_v17 = vsel %vm2162_vm4, %v2100_v8, %v1970_v4  ;;  %v1907_v18 = vadd.f32 %v3185_v2, %v1772_v9  ;;  %v1971_v19 = vadd.f32 %v3185_v2, %v1836_v10  ;;  %v294_v9 = vld [vmem:[%s2987_s7 + $0x1f0] sm:$0xff]  ;;  %v295_v14 = vld [vmem:[%s2987_s7 + $0x1f8] sm:$0xff] }
 0x118   : > { %2299 = vst.msk [vmem:[%s3205_s6 + $0x38] sm:$0xff] %vm2291_vm5, %v2170_v16  ;;  %2363 = vst.msk [vmem:[%s3205_s6 + $0x238] sm:$0xff] %vm2291_vm5, %v2234_v17  ;;  %v1281_v20 = vpop.f32.mrf.mxu0  ;;  %v1537_v21 = vpop.f32.mrf.mxu1  ;;  %v358_v15 = vld [vmem:[%s2987_s7 + $0x3f0] sm:$0xff]  ;;  %v359_v16 = vld [vmem:[%s2987_s7 + $0x3f8] sm:$0xff] }
 0x119   : > { %v2037_v24 = vmax.f32 %v1907_v18, 0.0  ;;  %v2101_v25 = vmax.f32 %v1971_v19, 0.0  ;;  %v1773_v26 = vmul.f32 %v3180_v63, %v1281_v20  ;;  %v1837_v27 = vmul.f32 %v3180_v63, %v1537_v21 }
 0x11a   : > { %v1283_v30 = vpop.f32.mrf.mxu0  ;;  %v1539_v31 = vpop.f32.mrf.mxu1 }
 0x11b   : > { %v2171_v32 = vsel %vm2162_vm4, %v2037_v24, %v1907_v18  ;;  %v2235_v33 = vsel %vm2162_vm4, %v2101_v25, %v1971_v19  ;;  %v1908_v34 = vadd.f32 %v3185_v2, %v1773_v26  ;;  %v1972_v35 = vadd.f32 %v3185_v2, %v1837_v27 }
 0x11c   : > { %2300 = vst.msk [vmem:[%s3205_s6 + $0x40] sm:$0xff] %vm2291_vm5, %v2171_v32  ;;  %2364 = vst.msk [vmem:[%s3205_s6 + $0x240] sm:$0xff] %vm2291_vm5, %v2235_v33  ;;  %v1286_v36 = vpop.f32.mrf.mxu0  ;;  %1477 = vmatmul.mubr.bf16.gmra.mxu0 %v2544_v22  ;;  %v1542_v37 = vpop.f32.mrf.mxu1  ;;  %1733 = vmatmul.mubr.bf16.gmra.mxu1 %v2608_v23  ;;  %v2548_v25 = vcombine.low %v294_v9, %v295_v14  ;;  %v2612_v26 = vcombine.low %v358_v15, %v359_v16 }
 0x11d   : > { %v2038_v39 = vmax.f32 %v1908_v34, 0.0  ;;  %v2102_v40 = vmax.f32 %v1972_v35, 0.0  ;;  %v1774_v41 = vmul.f32 %v3180_v63, %v1286_v36  ;;  %v1838_v42 = vmul.f32 %v3180_v63, %v1542_v37  ;;  %2654 = vmatprep.mubr.msk.bf16.mxu0 %vm1012_vm0, %v2901_v28  ;;  %2686 = vmatprep.mubr.msk.bf16.mxu1 %vm1012_vm0, %v2903_v29 }
 0x11e   : > { %v1288_v46 = vpop.f32.mrf.mxu0  ;;  %v1544_v47 = vpop.f32.mrf.mxu1 }
 0x11f   : > { %v2172_v48 = vsel %vm2162_vm4, %v2038_v39, %v1908_v34  ;;  %v2236_v49 = vsel %vm2162_vm4, %v2102_v40, %v1972_v35  ;;  %v1909_v50 = vadd.f32 %v3185_v2, %v1774_v41  ;;  %v1973_v51 = vadd.f32 %v3185_v2, %v1838_v42 }
 0x120   : > { %2301 = vst.msk [vmem:[%s3205_s6 + $0x48] sm:$0xff] %vm2291_vm5, %v2172_v48  ;;  %2365 = vst.msk [vmem:[%s3205_s6 + $0x248] sm:$0xff] %vm2291_vm5, %v2236_v49  ;;  %v1289_v52 = vpop.f32.mrf.mxu0  ;;  %v1545_v53 = vpop.f32.mrf.mxu1 }
 0x121   : > { %v2039_v56 = vmax.f32 %v1909_v50, 0.0  ;;  %v2103_v57 = vmax.f32 %v1973_v51, 0.0  ;;  %v1775_v58 = vmul.f32 %v3180_v63, %v1289_v52  ;;  %v1839_v59 = vmul.f32 %v3180_v63, %v1545_v53 }
 0x122   : > { %v1291_v62 = vpop.f32.mrf.mxu0  ;;  %v1547_v0 = vpop.f32.mrf.mxu1 }
 0x123   : > { %v2173_v4 = vsel %vm2162_vm4, %v2039_v56, %v1909_v50  ;;  %v2237_v1 = vsel %vm2162_vm4, %v2103_v57, %v1973_v51  ;;  %v1910_v5 = vadd.f32 %v3185_v2, %v1775_v58  ;;  %v1974_v6 = vadd.f32 %v3185_v2, %v1839_v59 }
 0x124   : > { %2302 = vst.msk [vmem:[%s3205_s6 + $0x50] sm:$0xff] %vm2291_vm5, %v2173_v4  ;;  %2366 = vst.msk [vmem:[%s3205_s6 + $0x250] sm:$0xff] %vm2291_vm5, %v2237_v1  ;;  %v1294_v7 = vpop.f32.mrf.mxu0  ;;  %1485 = vmatmul.mubr.bf16.gmra.mxu0 %v2546_v54  ;;  %v1550_v8 = vpop.f32.mrf.mxu1  ;;  %1741 = vmatmul.mubr.bf16.gmra.mxu1 %v2610_v55 }
 0x125   : > { %v2040_v10 = vmax.f32 %v1910_v5, 0.0  ;;  %v2104_v11 = vmax.f32 %v1974_v6, 0.0  ;;  %v1776_v12 = vmul.f32 %v3180_v63, %v1294_v7  ;;  %v1840_v13 = vmul.f32 %v3180_v63, %v1550_v8  ;;  %2655 = vmatprep.mubr.msk.bf16.mxu0 %vm1012_vm0, %v2905_v60  ;;  %2687 = vmatprep.mubr.msk.bf16.mxu1 %vm1012_vm0, %v2907_v61 }
 0x126   : > { %v1296_v17 = vpop.f32.mrf.mxu0  ;;  %v1552_v18 = vpop.f32.mrf.mxu1 }
 0x127   : > { %v2174_v19 = vsel %vm2162_vm4, %v2040_v10, %v1910_v5  ;;  %v2238_v20 = vsel %vm2162_vm4, %v2104_v11, %v1974_v6  ;;  %v1911_v21 = vadd.f32 %v3185_v2, %v1776_v12  ;;  %v1975_v22 = vadd.f32 %v3185_v2, %v1840_v13 }
 0x128   : > { %2303 = vst.msk [vmem:[%s3205_s6 + $0x58] sm:$0xff] %vm2291_vm5, %v2174_v19  ;;  %2367 = vst.msk [vmem:[%s3205_s6 + $0x258] sm:$0xff] %vm2291_vm5, %v2238_v20  ;;  %v1297_v23 = vpop.f32.mrf.mxu0  ;;  %v1553_v24 = vpop.f32.mrf.mxu1 }
 0x129   : > { %v2041_v27 = vmax.f32 %v1911_v21, 0.0  ;;  %v2105_v28 = vmax.f32 %v1975_v22, 0.0  ;;  %v1777_v29 = vmul.f32 %v3180_v63, %v1297_v23  ;;  %v1841_v30 = vmul.f32 %v3180_v63, %v1553_v24 }
 0x12a   : > { %v1299_v31 = vpop.f32.mrf.mxu0  ;;  %v1555_v32 = vpop.f32.mrf.mxu1 }
 0x12b   : > { %v2175_v33 = vsel %vm2162_vm4, %v2041_v27, %v1911_v21  ;;  %v2239_v34 = vsel %vm2162_vm4, %v2105_v28, %v1975_v22  ;;  %v1912_v35 = vadd.f32 %v3185_v2, %v1777_v29  ;;  %v1976_v36 = vadd.f32 %v3185_v2, %v1841_v30 }
 0x12c   : > { %2304 = vst.msk [vmem:[%s3205_s6 + $0x60] sm:$0xff] %vm2291_vm5, %v2175_v33  ;;  %2368 = vst.msk [vmem:[%s3205_s6 + $0x260] sm:$0xff] %vm2291_vm5, %v2239_v34  ;;  %v1302_v37 = vpop.f32.mrf.mxu0  ;;  %1493 = vmatmul.mubr.bf16.gmra.mxu0 %v2548_v25  ;;  %v1558_v38 = vpop.f32.mrf.mxu1  ;;  %1749 = vmatmul.mubr.bf16.gmra.mxu1 %v2612_v26 }
 0x12d   : > { %v2042_v39 = vmax.f32 %v1912_v35, 0.0  ;;  %v2106_v40 = vmax.f32 %v1976_v36, 0.0  ;;  %v1778_v41 = vmul.f32 %v3180_v63, %v1302_v37  ;;  %v1842_v42 = vmul.f32 %v3180_v63, %v1558_v38 }
 0x12e   : > { %v1304_v43 = vpop.f32.mrf.mxu0  ;;  %v1560_v44 = vpop.f32.mrf.mxu1 }
 0x12f   : > { %v2176_v45 = vsel %vm2162_vm4, %v2042_v39, %v1912_v35  ;;  %v2240_v46 = vsel %vm2162_vm4, %v2106_v40, %v1976_v36  ;;  %v1913_v47 = vadd.f32 %v3185_v2, %v1778_v41  ;;  %v1977_v48 = vadd.f32 %v3185_v2, %v1842_v42 }
 0x130   : > { %2305 = vst.msk [vmem:[%s3205_s6 + $0x68] sm:$0xff] %vm2291_vm5, %v2176_v45  ;;  %2369 = vst.msk [vmem:[%s3205_s6 + $0x268] sm:$0xff] %vm2291_vm5, %v2240_v46  ;;  %v1305_v49 = vpop.f32.mrf.mxu0  ;;  %v1561_v50 = vpop.f32.mrf.mxu1 }
 0x131   : > { %v2043_v51 = vmax.f32 %v1913_v47, 0.0  ;;  %v2107_v52 = vmax.f32 %v1977_v48, 0.0  ;;  %v1779_v53 = vmul.f32 %v3180_v63, %v1305_v49  ;;  %v1843_v54 = vmul.f32 %v3180_v63, %v1561_v50 }
 0x132   : > { %v1307_v55 = vpop.f32.mrf.mxu0  ;;  %v1563_v56 = vpop.f32.mrf.mxu1 }
 0x133   : > { %v2177_v57 = vsel %vm2162_vm4, %v2043_v51, %v1913_v47  ;;  %v2241_v58 = vsel %vm2162_vm4, %v2107_v52, %v1977_v48  ;;  %v1914_v59 = vadd.f32 %v3185_v2, %v1779_v53  ;;  %v1978_v60 = vadd.f32 %v3185_v2, %v1843_v54 }
 0x134   : > { %2306 = vst.msk [vmem:[%s3205_s6 + $0x70] sm:$0xff] %vm2291_vm5, %v2177_v57  ;;  %2370 = vst.msk [vmem:[%s3205_s6 + $0x270] sm:$0xff] %vm2291_vm5, %v2241_v58  ;;  %v1310_v61 = vpop.f32.mrf.mxu0  ;;  %v1566_v62 = vpop.f32.mrf.mxu1 }
 0x135   : > { %v2044_v0 = vmax.f32 %v1914_v59, 0.0  ;;  %v2108_v4 = vmax.f32 %v1978_v60, 0.0  ;;  %v1780_v1 = vmul.f32 %v3180_v63, %v1310_v61  ;;  %v1844_v5 = vmul.f32 %v3180_v63, %v1566_v62 }
 0x136   : > { %v1312_v6 = vpop.f32.mrf.mxu0  ;;  %v1568_v7 = vpop.f32.mrf.mxu1 }
 0x137   : > { %v2178_v8 = vsel %vm2162_vm4, %v2044_v0, %v1914_v59  ;;  %v2242_v9 = vsel %vm2162_vm4, %v2108_v4, %v1978_v60  ;;  %v1915_v10 = vadd.f32 %v3185_v2, %v1780_v1  ;;  %v1979_v11 = vadd.f32 %v3185_v2, %v1844_v5 }
 0x138   : > { %2307 = vst.msk [vmem:[%s3205_s6 + $0x78] sm:$0xff] %vm2291_vm5, %v2178_v8  ;;  %2371 = vst.msk [vmem:[%s3205_s6 + $0x278] sm:$0xff] %vm2291_vm5, %v2242_v9  ;;  %v1313_v12 = vpop.f32.mrf.mxu0  ;;  %v1569_v13 = vpop.f32.mrf.mxu1 }
 0x139   : > { %v2045_v14 = vmax.f32 %v1915_v10, 0.0  ;;  %v2109_v15 = vmax.f32 %v1979_v11, 0.0  ;;  %v1781_v16 = vmul.f32 %v3180_v63, %v1313_v12  ;;  %v1845_v17 = vmul.f32 %v3180_v63, %v1569_v13 }
 0x13a   : > { %v1315_v18 = vpop.f32.mrf.mxu0  ;;  %v1571_v19 = vpop.f32.mrf.mxu1 }
 0x13b   : > { %v2179_v20 = vsel %vm2162_vm4, %v2045_v14, %v1915_v10  ;;  %v2243_v21 = vsel %vm2162_vm4, %v2109_v15, %v1979_v11  ;;  %v1916_v22 = vadd.f32 %v3185_v2, %v1781_v16  ;;  %v1980_v23 = vadd.f32 %v3185_v2, %v1845_v17 }
 0x13c   : > { %2308 = vst.msk [vmem:[%s3205_s6 + $0x80] sm:$0xff] %vm2291_vm5, %v2179_v20  ;;  %2372 = vst.msk [vmem:[%s3205_s6 + $0x280] sm:$0xff] %vm2291_vm5, %v2243_v21  ;;  %v1318_v24 = vpop.f32.mrf.mxu0  ;;  %v1574_v25 = vpop.f32.mrf.mxu1 }
 0x13d   : > { %v2046_v26 = vmax.f32 %v1916_v22, 0.0  ;;  %v2110_v27 = vmax.f32 %v1980_v23, 0.0  ;;  %v1782_v28 = vmul.f32 %v3180_v63, %v1318_v24  ;;  %v1846_v29 = vmul.f32 %v3180_v63, %v1574_v25 }
 0x13e   : > { %v1320_v30 = vpop.f32.mrf.mxu0  ;;  %v1576_v31 = vpop.f32.mrf.mxu1 }
 0x13f   : > { %v2180_v32 = vsel %vm2162_vm4, %v2046_v26, %v1916_v22  ;;  %v2244_v33 = vsel %vm2162_vm4, %v2110_v27, %v1980_v23  ;;  %v1917_v34 = vadd.f32 %v3185_v2, %v1782_v28  ;;  %v1981_v35 = vadd.f32 %v3185_v2, %v1846_v29 }
 0x140   : > { %2309 = vst.msk [vmem:[%s3205_s6 + $0x88] sm:$0xff] %vm2291_vm5, %v2180_v32  ;;  %2373 = vst.msk [vmem:[%s3205_s6 + $0x288] sm:$0xff] %vm2291_vm5, %v2244_v33  ;;  %v1321_v36 = vpop.f32.mrf.mxu0  ;;  %v1577_v37 = vpop.f32.mrf.mxu1 }
 0x141   : > { %v2047_v38 = vmax.f32 %v1917_v34, 0.0  ;;  %v2111_v39 = vmax.f32 %v1981_v35, 0.0  ;;  %v1783_v40 = vmul.f32 %v3180_v63, %v1321_v36  ;;  %v1847_v41 = vmul.f32 %v3180_v63, %v1577_v37 }
 0x142   : > { %v1323_v42 = vpop.f32.mrf.mxu0  ;;  %v1579_v43 = vpop.f32.mrf.mxu1 }
 0x143   : > { %v2181_v44 = vsel %vm2162_vm4, %v2047_v38, %v1917_v34  ;;  %v2245_v45 = vsel %vm2162_vm4, %v2111_v39, %v1981_v35  ;;  %v1918_v46 = vadd.f32 %v3185_v2, %v1783_v40  ;;  %v1982_v47 = vadd.f32 %v3185_v2, %v1847_v41 }
 0x144   : > { %2310 = vst.msk [vmem:[%s3205_s6 + $0x90] sm:$0xff] %vm2291_vm5, %v2181_v44  ;;  %2374 = vst.msk [vmem:[%s3205_s6 + $0x290] sm:$0xff] %vm2291_vm5, %v2245_v45  ;;  %v1326_v48 = vpop.f32.mrf.mxu0  ;;  %v1582_v49 = vpop.f32.mrf.mxu1 }
 0x145   : > { %v2048_v50 = vmax.f32 %v1918_v46, 0.0  ;;  %v2112_v51 = vmax.f32 %v1982_v47, 0.0  ;;  %v1784_v52 = vmul.f32 %v3180_v63, %v1326_v48  ;;  %v1848_v53 = vmul.f32 %v3180_v63, %v1582_v49 }
 0x146   : > { %v1328_v54 = vpop.f32.mrf.mxu0  ;;  %v1584_v55 = vpop.f32.mrf.mxu1 }
 0x147   : > { %v2182_v56 = vsel %vm2162_vm4, %v2048_v50, %v1918_v46  ;;  %v2246_v57 = vsel %vm2162_vm4, %v2112_v51, %v1982_v47  ;;  %v1919_v58 = vadd.f32 %v3185_v2, %v1784_v52  ;;  %v1983_v59 = vadd.f32 %v3185_v2, %v1848_v53 }
 0x148   : > { %2311 = vst.msk [vmem:[%s3205_s6 + $0x98] sm:$0xff] %vm2291_vm5, %v2182_v56  ;;  %2375 = vst.msk [vmem:[%s3205_s6 + $0x298] sm:$0xff] %vm2291_vm5, %v2246_v57  ;;  %v1329_v60 = vpop.f32.mrf.mxu0  ;;  %v1585_v61 = vpop.f32.mrf.mxu1 }
 0x149   : > { %v2049_v62 = vmax.f32 %v1919_v58, 0.0  ;;  %v2113_v0 = vmax.f32 %v1983_v59, 0.0  ;;  %v1785_v4 = vmul.f32 %v3180_v63, %v1329_v60  ;;  %v1849_v1 = vmul.f32 %v3180_v63, %v1585_v61 }
 0x14a   : > { %v1331_v5 = vpop.f32.mrf.mxu0  ;;  %v1587_v6 = vpop.f32.mrf.mxu1 }
 0x14b   : > { %v2183_v7 = vsel %vm2162_vm4, %v2049_v62, %v1919_v58  ;;  %v2247_v8 = vsel %vm2162_vm4, %v2113_v0, %v1983_v59  ;;  %v1920_v9 = vadd.f32 %v3185_v2, %v1785_v4  ;;  %v1984_v10 = vadd.f32 %v3185_v2, %v1849_v1 }
 0x14c   : > { %2312 = vst.msk [vmem:[%s3205_s6 + $0xa0] sm:$0xff] %vm2291_vm5, %v2183_v7  ;;  %2376 = vst.msk [vmem:[%s3205_s6 + $0x2a0] sm:$0xff] %vm2291_vm5, %v2247_v8  ;;  %v1334_v11 = vpop.f32.mrf.mxu0  ;;  %v1590_v12 = vpop.f32.mrf.mxu1 }
 0x14d   : > { %v2050_v13 = vmax.f32 %v1920_v9, 0.0  ;;  %v2114_v14 = vmax.f32 %v1984_v10, 0.0  ;;  %v1786_v15 = vmul.f32 %v3180_v63, %v1334_v11  ;;  %v1850_v16 = vmul.f32 %v3180_v63, %v1590_v12 }
 0x14e   : > { %v1336_v17 = vpop.f32.mrf.mxu0  ;;  %v1592_v18 = vpop.f32.mrf.mxu1 }
 0x14f   : > { %v2184_v19 = vsel %vm2162_vm4, %v2050_v13, %v1920_v9  ;;  %v2248_v20 = vsel %vm2162_vm4, %v2114_v14, %v1984_v10  ;;  %v1921_v21 = vadd.f32 %v3185_v2, %v1786_v15  ;;  %v1985_v22 = vadd.f32 %v3185_v2, %v1850_v16 }
 0x150   : > { %2313 = vst.msk [vmem:[%s3205_s6 + $0xa8] sm:$0xff] %vm2291_vm5, %v2184_v19  ;;  %2377 = vst.msk [vmem:[%s3205_s6 + $0x2a8] sm:$0xff] %vm2291_vm5, %v2248_v20  ;;  %v1337_v23 = vpop.f32.mrf.mxu0  ;;  %v1593_v24 = vpop.f32.mrf.mxu1 }
 0x151   : > { %v2051_v25 = vmax.f32 %v1921_v21, 0.0  ;;  %v2115_v26 = vmax.f32 %v1985_v22, 0.0  ;;  %v1787_v27 = vmul.f32 %v3180_v63, %v1337_v23  ;;  %v1851_v28 = vmul.f32 %v3180_v63, %v1593_v24 }
 0x152   : > { %v1339_v29 = vpop.f32.mrf.mxu0  ;;  %v1595_v30 = vpop.f32.mrf.mxu1 }
 0x153   : > { %v2185_v31 = vsel %vm2162_vm4, %v2051_v25, %v1921_v21  ;;  %v2249_v32 = vsel %vm2162_vm4, %v2115_v26, %v1985_v22  ;;  %v1922_v33 = vadd.f32 %v3185_v2, %v1787_v27  ;;  %v1986_v34 = vadd.f32 %v3185_v2, %v1851_v28 }
 0x154   : > { %2314 = vst.msk [vmem:[%s3205_s6 + $0xb0] sm:$0xff] %vm2291_vm5, %v2185_v31  ;;  %2378 = vst.msk [vmem:[%s3205_s6 + $0x2b0] sm:$0xff] %vm2291_vm5, %v2249_v32  ;;  %v1342_v35 = vpop.f32.mrf.mxu0  ;;  %v1598_v36 = vpop.f32.mrf.mxu1 }
 0x155   : > { %v2052_v37 = vmax.f32 %v1922_v33, 0.0  ;;  %v2116_v38 = vmax.f32 %v1986_v34, 0.0  ;;  %v1788_v39 = vmul.f32 %v3180_v63, %v1342_v35  ;;  %v1852_v40 = vmul.f32 %v3180_v63, %v1598_v36 }
 0x156   : > { %v1344_v41 = vpop.f32.mrf.mxu0  ;;  %v1600_v42 = vpop.f32.mrf.mxu1 }
 0x157   : > { %v2186_v43 = vsel %vm2162_vm4, %v2052_v37, %v1922_v33  ;;  %v2250_v44 = vsel %vm2162_vm4, %v2116_v38, %v1986_v34  ;;  %v1923_v45 = vadd.f32 %v3185_v2, %v1788_v39  ;;  %v1987_v46 = vadd.f32 %v3185_v2, %v1852_v40 }
 0x158   : > { %2315 = vst.msk [vmem:[%s3205_s6 + $0xb8] sm:$0xff] %vm2291_vm5, %v2186_v43  ;;  %2379 = vst.msk [vmem:[%s3205_s6 + $0x2b8] sm:$0xff] %vm2291_vm5, %v2250_v44  ;;  %v1345_v47 = vpop.f32.mrf.mxu0  ;;  %v1601_v48 = vpop.f32.mrf.mxu1 }
 0x159   : > { %v2053_v49 = vmax.f32 %v1923_v45, 0.0  ;;  %v2117_v50 = vmax.f32 %v1987_v46, 0.0  ;;  %v1789_v51 = vmul.f32 %v3180_v63, %v1345_v47  ;;  %v1853_v52 = vmul.f32 %v3180_v63, %v1601_v48 }
 0x15a   : > { %v1347_v53 = vpop.f32.mrf.mxu0  ;;  %v1603_v54 = vpop.f32.mrf.mxu1 }
 0x15b   : > { %v2187_v55 = vsel %vm2162_vm4, %v2053_v49, %v1923_v45  ;;  %v2251_v56 = vsel %vm2162_vm4, %v2117_v50, %v1987_v46  ;;  %v1924_v57 = vadd.f32 %v3185_v2, %v1789_v51  ;;  %v1988_v58 = vadd.f32 %v3185_v2, %v1853_v52 }
 0x15c   : > { %2316 = vst.msk [vmem:[%s3205_s6 + $0xc0] sm:$0xff] %vm2291_vm5, %v2187_v55  ;;  %2380 = vst.msk [vmem:[%s3205_s6 + $0x2c0] sm:$0xff] %vm2291_vm5, %v2251_v56  ;;  %v1350_v59 = vpop.f32.mrf.mxu0  ;;  %v1606_v60 = vpop.f32.mrf.mxu1  ;;  %v3612_v55 = vld [vmem:[%s4035_s3] ss:$0 sm:$0xff] }
 0x15d   : > { %v2054_v61 = vmax.f32 %v1924_v57, 0.0  ;;  %v2118_v62 = vmax.f32 %v1988_v58, 0.0  ;;  %v1790_v0 = vmul.f32 %v3180_v63, %v1350_v59  ;;  %v1854_v4 = vmul.f32 %v3180_v63, %v1606_v60 }
 0x15e   : > { %v1352_v1 = vpop.f32.mrf.mxu0  ;;  %v1608_v5 = vpop.f32.mrf.mxu1 }
 0x15f   : > { %v2188_v6 = vsel %vm2162_vm4, %v2054_v61, %v1924_v57  ;;  %v2252_v7 = vsel %vm2162_vm4, %v2118_v62, %v1988_v58  ;;  %v1925_v8 = vadd.f32 %v3185_v2, %v1790_v0  ;;  %v1989_v9 = vadd.f32 %v3185_v2, %v1854_v4  ;;  %v3623_v61 = vld [vmem:[%s4034_s2] ss:$0 sm:$0xff] }
 0x160   : > { %2317 = vst.msk [vmem:[%s3205_s6 + $0xc8] sm:$0xff] %vm2291_vm5, %v2188_v6  ;;  %2381 = vst.msk [vmem:[%s3205_s6 + $0x2c8] sm:$0xff] %vm2291_vm5, %v2252_v7  ;;  %v1353_v10 = vpop.f32.mrf.mxu0  ;;  %v1609_v11 = vpop.f32.mrf.mxu1 }
 0x161   : > { %v2055_v12 = vmax.f32 %v1925_v8, 0.0  ;;  %v2119_v13 = vmax.f32 %v1989_v9, 0.0  ;;  %v1791_v14 = vmul.f32 %v3180_v63, %v1353_v10  ;;  %v1855_v15 = vmul.f32 %v3180_v63, %v1609_v11 }
 0x162   : > { %v1355_v16 = vpop.f32.mrf.mxu0  ;;  %v1611_v17 = vpop.f32.mrf.mxu1 }
 0x163   : > { %v2189_v18 = vsel %vm2162_vm4, %v2055_v12, %v1925_v8  ;;  %v2253_v19 = vsel %vm2162_vm4, %v2119_v13, %v1989_v9  ;;  %v1926_v20 = vadd.f32 %v3185_v2, %v1791_v14  ;;  %v1990_v21 = vadd.f32 %v3185_v2, %v1855_v15 }
 0x164   : > { %2318 = vst.msk [vmem:[%s3205_s6 + $0xd0] sm:$0xff] %vm2291_vm5, %v2189_v18  ;;  %2382 = vst.msk [vmem:[%s3205_s6 + $0x2d0] sm:$0xff] %vm2291_vm5, %v2253_v19  ;;  %v1358_v22 = vpop.f32.mrf.mxu0  ;;  %v1614_v23 = vpop.f32.mrf.mxu1 }
 0x165   : > { %v2056_v24 = vmax.f32 %v1926_v20, 0.0  ;;  %v2120_v25 = vmax.f32 %v1990_v21, 0.0  ;;  %v1792_v26 = vmul.f32 %v3180_v63, %v1358_v22  ;;  %v1856_v27 = vmul.f32 %v3180_v63, %v1614_v23 }
 0x166   : > { %v1360_v28 = vpop.f32.mrf.mxu0  ;;  %v1616_v29 = vpop.f32.mrf.mxu1 }
 0x167   : > { %v2190_v30 = vsel %vm2162_vm4, %v2056_v24, %v1926_v20  ;;  %v2254_v31 = vsel %vm2162_vm4, %v2120_v25, %v1990_v21  ;;  %v1927_v32 = vadd.f32 %v3185_v2, %v1792_v26  ;;  %v1991_v33 = vadd.f32 %v3185_v2, %v1856_v27 }
 0x168   : > { %2319 = vst.msk [vmem:[%s3205_s6 + $0xd8] sm:$0xff] %vm2291_vm5, %v2190_v30  ;;  %2383 = vst.msk [vmem:[%s3205_s6 + $0x2d8] sm:$0xff] %vm2291_vm5, %v2254_v31  ;;  %v1361_v34 = vpop.f32.mrf.mxu0  ;;  %v1617_v35 = vpop.f32.mrf.mxu1 }
 0x169   : > { %v2057_v36 = vmax.f32 %v1927_v32, 0.0  ;;  %v2121_v37 = vmax.f32 %v1991_v33, 0.0  ;;  %v1793_v38 = vmul.f32 %v3180_v63, %v1361_v34  ;;  %v1857_v39 = vmul.f32 %v3180_v63, %v1617_v35 }
 0x16a   : > { %v1363_v40 = vpop.f32.mrf.mxu0  ;;  %v1619_v41 = vpop.f32.mrf.mxu1 }
 0x16b   : > { %v2191_v42 = vsel %vm2162_vm4, %v2057_v36, %v1927_v32  ;;  %v2255_v43 = vsel %vm2162_vm4, %v2121_v37, %v1991_v33  ;;  %v1928_v44 = vadd.f32 %v3185_v2, %v1793_v38  ;;  %v1992_v45 = vadd.f32 %v3185_v2, %v1857_v39 }
 0x16c   : > { %2320 = vst.msk [vmem:[%s3205_s6 + $0xe0] sm:$0xff] %vm2291_vm5, %v2191_v42  ;;  %2384 = vst.msk [vmem:[%s3205_s6 + $0x2e0] sm:$0xff] %vm2291_vm5, %v2255_v43  ;;  %v1366_v46 = vpop.f32.mrf.mxu0  ;;  %v1622_v47 = vpop.f32.mrf.mxu1 }
 0x16d   : > { %v2058_v48 = vmax.f32 %v1928_v44, 0.0  ;;  %v2122_v49 = vmax.f32 %v1992_v45, 0.0  ;;  %v1794_v50 = vmul.f32 %v3180_v63, %v1366_v46  ;;  %v1858_v51 = vmul.f32 %v3180_v63, %v1622_v47 }
 0x16e   : > { %v1368_v52 = vpop.f32.mrf.mxu0  ;;  %v1624_v53 = vpop.f32.mrf.mxu1 }
 0x16f   : > { %v2192_v54 = vsel %vm2162_vm4, %v2058_v48, %v1928_v44  ;;  %v2256_v2 = vsel %vm2162_vm4, %v2122_v49, %v1992_v45  ;;  %v1929_v56 = vadd.f32 %v3612_v55, %v1794_v50  ;;  %v1993_v57 = vadd.f32 %v3612_v55, %v1858_v51 }
 0x170   : > { %2321 = vst.msk [vmem:[%s3205_s6 + $0xe8] sm:$0xff] %vm2291_vm5, %v2192_v54  ;;  %2385 = vst.msk [vmem:[%s3205_s6 + $0x2e8] sm:$0xff] %vm2291_vm5, %v2256_v2  ;;  %v1369_v63 = vpop.f32.mrf.mxu0  ;;  %v1625_v58 = vpop.f32.mrf.mxu1 }
 0x171   : > { %v2059_v59 = vmax.f32 %v1929_v56, 0.0  ;;  %v2123_v60 = vmax.f32 %v1993_v57, 0.0  ;;  %v1795_v62 = vmul.f32 %v3623_v61, %v1369_v63  ;;  %v1859_v0 = vmul.f32 %v3623_v61, %v1625_v58 }
 0x172   : > { %v1371_v4 = vpop.f32.mrf.mxu0  ;;  %v1627_v1 = vpop.f32.mrf.mxu1 }
 0x173   : > { %v2193_v5 = vsel %vm2162_vm4, %v2059_v59, %v1929_v56  ;;  %v2257_v6 = vsel %vm2162_vm4, %v2123_v60, %v1993_v57  ;;  %v1930_v7 = vadd.f32 %v3612_v55, %v1795_v62  ;;  %v1994_v8 = vadd.f32 %v3612_v55, %v1859_v0 }
 0x174   : > { %2322 = vst.msk [vmem:[%s3205_s6 + $0xf0] sm:$0xff] %vm2291_vm5, %v2193_v5  ;;  %2386 = vst.msk [vmem:[%s3205_s6 + $0x2f0] sm:$0xff] %vm2291_vm5, %v2257_v6  ;;  %v1374_v9 = vpop.f32.mrf.mxu0  ;;  %v1630_v10 = vpop.f32.mrf.mxu1 }
 0x175   : > { %v2060_v11 = vmax.f32 %v1930_v7, 0.0  ;;  %v2124_v12 = vmax.f32 %v1994_v8, 0.0  ;;  %v1796_v13 = vmul.f32 %v3623_v61, %v1374_v9  ;;  %v1860_v14 = vmul.f32 %v3623_v61, %v1630_v10 }
 0x176   : > { %v1376_v15 = vpop.f32.mrf.mxu0  ;;  %v1632_v16 = vpop.f32.mrf.mxu1 }
 0x177   : > { %v2194_v17 = vsel %vm2162_vm4, %v2060_v11, %v1930_v7  ;;  %v2258_v18 = vsel %vm2162_vm4, %v2124_v12, %v1994_v8  ;;  %v1931_v19 = vadd.f32 %v3612_v55, %v1796_v13  ;;  %v1995_v20 = vadd.f32 %v3612_v55, %v1860_v14 }
 0x178   : > { %2323 = vst.msk [vmem:[%s3205_s6 + $0xf8] sm:$0xff] %vm2291_vm5, %v2194_v17  ;;  %2387 = vst.msk [vmem:[%s3205_s6 + $0x2f8] sm:$0xff] %vm2291_vm5, %v2258_v18  ;;  %v1377_v21 = vpop.f32.mrf.mxu0  ;;  %v1633_v22 = vpop.f32.mrf.mxu1 }
 0x179   : > { %v2061_v23 = vmax.f32 %v1931_v19, 0.0  ;;  %v2125_v24 = vmax.f32 %v1995_v20, 0.0  ;;  %v1797_v25 = vmul.f32 %v3623_v61, %v1377_v21  ;;  %v1861_v26 = vmul.f32 %v3623_v61, %v1633_v22 }
 0x17a   : > { %v1379_v27 = vpop.f32.mrf.mxu0  ;;  %v1635_v28 = vpop.f32.mrf.mxu1 }
 0x17b   : > { %v2195_v29 = vsel %vm2162_vm4, %v2061_v23, %v1931_v19  ;;  %v2259_v30 = vsel %vm2162_vm4, %v2125_v24, %v1995_v20  ;;  %v1932_v31 = vadd.f32 %v3612_v55, %v1797_v25  ;;  %v1996_v32 = vadd.f32 %v3612_v55, %v1861_v26 }
 0x17c   : > { %2324 = vst.msk [vmem:[%s3205_s6 + $0x100] sm:$0xff] %vm2291_vm5, %v2195_v29  ;;  %2388 = vst.msk [vmem:[%s3205_s6 + $0x300] sm:$0xff] %vm2291_vm5, %v2259_v30  ;;  %v1382_v33 = vpop.f32.mrf.mxu0  ;;  %v1638_v34 = vpop.f32.mrf.mxu1 }
 0x17d   : > { %v2062_v35 = vmax.f32 %v1932_v31, 0.0  ;;  %v2126_v36 = vmax.f32 %v1996_v32, 0.0  ;;  %v1798_v37 = vmul.f32 %v3623_v61, %v1382_v33  ;;  %v1862_v38 = vmul.f32 %v3623_v61, %v1638_v34 }
 0x17e   : > { %v1384_v39 = vpop.f32.mrf.mxu0  ;;  %v1640_v40 = vpop.f32.mrf.mxu1 }
 0x17f   : > { %v2196_v41 = vsel %vm2162_vm4, %v2062_v35, %v1932_v31  ;;  %v2260_v42 = vsel %vm2162_vm4, %v2126_v36, %v1996_v32  ;;  %v1933_v43 = vadd.f32 %v3612_v55, %v1798_v37  ;;  %v1997_v44 = vadd.f32 %v3612_v55, %v1862_v38 }
 0x180   : > { %2325 = vst.msk [vmem:[%s3205_s6 + $0x108] sm:$0xff] %vm2291_vm5, %v2196_v41  ;;  %2389 = vst.msk [vmem:[%s3205_s6 + $0x308] sm:$0xff] %vm2291_vm5, %v2260_v42  ;;  %v1385_v45 = vpop.f32.mrf.mxu0  ;;  %v1641_v46 = vpop.f32.mrf.mxu1 }
 0x181   : > { %v2063_v47 = vmax.f32 %v1933_v43, 0.0  ;;  %v2127_v48 = vmax.f32 %v1997_v44, 0.0  ;;  %v1799_v49 = vmul.f32 %v3623_v61, %v1385_v45  ;;  %v1863_v50 = vmul.f32 %v3623_v61, %v1641_v46 }
 0x182   : > { %v1387_v51 = vpop.f32.mrf.mxu0  ;;  %v1643_v52 = vpop.f32.mrf.mxu1 }
 0x183   : > { %v2197_v53 = vsel %vm2162_vm4, %v2063_v47, %v1933_v43  ;;  %v2261_v54 = vsel %vm2162_vm4, %v2127_v48, %v1997_v44  ;;  %v1934_v2 = vadd.f32 %v3612_v55, %v1799_v49  ;;  %v1998_v56 = vadd.f32 %v3612_v55, %v1863_v50 }
 0x184   : > { %2326 = vst.msk [vmem:[%s3205_s6 + $0x110] sm:$0xff] %vm2291_vm5, %v2197_v53  ;;  %2390 = vst.msk [vmem:[%s3205_s6 + $0x310] sm:$0xff] %vm2291_vm5, %v2261_v54  ;;  %v1390_v57 = vpop.f32.mrf.mxu0  ;;  %v1646_v63 = vpop.f32.mrf.mxu1 }
 0x185   : > { %v2064_v58 = vmax.f32 %v1934_v2, 0.0  ;;  %v2128_v59 = vmax.f32 %v1998_v56, 0.0  ;;  %v1800_v60 = vmul.f32 %v3623_v61, %v1390_v57  ;;  %v1864_v62 = vmul.f32 %v3623_v61, %v1646_v63 }
 0x186   : > { %v1392_v0 = vpop.f32.mrf.mxu0  ;;  %v1648_v4 = vpop.f32.mrf.mxu1 }
 0x187   : > { %v2198_v1 = vsel %vm2162_vm4, %v2064_v58, %v1934_v2  ;;  %v2262_v5 = vsel %vm2162_vm4, %v2128_v59, %v1998_v56  ;;  %v1935_v6 = vadd.f32 %v3612_v55, %v1800_v60  ;;  %v1999_v7 = vadd.f32 %v3612_v55, %v1864_v62 }
 0x188   : > { %2327 = vst.msk [vmem:[%s3205_s6 + $0x118] sm:$0xff] %vm2291_vm5, %v2198_v1  ;;  %2391 = vst.msk [vmem:[%s3205_s6 + $0x318] sm:$0xff] %vm2291_vm5, %v2262_v5  ;;  %v1393_v8 = vpop.f32.mrf.mxu0  ;;  %v1649_v9 = vpop.f32.mrf.mxu1 }
 0x189   : > { %v2065_v10 = vmax.f32 %v1935_v6, 0.0  ;;  %v2129_v11 = vmax.f32 %v1999_v7, 0.0  ;;  %v1801_v12 = vmul.f32 %v3623_v61, %v1393_v8  ;;  %v1865_v13 = vmul.f32 %v3623_v61, %v1649_v9 }
 0x18a   : > { %v1395_v14 = vpop.f32.mrf.mxu0  ;;  %v1651_v15 = vpop.f32.mrf.mxu1 }
 0x18b   : > { %v2199_v16 = vsel %vm2162_vm4, %v2065_v10, %v1935_v6  ;;  %v2263_v17 = vsel %vm2162_vm4, %v2129_v11, %v1999_v7  ;;  %v1936_v18 = vadd.f32 %v3612_v55, %v1801_v12  ;;  %v2000_v19 = vadd.f32 %v3612_v55, %v1865_v13 }
 0x18c   : > { %2328 = vst.msk [vmem:[%s3205_s6 + $0x120] sm:$0xff] %vm2291_vm5, %v2199_v16  ;;  %2392 = vst.msk [vmem:[%s3205_s6 + $0x320] sm:$0xff] %vm2291_vm5, %v2263_v17  ;;  %v1398_v20 = vpop.f32.mrf.mxu0  ;;  %v1654_v21 = vpop.f32.mrf.mxu1 }
 0x18d   : > { %v2066_v22 = vmax.f32 %v1936_v18, 0.0  ;;  %v2130_v23 = vmax.f32 %v2000_v19, 0.0  ;;  %v1802_v24 = vmul.f32 %v3623_v61, %v1398_v20  ;;  %v1866_v25 = vmul.f32 %v3623_v61, %v1654_v21 }
 0x18e   : > { %v1400_v26 = vpop.f32.mrf.mxu0  ;;  %v1656_v27 = vpop.f32.mrf.mxu1 }
 0x18f   : > { %v2200_v28 = vsel %vm2162_vm4, %v2066_v22, %v1936_v18  ;;  %v2264_v29 = vsel %vm2162_vm4, %v2130_v23, %v2000_v19  ;;  %v1937_v30 = vadd.f32 %v3612_v55, %v1802_v24  ;;  %v2001_v31 = vadd.f32 %v3612_v55, %v1866_v25 }
 0x190   : > { %2329 = vst.msk [vmem:[%s3205_s6 + $0x128] sm:$0xff] %vm2291_vm5, %v2200_v28  ;;  %2393 = vst.msk [vmem:[%s3205_s6 + $0x328] sm:$0xff] %vm2291_vm5, %v2264_v29  ;;  %v1401_v32 = vpop.f32.mrf.mxu0  ;;  %v1657_v33 = vpop.f32.mrf.mxu1 }
 0x191   : > { %v2067_v34 = vmax.f32 %v1937_v30, 0.0  ;;  %v2131_v35 = vmax.f32 %v2001_v31, 0.0  ;;  %v1803_v36 = vmul.f32 %v3623_v61, %v1401_v32  ;;  %v1867_v37 = vmul.f32 %v3623_v61, %v1657_v33 }
 0x192   : > { %v1403_v38 = vpop.f32.mrf.mxu0  ;;  %v1659_v39 = vpop.f32.mrf.mxu1 }
 0x193   : > { %v2201_v40 = vsel %vm2162_vm4, %v2067_v34, %v1937_v30  ;;  %v2265_v41 = vsel %vm2162_vm4, %v2131_v35, %v2001_v31  ;;  %v1938_v42 = vadd.f32 %v3612_v55, %v1803_v36  ;;  %v2002_v43 = vadd.f32 %v3612_v55, %v1867_v37 }
 0x194   : > { %2330 = vst.msk [vmem:[%s3205_s6 + $0x130] sm:$0xff] %vm2291_vm5, %v2201_v40  ;;  %2394 = vst.msk [vmem:[%s3205_s6 + $0x330] sm:$0xff] %vm2291_vm5, %v2265_v41  ;;  %v1406_v44 = vpop.f32.mrf.mxu0  ;;  %v1662_v45 = vpop.f32.mrf.mxu1 }
 0x195   : > { %v2068_v46 = vmax.f32 %v1938_v42, 0.0  ;;  %v2132_v47 = vmax.f32 %v2002_v43, 0.0  ;;  %v1804_v48 = vmul.f32 %v3623_v61, %v1406_v44  ;;  %v1868_v49 = vmul.f32 %v3623_v61, %v1662_v45 }
 0x196   : > { %v1408_v50 = vpop.f32.mrf.mxu0  ;;  %v1664_v51 = vpop.f32.mrf.mxu1 }
 0x197   : > { %v2202_v52 = vsel %vm2162_vm4, %v2068_v46, %v1938_v42  ;;  %v2266_v53 = vsel %vm2162_vm4, %v2132_v47, %v2002_v43  ;;  %v1939_v54 = vadd.f32 %v3612_v55, %v1804_v48  ;;  %v2003_v2 = vadd.f32 %v3612_v55, %v1868_v49 }
 0x198   : > { %2331 = vst.msk [vmem:[%s3205_s6 + $0x138] sm:$0xff] %vm2291_vm5, %v2202_v52  ;;  %2395 = vst.msk [vmem:[%s3205_s6 + $0x338] sm:$0xff] %vm2291_vm5, %v2266_v53  ;;  %v1409_v56 = vpop.f32.mrf.mxu0  ;;  %v1665_v57 = vpop.f32.mrf.mxu1 }
 0x199   : > { %v2069_v63 = vmax.f32 %v1939_v54, 0.0  ;;  %v2133_v58 = vmax.f32 %v2003_v2, 0.0  ;;  %v1805_v59 = vmul.f32 %v3623_v61, %v1409_v56  ;;  %v1869_v60 = vmul.f32 %v3623_v61, %v1665_v57 }
 0x19a   : > { %v1411_v62 = vpop.f32.mrf.mxu0  ;;  %v1667_v0 = vpop.f32.mrf.mxu1 }
 0x19b   : > { %v2203_v4 = vsel %vm2162_vm4, %v2069_v63, %v1939_v54  ;;  %v2267_v1 = vsel %vm2162_vm4, %v2133_v58, %v2003_v2  ;;  %v1940_v5 = vadd.f32 %v3612_v55, %v1805_v59  ;;  %v2004_v6 = vadd.f32 %v3612_v55, %v1869_v60 }
 0x19c   : > { %2332 = vst.msk [vmem:[%s3205_s6 + $0x140] sm:$0xff] %vm2291_vm5, %v2203_v4  ;;  %2396 = vst.msk [vmem:[%s3205_s6 + $0x340] sm:$0xff] %vm2291_vm5, %v2267_v1  ;;  %v1414_v7 = vpop.f32.mrf.mxu0  ;;  %v1670_v8 = vpop.f32.mrf.mxu1 }
 0x19d   : > { %v2070_v9 = vmax.f32 %v1940_v5, 0.0  ;;  %v2134_v10 = vmax.f32 %v2004_v6, 0.0  ;;  %v1806_v11 = vmul.f32 %v3623_v61, %v1414_v7  ;;  %v1870_v12 = vmul.f32 %v3623_v61, %v1670_v8 }
 0x19e   : > { %v1416_v13 = vpop.f32.mrf.mxu0  ;;  %v1672_v14 = vpop.f32.mrf.mxu1 }
 0x19f   : > { %v2204_v15 = vsel %vm2162_vm4, %v2070_v9, %v1940_v5  ;;  %v2268_v16 = vsel %vm2162_vm4, %v2134_v10, %v2004_v6  ;;  %v1941_v17 = vadd.f32 %v3612_v55, %v1806_v11  ;;  %v2005_v18 = vadd.f32 %v3612_v55, %v1870_v12 }
 0x1a0   : > { %2333 = vst.msk [vmem:[%s3205_s6 + $0x148] sm:$0xff] %vm2291_vm5, %v2204_v15  ;;  %2397 = vst.msk [vmem:[%s3205_s6 + $0x348] sm:$0xff] %vm2291_vm5, %v2268_v16  ;;  %v1417_v19 = vpop.f32.mrf.mxu0  ;;  %v1673_v20 = vpop.f32.mrf.mxu1 }
 0x1a1   : > { %v2071_v21 = vmax.f32 %v1941_v17, 0.0  ;;  %v2135_v22 = vmax.f32 %v2005_v18, 0.0  ;;  %v1807_v23 = vmul.f32 %v3623_v61, %v1417_v19  ;;  %v1871_v24 = vmul.f32 %v3623_v61, %v1673_v20 }
 0x1a2   : > { %v1419_v25 = vpop.f32.mrf.mxu0  ;;  %v1675_v26 = vpop.f32.mrf.mxu1 }
 0x1a3   : > { %v2205_v27 = vsel %vm2162_vm4, %v2071_v21, %v1941_v17  ;;  %v2269_v28 = vsel %vm2162_vm4, %v2135_v22, %v2005_v18  ;;  %v1942_v29 = vadd.f32 %v3612_v55, %v1807_v23  ;;  %v2006_v30 = vadd.f32 %v3612_v55, %v1871_v24 }
 0x1a4   : > { %2334 = vst.msk [vmem:[%s3205_s6 + $0x150] sm:$0xff] %vm2291_vm5, %v2205_v27  ;;  %2398 = vst.msk [vmem:[%s3205_s6 + $0x350] sm:$0xff] %vm2291_vm5, %v2269_v28  ;;  %v1422_v31 = vpop.f32.mrf.mxu0  ;;  %v1678_v32 = vpop.f32.mrf.mxu1 }
 0x1a5   : > { %v2072_v33 = vmax.f32 %v1942_v29, 0.0  ;;  %v2136_v34 = vmax.f32 %v2006_v30, 0.0  ;;  %v1808_v35 = vmul.f32 %v3623_v61, %v1422_v31  ;;  %v1872_v36 = vmul.f32 %v3623_v61, %v1678_v32 }
 0x1a6   : > { %v1424_v37 = vpop.f32.mrf.mxu0  ;;  %v1680_v38 = vpop.f32.mrf.mxu1 }
 0x1a7   : > { %v2206_v39 = vsel %vm2162_vm4, %v2072_v33, %v1942_v29  ;;  %v2270_v40 = vsel %vm2162_vm4, %v2136_v34, %v2006_v30  ;;  %v1943_v41 = vadd.f32 %v3612_v55, %v1808_v35  ;;  %v2007_v42 = vadd.f32 %v3612_v55, %v1872_v36 }
 0x1a8   : > { %2335 = vst.msk [vmem:[%s3205_s6 + $0x158] sm:$0xff] %vm2291_vm5, %v2206_v39  ;;  %2399 = vst.msk [vmem:[%s3205_s6 + $0x358] sm:$0xff] %vm2291_vm5, %v2270_v40  ;;  %v1425_v43 = vpop.f32.mrf.mxu0  ;;  %v1681_v44 = vpop.f32.mrf.mxu1 }
 0x1a9   : > { %v2073_v45 = vmax.f32 %v1943_v41, 0.0  ;;  %v2137_v46 = vmax.f32 %v2007_v42, 0.0  ;;  %v1809_v47 = vmul.f32 %v3623_v61, %v1425_v43  ;;  %v1873_v48 = vmul.f32 %v3623_v61, %v1681_v44 }
 0x1aa   : > { %v1427_v49 = vpop.f32.mrf.mxu0  ;;  %v1683_v50 = vpop.f32.mrf.mxu1 }
 0x1ab   : > { %v2207_v51 = vsel %vm2162_vm4, %v2073_v45, %v1943_v41  ;;  %v2271_v52 = vsel %vm2162_vm4, %v2137_v46, %v2007_v42  ;;  %v1944_v53 = vadd.f32 %v3612_v55, %v1809_v47  ;;  %v2008_v54 = vadd.f32 %v3612_v55, %v1873_v48 }
 0x1ac   : > { %2336 = vst.msk [vmem:[%s3205_s6 + $0x160] sm:$0xff] %vm2291_vm5, %v2207_v51  ;;  %2400 = vst.msk [vmem:[%s3205_s6 + $0x360] sm:$0xff] %vm2291_vm5, %v2271_v52  ;;  %v1430_v2 = vpop.f32.mrf.mxu0  ;;  %v1686_v56 = vpop.f32.mrf.mxu1 }
 0x1ad   : > { %v2074_v57 = vmax.f32 %v1944_v53, 0.0  ;;  %v2138_v63 = vmax.f32 %v2008_v54, 0.0  ;;  %v1810_v58 = vmul.f32 %v3623_v61, %v1430_v2  ;;  %v1874_v59 = vmul.f32 %v3623_v61, %v1686_v56 }
 0x1ae   : > { %v1432_v60 = vpop.f32.mrf.mxu0  ;;  %v1688_v62 = vpop.f32.mrf.mxu1 }
 0x1af   : > { %v2208_v0 = vsel %vm2162_vm4, %v2074_v57, %v1944_v53  ;;  %v2272_v4 = vsel %vm2162_vm4, %v2138_v63, %v2008_v54  ;;  %v1945_v1 = vadd.f32 %v3612_v55, %v1810_v58  ;;  %v2009_v5 = vadd.f32 %v3612_v55, %v1874_v59 }
 0x1b0   : > { %2337 = vst.msk [vmem:[%s3205_s6 + $0x168] sm:$0xff] %vm2291_vm5, %v2208_v0  ;;  %2401 = vst.msk [vmem:[%s3205_s6 + $0x368] sm:$0xff] %vm2291_vm5, %v2272_v4  ;;  %v1433_v6 = vpop.f32.mrf.mxu0  ;;  %v1689_v7 = vpop.f32.mrf.mxu1 }
 0x1b1   : > { %v2075_v8 = vmax.f32 %v1945_v1, 0.0  ;;  %v2139_v9 = vmax.f32 %v2009_v5, 0.0  ;;  %v1811_v10 = vmul.f32 %v3623_v61, %v1433_v6  ;;  %v1875_v11 = vmul.f32 %v3623_v61, %v1689_v7 }
 0x1b2   : > { %v1435_v12 = vpop.f32.mrf.mxu0  ;;  %v1691_v13 = vpop.f32.mrf.mxu1 }
 0x1b3   : > { %v2209_v14 = vsel %vm2162_vm4, %v2075_v8, %v1945_v1  ;;  %v2273_v15 = vsel %vm2162_vm4, %v2139_v9, %v2009_v5  ;;  %v1946_v16 = vadd.f32 %v3612_v55, %v1811_v10  ;;  %v2010_v17 = vadd.f32 %v3612_v55, %v1875_v11 }
 0x1b4   : > { %2338 = vst.msk [vmem:[%s3205_s6 + $0x170] sm:$0xff] %vm2291_vm5, %v2209_v14  ;;  %2402 = vst.msk [vmem:[%s3205_s6 + $0x370] sm:$0xff] %vm2291_vm5, %v2273_v15  ;;  %v1438_v18 = vpop.f32.mrf.mxu0  ;;  %v1694_v19 = vpop.f32.mrf.mxu1 }
 0x1b5   : > { %v2076_v20 = vmax.f32 %v1946_v16, 0.0  ;;  %v2140_v21 = vmax.f32 %v2010_v17, 0.0  ;;  %v1812_v22 = vmul.f32 %v3623_v61, %v1438_v18  ;;  %v1876_v23 = vmul.f32 %v3623_v61, %v1694_v19 }
 0x1b6   : > { %v1440_v24 = vpop.f32.mrf.mxu0  ;;  %v1696_v25 = vpop.f32.mrf.mxu1 }
 0x1b7   : > { %v2210_v26 = vsel %vm2162_vm4, %v2076_v20, %v1946_v16  ;;  %v2274_v27 = vsel %vm2162_vm4, %v2140_v21, %v2010_v17  ;;  %v1947_v28 = vadd.f32 %v3612_v55, %v1812_v22  ;;  %v2011_v29 = vadd.f32 %v3612_v55, %v1876_v23 }
 0x1b8   : > { %2339 = vst.msk [vmem:[%s3205_s6 + $0x178] sm:$0xff] %vm2291_vm5, %v2210_v26  ;;  %2403 = vst.msk [vmem:[%s3205_s6 + $0x378] sm:$0xff] %vm2291_vm5, %v2274_v27  ;;  %v1441_v30 = vpop.f32.mrf.mxu0  ;;  %v1697_v31 = vpop.f32.mrf.mxu1 }
 0x1b9   : > { %v2077_v32 = vmax.f32 %v1947_v28, 0.0  ;;  %v2141_v33 = vmax.f32 %v2011_v29, 0.0  ;;  %v1813_v34 = vmul.f32 %v3623_v61, %v1441_v30  ;;  %v1877_v35 = vmul.f32 %v3623_v61, %v1697_v31 }
 0x1ba   : > { %v1443_v36 = vpop.f32.mrf.mxu0  ;;  %v1699_v37 = vpop.f32.mrf.mxu1 }
 0x1bb   : > { %v2211_v38 = vsel %vm2162_vm4, %v2077_v32, %v1947_v28  ;;  %v2275_v39 = vsel %vm2162_vm4, %v2141_v33, %v2011_v29  ;;  %v1948_v40 = vadd.f32 %v3612_v55, %v1813_v34  ;;  %v2012_v41 = vadd.f32 %v3612_v55, %v1877_v35 }
 0x1bc   : > { %2340 = vst.msk [vmem:[%s3205_s6 + $0x180] sm:$0xff] %vm2291_vm5, %v2211_v38  ;;  %2404 = vst.msk [vmem:[%s3205_s6 + $0x380] sm:$0xff] %vm2291_vm5, %v2275_v39  ;;  %v1446_v42 = vpop.f32.mrf.mxu0  ;;  %v1702_v43 = vpop.f32.mrf.mxu1 }
 0x1bd   : > { %v2078_v44 = vmax.f32 %v1948_v40, 0.0  ;;  %v2142_v45 = vmax.f32 %v2012_v41, 0.0  ;;  %v1814_v46 = vmul.f32 %v3623_v61, %v1446_v42  ;;  %v1878_v47 = vmul.f32 %v3623_v61, %v1702_v43 }
 0x1be   : > { %v1448_v48 = vpop.f32.mrf.mxu0  ;;  %v1704_v49 = vpop.f32.mrf.mxu1 }
 0x1bf   : > { %v2212_v50 = vsel %vm2162_vm4, %v2078_v44, %v1948_v40  ;;  %v2276_v51 = vsel %vm2162_vm4, %v2142_v45, %v2012_v41  ;;  %v1949_v52 = vadd.f32 %v3612_v55, %v1814_v46  ;;  %v2013_v53 = vadd.f32 %v3612_v55, %v1878_v47 }
 0x1c0   : > { %2341 = vst.msk [vmem:[%s3205_s6 + $0x188] sm:$0xff] %vm2291_vm5, %v2212_v50  ;;  %2405 = vst.msk [vmem:[%s3205_s6 + $0x388] sm:$0xff] %vm2291_vm5, %v2276_v51  ;;  %v1449_v54 = vpop.f32.mrf.mxu0  ;;  %v1705_v2 = vpop.f32.mrf.mxu1 }
 0x1c1   : > { %v2079_v56 = vmax.f32 %v1949_v52, 0.0  ;;  %v2143_v57 = vmax.f32 %v2013_v53, 0.0  ;;  %v1815_v63 = vmul.f32 %v3623_v61, %v1449_v54  ;;  %v1879_v58 = vmul.f32 %v3623_v61, %v1705_v2 }
 0x1c2   : > { %v1451_v59 = vpop.f32.mrf.mxu0  ;;  %v1707_v60 = vpop.f32.mrf.mxu1 }
 0x1c3   : > { %v2213_v62 = vsel %vm2162_vm4, %v2079_v56, %v1949_v52  ;;  %v2277_v0 = vsel %vm2162_vm4, %v2143_v57, %v2013_v53  ;;  %v1950_v4 = vadd.f32 %v3612_v55, %v1815_v63  ;;  %v2014_v1 = vadd.f32 %v3612_v55, %v1879_v58 }
 0x1c4   : > { %2342 = vst.msk [vmem:[%s3205_s6 + $0x190] sm:$0xff] %vm2291_vm5, %v2213_v62  ;;  %2406 = vst.msk [vmem:[%s3205_s6 + $0x390] sm:$0xff] %vm2291_vm5, %v2277_v0  ;;  %v1454_v5 = vpop.f32.mrf.mxu0  ;;  %v1710_v6 = vpop.f32.mrf.mxu1 }
 0x1c5   : > { %v2080_v7 = vmax.f32 %v1950_v4, 0.0  ;;  %v2144_v8 = vmax.f32 %v2014_v1, 0.0  ;;  %v1816_v9 = vmul.f32 %v3623_v61, %v1454_v5  ;;  %v1880_v10 = vmul.f32 %v3623_v61, %v1710_v6 }
 0x1c6   : > { %v1456_v11 = vpop.f32.mrf.mxu0  ;;  %v1712_v12 = vpop.f32.mrf.mxu1 }
 0x1c7   : > { %v2214_v13 = vsel %vm2162_vm4, %v2080_v7, %v1950_v4  ;;  %v2278_v14 = vsel %vm2162_vm4, %v2144_v8, %v2014_v1  ;;  %v1951_v15 = vadd.f32 %v3612_v55, %v1816_v9  ;;  %v2015_v16 = vadd.f32 %v3612_v55, %v1880_v10 }
 0x1c8   : > { %2343 = vst.msk [vmem:[%s3205_s6 + $0x198] sm:$0xff] %vm2291_vm5, %v2214_v13  ;;  %2407 = vst.msk [vmem:[%s3205_s6 + $0x398] sm:$0xff] %vm2291_vm5, %v2278_v14  ;;  %v1457_v17 = vpop.f32.mrf.mxu0  ;;  %v1713_v18 = vpop.f32.mrf.mxu1 }
 0x1c9   : > { %v2081_v19 = vmax.f32 %v1951_v15, 0.0  ;;  %v2145_v20 = vmax.f32 %v2015_v16, 0.0  ;;  %v1817_v21 = vmul.f32 %v3623_v61, %v1457_v17  ;;  %v1881_v22 = vmul.f32 %v3623_v61, %v1713_v18 }
 0x1ca   : > { %v1459_v23 = vpop.f32.mrf.mxu0  ;;  %v1715_v24 = vpop.f32.mrf.mxu1 }
 0x1cb   : > { %v2215_v25 = vsel %vm2162_vm4, %v2081_v19, %v1951_v15  ;;  %v2279_v26 = vsel %vm2162_vm4, %v2145_v20, %v2015_v16  ;;  %v1952_v27 = vadd.f32 %v3612_v55, %v1817_v21  ;;  %v2016_v28 = vadd.f32 %v3612_v55, %v1881_v22 }
 0x1cc   : > { %2344 = vst.msk [vmem:[%s3205_s6 + $0x1a0] sm:$0xff] %vm2291_vm5, %v2215_v25  ;;  %2408 = vst.msk [vmem:[%s3205_s6 + $0x3a0] sm:$0xff] %vm2291_vm5, %v2279_v26  ;;  %v1462_v29 = vpop.f32.mrf.mxu0  ;;  %v1718_v30 = vpop.f32.mrf.mxu1 }
 0x1cd   : > { %v2082_v31 = vmax.f32 %v1952_v27, 0.0  ;;  %v2146_v32 = vmax.f32 %v2016_v28, 0.0  ;;  %v1818_v33 = vmul.f32 %v3623_v61, %v1462_v29  ;;  %v1882_v34 = vmul.f32 %v3623_v61, %v1718_v30 }
 0x1ce   : > { %v1464_v35 = vpop.f32.mrf.mxu0  ;;  %v1720_v36 = vpop.f32.mrf.mxu1 }
 0x1cf   : > { %v2216_v37 = vsel %vm2162_vm4, %v2082_v31, %v1952_v27  ;;  %v2280_v38 = vsel %vm2162_vm4, %v2146_v32, %v2016_v28  ;;  %v1953_v39 = vadd.f32 %v3612_v55, %v1818_v33  ;;  %v2017_v40 = vadd.f32 %v3612_v55, %v1882_v34 }
 0x1d0   : > { %2345 = vst.msk [vmem:[%s3205_s6 + $0x1a8] sm:$0xff] %vm2291_vm5, %v2216_v37  ;;  %2409 = vst.msk [vmem:[%s3205_s6 + $0x3a8] sm:$0xff] %vm2291_vm5, %v2280_v38  ;;  %v1465_v41 = vpop.f32.mrf.mxu0  ;;  %v1721_v42 = vpop.f32.mrf.mxu1 }
 0x1d1   : > { %v2083_v43 = vmax.f32 %v1953_v39, 0.0  ;;  %v2147_v44 = vmax.f32 %v2017_v40, 0.0  ;;  %v1819_v45 = vmul.f32 %v3623_v61, %v1465_v41  ;;  %v1883_v46 = vmul.f32 %v3623_v61, %v1721_v42 }
 0x1d2   : > { %v1467_v47 = vpop.f32.mrf.mxu0  ;;  %v1723_v48 = vpop.f32.mrf.mxu1 }
 0x1d3   : > { %v2217_v49 = vsel %vm2162_vm4, %v2083_v43, %v1953_v39  ;;  %v2281_v50 = vsel %vm2162_vm4, %v2147_v44, %v2017_v40  ;;  %v1954_v51 = vadd.f32 %v3612_v55, %v1819_v45  ;;  %v2018_v52 = vadd.f32 %v3612_v55, %v1883_v46 }
 0x1d4   : > { %2346 = vst.msk [vmem:[%s3205_s6 + $0x1b0] sm:$0xff] %vm2291_vm5, %v2217_v49  ;;  %2410 = vst.msk [vmem:[%s3205_s6 + $0x3b0] sm:$0xff] %vm2291_vm5, %v2281_v50  ;;  %v1470_v53 = vpop.f32.mrf.mxu0  ;;  %v1726_v54 = vpop.f32.mrf.mxu1 }
 0x1d5   : > { %v2084_v2 = vmax.f32 %v1954_v51, 0.0  ;;  %v2148_v56 = vmax.f32 %v2018_v52, 0.0  ;;  %v1820_v57 = vmul.f32 %v3623_v61, %v1470_v53  ;;  %v1884_v63 = vmul.f32 %v3623_v61, %v1726_v54 }
 0x1d6   : > { %v1472_v58 = vpop.f32.mrf.mxu0  ;;  %v1728_v59 = vpop.f32.mrf.mxu1 }
 0x1d7   : > { %v2218_v60 = vsel %vm2162_vm4, %v2084_v2, %v1954_v51  ;;  %v2282_v62 = vsel %vm2162_vm4, %v2148_v56, %v2018_v52  ;;  %v1955_v0 = vadd.f32 %v3612_v55, %v1820_v57  ;;  %v2019_v4 = vadd.f32 %v3612_v55, %v1884_v63 }
 0x1d8   : > { %2347 = vst.msk [vmem:[%s3205_s6 + $0x1b8] sm:$0xff] %vm2291_vm5, %v2218_v60  ;;  %2411 = vst.msk [vmem:[%s3205_s6 + $0x3b8] sm:$0xff] %vm2291_vm5, %v2282_v62  ;;  %v1473_v1 = vpop.f32.mrf.mxu0  ;;  %v1729_v5 = vpop.f32.mrf.mxu1 }
 0x1d9   : > { %v2085_v6 = vmax.f32 %v1955_v0, 0.0  ;;  %v2149_v7 = vmax.f32 %v2019_v4, 0.0  ;;  %v1821_v8 = vmul.f32 %v3623_v61, %v1473_v1  ;;  %v1885_v9 = vmul.f32 %v3623_v61, %v1729_v5 }
 0x1da   : > { %v1475_v10 = vpop.f32.mrf.mxu0  ;;  %v1731_v11 = vpop.f32.mrf.mxu1 }
 0x1db   : > { %v2219_v12 = vsel %vm2162_vm4, %v2085_v6, %v1955_v0  ;;  %v2283_v13 = vsel %vm2162_vm4, %v2149_v7, %v2019_v4  ;;  %v1956_v14 = vadd.f32 %v3612_v55, %v1821_v8  ;;  %v2020_v15 = vadd.f32 %v3612_v55, %v1885_v9 }
 0x1dc   : > { %2348 = vst.msk [vmem:[%s3205_s6 + $0x1c0] sm:$0xff] %vm2291_vm5, %v2219_v12  ;;  %2412 = vst.msk [vmem:[%s3205_s6 + $0x3c0] sm:$0xff] %vm2291_vm5, %v2283_v13  ;;  %v1478_v16 = vpop.f32.mrf.mxu0  ;;  %v1734_v17 = vpop.f32.mrf.mxu1 }
 0x1dd   : > { %v2086_v18 = vmax.f32 %v1956_v14, 0.0  ;;  %v2150_v19 = vmax.f32 %v2020_v15, 0.0  ;;  %v1822_v20 = vmul.f32 %v3623_v61, %v1478_v16  ;;  %v1886_v21 = vmul.f32 %v3623_v61, %v1734_v17 }
 0x1de   : > { %v1480_v22 = vpop.f32.mrf.mxu0  ;;  %v1736_v23 = vpop.f32.mrf.mxu1 }
 0x1df   : > { %v2220_v24 = vsel %vm2162_vm4, %v2086_v18, %v1956_v14  ;;  %v2284_v25 = vsel %vm2162_vm4, %v2150_v19, %v2020_v15  ;;  %v1957_v26 = vadd.f32 %v3612_v55, %v1822_v20  ;;  %v2021_v27 = vadd.f32 %v3612_v55, %v1886_v21 }
 0x1e0   : > { %2349 = vst.msk [vmem:[%s3205_s6 + $0x1c8] sm:$0xff] %vm2291_vm5, %v2220_v24  ;;  %2413 = vst.msk [vmem:[%s3205_s6 + $0x3c8] sm:$0xff] %vm2291_vm5, %v2284_v25  ;;  %v1481_v28 = vpop.f32.mrf.mxu0  ;;  %v1737_v29 = vpop.f32.mrf.mxu1 }
 0x1e1   : > { %v2087_v30 = vmax.f32 %v1957_v26, 0.0  ;;  %v2151_v31 = vmax.f32 %v2021_v27, 0.0  ;;  %v1823_v32 = vmul.f32 %v3623_v61, %v1481_v28  ;;  %v1887_v33 = vmul.f32 %v3623_v61, %v1737_v29 }
 0x1e2   : > { %v1483_v34 = vpop.f32.mrf.mxu0  ;;  %v1739_v35 = vpop.f32.mrf.mxu1 }
 0x1e3   : > { %v2221_v36 = vsel %vm2162_vm4, %v2087_v30, %v1957_v26  ;;  %v2285_v37 = vsel %vm2162_vm4, %v2151_v31, %v2021_v27  ;;  %v1958_v38 = vadd.f32 %v3612_v55, %v1823_v32  ;;  %v2022_v39 = vadd.f32 %v3612_v55, %v1887_v33 }
 0x1e4   : > { %2350 = vst.msk [vmem:[%s3205_s6 + $0x1d0] sm:$0xff] %vm2291_vm5, %v2221_v36  ;;  %2414 = vst.msk [vmem:[%s3205_s6 + $0x3d0] sm:$0xff] %vm2291_vm5, %v2285_v37  ;;  %v1486_v40 = vpop.f32.mrf.mxu0  ;;  %v1742_v41 = vpop.f32.mrf.mxu1 }
 0x1e5   : > { %v2088_v42 = vmax.f32 %v1958_v38, 0.0  ;;  %v2152_v43 = vmax.f32 %v2022_v39, 0.0  ;;  %v1824_v44 = vmul.f32 %v3623_v61, %v1486_v40  ;;  %v1888_v45 = vmul.f32 %v3623_v61, %v1742_v41 }
 0x1e6   : > { %v1488_v46 = vpop.f32.mrf.mxu0  ;;  %v1744_v47 = vpop.f32.mrf.mxu1 }
 0x1e7   : > { %v2222_v48 = vsel %vm2162_vm4, %v2088_v42, %v1958_v38  ;;  %v2286_v49 = vsel %vm2162_vm4, %v2152_v43, %v2022_v39  ;;  %v1959_v50 = vadd.f32 %v3612_v55, %v1824_v44  ;;  %v2023_v51 = vadd.f32 %v3612_v55, %v1888_v45 }
 0x1e8   : > { %2351 = vst.msk [vmem:[%s3205_s6 + $0x1d8] sm:$0xff] %vm2291_vm5, %v2222_v48  ;;  %2415 = vst.msk [vmem:[%s3205_s6 + $0x3d8] sm:$0xff] %vm2291_vm5, %v2286_v49  ;;  %v1489_v52 = vpop.f32.mrf.mxu0  ;;  %v1745_v53 = vpop.f32.mrf.mxu1 }
 0x1e9   : > { %v2089_v54 = vmax.f32 %v1959_v50, 0.0  ;;  %v2153_v2 = vmax.f32 %v2023_v51, 0.0  ;;  %v1825_v56 = vmul.f32 %v3623_v61, %v1489_v52  ;;  %v1889_v57 = vmul.f32 %v3623_v61, %v1745_v53 }
 0x1ea   : > { %v1491_v63 = vpop.f32.mrf.mxu0  ;;  %v1747_v58 = vpop.f32.mrf.mxu1 }
 0x1eb   : > { %v2223_v59 = vsel %vm2162_vm4, %v2089_v54, %v1959_v50  ;;  %v2287_v60 = vsel %vm2162_vm4, %v2153_v2, %v2023_v51  ;;  %v1960_v62 = vadd.f32 %v3612_v55, %v1825_v56  ;;  %v2024_v0 = vadd.f32 %v3612_v55, %v1889_v57 }
 0x1ec   : > { %2352 = vst.msk [vmem:[%s3205_s6 + $0x1e0] sm:$0xff] %vm2291_vm5, %v2223_v59  ;;  %2416 = vst.msk [vmem:[%s3205_s6 + $0x3e0] sm:$0xff] %vm2291_vm5, %v2287_v60  ;;  %v1494_v4 = vpop.f32.mrf.mxu0  ;;  %v1750_v1 = vpop.f32.mrf.mxu1 }
 0x1ed   : > { %v2090_v5 = vmax.f32 %v1960_v62, 0.0  ;;  %v2154_v6 = vmax.f32 %v2024_v0, 0.0  ;;  %v1826_v7 = vmul.f32 %v3623_v61, %v1494_v4  ;;  %v1890_v8 = vmul.f32 %v3623_v61, %v1750_v1 }
 0x1ee   : > { %v1496_v9 = vpop.f32.mrf.mxu0  ;;  %v1752_v10 = vpop.f32.mrf.mxu1 }
 0x1ef   : > { %v2224_v11 = vsel %vm2162_vm4, %v2090_v5, %v1960_v62  ;;  %v2288_v12 = vsel %vm2162_vm4, %v2154_v6, %v2024_v0  ;;  %v1961_v13 = vadd.f32 %v3612_v55, %v1826_v7  ;;  %v2025_v14 = vadd.f32 %v3612_v55, %v1890_v8 }
 0x1f0   : > { %2353 = vst.msk [vmem:[%s3205_s6 + $0x1e8] sm:$0xff] %vm2291_vm5, %v2224_v11  ;;  %2417 = vst.msk [vmem:[%s3205_s6 + $0x3e8] sm:$0xff] %vm2291_vm5, %v2288_v12  ;;  %v1497_v15 = vpop.f32.mrf.mxu0  ;;  %v1753_v16 = vpop.f32.mrf.mxu1 }
 0x1f1   : > { %v2091_v17 = vmax.f32 %v1961_v13, 0.0  ;;  %v2155_v18 = vmax.f32 %v2025_v14, 0.0  ;;  %v1827_v19 = vmul.f32 %v3623_v61, %v1497_v15  ;;  %v1891_v20 = vmul.f32 %v3623_v61, %v1753_v16 }
 0x1f2   : > { %v1499_v21 = vpop.f32.mrf.mxu0  ;;  %v1755_v22 = vpop.f32.mrf.mxu1 }
 0x1f3   : > { %v2225_v23 = vsel %vm2162_vm4, %v2091_v17, %v1961_v13  ;;  %v2289_v24 = vsel %vm2162_vm4, %v2155_v18, %v2025_v14  ;;  %v1962_v25 = vadd.f32 %v3612_v55, %v1827_v19  ;;  %v2026_v26 = vadd.f32 %v3612_v55, %v1891_v20 }
 0x1f4   : > { %2354 = vst.msk [vmem:[%s3205_s6 + $0x1f0] sm:$0xff] %vm2291_vm5, %v2225_v23  ;;  %2418 = vst.msk [vmem:[%s3205_s6 + $0x3f0] sm:$0xff] %vm2291_vm5, %v2289_v24 }
 0x1f5   : > { %v2092_v27 = vmax.f32 %v1962_v25, 0.0  ;;  %v2156_v28 = vmax.f32 %v2026_v26, 0.0 }
 0x1f7   : > { %v2226_v61 = vsel %vm2162_vm4, %v2092_v27, %v1962_v25  ;;  %v2290_v29 = vsel %vm2162_vm4, %v2156_v28, %v2026_v26 }
 0x1f8   : > { %2355 = vst.msk [vmem:[%s3205_s6 + $0x1f8] sm:$0xff] %vm2291_vm5, %v2226_v61  ;;  %2419 = vst.msk [vmem:[%s3205_s6 + $0x3f8] sm:$0xff] %vm2291_vm5, %v2290_v29 }
 0x1f9 PF: > { %s15_s18 = sadd.s32 1, %s2917_s18  }
 0x1fa   : > { %p12_p4 = scmp.ge.s32.totalorder %s15_s18, 4  }
 0x1fc   :  { %14 = sbr.rel (!%p12_p4) target bundleno = 1 (0x1), region = 70 }

// kernel: forward.58
= control target key start
LH: loop header
LB: loop body
LE: loop exit
PB: predicated region body
PF: predicated region fallthrough
CT: control target
= control target key end

     0   :  { %vm378_vm0 = vcmask 1043456   ;;  %vm281_vm1 = vcmask 588800   ;;  %v880_v38 = vlaneseq  ;;  %v1250_v42 = vmov 0   ;;  %s1952_s1 = inlined_call_operand.vmem [shape: bf16[72,16], index: 1, kind: input, shape index: {}]   ;;  %s1953_s0 = inlined_call_operand.vmem [shape: bf16[512,72], index: 0, kind: input, shape index: {}]   ;;  %s1954_s4 = inlined_call_operand.vmem [shape: f32[1,16], index: 4, kind: input, shape index: {}]   ;;  %s1955_s2 = inlined_call_operand.vmem [shape: f32[1,16], index: 2, kind: input, shape index: {}]   ;;  %s1956_s3 = inlined_call_operand.vmem [shape: f32[1,16], index: 3, kind: input, shape index: {}]   ;;  %s1957_s5 = inlined_call_operand.vmem [shape: f32[512,16], index: 5, kind: output, shape index: {}]  }
   0x1   :  { %v1213_v0 = vld [vmem:[%s1952_s1 + $0x20] ss:$0 sps:$4 sm:$0xff]   ;;  %v1214_v1 = vld [vmem:[%s1952_s1 + $0x18] sm:$0xff]   ;;  %v1215_v3 = vld [vmem:[%s1952_s1 + $0x10] sm:$0xff]   ;;  %vm949_vm4 = vcmask 130048  }
   0x2   :  { %1210 = vmatprep.subr.msk.bf16.mxu0 %vm378_vm0, %v1213_v0  ;;  %1211 = vmatprep.subr.msk.bf16.mxu1 %vm378_vm0, %v1213_v0  ;;  %v380_v2 = vsel %vm378_vm0, %v1213_v0, 0  ;;  %v1218_v4 = vld [vmem:[%s1953_s0] sm:$0xff]   ;;  %v1216_v6 = vld [vmem:[%s1952_s1 + $0x8] sm:$0xff]   ;;  %v1222_v10 = vld [vmem:[%s1953_s0 + $0x10] sm:$0xff]   ;;  %v881_v40 = vshrl.u32 %v880_v38, 7 }
   0x3   :  { %1127 = vmatpush3.bf16.msra.mxu0 %v380_v2  ;;  %1205 = vmatpush3.bf16.msra.mxu1 %v380_v2  ;;  %v1219_v5 = vld [vmem:[%s1953_s0 + $0x80] sm:$0xff]   ;;  %v1220_v8 = vld [vmem:[%s1953_s0 + $0x8] sm:$0xff]   ;;  %v1223_v11 = vld [vmem:[%s1953_s0 + $0x90] sm:$0xff]  }
   0x4   :  { %1128 = vmatprep.subr.bf16.mxu0 %v1214_v1  ;;  %1201 = vmatprep.subr.bf16.mxu1 %v1214_v1  ;;  %v1217_v7 = vld [vmem:[%s1952_s1] sm:$0xff]   ;;  %v1221_v9 = vld [vmem:[%s1953_s0 + $0x88] sm:$0xff]   ;;  %v1224_v12 = vld [vmem:[%s1953_s0 + $0x18] sm:$0xff]   ;;  %v882_v41 = vsub.s32 0, %v881_v40 }
   0x5   :  { %1136 = vmatprep.mubr.msk.bf16.mxu0 %vm281_vm1, %v1218_v4  ;;  %1168 = vmatprep.mubr.msk.bf16.mxu1 %vm281_vm1, %v1219_v5  ;;  %v1225_v13 = vld [vmem:[%s1953_s0 + $0x98] sm:$0xff]   ;;  %v1226_v14 = vld [vmem:[%s1953_s0 + $0x20] sm:$0xff]   ;;  %v1228_v16 = vld [vmem:[%s1953_s0 + $0x28] sm:$0xff]  }
   0x6   :  { %v1227_v15 = vld [vmem:[%s1953_s0 + $0xa0] sm:$0xff]   ;;  %v1229_v17 = vld [vmem:[%s1953_s0 + $0xa8] sm:$0xff]   ;;  %v1230_v18 = vld [vmem:[%s1953_s0 + $0x30] sm:$0xff]  }
   0x7   :  { %1129 = vmatpush3.bf16.msra.mxu0 %v1214_v1  ;;  %1206 = vmatpush3.bf16.msra.mxu1 %v1214_v1  ;;  %v1231_v19 = vld [vmem:[%s1953_s0 + $0xb0] sm:$0xff]   ;;  %v1232_v20 = vld [vmem:[%s1953_s0 + $0x38] sm:$0xff]   ;;  %v1234_v22 = vld [vmem:[%s1953_s0 + $0x40] sm:$0xff]  }
   0x8   :  { %1130 = vmatprep.subr.bf16.mxu0 %v1215_v3  ;;  %1202 = vmatprep.subr.bf16.mxu1 %v1215_v3  ;;  %v1233_v21 = vld [vmem:[%s1953_s0 + $0xb8] sm:$0xff]   ;;  %v1235_v23 = vld [vmem:[%s1953_s0 + $0xc0] sm:$0xff]   ;;  %v1236_v24 = vld [vmem:[%s1953_s0 + $0x48] sm:$0xff]  }
   0x9   :  { %v1237_v25 = vld [vmem:[%s1953_s0 + $0xc8] sm:$0xff]   ;;  %v1238_v26 = vld [vmem:[%s1953_s0 + $0x50] sm:$0xff]   ;;  %v1240_v28 = vld [vmem:[%s1953_s0 + $0x58] sm:$0xff]  }
   0xa   :  { %v1239_v27 = vld [vmem:[%s1953_s0 + $0xd0] sm:$0xff]   ;;  %v1241_v29 = vld [vmem:[%s1953_s0 + $0xd8] sm:$0xff]   ;;  %v1242_v30 = vld [vmem:[%s1953_s0 + $0x60] sm:$0xff]  }
   0xb   :  { %1131 = vmatpush3.bf16.msra.mxu0 %v1215_v3  ;;  %1207 = vmatpush3.bf16.msra.mxu1 %v1215_v3  ;;  %v1243_v31 = vld [vmem:[%s1953_s0 + $0xe0] sm:$0xff]   ;;  %v1244_v32 = vld [vmem:[%s1953_s0 + $0x68] sm:$0xff]   ;;  %v1246_v34 = vld [vmem:[%s1953_s0 + $0x70] sm:$0xff]  }
   0xc   :  { %1132 = vmatprep.subr.bf16.mxu0 %v1216_v6  ;;  %1203 = vmatprep.subr.bf16.mxu1 %v1216_v6  ;;  %v1245_v33 = vld [vmem:[%s1953_s0 + $0xe8] sm:$0xff]   ;;  %v1247_v35 = vld [vmem:[%s1953_s0 + $0xf0] sm:$0xff]   ;;  %v1248_v36 = vld [vmem:[%s1953_s0 + $0x78] sm:$0xff]  }
   0xd   :  { %v1249_v37 = vld [vmem:[%s1953_s0 + $0xf8] sm:$0xff]   ;;  %v813_v39 = vld [vmem:[%s1954_s4] sm:$0x1] }
   0xe   :  { %vm814_vm2 = vcmp.gt.f32.partialorder %v813_v39, 0.0  ;;  %v1430_v44 = vld [vmem:[%s1955_s2] ss:$0 sm:$0xff] }
   0xf   :  { %1133 = vmatpush3.bf16.msra.mxu0 %v1216_v6  ;;  %1208 = vmatpush3.bf16.msra.mxu1 %v1216_v6  ;;  %v879_v43 = vsel %vm814_vm2, 1, %v1250_v42  ;;  %v1435_v46 = vld [vmem:[%s1956_s3] ss:$0 sm:$0xff] }
  0x10   :  { %1134 = vmatprep.subr.bf16.mxu0 %v1217_v7  ;;  %1204 = vmatprep.subr.bf16.mxu1 %v1217_v7  ;;  %v1437_v47 = vrot.slane %v879_v43, %v882_v41 }
  0x12   :  { %vm884_vm3 = vcmp.eq.s32.totalorder %v1437_v47, 1 }
  0x13   :  { %1135 = vmatpush3.bf16.msra.mxu0 %v1217_v7  ;;  %1209 = vmatpush3.bf16.msra.mxu1 %v1217_v7 }
  0x16   :  { %1137 = vmatmul.mubr.msk.bf16.vlgmr.msra.gmra.mxu0 %vm281_vm1, %v1220_v8  ;;  %1169 = vmatmul.mubr.msk.bf16.vlgmr.msra.gmra.mxu1 %vm281_vm1, %v1221_v9 }
  0x17   :  { %1140 = vmatprep.mubr.msk.bf16.mxu0 %vm281_vm1, %v1222_v10  ;;  %1172 = vmatprep.mubr.msk.bf16.mxu1 %vm281_vm1, %v1223_v11 }
  0x1e   :  { %1141 = vmatmul.mubr.msk.bf16.gmra.mxu0 %vm281_vm1, %v1224_v12  ;;  %1173 = vmatmul.mubr.msk.bf16.gmra.mxu1 %vm281_vm1, %v1225_v13 }
  0x1f   :  { %1144 = vmatprep.mubr.msk.bf16.mxu0 %vm281_vm1, %v1226_v14  ;;  %1176 = vmatprep.mubr.msk.bf16.mxu1 %vm281_vm1, %v1227_v15 }
  0x26   :  { %1145 = vmatmul.mubr.msk.bf16.gmra.mxu0 %vm281_vm1, %v1228_v16  ;;  %1177 = vmatmul.mubr.msk.bf16.gmra.mxu1 %vm281_vm1, %v1229_v17 }
  0x27   :  { %1148 = vmatprep.mubr.msk.bf16.mxu0 %vm281_vm1, %v1230_v18  ;;  %1180 = vmatprep.mubr.msk.bf16.mxu1 %vm281_vm1, %v1231_v19 }
  0x2e   :  { %1149 = vmatmul.mubr.msk.bf16.gmra.mxu0 %vm281_vm1, %v1232_v20  ;;  %1181 = vmatmul.mubr.msk.bf16.gmra.mxu1 %vm281_vm1, %v1233_v21 }
  0x2f   :  { %1152 = vmatprep.mubr.msk.bf16.mxu0 %vm281_vm1, %v1234_v22  ;;  %1184 = vmatprep.mubr.msk.bf16.mxu1 %vm281_vm1, %v1235_v23 }
  0x36   :  { %1153 = vmatmul.mubr.msk.bf16.gmra.mxu0 %vm281_vm1, %v1236_v24  ;;  %1185 = vmatmul.mubr.msk.bf16.gmra.mxu1 %vm281_vm1, %v1237_v25 }
  0x37   :  { %1156 = vmatprep.mubr.msk.bf16.mxu0 %vm281_vm1, %v1238_v26  ;;  %1188 = vmatprep.mubr.msk.bf16.mxu1 %vm281_vm1, %v1239_v27 }
  0x3e   :  { %1157 = vmatmul.mubr.msk.bf16.gmra.mxu0 %vm281_vm1, %v1240_v28  ;;  %1189 = vmatmul.mubr.msk.bf16.gmra.mxu1 %vm281_vm1, %v1241_v29 }
  0x3f   :  { %1160 = vmatprep.mubr.msk.bf16.mxu0 %vm281_vm1, %v1242_v30  ;;  %1192 = vmatprep.mubr.msk.bf16.mxu1 %vm281_vm1, %v1243_v31 }
  0x46   :  { %1161 = vmatmul.mubr.msk.bf16.gmra.mxu0 %vm281_vm1, %v1244_v32  ;;  %1193 = vmatmul.mubr.msk.bf16.gmra.mxu1 %vm281_vm1, %v1245_v33 }
  0x47   :  { %1164 = vmatprep.mubr.msk.bf16.mxu0 %vm281_vm1, %v1246_v34  ;;  %1196 = vmatprep.mubr.msk.bf16.mxu1 %vm281_vm1, %v1247_v35 }
  0x4e   :  { %1165 = vmatmul.mubr.msk.bf16.gmra.mxu0 %vm281_vm1, %v1248_v36  ;;  %1197 = vmatmul.mubr.msk.bf16.gmra.mxu1 %vm281_vm1, %v1249_v37 }
  0xd6   :  { %v1138_v45 = vpop.f32.mrf.mxu0  ;;  %v1170_v48 = vpop.f32.mrf.mxu1 }
  0xd7   :  { %v680_v49 = vmul.f32 %v1138_v45, %v1430_v44  ;;  %v712_v50 = vmul.f32 %v1170_v48, %v1430_v44 }
  0xd8   :  { %v416_v51 = vpop.f32.mrf.mxu0  ;;  %v544_v52 = vpop.f32.mrf.mxu1 }
  0xd9   :  { %v751_v53 = vadd.f32 %v1435_v46, %v680_v49  ;;  %v783_v54 = vadd.f32 %v1435_v46, %v712_v50  ;;  %v678_v55 = vmul.f32 %v1430_v44, %v416_v51  ;;  %v710_v56 = vmul.f32 %v1430_v44, %v544_v52 }
  0xda   :  { %v1139_v57 = vpop.f32.mrf.mxu0  ;;  %v1171_v58 = vpop.f32.mrf.mxu1 }
  0xdb   :  { %v817_v59 = vmax.f32 %v751_v53, 0.0  ;;  %v849_v60 = vmax.f32 %v783_v54, 0.0  ;;  %v749_v61 = vadd.f32 %v1435_v46, %v678_v55  ;;  %v781_v62 = vadd.f32 %v1435_v46, %v710_v56 }
  0xdc   :  { %v681_v63 = vmul.f32 %v1139_v57, %v1430_v44  ;;  %v713_v0 = vmul.f32 %v1171_v58, %v1430_v44  ;;  %v419_v1 = vpop.f32.mrf.mxu0  ;;  %v547_v2 = vpop.f32.mrf.mxu1 }
  0xdd   :  { %v887_v3 = vsel %vm884_vm3, %v817_v59, %v751_v53  ;;  %v919_v4 = vsel %vm884_vm3, %v849_v60, %v783_v54  ;;  %v815_v5 = vmax.f32 %v749_v61, 0.0  ;;  %v847_v6 = vmax.f32 %v781_v62, 0.0 }
  0xde   :  { %952 = vst.msk [vmem:[%s1957_s5 + $0x10] sm:$0xff] %vm949_vm4, %v887_v3  ;;  %984 = vst.msk [vmem:[%s1957_s5 + $0x110] sm:$0xff] %vm949_vm4, %v919_v4  ;;  %v752_v7 = vadd.f32 %v1435_v46, %v681_v63  ;;  %v784_v8 = vadd.f32 %v1435_v46, %v713_v0  ;;  %v679_v9 = vmul.f32 %v1430_v44, %v419_v1  ;;  %v1142_v11 = vpop.f32.mrf.mxu0  ;;  %v1174_v12 = vpop.f32.mrf.mxu1 }
  0xdf   :  { %v711_v10 = vmul.f32 %v1430_v44, %v547_v2  ;;  %v885_v13 = vsel %vm884_vm3, %v815_v5, %v749_v61  ;;  %v917_v14 = vsel %vm884_vm3, %v847_v6, %v781_v62  ;;  %v684_v15 = vmul.f32 %v1142_v11, %v1430_v44 }
  0xe0   :  { %v716_v16 = vmul.f32 %v1174_v12, %v1430_v44  ;;  %950 = vst.msk [vmem:[%s1957_s5] sm:$0xff] %vm949_vm4, %v885_v13  ;;  %982 = vst.msk [vmem:[%s1957_s5 + $0x100] sm:$0xff] %vm949_vm4, %v917_v14  ;;  %v818_v17 = vmax.f32 %v752_v7, 0.0  ;;  %v850_v18 = vmax.f32 %v784_v8, 0.0  ;;  %v750_v19 = vadd.f32 %v1435_v46, %v679_v9  ;;  %v432_v21 = vpop.f32.mrf.mxu0  ;;  %v560_v22 = vpop.f32.mrf.mxu1 }
  0xe1   :  { %v782_v20 = vadd.f32 %v1435_v46, %v711_v10  ;;  %v755_v23 = vadd.f32 %v1435_v46, %v684_v15  ;;  %v682_v25 = vmul.f32 %v1430_v44, %v432_v21  ;;  %v714_v26 = vmul.f32 %v1430_v44, %v560_v22 }
  0xe2   :  { %v787_v24 = vadd.f32 %v1435_v46, %v716_v16  ;;  %v888_v27 = vsel %vm884_vm3, %v818_v17, %v752_v7  ;;  %v920_v28 = vsel %vm884_vm3, %v850_v18, %v784_v8  ;;  %v816_v29 = vmax.f32 %v750_v19, 0.0  ;;  %v1143_v31 = vpop.f32.mrf.mxu0  ;;  %v1175_v32 = vpop.f32.mrf.mxu1 }
  0xe3   :  { %v848_v30 = vmax.f32 %v782_v20, 0.0  ;;  %953 = vst.msk [vmem:[%s1957_s5 + $0x18] sm:$0xff] %vm949_vm4, %v888_v27  ;;  %985 = vst.msk [vmem:[%s1957_s5 + $0x118] sm:$0xff] %vm949_vm4, %v920_v28  ;;  %v821_v33 = vmax.f32 %v755_v23, 0.0  ;;  %v753_v35 = vadd.f32 %v1435_v46, %v682_v25  ;;  %v785_v36 = vadd.f32 %v1435_v46, %v714_v26 }
  0xe4   :  { %v853_v34 = vmax.f32 %v787_v24, 0.0  ;;  %v886_v37 = vsel %vm884_vm3, %v816_v29, %v750_v19  ;;  %v685_v39 = vmul.f32 %v1143_v31, %v1430_v44  ;;  %v717_v40 = vmul.f32 %v1175_v32, %v1430_v44  ;;  %v435_v41 = vpop.f32.mrf.mxu0  ;;  %v563_v42 = vpop.f32.mrf.mxu1 }
  0xe5   :  { %v918_v38 = vsel %vm884_vm3, %v848_v30, %v782_v20  ;;  %951 = vst.msk [vmem:[%s1957_s5 + $0x8] sm:$0xff] %vm949_vm4, %v886_v37  ;;  %v891_v43 = vsel %vm884_vm3, %v821_v33, %v755_v23  ;;  %v819_v48 = vmax.f32 %v753_v35, 0.0  ;;  %v851_v49 = vmax.f32 %v785_v36, 0.0 }
  0xe6   :  { %983 = vst.msk [vmem:[%s1957_s5 + $0x108] sm:$0xff] %vm949_vm4, %v918_v38  ;;  %v923_v45 = vsel %vm884_vm3, %v853_v34, %v787_v24  ;;  %956 = vst.msk [vmem:[%s1957_s5 + $0x30] sm:$0xff] %vm949_vm4, %v891_v43  ;;  %v756_v50 = vadd.f32 %v1435_v46, %v685_v39  ;;  %v788_v51 = vadd.f32 %v1435_v46, %v717_v40  ;;  %v1146_v54 = vpop.f32.mrf.mxu0  ;;  %v1178_v55 = vpop.f32.mrf.mxu1 }
  0xe7   :  { %988 = vst.msk [vmem:[%s1957_s5 + $0x130] sm:$0xff] %vm949_vm4, %v923_v45  ;;  %v683_v52 = vmul.f32 %v1430_v44, %v435_v41  ;;  %v715_v53 = vmul.f32 %v1430_v44, %v563_v42  ;;  %v889_v56 = vsel %vm884_vm3, %v819_v48, %v753_v35  ;;  %v921_v57 = vsel %vm884_vm3, %v851_v49, %v785_v36 }
  0xe8   :  { %v688_v58 = vmul.f32 %v1146_v54, %v1430_v44  ;;  %v720_v59 = vmul.f32 %v1178_v55, %v1430_v44  ;;  %954 = vst.msk [vmem:[%s1957_s5 + $0x20] sm:$0xff] %vm949_vm4, %v889_v56  ;;  %986 = vst.msk [vmem:[%s1957_s5 + $0x120] sm:$0xff] %vm949_vm4, %v921_v57  ;;  %v822_v60 = vmax.f32 %v756_v50, 0.0  ;;  %v854_v61 = vmax.f32 %v788_v51, 0.0  ;;  %v448_v0 = vpop.f32.mrf.mxu0  ;;  %v576_v1 = vpop.f32.mrf.mxu1 }
  0xe9   :  { %v754_v62 = vadd.f32 %v1435_v46, %v683_v52  ;;  %v786_v63 = vadd.f32 %v1435_v46, %v715_v53  ;;  %v686_v4 = vmul.f32 %v1430_v44, %v448_v0  ;;  %v718_v5 = vmul.f32 %v1430_v44, %v576_v1 }
  0xea   :  { %v759_v2 = vadd.f32 %v1435_v46, %v688_v58  ;;  %v791_v3 = vadd.f32 %v1435_v46, %v720_v59  ;;  %v892_v6 = vsel %vm884_vm3, %v822_v60, %v756_v50  ;;  %v924_v7 = vsel %vm884_vm3, %v854_v61, %v788_v51  ;;  %v1147_v10 = vpop.f32.mrf.mxu0  ;;  %v1179_v11 = vpop.f32.mrf.mxu1 }
  0xeb   :  { %v820_v8 = vmax.f32 %v754_v62, 0.0  ;;  %v852_v9 = vmax.f32 %v786_v63, 0.0  ;;  %957 = vst.msk [vmem:[%s1957_s5 + $0x38] sm:$0xff] %vm949_vm4, %v892_v6  ;;  %989 = vst.msk [vmem:[%s1957_s5 + $0x138] sm:$0xff] %vm949_vm4, %v924_v7  ;;  %v757_v14 = vadd.f32 %v1435_v46, %v686_v4  ;;  %v789_v15 = vadd.f32 %v1435_v46, %v718_v5 }
  0xec   :  { %v825_v12 = vmax.f32 %v759_v2, 0.0  ;;  %v857_v13 = vmax.f32 %v791_v3, 0.0  ;;  %v689_v18 = vmul.f32 %v1147_v10, %v1430_v44  ;;  %v721_v19 = vmul.f32 %v1179_v11, %v1430_v44  ;;  %v451_v20 = vpop.f32.mrf.mxu0  ;;  %v579_v21 = vpop.f32.mrf.mxu1 }
  0xed   :  { %v890_v16 = vsel %vm884_vm3, %v820_v8, %v754_v62  ;;  %v922_v17 = vsel %vm884_vm3, %v852_v9, %v786_v63  ;;  %v823_v24 = vmax.f32 %v757_v14, 0.0  ;;  %v855_v25 = vmax.f32 %v789_v15, 0.0 }
  0xee   :  { %955 = vst.msk [vmem:[%s1957_s5 + $0x28] sm:$0xff] %vm949_vm4, %v890_v16  ;;  %987 = vst.msk [vmem:[%s1957_s5 + $0x128] sm:$0xff] %vm949_vm4, %v922_v17  ;;  %v895_v22 = vsel %vm884_vm3, %v825_v12, %v759_v2  ;;  %v927_v23 = vsel %vm884_vm3, %v857_v13, %v791_v3  ;;  %v760_v26 = vadd.f32 %v1435_v46, %v689_v18  ;;  %v1150_v30 = vpop.f32.mrf.mxu0  ;;  %v1182_v31 = vpop.f32.mrf.mxu1 }
  0xef   :  { %960 = vst.msk [vmem:[%s1957_s5 + $0x50] sm:$0xff] %vm949_vm4, %v895_v22  ;;  %992 = vst.msk [vmem:[%s1957_s5 + $0x150] sm:$0xff] %vm949_vm4, %v927_v23  ;;  %v792_v27 = vadd.f32 %v1435_v46, %v721_v19  ;;  %v687_v28 = vmul.f32 %v1430_v44, %v451_v20  ;;  %v719_v29 = vmul.f32 %v1430_v44, %v579_v21 }
  0xf0   :  { %v893_v32 = vsel %vm884_vm3, %v823_v24, %v757_v14  ;;  %v925_v33 = vsel %vm884_vm3, %v855_v25, %v789_v15  ;;  %v692_v34 = vmul.f32 %v1150_v30, %v1430_v44  ;;  %v724_v35 = vmul.f32 %v1182_v31, %v1430_v44  ;;  %v464_v40 = vpop.f32.mrf.mxu0  ;;  %v592_v41 = vpop.f32.mrf.mxu1 }
  0xf1   :  { %958 = vst.msk [vmem:[%s1957_s5 + $0x40] sm:$0xff] %vm949_vm4, %v893_v32  ;;  %990 = vst.msk [vmem:[%s1957_s5 + $0x140] sm:$0xff] %vm949_vm4, %v925_v33  ;;  %v826_v36 = vmax.f32 %v760_v26, 0.0  ;;  %v858_v37 = vmax.f32 %v792_v27, 0.0  ;;  %v758_v38 = vadd.f32 %v1435_v46, %v687_v28  ;;  %v790_v39 = vadd.f32 %v1435_v46, %v719_v29 }
  0xf2   :  { %v763_v42 = vadd.f32 %v1435_v46, %v692_v34  ;;  %v795_v43 = vadd.f32 %v1435_v46, %v724_v35  ;;  %v690_v45 = vmul.f32 %v1430_v44, %v464_v40  ;;  %v722_v48 = vmul.f32 %v1430_v44, %v592_v41  ;;  %v1151_v53 = vpop.f32.mrf.mxu0  ;;  %v1183_v54 = vpop.f32.mrf.mxu1 }
  0xf3   :  { %v896_v49 = vsel %vm884_vm3, %v826_v36, %v760_v26  ;;  %v928_v50 = vsel %vm884_vm3, %v858_v37, %v792_v27  ;;  %v824_v51 = vmax.f32 %v758_v38, 0.0  ;;  %v856_v52 = vmax.f32 %v790_v39, 0.0 }
  0xf4   :  { %961 = vst.msk [vmem:[%s1957_s5 + $0x58] sm:$0xff] %vm949_vm4, %v896_v49  ;;  %993 = vst.msk [vmem:[%s1957_s5 + $0x158] sm:$0xff] %vm949_vm4, %v928_v50  ;;  %v829_v55 = vmax.f32 %v763_v42, 0.0  ;;  %v861_v56 = vmax.f32 %v795_v43, 0.0  ;;  %v761_v57 = vadd.f32 %v1435_v46, %v690_v45  ;;  %v793_v58 = vadd.f32 %v1435_v46, %v722_v48  ;;  %v467_v63 = vpop.f32.mrf.mxu0  ;;  %v595_v0 = vpop.f32.mrf.mxu1 }
  0xf5   :  { %v894_v59 = vsel %vm884_vm3, %v824_v51, %v758_v38  ;;  %v926_v60 = vsel %vm884_vm3, %v856_v52, %v790_v39  ;;  %v693_v61 = vmul.f32 %v1151_v53, %v1430_v44  ;;  %v725_v62 = vmul.f32 %v1183_v54, %v1430_v44 }
  0xf6   :  { %959 = vst.msk [vmem:[%s1957_s5 + $0x48] sm:$0xff] %vm949_vm4, %v894_v59  ;;  %991 = vst.msk [vmem:[%s1957_s5 + $0x148] sm:$0xff] %vm949_vm4, %v926_v60  ;;  %v899_v1 = vsel %vm884_vm3, %v829_v55, %v763_v42  ;;  %v931_v2 = vsel %vm884_vm3, %v861_v56, %v795_v43  ;;  %v827_v3 = vmax.f32 %v761_v57, 0.0  ;;  %v859_v4 = vmax.f32 %v793_v58, 0.0  ;;  %v1154_v9 = vpop.f32.mrf.mxu0  ;;  %v1186_v10 = vpop.f32.mrf.mxu1 }
  0xf7   :  { %964 = vst.msk [vmem:[%s1957_s5 + $0x70] sm:$0xff] %vm949_vm4, %v899_v1  ;;  %996 = vst.msk [vmem:[%s1957_s5 + $0x170] sm:$0xff] %vm949_vm4, %v931_v2  ;;  %v764_v5 = vadd.f32 %v1435_v46, %v693_v61  ;;  %v796_v6 = vadd.f32 %v1435_v46, %v725_v62  ;;  %v691_v7 = vmul.f32 %v1430_v44, %v467_v63 }
  0xf8   :  { %v723_v8 = vmul.f32 %v1430_v44, %v595_v0  ;;  %v897_v11 = vsel %vm884_vm3, %v827_v3, %v761_v57  ;;  %v929_v12 = vsel %vm884_vm3, %v859_v4, %v793_v58  ;;  %v696_v13 = vmul.f32 %v1154_v9, %v1430_v44  ;;  %v480_v19 = vpop.f32.mrf.mxu0  ;;  %v608_v20 = vpop.f32.mrf.mxu1 }
  0xf9   :  { %v728_v14 = vmul.f32 %v1186_v10, %v1430_v44  ;;  %962 = vst.msk [vmem:[%s1957_s5 + $0x60] sm:$0xff] %vm949_vm4, %v897_v11  ;;  %994 = vst.msk [vmem:[%s1957_s5 + $0x160] sm:$0xff] %vm949_vm4, %v929_v12  ;;  %v830_v15 = vmax.f32 %v764_v5, 0.0  ;;  %v862_v16 = vmax.f32 %v796_v6, 0.0  ;;  %v762_v17 = vadd.f32 %v1435_v46, %v691_v7 }
  0xfa   :  { %v794_v18 = vadd.f32 %v1435_v46, %v723_v8  ;;  %v767_v21 = vadd.f32 %v1435_v46, %v696_v13  ;;  %v694_v23 = vmul.f32 %v1430_v44, %v480_v19  ;;  %v726_v24 = vmul.f32 %v1430_v44, %v608_v20  ;;  %v1155_v29 = vpop.f32.mrf.mxu0  ;;  %v1187_v30 = vpop.f32.mrf.mxu1 }
  0xfb   :  { %v799_v22 = vadd.f32 %v1435_v46, %v728_v14  ;;  %v900_v25 = vsel %vm884_vm3, %v830_v15, %v764_v5  ;;  %v932_v26 = vsel %vm884_vm3, %v862_v16, %v796_v6  ;;  %v828_v27 = vmax.f32 %v762_v17, 0.0 }
  0xfc   :  { %v860_v28 = vmax.f32 %v794_v18, 0.0  ;;  %965 = vst.msk [vmem:[%s1957_s5 + $0x78] sm:$0xff] %vm949_vm4, %v900_v25  ;;  %997 = vst.msk [vmem:[%s1957_s5 + $0x178] sm:$0xff] %vm949_vm4, %v932_v26  ;;  %v833_v31 = vmax.f32 %v767_v21, 0.0  ;;  %v765_v33 = vadd.f32 %v1435_v46, %v694_v23  ;;  %v797_v34 = vadd.f32 %v1435_v46, %v726_v24  ;;  %v483_v39 = vpop.f32.mrf.mxu0  ;;  %v611_v40 = vpop.f32.mrf.mxu1 }
  0xfd   :  { %v865_v32 = vmax.f32 %v799_v22, 0.0  ;;  %v898_v35 = vsel %vm884_vm3, %v828_v27, %v762_v17  ;;  %v697_v37 = vmul.f32 %v1155_v29, %v1430_v44  ;;  %v729_v38 = vmul.f32 %v1187_v30, %v1430_v44 }
  0xfe   :  { %v930_v36 = vsel %vm884_vm3, %v860_v28, %v794_v18  ;;  %963 = vst.msk [vmem:[%s1957_s5 + $0x68] sm:$0xff] %vm949_vm4, %v898_v35  ;;  %v903_v41 = vsel %vm884_vm3, %v833_v31, %v767_v21  ;;  %v831_v43 = vmax.f32 %v765_v33, 0.0  ;;  %v863_v45 = vmax.f32 %v797_v34, 0.0  ;;  %v1158_v52 = vpop.f32.mrf.mxu0  ;;  %v1190_v53 = vpop.f32.mrf.mxu1 }
  0xff   :  { %995 = vst.msk [vmem:[%s1957_s5 + $0x168] sm:$0xff] %vm949_vm4, %v930_v36  ;;  %v935_v42 = vsel %vm884_vm3, %v865_v32, %v799_v22  ;;  %968 = vst.msk [vmem:[%s1957_s5 + $0x90] sm:$0xff] %vm949_vm4, %v903_v41  ;;  %v768_v48 = vadd.f32 %v1435_v46, %v697_v37  ;;  %v800_v49 = vadd.f32 %v1435_v46, %v729_v38 }
 0x100   :  { %1000 = vst.msk [vmem:[%s1957_s5 + $0x190] sm:$0xff] %vm949_vm4, %v935_v42  ;;  %v695_v50 = vmul.f32 %v1430_v44, %v483_v39  ;;  %v727_v51 = vmul.f32 %v1430_v44, %v611_v40  ;;  %v901_v54 = vsel %vm884_vm3, %v831_v43, %v765_v33  ;;  %v933_v55 = vsel %vm884_vm3, %v863_v45, %v797_v34  ;;  %v496_v62 = vpop.f32.mrf.mxu0  ;;  %v624_v63 = vpop.f32.mrf.mxu1 }
 0x101   :  { %v700_v56 = vmul.f32 %v1158_v52, %v1430_v44  ;;  %v732_v57 = vmul.f32 %v1190_v53, %v1430_v44  ;;  %966 = vst.msk [vmem:[%s1957_s5 + $0x80] sm:$0xff] %vm949_vm4, %v901_v54  ;;  %998 = vst.msk [vmem:[%s1957_s5 + $0x180] sm:$0xff] %vm949_vm4, %v933_v55  ;;  %v834_v58 = vmax.f32 %v768_v48, 0.0  ;;  %v866_v59 = vmax.f32 %v800_v49, 0.0 }
 0x102   :  { %v766_v60 = vadd.f32 %v1435_v46, %v695_v50  ;;  %v798_v61 = vadd.f32 %v1435_v46, %v727_v51  ;;  %v698_v2 = vmul.f32 %v1430_v44, %v496_v62  ;;  %v730_v3 = vmul.f32 %v1430_v44, %v624_v63  ;;  %v1159_v8 = vpop.f32.mrf.mxu0  ;;  %v1191_v9 = vpop.f32.mrf.mxu1 }
 0x103   :  { %v771_v0 = vadd.f32 %v1435_v46, %v700_v56  ;;  %v803_v1 = vadd.f32 %v1435_v46, %v732_v57  ;;  %v904_v4 = vsel %vm884_vm3, %v834_v58, %v768_v48  ;;  %v936_v5 = vsel %vm884_vm3, %v866_v59, %v800_v49 }
 0x104   :  { %v832_v6 = vmax.f32 %v766_v60, 0.0  ;;  %v864_v7 = vmax.f32 %v798_v61, 0.0  ;;  %969 = vst.msk [vmem:[%s1957_s5 + $0x98] sm:$0xff] %vm949_vm4, %v904_v4  ;;  %1001 = vst.msk [vmem:[%s1957_s5 + $0x198] sm:$0xff] %vm949_vm4, %v936_v5  ;;  %v769_v12 = vadd.f32 %v1435_v46, %v698_v2  ;;  %v801_v13 = vadd.f32 %v1435_v46, %v730_v3  ;;  %v499_v18 = vpop.f32.mrf.mxu0  ;;  %v627_v19 = vpop.f32.mrf.mxu1 }
 0x105   :  { %v837_v10 = vmax.f32 %v771_v0, 0.0  ;;  %v869_v11 = vmax.f32 %v803_v1, 0.0  ;;  %v701_v16 = vmul.f32 %v1159_v8, %v1430_v44  ;;  %v733_v17 = vmul.f32 %v1191_v9, %v1430_v44 }
 0x106   :  { %v902_v14 = vsel %vm884_vm3, %v832_v6, %v766_v60  ;;  %v934_v15 = vsel %vm884_vm3, %v864_v7, %v798_v61  ;;  %v835_v22 = vmax.f32 %v769_v12, 0.0  ;;  %v867_v23 = vmax.f32 %v801_v13, 0.0  ;;  %v1162_v28 = vpop.f32.mrf.mxu0  ;;  %v1194_v29 = vpop.f32.mrf.mxu1 }
 0x107   :  { %967 = vst.msk [vmem:[%s1957_s5 + $0x88] sm:$0xff] %vm949_vm4, %v902_v14  ;;  %999 = vst.msk [vmem:[%s1957_s5 + $0x188] sm:$0xff] %vm949_vm4, %v934_v15  ;;  %v907_v20 = vsel %vm884_vm3, %v837_v10, %v771_v0  ;;  %v939_v21 = vsel %vm884_vm3, %v869_v11, %v803_v1  ;;  %v772_v24 = vadd.f32 %v1435_v46, %v701_v16 }
 0x108   :  { %972 = vst.msk [vmem:[%s1957_s5 + $0xb0] sm:$0xff] %vm949_vm4, %v907_v20  ;;  %1004 = vst.msk [vmem:[%s1957_s5 + $0x1b0] sm:$0xff] %vm949_vm4, %v939_v21  ;;  %v804_v25 = vadd.f32 %v1435_v46, %v733_v17  ;;  %v699_v26 = vmul.f32 %v1430_v44, %v499_v18  ;;  %v731_v27 = vmul.f32 %v1430_v44, %v627_v19  ;;  %v512_v38 = vpop.f32.mrf.mxu0  ;;  %v640_v39 = vpop.f32.mrf.mxu1 }
 0x109   :  { %v905_v30 = vsel %vm884_vm3, %v835_v22, %v769_v12  ;;  %v937_v31 = vsel %vm884_vm3, %v867_v23, %v801_v13  ;;  %v704_v32 = vmul.f32 %v1162_v28, %v1430_v44  ;;  %v736_v33 = vmul.f32 %v1194_v29, %v1430_v44 }
 0x10a   :  { %970 = vst.msk [vmem:[%s1957_s5 + $0xa0] sm:$0xff] %vm949_vm4, %v905_v30  ;;  %1002 = vst.msk [vmem:[%s1957_s5 + $0x1a0] sm:$0xff] %vm949_vm4, %v937_v31  ;;  %v838_v34 = vmax.f32 %v772_v24, 0.0  ;;  %v870_v35 = vmax.f32 %v804_v25, 0.0  ;;  %v770_v36 = vadd.f32 %v1435_v46, %v699_v26  ;;  %v802_v37 = vadd.f32 %v1435_v46, %v731_v27  ;;  %v1163_v51 = vpop.f32.mrf.mxu0  ;;  %v1195_v52 = vpop.f32.mrf.mxu1 }
 0x10b   :  { %v775_v40 = vadd.f32 %v1435_v46, %v704_v32  ;;  %v807_v41 = vadd.f32 %v1435_v46, %v736_v33  ;;  %v702_v42 = vmul.f32 %v1430_v44, %v512_v38  ;;  %v734_v43 = vmul.f32 %v1430_v44, %v640_v39 }
 0x10c   :  { %v908_v45 = vsel %vm884_vm3, %v838_v34, %v772_v24  ;;  %v940_v48 = vsel %vm884_vm3, %v870_v35, %v804_v25  ;;  %v836_v49 = vmax.f32 %v770_v36, 0.0  ;;  %v868_v50 = vmax.f32 %v802_v37, 0.0  ;;  %v515_v61 = vpop.f32.mrf.mxu0  ;;  %v643_v62 = vpop.f32.mrf.mxu1 }
 0x10d   :  { %973 = vst.msk [vmem:[%s1957_s5 + $0xb8] sm:$0xff] %vm949_vm4, %v908_v45  ;;  %1005 = vst.msk [vmem:[%s1957_s5 + $0x1b8] sm:$0xff] %vm949_vm4, %v940_v48  ;;  %v841_v53 = vmax.f32 %v775_v40, 0.0  ;;  %v873_v54 = vmax.f32 %v807_v41, 0.0  ;;  %v773_v55 = vadd.f32 %v1435_v46, %v702_v42  ;;  %v805_v56 = vadd.f32 %v1435_v46, %v734_v43 }
 0x10e   :  { %v906_v57 = vsel %vm884_vm3, %v836_v49, %v770_v36  ;;  %v938_v58 = vsel %vm884_vm3, %v868_v50, %v802_v37  ;;  %v705_v59 = vmul.f32 %v1163_v51, %v1430_v44  ;;  %v737_v60 = vmul.f32 %v1195_v52, %v1430_v44  ;;  %v1166_v7 = vpop.f32.mrf.mxu0  ;;  %v1198_v8 = vpop.f32.mrf.mxu1 }
 0x10f   :  { %971 = vst.msk [vmem:[%s1957_s5 + $0xa8] sm:$0xff] %vm949_vm4, %v906_v57  ;;  %1003 = vst.msk [vmem:[%s1957_s5 + $0x1a8] sm:$0xff] %vm949_vm4, %v938_v58  ;;  %v911_v63 = vsel %vm884_vm3, %v841_v53, %v775_v40  ;;  %v943_v0 = vsel %vm884_vm3, %v873_v54, %v807_v41  ;;  %v839_v1 = vmax.f32 %v773_v55, 0.0  ;;  %v871_v2 = vmax.f32 %v805_v56, 0.0 }
 0x110   :  { %976 = vst.msk [vmem:[%s1957_s5 + $0xd0] sm:$0xff] %vm949_vm4, %v911_v63  ;;  %1008 = vst.msk [vmem:[%s1957_s5 + $0x1d0] sm:$0xff] %vm949_vm4, %v943_v0  ;;  %v776_v3 = vadd.f32 %v1435_v46, %v705_v59  ;;  %v808_v4 = vadd.f32 %v1435_v46, %v737_v60  ;;  %v703_v5 = vmul.f32 %v1430_v44, %v515_v61  ;;  %v528_v17 = vpop.f32.mrf.mxu0  ;;  %v656_v18 = vpop.f32.mrf.mxu1 }
 0x111   :  { %v735_v6 = vmul.f32 %v1430_v44, %v643_v62  ;;  %v909_v9 = vsel %vm884_vm3, %v839_v1, %v773_v55  ;;  %v941_v10 = vsel %vm884_vm3, %v871_v2, %v805_v56  ;;  %v708_v11 = vmul.f32 %v1166_v7, %v1430_v44 }
 0x112   :  { %v740_v12 = vmul.f32 %v1198_v8, %v1430_v44  ;;  %974 = vst.msk [vmem:[%s1957_s5 + $0xc0] sm:$0xff] %vm949_vm4, %v909_v9  ;;  %1006 = vst.msk [vmem:[%s1957_s5 + $0x1c0] sm:$0xff] %vm949_vm4, %v941_v10  ;;  %v842_v13 = vmax.f32 %v776_v3, 0.0  ;;  %v874_v14 = vmax.f32 %v808_v4, 0.0  ;;  %v774_v15 = vadd.f32 %v1435_v46, %v703_v5  ;;  %v1167_v27 = vpop.f32.mrf.mxu0  ;;  %v1199_v28 = vpop.f32.mrf.mxu1 }
 0x113   :  { %v806_v16 = vadd.f32 %v1435_v46, %v735_v6  ;;  %v779_v19 = vadd.f32 %v1435_v46, %v708_v11  ;;  %v706_v21 = vmul.f32 %v1430_v44, %v528_v17  ;;  %v738_v22 = vmul.f32 %v1430_v44, %v656_v18 }
 0x114   :  { %v811_v20 = vadd.f32 %v1435_v46, %v740_v12  ;;  %v912_v23 = vsel %vm884_vm3, %v842_v13, %v776_v3  ;;  %v944_v24 = vsel %vm884_vm3, %v874_v14, %v808_v4  ;;  %v840_v25 = vmax.f32 %v774_v15, 0.0  ;;  %v531_v37 = vpop.f32.mrf.mxu0  ;;  %v659_v38 = vpop.f32.mrf.mxu1 }
 0x115   :  { %v872_v26 = vmax.f32 %v806_v16, 0.0  ;;  %977 = vst.msk [vmem:[%s1957_s5 + $0xd8] sm:$0xff] %vm949_vm4, %v912_v23  ;;  %1009 = vst.msk [vmem:[%s1957_s5 + $0x1d8] sm:$0xff] %vm949_vm4, %v944_v24  ;;  %v845_v29 = vmax.f32 %v779_v19, 0.0  ;;  %v777_v31 = vadd.f32 %v1435_v46, %v706_v21  ;;  %v809_v32 = vadd.f32 %v1435_v46, %v738_v22 }
 0x116   :  { %v877_v30 = vmax.f32 %v811_v20, 0.0  ;;  %v910_v33 = vsel %vm884_vm3, %v840_v25, %v774_v15  ;;  %v709_v35 = vmul.f32 %v1167_v27, %v1430_v44  ;;  %v741_v36 = vmul.f32 %v1199_v28, %v1430_v44 }
 0x117   :  { %v942_v34 = vsel %vm884_vm3, %v872_v26, %v806_v16  ;;  %975 = vst.msk [vmem:[%s1957_s5 + $0xc8] sm:$0xff] %vm949_vm4, %v910_v33  ;;  %v915_v39 = vsel %vm884_vm3, %v845_v29, %v779_v19  ;;  %v843_v41 = vmax.f32 %v777_v31, 0.0  ;;  %v875_v42 = vmax.f32 %v809_v32, 0.0 }
 0x118   :  { %1007 = vst.msk [vmem:[%s1957_s5 + $0x1c8] sm:$0xff] %vm949_vm4, %v942_v34  ;;  %v947_v40 = vsel %vm884_vm3, %v877_v30, %v811_v20  ;;  %980 = vst.msk [vmem:[%s1957_s5 + $0xf0] sm:$0xff] %vm949_vm4, %v915_v39  ;;  %v780_v43 = vadd.f32 %v1435_v46, %v709_v35  ;;  %v812_v45 = vadd.f32 %v1435_v46, %v741_v36 }
 0x119   :  { %1012 = vst.msk [vmem:[%s1957_s5 + $0x1f0] sm:$0xff] %vm949_vm4, %v947_v40  ;;  %v707_v48 = vmul.f32 %v1430_v44, %v531_v37  ;;  %v739_v49 = vmul.f32 %v1430_v44, %v659_v38  ;;  %v913_v50 = vsel %vm884_vm3, %v843_v41, %v777_v31  ;;  %v945_v51 = vsel %vm884_vm3, %v875_v42, %v809_v32 }
 0x11a   :  { %978 = vst.msk [vmem:[%s1957_s5 + $0xe0] sm:$0xff] %vm949_vm4, %v913_v50  ;;  %1010 = vst.msk [vmem:[%s1957_s5 + $0x1e0] sm:$0xff] %vm949_vm4, %v945_v51  ;;  %v846_v52 = vmax.f32 %v780_v43, 0.0  ;;  %v878_v53 = vmax.f32 %v812_v45, 0.0 }
 0x11b   :  { %v778_v44 = vadd.f32 %v1435_v46, %v707_v48  ;;  %v810_v54 = vadd.f32 %v1435_v46, %v739_v49 }
 0x11c   :  { %v916_v55 = vsel %vm884_vm3, %v846_v52, %v780_v43  ;;  %v948_v56 = vsel %vm884_vm3, %v878_v53, %v812_v45 }
 0x11d   :  { %v844_v57 = vmax.f32 %v778_v44, 0.0  ;;  %v876_v58 = vmax.f32 %v810_v54, 0.0  ;;  %981 = vst.msk [vmem:[%s1957_s5 + $0xf8] sm:$0xff] %vm949_vm4, %v916_v55  ;;  %1013 = vst.msk [vmem:[%s1957_s5 + $0x1f8] sm:$0xff] %vm949_vm4, %v948_v56 }
 0x11f   :  { %v914_v46 = vsel %vm884_vm3, %v844_v57, %v778_v44  ;;  %v946_v59 = vsel %vm884_vm3, %v876_v58, %v810_v54 }
 0x120   :  { %979 = vst.msk [vmem:[%s1957_s5 + $0xe8] sm:$0xff] %vm949_vm4, %v914_v46  ;;  %1011 = vst.msk [vmem:[%s1957_s5 + $0x1e8] sm:$0xff] %vm949_vm4, %v946_v59 }

// kernel: forward.59
= control target key start
LH: loop header
LB: loop body
LE: loop exit
PB: predicated region body
PF: predicated region fallthrough
CT: control target
= control target key end

     0   :  { %vm381_vm0 = vcmask 1043456   ;;  %vm284_vm1 = vcmask 588800   ;;  %vm1015_vm2 = vcmask 64512   ;;  %s2149_s1 = inlined_call_operand.vmem [shape: bf16[72,8], index: 1, kind: input, shape index: {}]   ;;  %s2150_s0 = inlined_call_operand.vmem [shape: bf16[512,72], index: 0, kind: input, shape index: {}]   ;;  %s2151_s2 = inlined_call_operand.vmem [shape: f32[1,8], index: 2, kind: input, shape index: {}]   ;;  %s2152_s3 = inlined_call_operand.vmem [shape: f32[1,8], index: 3, kind: input, shape index: {}]   ;;  %s2153_s4 = inlined_call_operand.vmem [shape: f32[512,8], index: 4, kind: input, shape index: {}]   ;;  %s2154_s5 = inlined_call_operand.vmem [shape: f32[1,8], index: 5, kind: input, shape index: {}]   ;;  %s2155_s6 = inlined_call_operand.vmem [shape: f32[512,8], index: 6, kind: output, shape index: {}]  }
   0x1   :  { %v1279_v0 = vld [vmem:[%s2149_s1 + $0x20] ss:$0 sps:$4 sm:$0xff]   ;;  %v1280_v1 = vld [vmem:[%s2149_s1 + $0x18] sm:$0xff]   ;;  %v1281_v3 = vld [vmem:[%s2149_s1 + $0x10] sm:$0xff]  }
   0x2   :  { %1277 = vmatprep.subr.msk.bf16.mxu0 %vm381_vm0, %v1279_v0  ;;  %1278 = vmatprep.subr.msk.bf16.mxu1 %vm381_vm0, %v1279_v0  ;;  %v383_v2 = vsel %vm381_vm0, %v1279_v0, 0  ;;  %v1284_v4 = vld [vmem:[%s2150_s0] sm:$0xff]   ;;  %v1282_v6 = vld [vmem:[%s2149_s1 + $0x8] sm:$0xff]   ;;  %v1288_v10 = vld [vmem:[%s2150_s0 + $0x10] sm:$0xff]  }
   0x3   :  { %1194 = vmatpush3.bf16.msra.mxu0 %v383_v2  ;;  %1272 = vmatpush3.bf16.msra.mxu1 %v383_v2  ;;  %v1285_v5 = vld [vmem:[%s2150_s0 + $0x80] sm:$0xff]   ;;  %v1286_v8 = vld [vmem:[%s2150_s0 + $0x8] sm:$0xff]   ;;  %v1289_v11 = vld [vmem:[%s2150_s0 + $0x90] sm:$0xff]  }
   0x4   :  { %1195 = vmatprep.subr.bf16.mxu0 %v1280_v1  ;;  %1268 = vmatprep.subr.bf16.mxu1 %v1280_v1  ;;  %v1283_v7 = vld [vmem:[%s2149_s1] sm:$0xff]   ;;  %v1287_v9 = vld [vmem:[%s2150_s0 + $0x88] sm:$0xff]   ;;  %v1290_v12 = vld [vmem:[%s2150_s0 + $0x18] sm:$0xff]  }
   0x5   :  { %1203 = vmatprep.mubr.msk.bf16.mxu0 %vm284_vm1, %v1284_v4  ;;  %1235 = vmatprep.mubr.msk.bf16.mxu1 %vm284_vm1, %v1285_v5  ;;  %v1291_v13 = vld [vmem:[%s2150_s0 + $0x98] sm:$0xff]   ;;  %v1292_v14 = vld [vmem:[%s2150_s0 + $0x20] sm:$0xff]   ;;  %v1294_v16 = vld [vmem:[%s2150_s0 + $0x28] sm:$0xff]  }
   0x6   :  { %v1293_v15 = vld [vmem:[%s2150_s0 + $0xa0] sm:$0xff]   ;;  %v1295_v17 = vld [vmem:[%s2150_s0 + $0xa8] sm:$0xff]   ;;  %v1296_v18 = vld [vmem:[%s2150_s0 + $0x30] sm:$0xff]  }
   0x7   :  { %1196 = vmatpush3.bf16.msra.mxu0 %v1280_v1  ;;  %1273 = vmatpush3.bf16.msra.mxu1 %v1280_v1  ;;  %v1297_v19 = vld [vmem:[%s2150_s0 + $0xb0] sm:$0xff]   ;;  %v1298_v20 = vld [vmem:[%s2150_s0 + $0x38] sm:$0xff]   ;;  %v1300_v22 = vld [vmem:[%s2150_s0 + $0x40] sm:$0xff]  }
   0x8   :  { %1197 = vmatprep.subr.bf16.mxu0 %v1281_v3  ;;  %1269 = vmatprep.subr.bf16.mxu1 %v1281_v3  ;;  %v1299_v21 = vld [vmem:[%s2150_s0 + $0xb8] sm:$0xff]   ;;  %v1301_v23 = vld [vmem:[%s2150_s0 + $0xc0] sm:$0xff]   ;;  %v1302_v24 = vld [vmem:[%s2150_s0 + $0x48] sm:$0xff]  }
   0x9   :  { %v1303_v25 = vld [vmem:[%s2150_s0 + $0xc8] sm:$0xff]   ;;  %v1304_v26 = vld [vmem:[%s2150_s0 + $0x50] sm:$0xff]   ;;  %v1306_v28 = vld [vmem:[%s2150_s0 + $0x58] sm:$0xff]  }
   0xa   :  { %v1305_v27 = vld [vmem:[%s2150_s0 + $0xd0] sm:$0xff]   ;;  %v1307_v29 = vld [vmem:[%s2150_s0 + $0xd8] sm:$0xff]   ;;  %v1308_v30 = vld [vmem:[%s2150_s0 + $0x60] sm:$0xff]  }
   0xb   :  { %1198 = vmatpush3.bf16.msra.mxu0 %v1281_v3  ;;  %1274 = vmatpush3.bf16.msra.mxu1 %v1281_v3  ;;  %v1309_v31 = vld [vmem:[%s2150_s0 + $0xe0] sm:$0xff]   ;;  %v1310_v32 = vld [vmem:[%s2150_s0 + $0x68] sm:$0xff]   ;;  %v1312_v34 = vld [vmem:[%s2150_s0 + $0x70] sm:$0xff]  }
   0xc   :  { %1199 = vmatprep.subr.bf16.mxu0 %v1282_v6  ;;  %1270 = vmatprep.subr.bf16.mxu1 %v1282_v6  ;;  %v1311_v33 = vld [vmem:[%s2150_s0 + $0xe8] sm:$0xff]   ;;  %v1313_v35 = vld [vmem:[%s2150_s0 + $0xf0] sm:$0xff]   ;;  %v1314_v36 = vld [vmem:[%s2150_s0 + $0x78] sm:$0xff]  }
   0xd   :  { %v1315_v37 = vld [vmem:[%s2150_s0 + $0xf8] sm:$0xff]   ;;  %v1497_v38 = vld [vmem:[%s2151_s2] ss:$0 sm:$0xff]  ;;  %v818_v44 = vld [vmem:[%s2153_s4 + $0x10] sm:$0xff] }
   0xe   :  { %v1502_v40 = vld [vmem:[%s2152_s3] ss:$0 sm:$0xff]  ;;  %v850_v45 = vld [vmem:[%s2153_s4 + $0x110] sm:$0xff]  ;;  %v819_v5 = vld [vmem:[%s2153_s4 + $0x18] sm:$0xff] }
   0xf   :  { %1200 = vmatpush3.bf16.msra.mxu0 %v1282_v6  ;;  %1275 = vmatpush3.bf16.msra.mxu1 %v1282_v6  ;;  %v1519_v52 = vld [vmem:[%s2154_s5] ss:$0 sm:$0xff]  ;;  %v851_v6 = vld [vmem:[%s2153_s4 + $0x118] sm:$0xff] }
  0x10   :  { %1201 = vmatprep.subr.bf16.mxu0 %v1283_v7  ;;  %1271 = vmatprep.subr.bf16.mxu1 %v1283_v7  ;;  %v816_v53 = vld [vmem:[%s2153_s4] sm:$0xff] }
  0x11   :  { %v848_v54 = vld [vmem:[%s2153_s4 + $0x100] sm:$0xff] }
  0x13   :  { %1202 = vmatpush3.bf16.msra.mxu0 %v1283_v7  ;;  %1276 = vmatpush3.bf16.msra.mxu1 %v1283_v7 }
  0x16   :  { %1204 = vmatmul.mubr.msk.bf16.vlgmr.msra.gmra.mxu0 %vm284_vm1, %v1286_v8  ;;  %1236 = vmatmul.mubr.msk.bf16.vlgmr.msra.gmra.mxu1 %vm284_vm1, %v1287_v9 }
  0x17   :  { %1207 = vmatprep.mubr.msk.bf16.mxu0 %vm284_vm1, %v1288_v10  ;;  %1239 = vmatprep.mubr.msk.bf16.mxu1 %vm284_vm1, %v1289_v11 }
  0x1e   :  { %1208 = vmatmul.mubr.msk.bf16.gmra.mxu0 %vm284_vm1, %v1290_v12  ;;  %1240 = vmatmul.mubr.msk.bf16.gmra.mxu1 %vm284_vm1, %v1291_v13 }
  0x1f   :  { %1211 = vmatprep.mubr.msk.bf16.mxu0 %vm284_vm1, %v1292_v14  ;;  %1243 = vmatprep.mubr.msk.bf16.mxu1 %vm284_vm1, %v1293_v15  ;;  %v817_v15 = vld [vmem:[%s2153_s4 + $0x8] sm:$0xff] }
  0x26   :  { %1212 = vmatmul.mubr.msk.bf16.gmra.mxu0 %vm284_vm1, %v1294_v16  ;;  %1244 = vmatmul.mubr.msk.bf16.gmra.mxu1 %vm284_vm1, %v1295_v17  ;;  %v849_v16 = vld [vmem:[%s2153_s4 + $0x108] sm:$0xff] }
  0x27   :  { %1215 = vmatprep.mubr.msk.bf16.mxu0 %vm284_vm1, %v1296_v18  ;;  %1247 = vmatprep.mubr.msk.bf16.mxu1 %vm284_vm1, %v1297_v19 }
  0x2e   :  { %1216 = vmatmul.mubr.msk.bf16.gmra.mxu0 %vm284_vm1, %v1298_v20  ;;  %1248 = vmatmul.mubr.msk.bf16.gmra.mxu1 %vm284_vm1, %v1299_v21 }
  0x2f   :  { %1219 = vmatprep.mubr.msk.bf16.mxu0 %vm284_vm1, %v1300_v22  ;;  %1251 = vmatprep.mubr.msk.bf16.mxu1 %vm284_vm1, %v1301_v23  ;;  %v822_v23 = vld [vmem:[%s2153_s4 + $0x30] sm:$0xff] }
  0x36   :  { %1220 = vmatmul.mubr.msk.bf16.gmra.mxu0 %vm284_vm1, %v1302_v24  ;;  %1252 = vmatmul.mubr.msk.bf16.gmra.mxu1 %vm284_vm1, %v1303_v25  ;;  %v854_v24 = vld [vmem:[%s2153_s4 + $0x130] sm:$0xff] }
  0x37   :  { %1223 = vmatprep.mubr.msk.bf16.mxu0 %vm284_vm1, %v1304_v26  ;;  %1255 = vmatprep.mubr.msk.bf16.mxu1 %vm284_vm1, %v1305_v27 }
  0x3e   :  { %1224 = vmatmul.mubr.msk.bf16.gmra.mxu0 %vm284_vm1, %v1306_v28  ;;  %1256 = vmatmul.mubr.msk.bf16.gmra.mxu1 %vm284_vm1, %v1307_v29 }
  0x3f   :  { %1227 = vmatprep.mubr.msk.bf16.mxu0 %vm284_vm1, %v1308_v30  ;;  %1259 = vmatprep.mubr.msk.bf16.mxu1 %vm284_vm1, %v1309_v31 }
  0x46   :  { %1228 = vmatmul.mubr.msk.bf16.gmra.mxu0 %vm284_vm1, %v1310_v32  ;;  %1260 = vmatmul.mubr.msk.bf16.gmra.mxu1 %vm284_vm1, %v1311_v33 }
  0x47   :  { %1231 = vmatprep.mubr.msk.bf16.mxu0 %vm284_vm1, %v1312_v34  ;;  %1263 = vmatprep.mubr.msk.bf16.mxu1 %vm284_vm1, %v1313_v35  ;;  %v820_v35 = vld [vmem:[%s2153_s4 + $0x20] sm:$0xff] }
  0x4e   :  { %1232 = vmatmul.mubr.msk.bf16.gmra.mxu0 %vm284_vm1, %v1314_v36  ;;  %1264 = vmatmul.mubr.msk.bf16.gmra.mxu1 %vm284_vm1, %v1315_v37  ;;  %v852_v36 = vld [vmem:[%s2153_s4 + $0x120] sm:$0xff] }
  0xd6   :  { %v1205_v39 = vpop.f32.mrf.mxu0  ;;  %v1237_v41 = vpop.f32.mrf.mxu1 }
  0xd7   :  { %v683_v42 = vmul.f32 %v1205_v39, %v1497_v38  ;;  %v715_v43 = vmul.f32 %v1237_v41, %v1497_v38 }
  0xd8   :  { %v419_v46 = vpop.f32.mrf.mxu0  ;;  %v547_v47 = vpop.f32.mrf.mxu1 }
  0xd9   :  { %v754_v48 = vadd.f32 %v1502_v40, %v683_v42  ;;  %v786_v49 = vadd.f32 %v1502_v40, %v715_v43  ;;  %v681_v50 = vmul.f32 %v1497_v38, %v419_v46  ;;  %v713_v51 = vmul.f32 %v1497_v38, %v547_v47 }
  0xda   :  { %v1206_v55 = vpop.f32.mrf.mxu0  ;;  %v1238_v56 = vpop.f32.mrf.mxu1 }
  0xdb   :  { %v882_v57 = vadd.f32 %v818_v44, %v754_v48  ;;  %v914_v58 = vadd.f32 %v850_v45, %v786_v49  ;;  %v752_v59 = vadd.f32 %v1502_v40, %v681_v50  ;;  %v784_v60 = vadd.f32 %v1502_v40, %v713_v51 }
  0xdc   :  { %v684_v61 = vmul.f32 %v1206_v55, %v1497_v38  ;;  %v716_v62 = vmul.f32 %v1238_v56, %v1497_v38  ;;  %v422_v63 = vpop.f32.mrf.mxu0  ;;  %v550_v0 = vpop.f32.mrf.mxu1  ;;  %v823_v56 = vld [vmem:[%s2153_s4 + $0x38] sm:$0xff] }
  0xdd   :  { %v953_v1 = vmul.f32 %v1519_v52, %v882_v57  ;;  %v985_v2 = vmul.f32 %v1519_v52, %v914_v58  ;;  %v880_v3 = vadd.f32 %v816_v53, %v752_v59  ;;  %v912_v4 = vadd.f32 %v848_v54, %v784_v60  ;;  %v855_v57 = vld [vmem:[%s2153_s4 + $0x138] sm:$0xff] }
  0xde   :  { %v755_v7 = vadd.f32 %v1502_v40, %v684_v61  ;;  %v787_v8 = vadd.f32 %v1502_v40, %v716_v62  ;;  %v682_v9 = vmul.f32 %v1497_v38, %v422_v63  ;;  %v714_v10 = vmul.f32 %v1497_v38, %v550_v0  ;;  %v1209_v11 = vpop.f32.mrf.mxu0  ;;  %v1241_v12 = vpop.f32.mrf.mxu1 }
  0xdf   :  { %1018 = vst.msk [vmem:[%s2155_s6 + $0x10] sm:$0xff] %vm1015_vm2, %v953_v1  ;;  %1050 = vst.msk [vmem:[%s2155_s6 + $0x110] sm:$0xff] %vm1015_vm2, %v985_v2  ;;  %v951_v13 = vmul.f32 %v1519_v52, %v880_v3  ;;  %v983_v14 = vmul.f32 %v1519_v52, %v912_v4  ;;  %v687_v17 = vmul.f32 %v1209_v11, %v1497_v38  ;;  %v821_v2 = vld [vmem:[%s2153_s4 + $0x28] sm:$0xff]  ;;  %v858_v11 = vld [vmem:[%s2153_s4 + $0x150] sm:$0xff] }
  0xe0   :  { %v719_v18 = vmul.f32 %v1241_v12, %v1497_v38  ;;  %v883_v19 = vadd.f32 %v819_v5, %v755_v7  ;;  %v915_v20 = vadd.f32 %v851_v6, %v787_v8  ;;  %v753_v21 = vadd.f32 %v1502_v40, %v682_v9  ;;  %v435_v25 = vpop.f32.mrf.mxu0  ;;  %v563_v26 = vpop.f32.mrf.mxu1  ;;  %v853_v3 = vld [vmem:[%s2153_s4 + $0x128] sm:$0xff] }
  0xe1   :  { %v785_v22 = vadd.f32 %v1502_v40, %v714_v10  ;;  %1016 = vst.msk [vmem:[%s2155_s6] sm:$0xff] %vm1015_vm2, %v951_v13  ;;  %1048 = vst.msk [vmem:[%s2155_s6 + $0x100] sm:$0xff] %vm1015_vm2, %v983_v14  ;;  %v758_v27 = vadd.f32 %v1502_v40, %v687_v17  ;;  %v685_v29 = vmul.f32 %v1497_v38, %v435_v25  ;;  %v826_v10 = vld [vmem:[%s2153_s4 + $0x50] sm:$0xff] }
  0xe2   :  { %v790_v28 = vadd.f32 %v1502_v40, %v719_v18  ;;  %v717_v30 = vmul.f32 %v1497_v38, %v563_v26  ;;  %v954_v31 = vmul.f32 %v1519_v52, %v883_v19  ;;  %v986_v32 = vmul.f32 %v1519_v52, %v915_v20  ;;  %v1210_v37 = vpop.f32.mrf.mxu0  ;;  %v1242_v39 = vpop.f32.mrf.mxu1 }
  0xe3   :  { %v881_v33 = vadd.f32 %v817_v15, %v753_v21  ;;  %v913_v34 = vadd.f32 %v849_v16, %v785_v22  ;;  %v886_v41 = vadd.f32 %v822_v23, %v758_v27  ;;  %v756_v43 = vadd.f32 %v1502_v40, %v685_v29  ;;  %v824_v22 = vld [vmem:[%s2153_s4 + $0x40] sm:$0xff] }
  0xe4   :  { %v918_v42 = vadd.f32 %v854_v24, %v790_v28  ;;  %v788_v44 = vadd.f32 %v1502_v40, %v717_v30  ;;  %1019 = vst.msk [vmem:[%s2155_s6 + $0x18] sm:$0xff] %vm1015_vm2, %v954_v31  ;;  %1051 = vst.msk [vmem:[%s2155_s6 + $0x118] sm:$0xff] %vm1015_vm2, %v986_v32  ;;  %v688_v47 = vmul.f32 %v1210_v37, %v1497_v38  ;;  %v438_v49 = vpop.f32.mrf.mxu0  ;;  %v566_v50 = vpop.f32.mrf.mxu1  ;;  %v856_v23 = vld [vmem:[%s2153_s4 + $0x140] sm:$0xff] }
  0xe5   :  { %v952_v45 = vmul.f32 %v1519_v52, %v881_v33  ;;  %v984_v46 = vmul.f32 %v1519_v52, %v913_v34  ;;  %v720_v48 = vmul.f32 %v1242_v39, %v1497_v38  ;;  %v957_v51 = vmul.f32 %v1519_v52, %v886_v41 }
  0xe6   :  { %v989_v53 = vmul.f32 %v1519_v52, %v918_v42  ;;  %v884_v54 = vadd.f32 %v820_v35, %v756_v43  ;;  %v916_v55 = vadd.f32 %v852_v36, %v788_v44  ;;  %v759_v58 = vadd.f32 %v1502_v40, %v688_v47  ;;  %v1213_v62 = vpop.f32.mrf.mxu0  ;;  %v1245_v63 = vpop.f32.mrf.mxu1  ;;  %v827_v42 = vld [vmem:[%s2153_s4 + $0x58] sm:$0xff] }
  0xe7   :  { %1017 = vst.msk [vmem:[%s2155_s6 + $0x8] sm:$0xff] %vm1015_vm2, %v952_v45  ;;  %1049 = vst.msk [vmem:[%s2155_s6 + $0x108] sm:$0xff] %vm1015_vm2, %v984_v46  ;;  %v791_v59 = vadd.f32 %v1502_v40, %v720_v48  ;;  %v686_v60 = vmul.f32 %v1497_v38, %v438_v49  ;;  %v718_v61 = vmul.f32 %v1497_v38, %v566_v50  ;;  %v859_v43 = vld [vmem:[%s2153_s4 + $0x158] sm:$0xff] }
  0xe8   :  { %1022 = vst.msk [vmem:[%s2155_s6 + $0x30] sm:$0xff] %vm1015_vm2, %v957_v51  ;;  %1054 = vst.msk [vmem:[%s2155_s6 + $0x130] sm:$0xff] %vm1015_vm2, %v989_v53  ;;  %v955_v0 = vmul.f32 %v1519_v52, %v884_v54  ;;  %v987_v1 = vmul.f32 %v1519_v52, %v916_v55  ;;  %v691_v4 = vmul.f32 %v1213_v62, %v1497_v38  ;;  %v451_v12 = vpop.f32.mrf.mxu0  ;;  %v579_v13 = vpop.f32.mrf.mxu1  ;;  %v825_v53 = vld [vmem:[%s2153_s4 + $0x48] sm:$0xff]  ;;  %v862_v62 = vld [vmem:[%s2153_s4 + $0x170] sm:$0xff] }
  0xe9   :  { %v723_v5 = vmul.f32 %v1245_v63, %v1497_v38  ;;  %v887_v6 = vadd.f32 %v823_v56, %v759_v58  ;;  %v919_v7 = vadd.f32 %v855_v57, %v791_v59  ;;  %v757_v8 = vadd.f32 %v1502_v40, %v686_v60  ;;  %v857_v54 = vld [vmem:[%s2153_s4 + $0x148] sm:$0xff] }
  0xea   :  { %v789_v9 = vadd.f32 %v1502_v40, %v718_v61  ;;  %1020 = vst.msk [vmem:[%s2155_s6 + $0x20] sm:$0xff] %vm1015_vm2, %v955_v0  ;;  %1052 = vst.msk [vmem:[%s2155_s6 + $0x120] sm:$0xff] %vm1015_vm2, %v987_v1  ;;  %v762_v14 = vadd.f32 %v1502_v40, %v691_v4  ;;  %v689_v16 = vmul.f32 %v1497_v38, %v451_v12  ;;  %v1214_v24 = vpop.f32.mrf.mxu0  ;;  %v1246_v25 = vpop.f32.mrf.mxu1  ;;  %v830_v61 = vld [vmem:[%s2153_s4 + $0x70] sm:$0xff] }
  0xeb   :  { %v794_v15 = vadd.f32 %v1502_v40, %v723_v5  ;;  %v721_v17 = vmul.f32 %v1497_v38, %v579_v13  ;;  %v958_v18 = vmul.f32 %v1519_v52, %v887_v6  ;;  %v990_v19 = vmul.f32 %v1519_v52, %v919_v7 }
  0xec   :  { %v885_v20 = vadd.f32 %v821_v2, %v757_v8  ;;  %v917_v21 = vadd.f32 %v853_v3, %v789_v9  ;;  %v890_v26 = vadd.f32 %v826_v10, %v762_v14  ;;  %v760_v28 = vadd.f32 %v1502_v40, %v689_v16  ;;  %v454_v34 = vpop.f32.mrf.mxu0  ;;  %v582_v35 = vpop.f32.mrf.mxu1  ;;  %v828_v9 = vld [vmem:[%s2153_s4 + $0x60] sm:$0xff] }
  0xed   :  { %v922_v27 = vadd.f32 %v858_v11, %v794_v15  ;;  %v792_v29 = vadd.f32 %v1502_v40, %v721_v17  ;;  %1023 = vst.msk [vmem:[%s2155_s6 + $0x38] sm:$0xff] %vm1015_vm2, %v958_v18  ;;  %1055 = vst.msk [vmem:[%s2155_s6 + $0x138] sm:$0xff] %vm1015_vm2, %v990_v19  ;;  %v692_v32 = vmul.f32 %v1214_v24, %v1497_v38  ;;  %v860_v10 = vld [vmem:[%s2153_s4 + $0x160] sm:$0xff] }
  0xee   :  { %v956_v30 = vmul.f32 %v1519_v52, %v885_v20  ;;  %v988_v31 = vmul.f32 %v1519_v52, %v917_v21  ;;  %v724_v33 = vmul.f32 %v1246_v25, %v1497_v38  ;;  %v961_v36 = vmul.f32 %v1519_v52, %v890_v26  ;;  %v1217_v48 = vpop.f32.mrf.mxu0  ;;  %v1249_v49 = vpop.f32.mrf.mxu1 }
  0xef   :  { %v993_v37 = vmul.f32 %v1519_v52, %v922_v27  ;;  %v888_v39 = vadd.f32 %v824_v22, %v760_v28  ;;  %v920_v41 = vadd.f32 %v856_v23, %v792_v29  ;;  %v763_v44 = vadd.f32 %v1502_v40, %v692_v32  ;;  %v831_v27 = vld [vmem:[%s2153_s4 + $0x78] sm:$0xff] }
  0xf0   :  { %1021 = vst.msk [vmem:[%s2155_s6 + $0x28] sm:$0xff] %vm1015_vm2, %v956_v30  ;;  %1053 = vst.msk [vmem:[%s2155_s6 + $0x128] sm:$0xff] %vm1015_vm2, %v988_v31  ;;  %v795_v45 = vadd.f32 %v1502_v40, %v724_v33  ;;  %v690_v46 = vmul.f32 %v1497_v38, %v454_v34  ;;  %v722_v47 = vmul.f32 %v1497_v38, %v582_v35  ;;  %v467_v63 = vpop.f32.mrf.mxu0  ;;  %v595_v0 = vpop.f32.mrf.mxu1  ;;  %v863_v28 = vld [vmem:[%s2153_s4 + $0x178] sm:$0xff] }
  0xf1   :  { %1026 = vst.msk [vmem:[%s2155_s6 + $0x50] sm:$0xff] %vm1015_vm2, %v961_v36  ;;  %1058 = vst.msk [vmem:[%s2155_s6 + $0x150] sm:$0xff] %vm1015_vm2, %v993_v37  ;;  %v959_v50 = vmul.f32 %v1519_v52, %v888_v39  ;;  %v991_v51 = vmul.f32 %v1519_v52, %v920_v41  ;;  %v695_v55 = vmul.f32 %v1217_v48, %v1497_v38  ;;  %v829_v37 = vld [vmem:[%s2153_s4 + $0x68] sm:$0xff]  ;;  %v866_v48 = vld [vmem:[%s2153_s4 + $0x190] sm:$0xff] }
  0xf2   :  { %v727_v56 = vmul.f32 %v1249_v49, %v1497_v38  ;;  %v891_v57 = vadd.f32 %v827_v42, %v763_v44  ;;  %v923_v58 = vadd.f32 %v859_v43, %v795_v45  ;;  %v761_v59 = vadd.f32 %v1502_v40, %v690_v46  ;;  %v1218_v11 = vpop.f32.mrf.mxu0  ;;  %v1250_v12 = vpop.f32.mrf.mxu1  ;;  %v861_v39 = vld [vmem:[%s2153_s4 + $0x168] sm:$0xff] }
  0xf3   :  { %v793_v60 = vadd.f32 %v1502_v40, %v722_v47  ;;  %1024 = vst.msk [vmem:[%s2155_s6 + $0x40] sm:$0xff] %vm1015_vm2, %v959_v50  ;;  %1056 = vst.msk [vmem:[%s2155_s6 + $0x140] sm:$0xff] %vm1015_vm2, %v991_v51  ;;  %v766_v1 = vadd.f32 %v1502_v40, %v695_v55  ;;  %v693_v3 = vmul.f32 %v1497_v38, %v467_v63  ;;  %v834_v47 = vld [vmem:[%s2153_s4 + $0x90] sm:$0xff] }
  0xf4   :  { %v798_v2 = vadd.f32 %v1502_v40, %v727_v56  ;;  %v725_v4 = vmul.f32 %v1497_v38, %v595_v0  ;;  %v962_v5 = vmul.f32 %v1519_v52, %v891_v57  ;;  %v994_v6 = vmul.f32 %v1519_v52, %v923_v58  ;;  %v470_v21 = vpop.f32.mrf.mxu0  ;;  %v598_v22 = vpop.f32.mrf.mxu1 }
  0xf5   :  { %v889_v7 = vadd.f32 %v825_v53, %v761_v59  ;;  %v921_v8 = vadd.f32 %v857_v54, %v793_v60  ;;  %v894_v13 = vadd.f32 %v830_v61, %v766_v1  ;;  %v764_v15 = vadd.f32 %v1502_v40, %v693_v3  ;;  %v832_v60 = vld [vmem:[%s2153_s4 + $0x80] sm:$0xff] }
  0xf6   :  { %v926_v14 = vadd.f32 %v862_v62, %v798_v2  ;;  %v796_v16 = vadd.f32 %v1502_v40, %v725_v4  ;;  %1027 = vst.msk [vmem:[%s2155_s6 + $0x58] sm:$0xff] %vm1015_vm2, %v962_v5  ;;  %1059 = vst.msk [vmem:[%s2155_s6 + $0x158] sm:$0xff] %vm1015_vm2, %v994_v6  ;;  %v696_v19 = vmul.f32 %v1218_v11, %v1497_v38  ;;  %v1221_v33 = vpop.f32.mrf.mxu0  ;;  %v1253_v34 = vpop.f32.mrf.mxu1  ;;  %v864_v61 = vld [vmem:[%s2153_s4 + $0x180] sm:$0xff] }
  0xf7   :  { %v960_v17 = vmul.f32 %v1519_v52, %v889_v7  ;;  %v992_v18 = vmul.f32 %v1519_v52, %v921_v8  ;;  %v728_v20 = vmul.f32 %v1250_v12, %v1497_v38  ;;  %v965_v23 = vmul.f32 %v1519_v52, %v894_v13 }
  0xf8   :  { %v997_v24 = vmul.f32 %v1519_v52, %v926_v14  ;;  %v892_v25 = vadd.f32 %v828_v9, %v764_v15  ;;  %v924_v26 = vadd.f32 %v860_v10, %v796_v16  ;;  %v767_v29 = vadd.f32 %v1502_v40, %v696_v19  ;;  %v483_v49 = vpop.f32.mrf.mxu0  ;;  %v611_v50 = vpop.f32.mrf.mxu1  ;;  %v835_v14 = vld [vmem:[%s2153_s4 + $0x98] sm:$0xff] }
  0xf9   :  { %1025 = vst.msk [vmem:[%s2155_s6 + $0x48] sm:$0xff] %vm1015_vm2, %v960_v17  ;;  %1057 = vst.msk [vmem:[%s2155_s6 + $0x148] sm:$0xff] %vm1015_vm2, %v992_v18  ;;  %v799_v30 = vadd.f32 %v1502_v40, %v728_v20  ;;  %v694_v31 = vmul.f32 %v1497_v38, %v470_v21  ;;  %v726_v32 = vmul.f32 %v1497_v38, %v598_v22  ;;  %v867_v15 = vld [vmem:[%s2153_s4 + $0x198] sm:$0xff] }
  0xfa   :  { %1030 = vst.msk [vmem:[%s2155_s6 + $0x70] sm:$0xff] %vm1015_vm2, %v965_v23  ;;  %1062 = vst.msk [vmem:[%s2155_s6 + $0x170] sm:$0xff] %vm1015_vm2, %v997_v24  ;;  %v963_v35 = vmul.f32 %v1519_v52, %v892_v25  ;;  %v995_v36 = vmul.f32 %v1519_v52, %v924_v26  ;;  %v699_v41 = vmul.f32 %v1221_v33, %v1497_v38  ;;  %v1222_v62 = vpop.f32.mrf.mxu0  ;;  %v1254_v63 = vpop.f32.mrf.mxu1  ;;  %v833_v24 = vld [vmem:[%s2153_s4 + $0x88] sm:$0xff]  ;;  %v870_v33 = vld [vmem:[%s2153_s4 + $0x1b0] sm:$0xff] }
  0xfb   :  { %v731_v42 = vmul.f32 %v1253_v34, %v1497_v38  ;;  %v895_v43 = vadd.f32 %v831_v27, %v767_v29  ;;  %v927_v44 = vadd.f32 %v863_v28, %v799_v30  ;;  %v765_v45 = vadd.f32 %v1502_v40, %v694_v31  ;;  %v865_v25 = vld [vmem:[%s2153_s4 + $0x188] sm:$0xff] }
  0xfc   :  { %v797_v46 = vadd.f32 %v1502_v40, %v726_v32  ;;  %1028 = vst.msk [vmem:[%s2155_s6 + $0x60] sm:$0xff] %vm1015_vm2, %v963_v35  ;;  %1060 = vst.msk [vmem:[%s2155_s6 + $0x160] sm:$0xff] %vm1015_vm2, %v995_v36  ;;  %v770_v51 = vadd.f32 %v1502_v40, %v699_v41  ;;  %v697_v54 = vmul.f32 %v1497_v38, %v483_v49  ;;  %v486_v8 = vpop.f32.mrf.mxu0  ;;  %v614_v9 = vpop.f32.mrf.mxu1  ;;  %v838_v32 = vld [vmem:[%s2153_s4 + $0xb0] sm:$0xff] }
  0xfd   :  { %v802_v53 = vadd.f32 %v1502_v40, %v731_v42  ;;  %v729_v55 = vmul.f32 %v1497_v38, %v611_v50  ;;  %v966_v56 = vmul.f32 %v1519_v52, %v895_v43  ;;  %v998_v57 = vmul.f32 %v1519_v52, %v927_v44 }
  0xfe   :  { %v893_v58 = vadd.f32 %v829_v37, %v765_v45  ;;  %v925_v59 = vadd.f32 %v861_v39, %v797_v46  ;;  %v898_v0 = vadd.f32 %v834_v47, %v770_v51  ;;  %v768_v2 = vadd.f32 %v1502_v40, %v697_v54  ;;  %v1225_v20 = vpop.f32.mrf.mxu0  ;;  %v1257_v21 = vpop.f32.mrf.mxu1  ;;  %v836_v46 = vld [vmem:[%s2153_s4 + $0xa0] sm:$0xff] }
  0xff   :  { %v930_v1 = vadd.f32 %v866_v48, %v802_v53  ;;  %v800_v3 = vadd.f32 %v1502_v40, %v729_v55  ;;  %1031 = vst.msk [vmem:[%s2155_s6 + $0x78] sm:$0xff] %vm1015_vm2, %v966_v56  ;;  %1063 = vst.msk [vmem:[%s2155_s6 + $0x178] sm:$0xff] %vm1015_vm2, %v998_v57  ;;  %v700_v6 = vmul.f32 %v1222_v62, %v1497_v38  ;;  %v868_v47 = vld [vmem:[%s2153_s4 + $0x1a0] sm:$0xff] }
 0x100   :  { %v964_v4 = vmul.f32 %v1519_v52, %v893_v58  ;;  %v996_v5 = vmul.f32 %v1519_v52, %v925_v59  ;;  %v732_v7 = vmul.f32 %v1254_v63, %v1497_v38  ;;  %v969_v10 = vmul.f32 %v1519_v52, %v898_v0  ;;  %v499_v34 = vpop.f32.mrf.mxu0  ;;  %v627_v35 = vpop.f32.mrf.mxu1 }
 0x101   :  { %v1001_v11 = vmul.f32 %v1519_v52, %v930_v1  ;;  %v896_v12 = vadd.f32 %v832_v60, %v768_v2  ;;  %v928_v13 = vadd.f32 %v864_v61, %v800_v3  ;;  %v771_v16 = vadd.f32 %v1502_v40, %v700_v6  ;;  %v839_v1 = vld [vmem:[%s2153_s4 + $0xb8] sm:$0xff] }
 0x102   :  { %1029 = vst.msk [vmem:[%s2155_s6 + $0x68] sm:$0xff] %vm1015_vm2, %v964_v4  ;;  %1061 = vst.msk [vmem:[%s2155_s6 + $0x168] sm:$0xff] %vm1015_vm2, %v996_v5  ;;  %v803_v17 = vadd.f32 %v1502_v40, %v732_v7  ;;  %v698_v18 = vmul.f32 %v1497_v38, %v486_v8  ;;  %v730_v19 = vmul.f32 %v1497_v38, %v614_v9  ;;  %v1226_v48 = vpop.f32.mrf.mxu0  ;;  %v1258_v49 = vpop.f32.mrf.mxu1  ;;  %v871_v2 = vld [vmem:[%s2153_s4 + $0x1b8] sm:$0xff] }
 0x103   :  { %1034 = vst.msk [vmem:[%s2155_s6 + $0x90] sm:$0xff] %vm1015_vm2, %v969_v10  ;;  %1066 = vst.msk [vmem:[%s2155_s6 + $0x190] sm:$0xff] %vm1015_vm2, %v1001_v11  ;;  %v967_v22 = vmul.f32 %v1519_v52, %v896_v12  ;;  %v999_v23 = vmul.f32 %v1519_v52, %v928_v13  ;;  %v703_v26 = vmul.f32 %v1225_v20, %v1497_v38  ;;  %v837_v11 = vld [vmem:[%s2153_s4 + $0xa8] sm:$0xff]  ;;  %v874_v20 = vld [vmem:[%s2153_s4 + $0x1d0] sm:$0xff] }
 0x104   :  { %v735_v27 = vmul.f32 %v1257_v21, %v1497_v38  ;;  %v899_v28 = vadd.f32 %v835_v14, %v771_v16  ;;  %v931_v29 = vadd.f32 %v867_v15, %v803_v17  ;;  %v769_v30 = vadd.f32 %v1502_v40, %v698_v18  ;;  %v502_v59 = vpop.f32.mrf.mxu0  ;;  %v630_v60 = vpop.f32.mrf.mxu1  ;;  %v869_v12 = vld [vmem:[%s2153_s4 + $0x1a8] sm:$0xff] }
 0x105   :  { %v801_v31 = vadd.f32 %v1502_v40, %v730_v19  ;;  %1032 = vst.msk [vmem:[%s2155_s6 + $0x80] sm:$0xff] %vm1015_vm2, %v967_v22  ;;  %1064 = vst.msk [vmem:[%s2155_s6 + $0x180] sm:$0xff] %vm1015_vm2, %v999_v23  ;;  %v774_v36 = vadd.f32 %v1502_v40, %v703_v26  ;;  %v701_v39 = vmul.f32 %v1497_v38, %v499_v34  ;;  %v842_v19 = vld [vmem:[%s2153_s4 + $0xd0] sm:$0xff] }
 0x106   :  { %v806_v37 = vadd.f32 %v1502_v40, %v735_v27  ;;  %v733_v41 = vmul.f32 %v1497_v38, %v627_v35  ;;  %v970_v42 = vmul.f32 %v1519_v52, %v899_v28  ;;  %v1002_v43 = vmul.f32 %v1519_v52, %v931_v29  ;;  %v1229_v7 = vpop.f32.mrf.mxu0  ;;  %v1261_v8 = vpop.f32.mrf.mxu1 }
 0x107   :  { %v897_v44 = vadd.f32 %v833_v24, %v769_v30  ;;  %v929_v45 = vadd.f32 %v865_v25, %v801_v31  ;;  %v902_v50 = vadd.f32 %v838_v32, %v774_v36  ;;  %v772_v53 = vadd.f32 %v1502_v40, %v701_v39  ;;  %v840_v31 = vld [vmem:[%s2153_s4 + $0xc0] sm:$0xff] }
 0x108   :  { %v934_v51 = vadd.f32 %v870_v33, %v806_v37  ;;  %v804_v54 = vadd.f32 %v1502_v40, %v733_v41  ;;  %1035 = vst.msk [vmem:[%s2155_s6 + $0x98] sm:$0xff] %vm1015_vm2, %v970_v42  ;;  %1067 = vst.msk [vmem:[%s2155_s6 + $0x198] sm:$0xff] %vm1015_vm2, %v1002_v43  ;;  %v704_v57 = vmul.f32 %v1226_v48, %v1497_v38  ;;  %v515_v21 = vpop.f32.mrf.mxu0  ;;  %v643_v22 = vpop.f32.mrf.mxu1  ;;  %v872_v32 = vld [vmem:[%s2153_s4 + $0x1c0] sm:$0xff] }
 0x109   :  { %v968_v55 = vmul.f32 %v1519_v52, %v897_v44  ;;  %v1000_v56 = vmul.f32 %v1519_v52, %v929_v45  ;;  %v736_v58 = vmul.f32 %v1258_v49, %v1497_v38  ;;  %v973_v61 = vmul.f32 %v1519_v52, %v902_v50 }
 0x10a   :  { %v1005_v62 = vmul.f32 %v1519_v52, %v934_v51  ;;  %v900_v63 = vadd.f32 %v836_v46, %v772_v53  ;;  %v932_v0 = vadd.f32 %v868_v47, %v804_v54  ;;  %v775_v3 = vadd.f32 %v1502_v40, %v704_v57  ;;  %v1230_v33 = vpop.f32.mrf.mxu0  ;;  %v1262_v34 = vpop.f32.mrf.mxu1  ;;  %v843_v51 = vld [vmem:[%s2153_s4 + $0xd8] sm:$0xff] }
 0x10b   :  { %1033 = vst.msk [vmem:[%s2155_s6 + $0x88] sm:$0xff] %vm1015_vm2, %v968_v55  ;;  %1065 = vst.msk [vmem:[%s2155_s6 + $0x188] sm:$0xff] %vm1015_vm2, %v1000_v56  ;;  %v807_v4 = vadd.f32 %v1502_v40, %v736_v58  ;;  %v702_v5 = vmul.f32 %v1497_v38, %v502_v59  ;;  %v734_v6 = vmul.f32 %v1497_v38, %v630_v60  ;;  %v875_v53 = vld [vmem:[%s2153_s4 + $0x1d8] sm:$0xff] }
 0x10c   :  { %1038 = vst.msk [vmem:[%s2155_s6 + $0xb0] sm:$0xff] %vm1015_vm2, %v973_v61  ;;  %1070 = vst.msk [vmem:[%s2155_s6 + $0x1b0] sm:$0xff] %vm1015_vm2, %v1005_v62  ;;  %v971_v9 = vmul.f32 %v1519_v52, %v900_v63  ;;  %v1003_v10 = vmul.f32 %v1519_v52, %v932_v0  ;;  %v707_v13 = vmul.f32 %v1229_v7, %v1497_v38  ;;  %v518_v45 = vpop.f32.mrf.mxu0  ;;  %v646_v46 = vpop.f32.mrf.mxu1  ;;  %v841_v62 = vld [vmem:[%s2153_s4 + $0xc8] sm:$0xff]  ;;  %v878_v7 = vld [vmem:[%s2153_s4 + $0x1f0] sm:$0xff] }
 0x10d   :  { %v739_v14 = vmul.f32 %v1261_v8, %v1497_v38  ;;  %v903_v15 = vadd.f32 %v839_v1, %v775_v3  ;;  %v935_v16 = vadd.f32 %v871_v2, %v807_v4  ;;  %v773_v17 = vadd.f32 %v1502_v40, %v702_v5  ;;  %v873_v63 = vld [vmem:[%s2153_s4 + $0x1c8] sm:$0xff] }
 0x10e   :  { %v805_v18 = vadd.f32 %v1502_v40, %v734_v6  ;;  %1036 = vst.msk [vmem:[%s2155_s6 + $0xa0] sm:$0xff] %vm1015_vm2, %v971_v9  ;;  %1068 = vst.msk [vmem:[%s2155_s6 + $0x1a0] sm:$0xff] %vm1015_vm2, %v1003_v10  ;;  %v778_v23 = vadd.f32 %v1502_v40, %v707_v13  ;;  %v705_v25 = vmul.f32 %v1497_v38, %v515_v21  ;;  %v1233_v58 = vpop.f32.mrf.mxu0  ;;  %v1265_v59 = vpop.f32.mrf.mxu1  ;;  %v846_v6 = vld [vmem:[%s2153_s4 + $0xf0] sm:$0xff] }
 0x10f   :  { %v810_v24 = vadd.f32 %v1502_v40, %v739_v14  ;;  %v737_v26 = vmul.f32 %v1497_v38, %v643_v22  ;;  %v974_v27 = vmul.f32 %v1519_v52, %v903_v15  ;;  %v1006_v28 = vmul.f32 %v1519_v52, %v935_v16 }
 0x110   :  { %v901_v29 = vadd.f32 %v837_v11, %v773_v17  ;;  %v933_v30 = vadd.f32 %v869_v12, %v805_v18  ;;  %v906_v35 = vadd.f32 %v842_v19, %v778_v23  ;;  %v776_v37 = vadd.f32 %v1502_v40, %v705_v25  ;;  %v531_v8 = vpop.f32.mrf.mxu0  ;;  %v659_v9 = vpop.f32.mrf.mxu1  ;;  %v844_v18 = vld [vmem:[%s2153_s4 + $0xe0] sm:$0xff] }
 0x111   :  { %v938_v36 = vadd.f32 %v874_v20, %v810_v24  ;;  %v808_v39 = vadd.f32 %v1502_v40, %v737_v26  ;;  %1039 = vst.msk [vmem:[%s2155_s6 + $0xb8] sm:$0xff] %vm1015_vm2, %v974_v27  ;;  %1071 = vst.msk [vmem:[%s2155_s6 + $0x1b8] sm:$0xff] %vm1015_vm2, %v1006_v28  ;;  %v708_v43 = vmul.f32 %v1230_v33, %v1497_v38  ;;  %v876_v19 = vld [vmem:[%s2153_s4 + $0x1e0] sm:$0xff] }
 0x112   :  { %v972_v41 = vmul.f32 %v1519_v52, %v901_v29  ;;  %v1004_v42 = vmul.f32 %v1519_v52, %v933_v30  ;;  %v740_v44 = vmul.f32 %v1262_v34, %v1497_v38  ;;  %v977_v47 = vmul.f32 %v1519_v52, %v906_v35  ;;  %v1234_v20 = vpop.f32.mrf.mxu0  ;;  %v1266_v21 = vpop.f32.mrf.mxu1 }
 0x113   :  { %v1009_v48 = vmul.f32 %v1519_v52, %v938_v36  ;;  %v904_v49 = vadd.f32 %v840_v31, %v776_v37  ;;  %v936_v50 = vadd.f32 %v872_v32, %v808_v39  ;;  %v779_v54 = vadd.f32 %v1502_v40, %v708_v43  ;;  %v847_v36 = vld [vmem:[%s2153_s4 + $0xf8] sm:$0xff] }
 0x114   :  { %1037 = vst.msk [vmem:[%s2155_s6 + $0xa8] sm:$0xff] %vm1015_vm2, %v972_v41  ;;  %1069 = vst.msk [vmem:[%s2155_s6 + $0x1a8] sm:$0xff] %vm1015_vm2, %v1004_v42  ;;  %v811_v55 = vadd.f32 %v1502_v40, %v740_v44  ;;  %v706_v56 = vmul.f32 %v1497_v38, %v518_v45  ;;  %v738_v57 = vmul.f32 %v1497_v38, %v646_v46  ;;  %v534_v30 = vpop.f32.mrf.mxu0  ;;  %v662_v31 = vpop.f32.mrf.mxu1  ;;  %v879_v37 = vld [vmem:[%s2153_s4 + $0x1f8] sm:$0xff]  ;;  %v845_v46 = vld [vmem:[%s2153_s4 + $0xe8] sm:$0xff] }
 0x115   :  { %1042 = vst.msk [vmem:[%s2155_s6 + $0xd0] sm:$0xff] %vm1015_vm2, %v977_v47  ;;  %1074 = vst.msk [vmem:[%s2155_s6 + $0x1d0] sm:$0xff] %vm1015_vm2, %v1009_v48  ;;  %v975_v60 = vmul.f32 %v1519_v52, %v904_v49  ;;  %v1007_v61 = vmul.f32 %v1519_v52, %v936_v50  ;;  %v711_v0 = vmul.f32 %v1233_v58, %v1497_v38 }
 0x116   :  { %v743_v1 = vmul.f32 %v1265_v59, %v1497_v38  ;;  %v907_v2 = vadd.f32 %v843_v51, %v779_v54  ;;  %v939_v3 = vadd.f32 %v875_v53, %v811_v55  ;;  %v777_v4 = vadd.f32 %v1502_v40, %v706_v56 }
 0x117   :  { %v809_v5 = vadd.f32 %v1502_v40, %v738_v57  ;;  %1040 = vst.msk [vmem:[%s2155_s6 + $0xc0] sm:$0xff] %vm1015_vm2, %v975_v60  ;;  %1072 = vst.msk [vmem:[%s2155_s6 + $0x1c0] sm:$0xff] %vm1015_vm2, %v1007_v61  ;;  %v782_v10 = vadd.f32 %v1502_v40, %v711_v0  ;;  %v709_v12 = vmul.f32 %v1497_v38, %v531_v8 }
 0x118   :  { %v814_v11 = vadd.f32 %v1502_v40, %v743_v1  ;;  %v741_v13 = vmul.f32 %v1497_v38, %v659_v9  ;;  %v978_v14 = vmul.f32 %v1519_v52, %v907_v2  ;;  %v1010_v15 = vmul.f32 %v1519_v52, %v939_v3 }
 0x119   :  { %v905_v16 = vadd.f32 %v841_v62, %v777_v4  ;;  %v937_v17 = vadd.f32 %v873_v63, %v809_v5  ;;  %v910_v22 = vadd.f32 %v846_v6, %v782_v10  ;;  %v780_v24 = vadd.f32 %v1502_v40, %v709_v12 }
 0x11a   :  { %v942_v23 = vadd.f32 %v878_v7, %v814_v11  ;;  %v812_v25 = vadd.f32 %v1502_v40, %v741_v13  ;;  %1043 = vst.msk [vmem:[%s2155_s6 + $0xd8] sm:$0xff] %vm1015_vm2, %v978_v14  ;;  %1075 = vst.msk [vmem:[%s2155_s6 + $0x1d8] sm:$0xff] %vm1015_vm2, %v1010_v15  ;;  %v712_v28 = vmul.f32 %v1234_v20, %v1497_v38 }
 0x11b   :  { %v976_v26 = vmul.f32 %v1519_v52, %v905_v16  ;;  %v1008_v27 = vmul.f32 %v1519_v52, %v937_v17  ;;  %v744_v29 = vmul.f32 %v1266_v21, %v1497_v38  ;;  %v981_v32 = vmul.f32 %v1519_v52, %v910_v22 }
 0x11c   :  { %v1013_v33 = vmul.f32 %v1519_v52, %v942_v23  ;;  %v908_v34 = vadd.f32 %v844_v18, %v780_v24  ;;  %v940_v35 = vadd.f32 %v876_v19, %v812_v25  ;;  %v783_v39 = vadd.f32 %v1502_v40, %v712_v28 }
 0x11d   :  { %1041 = vst.msk [vmem:[%s2155_s6 + $0xc8] sm:$0xff] %vm1015_vm2, %v976_v26  ;;  %1073 = vst.msk [vmem:[%s2155_s6 + $0x1c8] sm:$0xff] %vm1015_vm2, %v1008_v27  ;;  %v815_v41 = vadd.f32 %v1502_v40, %v744_v29  ;;  %v710_v42 = vmul.f32 %v1497_v38, %v534_v30  ;;  %v742_v43 = vmul.f32 %v1497_v38, %v662_v31  ;;  %v877_v38 = vld [vmem:[%s2153_s4 + $0x1e8] sm:$0xff] }
 0x11e   :  { %1046 = vst.msk [vmem:[%s2155_s6 + $0xf0] sm:$0xff] %vm1015_vm2, %v981_v32  ;;  %1078 = vst.msk [vmem:[%s2155_s6 + $0x1f0] sm:$0xff] %vm1015_vm2, %v1013_v33  ;;  %v979_v44 = vmul.f32 %v1519_v52, %v908_v34  ;;  %v1011_v45 = vmul.f32 %v1519_v52, %v940_v35  ;;  %v911_v47 = vadd.f32 %v847_v36, %v783_v39 }
 0x11f   :  { %v943_v48 = vadd.f32 %v879_v37, %v815_v41  ;;  %v781_v49 = vadd.f32 %v1502_v40, %v710_v42  ;;  %v813_v50 = vadd.f32 %v1502_v40, %v742_v43 }
 0x120   :  { %1044 = vst.msk [vmem:[%s2155_s6 + $0xe0] sm:$0xff] %vm1015_vm2, %v979_v44  ;;  %1076 = vst.msk [vmem:[%s2155_s6 + $0x1e0] sm:$0xff] %vm1015_vm2, %v1011_v45  ;;  %v982_v51 = vmul.f32 %v1519_v52, %v911_v47 }
 0x121   :  { %v1014_v53 = vmul.f32 %v1519_v52, %v943_v48  ;;  %v909_v54 = vadd.f32 %v845_v46, %v781_v49  ;;  %v941_v55 = vadd.f32 %v877_v38, %v813_v50 }
 0x122   :  { %1047 = vst.msk [vmem:[%s2155_s6 + $0xf8] sm:$0xff] %vm1015_vm2, %v982_v51 }
 0x123   :  { %1079 = vst.msk [vmem:[%s2155_s6 + $0x1f8] sm:$0xff] %vm1015_vm2, %v1014_v53  ;;  %v980_v40 = vmul.f32 %v1519_v52, %v909_v54  ;;  %v1012_v56 = vmul.f32 %v1519_v52, %v941_v55 }
 0x125   :  { %1045 = vst.msk [vmem:[%s2155_s6 + $0xe8] sm:$0xff] %vm1015_vm2, %v980_v40  ;;  %1077 = vst.msk [vmem:[%s2155_s6 + $0x1e8] sm:$0xff] %vm1015_vm2, %v1012_v56 }

// kernel: forward.64
= control target key start
LH: loop header
LB: loop body
LE: loop exit
PB: predicated region body
PF: predicated region fallthrough
CT: control target
= control target key end

     0   :  { %vm138_vm0 = vcmask 1043456   ;;  %vm113_vm1 = vcmask 588800   ;;  %v304_v14 = vlaneseq  ;;  %v434_v18 = vmov 0   ;;  %s656_s1 = inlined_call_operand.vmem [shape: bf16[72,32], index: 1, kind: input, shape index: {}]   ;;  %s657_s0 = inlined_call_operand.vmem [shape: bf16[128,72], index: 0, kind: input, shape index: {}]   ;;  %s658_s4 = inlined_call_operand.vmem [shape: f32[1,32], index: 4, kind: input, shape index: {}]   ;;  %s659_s2 = inlined_call_operand.vmem [shape: f32[1,32], index: 2, kind: input, shape index: {}]   ;;  %s660_s3 = inlined_call_operand.vmem [shape: f32[1,32], index: 3, kind: input, shape index: {}]   ;;  %s661_s5 = inlined_call_operand.vmem [shape: f32[128,32], index: 5, kind: output, shape index: {}]  }
   0x1   :  { %v421_v0 = vld [vmem:[%s656_s1 + $0x20] ss:$0 sps:$4 sm:$0xff]   ;;  %v422_v1 = vld [vmem:[%s656_s1 + $0x18] sm:$0xff]   ;;  %v423_v3 = vld [vmem:[%s656_s1 + $0x10] sm:$0xff]   ;;  %vm325_vm4 = vcmask 261120  }
   0x2   :  { %418 = vmatprep.subr.msk.bf16.mxu0 %vm138_vm0, %v421_v0  ;;  %419 = vmatprep.subr.msk.bf16.mxu1 %vm138_vm0, %v421_v0  ;;  %v140_v2 = vsel %vm138_vm0, %v421_v0, 0  ;;  %v426_v4 = vld [vmem:[%s657_s0] sm:$0xff]   ;;  %v424_v6 = vld [vmem:[%s656_s1 + $0x8] sm:$0xff]   ;;  %v430_v10 = vld [vmem:[%s657_s0 + $0x10] sm:$0xff]   ;;  %v305_v16 = vshrl.u32 %v304_v14, 7 }
   0x3   :  { %383 = vmatpush3.bf16.msra.mxu0 %v140_v2  ;;  %413 = vmatpush3.bf16.msra.mxu1 %v140_v2  ;;  %v427_v5 = vld [vmem:[%s657_s0 + $0x20] sm:$0xff]   ;;  %v428_v8 = vld [vmem:[%s657_s0 + $0x8] sm:$0xff]   ;;  %v431_v11 = vld [vmem:[%s657_s0 + $0x30] sm:$0xff]  }
   0x4   :  { %384 = vmatprep.subr.bf16.mxu0 %v422_v1  ;;  %409 = vmatprep.subr.bf16.mxu1 %v422_v1  ;;  %v425_v7 = vld [vmem:[%s656_s1] sm:$0xff]   ;;  %v429_v9 = vld [vmem:[%s657_s0 + $0x28] sm:$0xff]   ;;  %v432_v12 = vld [vmem:[%s657_s0 + $0x18] sm:$0xff]   ;;  %v306_v17 = vsub.s32 0, %v305_v16 }
   0x5   :  { %392 = vmatprep.mubr.msk.bf16.mxu0 %vm113_vm1, %v426_v4  ;;  %400 = vmatprep.mubr.msk.bf16.mxu1 %vm113_vm1, %v427_v5  ;;  %v433_v13 = vld [vmem:[%s657_s0 + $0x38] sm:$0xff]   ;;  %v285_v15 = vld [vmem:[%s658_s4] sm:$0x1] }
   0x6   :  { %vm286_vm2 = vcmp.gt.f32.partialorder %v285_v15, 0.0  ;;  %v518_v20 = vld [vmem:[%s659_s2] ss:$0 sm:$0xff] }
   0x7   :  { %385 = vmatpush3.bf16.msra.mxu0 %v422_v1  ;;  %414 = vmatpush3.bf16.msra.mxu1 %v422_v1  ;;  %v303_v19 = vsel %vm286_vm2, 1, %v434_v18  ;;  %v523_v22 = vld [vmem:[%s660_s3] ss:$0 sm:$0xff] }
   0x8   :  { %386 = vmatprep.subr.bf16.mxu0 %v423_v3  ;;  %410 = vmatprep.subr.bf16.mxu1 %v423_v3  ;;  %v525_v23 = vrot.slane %v303_v19, %v306_v17 }
   0xa   :  { %vm308_vm3 = vcmp.eq.s32.totalorder %v525_v23, 1 }
   0xb   :  { %387 = vmatpush3.bf16.msra.mxu0 %v423_v3  ;;  %415 = vmatpush3.bf16.msra.mxu1 %v423_v3 }
   0xc   :  { %388 = vmatprep.subr.bf16.mxu0 %v424_v6  ;;  %411 = vmatprep.subr.bf16.mxu1 %v424_v6 }
   0xf   :  { %389 = vmatpush3.bf16.msra.mxu0 %v424_v6  ;;  %416 = vmatpush3.bf16.msra.mxu1 %v424_v6 }
  0x10   :  { %390 = vmatprep.subr.bf16.mxu0 %v425_v7  ;;  %412 = vmatprep.subr.bf16.mxu1 %v425_v7 }
  0x13   :  { %391 = vmatpush3.bf16.msra.mxu0 %v425_v7  ;;  %417 = vmatpush3.bf16.msra.mxu1 %v425_v7 }
  0x16   :  { %393 = vmatmul.mubr.msk.bf16.vlgmr.msra.gmra.mxu0 %vm113_vm1, %v428_v8  ;;  %401 = vmatmul.mubr.msk.bf16.vlgmr.msra.gmra.mxu1 %vm113_vm1, %v429_v9 }
  0x17   :  { %396 = vmatprep.mubr.msk.bf16.mxu0 %vm113_vm1, %v430_v10  ;;  %404 = vmatprep.mubr.msk.bf16.mxu1 %vm113_vm1, %v431_v11 }
  0x1e   :  { %397 = vmatmul.mubr.msk.bf16.gmra.mxu0 %vm113_vm1, %v432_v12  ;;  %405 = vmatmul.mubr.msk.bf16.gmra.mxu1 %vm113_vm1, %v433_v13 }
  0xd6   :  { %v394_v21 = vpop.f32.mrf.mxu0  ;;  %v402_v24 = vpop.f32.mrf.mxu1 }
  0xd7   :  { %v248_v25 = vmul.f32 %v394_v21, %v518_v20  ;;  %v256_v26 = vmul.f32 %v402_v24, %v518_v20 }
  0xd8   :  { %v176_v27 = vpop.f32.mrf.mxu0  ;;  %v208_v28 = vpop.f32.mrf.mxu1 }
  0xd9   :  { %v271_v29 = vadd.f32 %v523_v22, %v248_v25  ;;  %v279_v30 = vadd.f32 %v523_v22, %v256_v26  ;;  %v246_v31 = vmul.f32 %v518_v20, %v176_v27  ;;  %v254_v32 = vmul.f32 %v518_v20, %v208_v28 }
  0xda   :  { %v395_v33 = vpop.f32.mrf.mxu0  ;;  %v403_v34 = vpop.f32.mrf.mxu1 }
  0xdb   :  { %v289_v35 = vmax.f32 %v271_v29, 0.0  ;;  %v297_v36 = vmax.f32 %v279_v30, 0.0  ;;  %v269_v37 = vadd.f32 %v523_v22, %v246_v31  ;;  %v277_v38 = vadd.f32 %v523_v22, %v254_v32 }
  0xdc   :  { %v249_v39 = vmul.f32 %v395_v33, %v518_v20  ;;  %v257_v40 = vmul.f32 %v403_v34, %v518_v20  ;;  %v179_v41 = vpop.f32.mrf.mxu0  ;;  %v211_v42 = vpop.f32.mrf.mxu1 }
  0xdd   :  { %v311_v43 = vsel %vm308_vm3, %v289_v35, %v271_v29  ;;  %v319_v44 = vsel %vm308_vm3, %v297_v36, %v279_v30  ;;  %v287_v45 = vmax.f32 %v269_v37, 0.0  ;;  %v295_v46 = vmax.f32 %v277_v38, 0.0 }
  0xde   :  { %328 = vst.msk [vmem:[%s661_s5 + $0x10] sm:$0xff] %vm325_vm4, %v311_v43  ;;  %336 = vst.msk [vmem:[%s661_s5 + $0x50] sm:$0xff] %vm325_vm4, %v319_v44  ;;  %v272_v47 = vadd.f32 %v523_v22, %v249_v39  ;;  %v280_v48 = vadd.f32 %v523_v22, %v257_v40  ;;  %v247_v49 = vmul.f32 %v518_v20, %v179_v41  ;;  %v398_v51 = vpop.f32.mrf.mxu0  ;;  %v406_v52 = vpop.f32.mrf.mxu1 }
  0xdf   :  { %v255_v50 = vmul.f32 %v518_v20, %v211_v42  ;;  %v309_v53 = vsel %vm308_vm3, %v287_v45, %v269_v37  ;;  %v317_v54 = vsel %vm308_vm3, %v295_v46, %v277_v38  ;;  %v252_v55 = vmul.f32 %v398_v51, %v518_v20 }
  0xe0   :  { %v260_v56 = vmul.f32 %v406_v52, %v518_v20  ;;  %326 = vst.msk [vmem:[%s661_s5] sm:$0xff] %vm325_vm4, %v309_v53  ;;  %334 = vst.msk [vmem:[%s661_s5 + $0x40] sm:$0xff] %vm325_vm4, %v317_v54  ;;  %v290_v57 = vmax.f32 %v272_v47, 0.0  ;;  %v298_v58 = vmax.f32 %v280_v48, 0.0  ;;  %v270_v59 = vadd.f32 %v523_v22, %v247_v49  ;;  %v192_v61 = vpop.f32.mrf.mxu0  ;;  %v224_v62 = vpop.f32.mrf.mxu1 }
  0xe1   :  { %v278_v60 = vadd.f32 %v523_v22, %v255_v50  ;;  %v275_v63 = vadd.f32 %v523_v22, %v252_v55  ;;  %v250_v1 = vmul.f32 %v518_v20, %v192_v61  ;;  %v258_v2 = vmul.f32 %v518_v20, %v224_v62 }
  0xe2   :  { %v283_v0 = vadd.f32 %v523_v22, %v260_v56  ;;  %v312_v3 = vsel %vm308_vm3, %v290_v57, %v272_v47  ;;  %v320_v4 = vsel %vm308_vm3, %v298_v58, %v280_v48  ;;  %v288_v5 = vmax.f32 %v270_v59, 0.0  ;;  %v399_v7 = vpop.f32.mrf.mxu0  ;;  %v407_v8 = vpop.f32.mrf.mxu1 }
  0xe3   :  { %v296_v6 = vmax.f32 %v278_v60, 0.0  ;;  %329 = vst.msk [vmem:[%s661_s5 + $0x18] sm:$0xff] %vm325_vm4, %v312_v3  ;;  %337 = vst.msk [vmem:[%s661_s5 + $0x58] sm:$0xff] %vm325_vm4, %v320_v4  ;;  %v293_v9 = vmax.f32 %v275_v63, 0.0  ;;  %v273_v11 = vadd.f32 %v523_v22, %v250_v1  ;;  %v281_v12 = vadd.f32 %v523_v22, %v258_v2 }
  0xe4   :  { %v301_v10 = vmax.f32 %v283_v0, 0.0  ;;  %v310_v13 = vsel %vm308_vm3, %v288_v5, %v270_v59  ;;  %v253_v15 = vmul.f32 %v399_v7, %v518_v20  ;;  %v261_v16 = vmul.f32 %v407_v8, %v518_v20  ;;  %v195_v17 = vpop.f32.mrf.mxu0  ;;  %v227_v18 = vpop.f32.mrf.mxu1 }
  0xe5   :  { %v318_v14 = vsel %vm308_vm3, %v296_v6, %v278_v60  ;;  %327 = vst.msk [vmem:[%s661_s5 + $0x8] sm:$0xff] %vm325_vm4, %v310_v13  ;;  %v315_v19 = vsel %vm308_vm3, %v293_v9, %v275_v63  ;;  %v291_v24 = vmax.f32 %v273_v11, 0.0  ;;  %v299_v25 = vmax.f32 %v281_v12, 0.0 }
  0xe6   :  { %335 = vst.msk [vmem:[%s661_s5 + $0x48] sm:$0xff] %vm325_vm4, %v318_v14  ;;  %v323_v21 = vsel %vm308_vm3, %v301_v10, %v283_v0  ;;  %332 = vst.msk [vmem:[%s661_s5 + $0x30] sm:$0xff] %vm325_vm4, %v315_v19  ;;  %v276_v26 = vadd.f32 %v523_v22, %v253_v15  ;;  %v284_v27 = vadd.f32 %v523_v22, %v261_v16 }
  0xe7   :  { %340 = vst.msk [vmem:[%s661_s5 + $0x70] sm:$0xff] %vm325_vm4, %v323_v21  ;;  %v251_v28 = vmul.f32 %v518_v20, %v195_v17  ;;  %v259_v29 = vmul.f32 %v518_v20, %v227_v18  ;;  %v313_v30 = vsel %vm308_vm3, %v291_v24, %v273_v11  ;;  %v321_v31 = vsel %vm308_vm3, %v299_v25, %v281_v12 }
  0xe8   :  { %330 = vst.msk [vmem:[%s661_s5 + $0x20] sm:$0xff] %vm325_vm4, %v313_v30  ;;  %338 = vst.msk [vmem:[%s661_s5 + $0x60] sm:$0xff] %vm325_vm4, %v321_v31  ;;  %v294_v32 = vmax.f32 %v276_v26, 0.0  ;;  %v302_v33 = vmax.f32 %v284_v27, 0.0 }
  0xe9   :  { %v274_v20 = vadd.f32 %v523_v22, %v251_v28  ;;  %v282_v34 = vadd.f32 %v523_v22, %v259_v29 }
  0xea   :  { %v316_v35 = vsel %vm308_vm3, %v294_v32, %v276_v26  ;;  %v324_v36 = vsel %vm308_vm3, %v302_v33, %v284_v27 }
  0xeb   :  { %v292_v37 = vmax.f32 %v274_v20, 0.0  ;;  %v300_v38 = vmax.f32 %v282_v34, 0.0  ;;  %333 = vst.msk [vmem:[%s661_s5 + $0x38] sm:$0xff] %vm325_vm4, %v316_v35  ;;  %341 = vst.msk [vmem:[%s661_s5 + $0x78] sm:$0xff] %vm325_vm4, %v324_v36 }
  0xed   :  { %v314_v22 = vsel %vm308_vm3, %v292_v37, %v274_v20  ;;  %v322_v39 = vsel %vm308_vm3, %v300_v38, %v282_v34 }
  0xee   :  { %331 = vst.msk [vmem:[%s661_s5 + $0x28] sm:$0xff] %vm325_vm4, %v314_v22  ;;  %339 = vst.msk [vmem:[%s661_s5 + $0x68] sm:$0xff] %vm325_vm4, %v322_v39 }

// kernel: forward.65
= control target key start
LH: loop header
LB: loop body
LE: loop exit
PB: predicated region body
PF: predicated region fallthrough
CT: control target
= control target key end

     0   :  { %v515_v0 = vmov 0   ;;  %vm184_vm0 = vcmask 130048   ;;  %s809_s1 = inlined_call_operand.vmem [shape: bf16[144,16], index: 1, kind: input, shape index: {}]   ;;  %s810_s0 = inlined_call_operand.vmem [shape: bf16[128,144], index: 0, kind: input, shape index: {}]   ;;  %s811_s2 = inlined_call_operand.vmem [shape: f32[1,16], index: 2, kind: input, shape index: {}]   ;;  %s812_s3 = inlined_call_operand.vmem [shape: f32[1,16], index: 3, kind: input, shape index: {}]   ;;  %s813_s4 = inlined_call_operand.vmem [shape: f32[128,16], index: 4, kind: input, shape index: {}]   ;;  %s814_s5 = inlined_call_operand.vmem [shape: f32[1,16], index: 5, kind: input, shape index: {}]   ;;  %s815_s6 = inlined_call_operand.vmem [shape: f32[128,16], index: 6, kind: output, shape index: {}]  }
   0x1   :  { %209 = vmatprep.subr.bf16.mxu0 %v515_v0  ;;  %463 = vmatprep.subr.bf16.mxu1 %v515_v0  ;;  %v482_v1 = vld [vmem:[%s809_s1 + $0x38] sm:$0xff]   ;;  %v483_v2 = vld [vmem:[%s809_s1 + $0x30] sm:$0xff]   ;;  %v484_v3 = vld [vmem:[%s809_s1 + $0x28] sm:$0xff]  }
   0x2   :  { %210 = vmatpush1.bf16.msra.mxu0 %v482_v1  ;;  %472 = vmatpush1.bf16.msra.mxu1 %v482_v1  ;;  %v485_v4 = vld [vmem:[%s809_s1 + $0x20] sm:$0xff]   ;;  %v486_v7 = vld [vmem:[%s809_s1 + $0x18] sm:$0xff]   ;;  %v487_v8 = vld [vmem:[%s809_s1 + $0x10] sm:$0xff]  }
   0x3   :  { %211 = vmatprep.subr.bf16.mxu0 %v515_v0  ;;  %464 = vmatprep.subr.bf16.mxu1 %v515_v0  ;;  %v493_v5 = vld [vmem:[%s810_s0 + $0x4] ss:$8 sps:$4 sm:$0xff]   ;;  %v491_v12 = vld [vmem:[%s810_s0] ss:$8 sps:$4 sm:$0xff]   ;;  %v497_v14 = vld [vmem:[%s810_s0 + $0x14] ss:$8 sps:$4 sm:$0xff]  }
   0x4   :  { %v496_v6 = vld [vmem:[%s810_s0 + $0x44] ss:$8 sps:$4 sm:$0xff]   ;;  %452 = vmatprep.mubr.msk.bf16.mxu0 %vm184_vm0, %v493_v5  ;;  %v494_v13 = vld [vmem:[%s810_s0 + $0x40] ss:$8 sps:$4 sm:$0xff]   ;;  %v499_v15 = vld [vmem:[%s810_s0 + $0x54] ss:$8 sps:$4 sm:$0xff]  }
   0x5   :  { %456 = vmatprep.mubr.msk.bf16.mxu1 %vm184_vm0, %v496_v6  ;;  %v488_v9 = vld [vmem:[%s809_s1 + $0x8] sm:$0xff]   ;;  %v489_v10 = vld [vmem:[%s809_s1] sm:$0xff]   ;;  %v501_v16 = vld [vmem:[%s810_s0 + $0x10] ss:$8 sps:$4 sm:$0xff]  }
   0x6   :  { %212 = vmatpush1.bf16.msra.mxu0 %v483_v2  ;;  %473 = vmatpush1.bf16.msra.mxu1 %v483_v2  ;;  %v490_v11 = vld [vmem:[%s809_s1 + $0x40] sm:$0xff]   ;;  %v502_v17 = vld [vmem:[%s810_s0 + $0x50] ss:$8 sps:$4 sm:$0xff]   ;;  %v509_v22 = vld [vmem:[%s810_s0 + $0x34] ss:$8 sps:$4 sm:$0xff]  }
   0x7   :  { %213 = vmatprep.subr.bf16.mxu0 %v515_v0  ;;  %465 = vmatprep.subr.bf16.mxu1 %v515_v0  ;;  %v503_v18 = vld [vmem:[%s810_s0 + $0x24] ss:$8 sps:$4 sm:$0xff]   ;;  %v507_v20 = vld [vmem:[%s810_s0 + $0x20] ss:$8 sps:$4 sm:$0xff]   ;;  %v511_v23 = vld [vmem:[%s810_s0 + $0x74] ss:$8 sps:$4 sm:$0xff]  }
   0x8   :  { %v505_v19 = vld [vmem:[%s810_s0 + $0x64] ss:$8 sps:$4 sm:$0xff]   ;;  %v508_v21 = vld [vmem:[%s810_s0 + $0x60] ss:$8 sps:$4 sm:$0xff]   ;;  %v513_v24 = vld [vmem:[%s810_s0 + $0x30] ss:$8 sps:$4 sm:$0xff]  }
   0x9   :  { %v514_v25 = vld [vmem:[%s810_s0 + $0x70] ss:$8 sps:$4 sm:$0xff]   ;;  %v637_v26 = vld [vmem:[%s811_s2] ss:$0 sm:$0xff]  ;;  %v353_v45 = vld [vmem:[%s813_s4 + $0x8] sm:$0xff] }
   0xa   :  { %214 = vmatpush1.bf16.msra.mxu0 %v484_v3  ;;  %474 = vmatpush1.bf16.msra.mxu1 %v484_v3  ;;  %v642_v28 = vld [vmem:[%s812_s3] ss:$0 sm:$0xff]  ;;  %v361_v46 = vld [vmem:[%s813_s4 + $0x48] sm:$0xff]  ;;  %v354_v59 = vld [vmem:[%s813_s4 + $0x10] sm:$0xff] }
   0xb   :  { %215 = vmatprep.subr.bf16.mxu0 %v515_v0  ;;  %466 = vmatprep.subr.bf16.mxu1 %v515_v0  ;;  %v352_v32 = vld [vmem:[%s813_s4] sm:$0xff]  ;;  %v362_v60 = vld [vmem:[%s813_s4 + $0x50] sm:$0xff] }
   0xc   :  { %v360_v33 = vld [vmem:[%s813_s4 + $0x40] sm:$0xff] }
   0xd   :  { %v657_v38 = vld [vmem:[%s814_s5] ss:$0 sm:$0xff] }
   0xe   :  { %216 = vmatpush1.bf16.msra.mxu0 %v485_v4  ;;  %475 = vmatpush1.bf16.msra.mxu1 %v485_v4 }
   0xf   :  { %217 = vmatprep.subr.bf16.mxu0 %v515_v0  ;;  %467 = vmatprep.subr.bf16.mxu1 %v515_v0 }
  0x12   :  { %218 = vmatpush1.bf16.msra.mxu0 %v486_v7  ;;  %476 = vmatpush1.bf16.msra.mxu1 %v486_v7 }
  0x13   :  { %219 = vmatprep.subr.bf16.mxu0 %v515_v0  ;;  %468 = vmatprep.subr.bf16.mxu1 %v515_v0 }
  0x16   :  { %220 = vmatpush1.bf16.msra.mxu0 %v487_v8  ;;  %477 = vmatpush1.bf16.msra.mxu1 %v487_v8 }
  0x17   :  { %221 = vmatprep.subr.bf16.mxu0 %v515_v0  ;;  %469 = vmatprep.subr.bf16.mxu1 %v515_v0 }
  0x1a   :  { %222 = vmatpush1.bf16.msra.mxu0 %v488_v9  ;;  %478 = vmatpush1.bf16.msra.mxu1 %v488_v9  ;;  %v355_v9 = vld [vmem:[%s813_s4 + $0x18] sm:$0xff] }
  0x1b   :  { %223 = vmatprep.subr.bf16.mxu0 %v515_v0  ;;  %470 = vmatprep.subr.bf16.mxu1 %v515_v0 }
  0x1e   :  { %224 = vmatpush1.bf16.msra.mxu0 %v489_v10  ;;  %479 = vmatpush1.bf16.msra.mxu1 %v489_v10  ;;  %v363_v10 = vld [vmem:[%s813_s4 + $0x58] sm:$0xff] }
  0x1f   :  { %239 = vmatprep.subr.bf16.mxu0 %v515_v0  ;;  %471 = vmatprep.subr.bf16.mxu1 %v515_v0 }
  0x22   :  { %240 = vmatpush2.bf16.msra.mxu0 %v490_v11  ;;  %480 = vmatpush2.bf16.msra.mxu1 %v490_v11 }
  0x25   :  { %242 = vmatmul.mubr.bf16.vlgmr.msra.gmra.mxu0 %v491_v12  ;;  %274 = vmatmul.mubr.bf16.vlgmr.msra.gmra.mxu1 %v494_v13 }
  0x26   :  { %453 = vmatprep.mubr.msk.bf16.mxu0 %vm184_vm0, %v497_v14  ;;  %457 = vmatprep.mubr.msk.bf16.mxu1 %vm184_vm0, %v499_v15 }
  0x2d   :  { %250 = vmatmul.mubr.bf16.gmra.mxu0 %v501_v16  ;;  %282 = vmatmul.mubr.bf16.gmra.mxu1 %v502_v17 }
  0x2e   :  { %454 = vmatprep.mubr.msk.bf16.mxu0 %vm184_vm0, %v503_v18  ;;  %458 = vmatprep.mubr.msk.bf16.mxu1 %vm184_vm0, %v505_v19 }
  0x35   :  { %258 = vmatmul.mubr.bf16.gmra.mxu0 %v507_v20  ;;  %290 = vmatmul.mubr.bf16.gmra.mxu1 %v508_v21 }
  0x36   :  { %455 = vmatprep.mubr.msk.bf16.mxu0 %vm184_vm0, %v509_v22  ;;  %459 = vmatprep.mubr.msk.bf16.mxu1 %vm184_vm0, %v511_v23  ;;  %v356_v23 = vld [vmem:[%s813_s4 + $0x20] sm:$0xff] }
  0x3d   :  { %266 = vmatmul.mubr.bf16.gmra.mxu0 %v513_v24  ;;  %298 = vmatmul.mubr.bf16.gmra.mxu1 %v514_v25  ;;  %v364_v24 = vld [vmem:[%s813_s4 + $0x60] sm:$0xff] }
  0xe5   :  { %v243_v27 = vpop.f32.mrf.mxu0  ;;  %v275_v29 = vpop.f32.mrf.mxu1 }
  0xe6   :  { %v313_v30 = vmul.f32 %v637_v26, %v243_v27  ;;  %v321_v31 = vmul.f32 %v637_v26, %v275_v29 }
  0xe7   :  { %v245_v34 = vpop.f32.mrf.mxu0  ;;  %v277_v35 = vpop.f32.mrf.mxu1 }
  0xe8   :  { %v336_v36 = vadd.f32 %v642_v28, %v313_v30  ;;  %v344_v37 = vadd.f32 %v642_v28, %v321_v31 }
  0xe9   :  { %v246_v39 = vpop.f32.mrf.mxu0  ;;  %v278_v40 = vpop.f32.mrf.mxu1 }
  0xea   :  { %v368_v41 = vadd.f32 %v352_v32, %v336_v36  ;;  %v376_v42 = vadd.f32 %v360_v33, %v344_v37  ;;  %v314_v43 = vmul.f32 %v637_v26, %v246_v39  ;;  %v322_v44 = vmul.f32 %v637_v26, %v278_v40  ;;  %v357_v40 = vld [vmem:[%s813_s4 + $0x28] sm:$0xff] }
  0xeb   :  { %v248_v47 = vpop.f32.mrf.mxu0  ;;  %v280_v48 = vpop.f32.mrf.mxu1 }
  0xec   :  { %v391_v49 = vmul.f32 %v657_v38, %v368_v41  ;;  %v399_v50 = vmul.f32 %v657_v38, %v376_v42  ;;  %v337_v51 = vadd.f32 %v642_v28, %v314_v43  ;;  %v345_v52 = vadd.f32 %v642_v28, %v322_v44  ;;  %v365_v41 = vld [vmem:[%s813_s4 + $0x68] sm:$0xff] }
  0xed   :  { %v251_v53 = vpop.f32.mrf.mxu0  ;;  %v283_v54 = vpop.f32.mrf.mxu1 }
  0xee   :  { %407 = vst.msk [vmem:[%s815_s6] sm:$0xff] %vm184_vm0, %v391_v49  ;;  %415 = vst.msk [vmem:[%s815_s6 + $0x40] sm:$0xff] %vm184_vm0, %v399_v50  ;;  %v369_v55 = vadd.f32 %v353_v45, %v337_v51  ;;  %v377_v56 = vadd.f32 %v361_v46, %v345_v52  ;;  %v315_v57 = vmul.f32 %v637_v26, %v251_v53 }
  0xef   :  { %v323_v58 = vmul.f32 %v637_v26, %v283_v54  ;;  %v253_v61 = vpop.f32.mrf.mxu0  ;;  %v285_v62 = vpop.f32.mrf.mxu1  ;;  %v358_v54 = vld [vmem:[%s813_s4 + $0x30] sm:$0xff] }
  0xf0   :  { %v392_v63 = vmul.f32 %v657_v38, %v369_v55  ;;  %v400_v0 = vmul.f32 %v657_v38, %v377_v56  ;;  %v338_v1 = vadd.f32 %v642_v28, %v315_v57  ;;  %v366_v55 = vld [vmem:[%s813_s4 + $0x70] sm:$0xff] }
  0xf1   :  { %v346_v2 = vadd.f32 %v642_v28, %v323_v58  ;;  %v254_v3 = vpop.f32.mrf.mxu0  ;;  %v286_v4 = vpop.f32.mrf.mxu1 }
  0xf2   :  { %408 = vst.msk [vmem:[%s815_s6 + $0x8] sm:$0xff] %vm184_vm0, %v392_v63  ;;  %416 = vst.msk [vmem:[%s815_s6 + $0x48] sm:$0xff] %vm184_vm0, %v400_v0  ;;  %v370_v5 = vadd.f32 %v354_v59, %v338_v1  ;;  %v316_v7 = vmul.f32 %v637_v26, %v254_v3  ;;  %v324_v8 = vmul.f32 %v637_v26, %v286_v4  ;;  %v359_v4 = vld [vmem:[%s813_s4 + $0x38] sm:$0xff] }
  0xf3   :  { %v378_v6 = vadd.f32 %v362_v60, %v346_v2  ;;  %v256_v11 = vpop.f32.mrf.mxu0  ;;  %v288_v12 = vpop.f32.mrf.mxu1 }
  0xf4   :  { %v393_v13 = vmul.f32 %v657_v38, %v370_v5  ;;  %v339_v15 = vadd.f32 %v642_v28, %v316_v7  ;;  %v347_v16 = vadd.f32 %v642_v28, %v324_v8  ;;  %v367_v5 = vld [vmem:[%s813_s4 + $0x78] sm:$0xff] }
  0xf5   :  { %v401_v14 = vmul.f32 %v657_v38, %v378_v6  ;;  %v259_v17 = vpop.f32.mrf.mxu0  ;;  %v291_v18 = vpop.f32.mrf.mxu1 }
  0xf6   :  { %409 = vst.msk [vmem:[%s815_s6 + $0x10] sm:$0xff] %vm184_vm0, %v393_v13  ;;  %v371_v19 = vadd.f32 %v355_v9, %v339_v15  ;;  %v379_v20 = vadd.f32 %v363_v10, %v347_v16  ;;  %v317_v21 = vmul.f32 %v637_v26, %v259_v17  ;;  %v325_v22 = vmul.f32 %v637_v26, %v291_v18 }
  0xf7   :  { %417 = vst.msk [vmem:[%s815_s6 + $0x50] sm:$0xff] %vm184_vm0, %v401_v14  ;;  %v261_v25 = vpop.f32.mrf.mxu0  ;;  %v293_v27 = vpop.f32.mrf.mxu1 }
  0xf8   :  { %v394_v29 = vmul.f32 %v657_v38, %v371_v19  ;;  %v402_v30 = vmul.f32 %v657_v38, %v379_v20  ;;  %v340_v31 = vadd.f32 %v642_v28, %v317_v21  ;;  %v348_v32 = vadd.f32 %v642_v28, %v325_v22 }
  0xf9   :  { %v262_v33 = vpop.f32.mrf.mxu0  ;;  %v294_v34 = vpop.f32.mrf.mxu1 }
  0xfa   :  { %410 = vst.msk [vmem:[%s815_s6 + $0x18] sm:$0xff] %vm184_vm0, %v394_v29  ;;  %418 = vst.msk [vmem:[%s815_s6 + $0x58] sm:$0xff] %vm184_vm0, %v402_v30  ;;  %v372_v35 = vadd.f32 %v356_v23, %v340_v31  ;;  %v380_v36 = vadd.f32 %v364_v24, %v348_v32  ;;  %v318_v37 = vmul.f32 %v637_v26, %v262_v33 }
  0xfb   :  { %v326_v39 = vmul.f32 %v637_v26, %v294_v34  ;;  %v264_v42 = vpop.f32.mrf.mxu0  ;;  %v296_v43 = vpop.f32.mrf.mxu1 }
  0xfc   :  { %v395_v44 = vmul.f32 %v657_v38, %v372_v35  ;;  %v403_v45 = vmul.f32 %v657_v38, %v380_v36  ;;  %v341_v46 = vadd.f32 %v642_v28, %v318_v37 }
  0xfd   :  { %v349_v47 = vadd.f32 %v642_v28, %v326_v39  ;;  %v267_v48 = vpop.f32.mrf.mxu0  ;;  %v299_v49 = vpop.f32.mrf.mxu1 }
  0xfe   :  { %411 = vst.msk [vmem:[%s815_s6 + $0x20] sm:$0xff] %vm184_vm0, %v395_v44  ;;  %419 = vst.msk [vmem:[%s815_s6 + $0x60] sm:$0xff] %vm184_vm0, %v403_v45  ;;  %v373_v50 = vadd.f32 %v357_v40, %v341_v46  ;;  %v319_v52 = vmul.f32 %v637_v26, %v267_v48  ;;  %v327_v53 = vmul.f32 %v637_v26, %v299_v49 }
  0xff   :  { %v381_v51 = vadd.f32 %v365_v41, %v349_v47  ;;  %v269_v56 = vpop.f32.mrf.mxu0  ;;  %v301_v57 = vpop.f32.mrf.mxu1 }
 0x100   :  { %v396_v58 = vmul.f32 %v657_v38, %v373_v50  ;;  %v342_v60 = vadd.f32 %v642_v28, %v319_v52  ;;  %v350_v61 = vadd.f32 %v642_v28, %v327_v53 }
 0x101   :  { %v404_v59 = vmul.f32 %v657_v38, %v381_v51  ;;  %v270_v62 = vpop.f32.mrf.mxu0  ;;  %v302_v63 = vpop.f32.mrf.mxu1 }
 0x102   :  { %412 = vst.msk [vmem:[%s815_s6 + $0x28] sm:$0xff] %vm184_vm0, %v396_v58  ;;  %v374_v0 = vadd.f32 %v358_v54, %v342_v60  ;;  %v382_v1 = vadd.f32 %v366_v55, %v350_v61  ;;  %v320_v2 = vmul.f32 %v637_v26, %v270_v62  ;;  %v328_v3 = vmul.f32 %v637_v26, %v302_v63 }
 0x103   :  { %420 = vst.msk [vmem:[%s815_s6 + $0x68] sm:$0xff] %vm184_vm0, %v404_v59  ;;  %v272_v6 = vpop.f32.mrf.mxu0  ;;  %v304_v7 = vpop.f32.mrf.mxu1 }
 0x104   :  { %v397_v8 = vmul.f32 %v657_v38, %v374_v0  ;;  %v405_v9 = vmul.f32 %v657_v38, %v382_v1  ;;  %v343_v10 = vadd.f32 %v642_v28, %v320_v2  ;;  %v351_v11 = vadd.f32 %v642_v28, %v328_v3 }
 0x106   :  { %413 = vst.msk [vmem:[%s815_s6 + $0x30] sm:$0xff] %vm184_vm0, %v397_v8  ;;  %421 = vst.msk [vmem:[%s815_s6 + $0x70] sm:$0xff] %vm184_vm0, %v405_v9  ;;  %v375_v26 = vadd.f32 %v359_v4, %v343_v10  ;;  %v383_v12 = vadd.f32 %v367_v5, %v351_v11 }
 0x108   :  { %v398_v13 = vmul.f32 %v657_v38, %v375_v26  ;;  %v406_v14 = vmul.f32 %v657_v38, %v383_v12 }
 0x10a   :  { %414 = vst.msk [vmem:[%s815_s6 + $0x38] sm:$0xff] %vm184_vm0, %v398_v13  ;;  %422 = vst.msk [vmem:[%s815_s6 + $0x78] sm:$0xff] %vm184_vm0, %v406_v14 }

// kernel: forward.66
= control target key start
LH: loop header
LB: loop body
LE: loop exit
PB: predicated region body
PF: predicated region fallthrough
CT: control target
= control target key end

     0   :  { %v497_v0 = vmov 0   ;;  %vm181_vm0 = vcmask 130048   ;;  %v368_v26 = vlaneseq  ;;  %vm389_vm3 = vcmask 261120   ;;  %s774_s1 = inlined_call_operand.vmem [shape: bf16[144,32], index: 1, kind: input, shape index: {}]   ;;  %s775_s0 = inlined_call_operand.vmem [shape: bf16[128,144], index: 0, kind: input, shape index: {}]   ;;  %s776_s4 = inlined_call_operand.vmem [shape: f32[1,32], index: 4, kind: input, shape index: {}]   ;;  %s777_s2 = inlined_call_operand.vmem [shape: f32[1,32], index: 2, kind: input, shape index: {}]   ;;  %s778_s3 = inlined_call_operand.vmem [shape: f32[1,32], index: 3, kind: input, shape index: {}]   ;;  %s779_s5 = inlined_call_operand.vmem [shape: f32[128,32], index: 5, kind: output, shape index: {}]  }
   0x1   :  { %206 = vmatprep.subr.bf16.mxu0 %v497_v0  ;;  %445 = vmatprep.subr.bf16.mxu1 %v497_v0  ;;  %v464_v1 = vld [vmem:[%s774_s1 + $0x38] sm:$0xff]   ;;  %v465_v2 = vld [vmem:[%s774_s1 + $0x30] sm:$0xff]   ;;  %v466_v3 = vld [vmem:[%s774_s1 + $0x28] sm:$0xff]  }
   0x2   :  { %207 = vmatpush1.bf16.msra.mxu0 %v464_v1  ;;  %454 = vmatpush1.bf16.msra.mxu1 %v464_v1  ;;  %v467_v4 = vld [vmem:[%s774_s1 + $0x20] sm:$0xff]   ;;  %v468_v7 = vld [vmem:[%s774_s1 + $0x18] sm:$0xff]   ;;  %v469_v8 = vld [vmem:[%s774_s1 + $0x10] sm:$0xff]   ;;  %v369_v28 = vshrl.u32 %v368_v26, 7 }
   0x3   :  { %208 = vmatprep.subr.bf16.mxu0 %v497_v0  ;;  %446 = vmatprep.subr.bf16.mxu1 %v497_v0  ;;  %v475_v5 = vld [vmem:[%s775_s0 + $0x4] ss:$8 sps:$4 sm:$0xff]   ;;  %v473_v12 = vld [vmem:[%s775_s0] ss:$8 sps:$4 sm:$0xff]   ;;  %v479_v14 = vld [vmem:[%s775_s0 + $0x14] ss:$8 sps:$4 sm:$0xff]  }
   0x4   :  { %v478_v6 = vld [vmem:[%s775_s0 + $0x44] ss:$8 sps:$4 sm:$0xff]   ;;  %435 = vmatprep.mubr.msk.bf16.mxu0 %vm181_vm0, %v475_v5  ;;  %v476_v13 = vld [vmem:[%s775_s0 + $0x40] ss:$8 sps:$4 sm:$0xff]   ;;  %v481_v15 = vld [vmem:[%s775_s0 + $0x54] ss:$8 sps:$4 sm:$0xff]  }
   0x5   :  { %439 = vmatprep.mubr.msk.bf16.mxu1 %vm181_vm0, %v478_v6  ;;  %v470_v9 = vld [vmem:[%s774_s1 + $0x8] sm:$0xff]   ;;  %v471_v10 = vld [vmem:[%s774_s1] sm:$0xff]   ;;  %v483_v16 = vld [vmem:[%s775_s0 + $0x10] ss:$8 sps:$4 sm:$0xff]   ;;  %v370_v29 = vsub.s32 0, %v369_v28 }
   0x6   :  { %209 = vmatpush1.bf16.msra.mxu0 %v465_v2  ;;  %455 = vmatpush1.bf16.msra.mxu1 %v465_v2  ;;  %v472_v11 = vld [vmem:[%s774_s1 + $0x40] sm:$0xff]   ;;  %v484_v17 = vld [vmem:[%s775_s0 + $0x50] ss:$8 sps:$4 sm:$0xff]   ;;  %v491_v22 = vld [vmem:[%s775_s0 + $0x34] ss:$8 sps:$4 sm:$0xff]  }
   0x7   :  { %210 = vmatprep.subr.bf16.mxu0 %v497_v0  ;;  %447 = vmatprep.subr.bf16.mxu1 %v497_v0  ;;  %v485_v18 = vld [vmem:[%s775_s0 + $0x24] ss:$8 sps:$4 sm:$0xff]   ;;  %v489_v20 = vld [vmem:[%s775_s0 + $0x20] ss:$8 sps:$4 sm:$0xff]   ;;  %v493_v23 = vld [vmem:[%s775_s0 + $0x74] ss:$8 sps:$4 sm:$0xff]  }
   0x8   :  { %v487_v19 = vld [vmem:[%s775_s0 + $0x64] ss:$8 sps:$4 sm:$0xff]   ;;  %v490_v21 = vld [vmem:[%s775_s0 + $0x60] ss:$8 sps:$4 sm:$0xff]   ;;  %v495_v24 = vld [vmem:[%s775_s0 + $0x30] ss:$8 sps:$4 sm:$0xff]  }
   0x9   :  { %v496_v25 = vld [vmem:[%s775_s0 + $0x70] ss:$8 sps:$4 sm:$0xff]   ;;  %v349_v27 = vld [vmem:[%s776_s4] sm:$0x1] }
   0xa   :  { %211 = vmatpush1.bf16.msra.mxu0 %v466_v3  ;;  %456 = vmatpush1.bf16.msra.mxu1 %v466_v3  ;;  %vm350_vm1 = vcmp.gt.f32.partialorder %v349_v27, 0.0  ;;  %v636_v31 = vld [vmem:[%s777_s2] ss:$0 sm:$0xff] }
   0xb   :  { %212 = vmatprep.subr.bf16.mxu0 %v497_v0  ;;  %448 = vmatprep.subr.bf16.mxu1 %v497_v0  ;;  %v367_v30 = vsel %vm350_vm1, 1, %v497_v0  ;;  %v641_v33 = vld [vmem:[%s778_s3] ss:$0 sm:$0xff] }
   0xc   :  { %v643_v34 = vrot.slane %v367_v30, %v370_v29 }
   0xe   :  { %213 = vmatpush1.bf16.msra.mxu0 %v467_v4  ;;  %457 = vmatpush1.bf16.msra.mxu1 %v467_v4  ;;  %vm372_vm2 = vcmp.eq.s32.totalorder %v643_v34, 1 }
   0xf   :  { %214 = vmatprep.subr.bf16.mxu0 %v497_v0  ;;  %449 = vmatprep.subr.bf16.mxu1 %v497_v0 }
  0x12   :  { %215 = vmatpush1.bf16.msra.mxu0 %v468_v7  ;;  %458 = vmatpush1.bf16.msra.mxu1 %v468_v7 }
  0x13   :  { %216 = vmatprep.subr.bf16.mxu0 %v497_v0  ;;  %450 = vmatprep.subr.bf16.mxu1 %v497_v0 }
  0x16   :  { %217 = vmatpush1.bf16.msra.mxu0 %v469_v8  ;;  %459 = vmatpush1.bf16.msra.mxu1 %v469_v8 }
  0x17   :  { %218 = vmatprep.subr.bf16.mxu0 %v497_v0  ;;  %451 = vmatprep.subr.bf16.mxu1 %v497_v0 }
  0x1a   :  { %219 = vmatpush1.bf16.msra.mxu0 %v470_v9  ;;  %460 = vmatpush1.bf16.msra.mxu1 %v470_v9 }
  0x1b   :  { %220 = vmatprep.subr.bf16.mxu0 %v497_v0  ;;  %452 = vmatprep.subr.bf16.mxu1 %v497_v0 }
  0x1e   :  { %221 = vmatpush1.bf16.msra.mxu0 %v471_v10  ;;  %461 = vmatpush1.bf16.msra.mxu1 %v471_v10 }
  0x1f   :  { %236 = vmatprep.subr.bf16.mxu0 %v497_v0  ;;  %453 = vmatprep.subr.bf16.mxu1 %v497_v0 }
  0x22   :  { %237 = vmatpush2.bf16.msra.mxu0 %v472_v11  ;;  %462 = vmatpush2.bf16.msra.mxu1 %v472_v11 }
  0x25   :  { %239 = vmatmul.mubr.bf16.vlgmr.msra.gmra.mxu0 %v473_v12  ;;  %271 = vmatmul.mubr.bf16.vlgmr.msra.gmra.mxu1 %v476_v13 }
  0x26   :  { %436 = vmatprep.mubr.msk.bf16.mxu0 %vm181_vm0, %v479_v14  ;;  %440 = vmatprep.mubr.msk.bf16.mxu1 %vm181_vm0, %v481_v15 }
  0x2d   :  { %247 = vmatmul.mubr.bf16.gmra.mxu0 %v483_v16  ;;  %279 = vmatmul.mubr.bf16.gmra.mxu1 %v484_v17 }
  0x2e   :  { %437 = vmatprep.mubr.msk.bf16.mxu0 %vm181_vm0, %v485_v18  ;;  %441 = vmatprep.mubr.msk.bf16.mxu1 %vm181_vm0, %v487_v19 }
  0x35   :  { %255 = vmatmul.mubr.bf16.gmra.mxu0 %v489_v20  ;;  %287 = vmatmul.mubr.bf16.gmra.mxu1 %v490_v21 }
  0x36   :  { %438 = vmatprep.mubr.msk.bf16.mxu0 %vm181_vm0, %v491_v22  ;;  %442 = vmatprep.mubr.msk.bf16.mxu1 %vm181_vm0, %v493_v23 }
  0x3d   :  { %263 = vmatmul.mubr.bf16.gmra.mxu0 %v495_v24  ;;  %295 = vmatmul.mubr.bf16.gmra.mxu1 %v496_v25 }
  0xe5   :  { %v240_v32 = vpop.f32.mrf.mxu0  ;;  %v272_v35 = vpop.f32.mrf.mxu1 }
  0xe6   :  { %v310_v36 = vmul.f32 %v636_v31, %v240_v32  ;;  %v318_v37 = vmul.f32 %v636_v31, %v272_v35 }
  0xe7   :  { %v242_v38 = vpop.f32.mrf.mxu0  ;;  %v274_v39 = vpop.f32.mrf.mxu1 }
  0xe8   :  { %v333_v40 = vadd.f32 %v641_v33, %v310_v36  ;;  %v341_v41 = vadd.f32 %v641_v33, %v318_v37 }
  0xe9   :  { %v243_v42 = vpop.f32.mrf.mxu0  ;;  %v275_v43 = vpop.f32.mrf.mxu1 }
  0xea   :  { %v351_v44 = vmax.f32 %v333_v40, 0.0  ;;  %v359_v45 = vmax.f32 %v341_v41, 0.0  ;;  %v311_v46 = vmul.f32 %v636_v31, %v243_v42  ;;  %v319_v47 = vmul.f32 %v636_v31, %v275_v43 }
  0xeb   :  { %v245_v48 = vpop.f32.mrf.mxu0  ;;  %v277_v49 = vpop.f32.mrf.mxu1 }
  0xec   :  { %v373_v50 = vsel %vm372_vm2, %v351_v44, %v333_v40  ;;  %v381_v51 = vsel %vm372_vm2, %v359_v45, %v341_v41  ;;  %v334_v52 = vadd.f32 %v641_v33, %v311_v46  ;;  %v342_v53 = vadd.f32 %v641_v33, %v319_v47 }
  0xed   :  { %390 = vst.msk [vmem:[%s779_s5] sm:$0xff] %vm389_vm3, %v373_v50  ;;  %398 = vst.msk [vmem:[%s779_s5 + $0x40] sm:$0xff] %vm389_vm3, %v381_v51  ;;  %v248_v54 = vpop.f32.mrf.mxu0  ;;  %v280_v55 = vpop.f32.mrf.mxu1 }
  0xee   :  { %v352_v56 = vmax.f32 %v334_v52, 0.0  ;;  %v360_v57 = vmax.f32 %v342_v53, 0.0  ;;  %v312_v58 = vmul.f32 %v636_v31, %v248_v54  ;;  %v320_v59 = vmul.f32 %v636_v31, %v280_v55 }
  0xef   :  { %v250_v60 = vpop.f32.mrf.mxu0  ;;  %v282_v61 = vpop.f32.mrf.mxu1 }
  0xf0   :  { %v374_v62 = vsel %vm372_vm2, %v352_v56, %v334_v52  ;;  %v382_v63 = vsel %vm372_vm2, %v360_v57, %v342_v53  ;;  %v335_v0 = vadd.f32 %v641_v33, %v312_v58  ;;  %v343_v1 = vadd.f32 %v641_v33, %v320_v59 }
  0xf1   :  { %391 = vst.msk [vmem:[%s779_s5 + $0x8] sm:$0xff] %vm389_vm3, %v374_v62  ;;  %399 = vst.msk [vmem:[%s779_s5 + $0x48] sm:$0xff] %vm389_vm3, %v382_v63  ;;  %v251_v2 = vpop.f32.mrf.mxu0  ;;  %v283_v3 = vpop.f32.mrf.mxu1 }
  0xf2   :  { %v353_v4 = vmax.f32 %v335_v0, 0.0  ;;  %v361_v5 = vmax.f32 %v343_v1, 0.0  ;;  %v313_v6 = vmul.f32 %v636_v31, %v251_v2  ;;  %v321_v7 = vmul.f32 %v636_v31, %v283_v3 }
  0xf3   :  { %v253_v8 = vpop.f32.mrf.mxu0  ;;  %v285_v9 = vpop.f32.mrf.mxu1 }
  0xf4   :  { %v375_v10 = vsel %vm372_vm2, %v353_v4, %v335_v0  ;;  %v383_v11 = vsel %vm372_vm2, %v361_v5, %v343_v1  ;;  %v336_v12 = vadd.f32 %v641_v33, %v313_v6  ;;  %v344_v13 = vadd.f32 %v641_v33, %v321_v7 }
  0xf5   :  { %392 = vst.msk [vmem:[%s779_s5 + $0x10] sm:$0xff] %vm389_vm3, %v375_v10  ;;  %400 = vst.msk [vmem:[%s779_s5 + $0x50] sm:$0xff] %vm389_vm3, %v383_v11  ;;  %v256_v14 = vpop.f32.mrf.mxu0  ;;  %v288_v15 = vpop.f32.mrf.mxu1 }
  0xf6   :  { %v354_v16 = vmax.f32 %v336_v12, 0.0  ;;  %v362_v17 = vmax.f32 %v344_v13, 0.0  ;;  %v314_v18 = vmul.f32 %v636_v31, %v256_v14  ;;  %v322_v19 = vmul.f32 %v636_v31, %v288_v15 }
  0xf7   :  { %v258_v20 = vpop.f32.mrf.mxu0  ;;  %v290_v21 = vpop.f32.mrf.mxu1 }
  0xf8   :  { %v376_v22 = vsel %vm372_vm2, %v354_v16, %v336_v12  ;;  %v384_v23 = vsel %vm372_vm2, %v362_v17, %v344_v13  ;;  %v337_v24 = vadd.f32 %v641_v33, %v314_v18  ;;  %v345_v25 = vadd.f32 %v641_v33, %v322_v19 }
  0xf9   :  { %393 = vst.msk [vmem:[%s779_s5 + $0x18] sm:$0xff] %vm389_vm3, %v376_v22  ;;  %401 = vst.msk [vmem:[%s779_s5 + $0x58] sm:$0xff] %vm389_vm3, %v384_v23  ;;  %v259_v26 = vpop.f32.mrf.mxu0  ;;  %v291_v27 = vpop.f32.mrf.mxu1 }
  0xfa   :  { %v355_v28 = vmax.f32 %v337_v24, 0.0  ;;  %v363_v29 = vmax.f32 %v345_v25, 0.0  ;;  %v315_v30 = vmul.f32 %v636_v31, %v259_v26  ;;  %v323_v32 = vmul.f32 %v636_v31, %v291_v27 }
  0xfb   :  { %v261_v35 = vpop.f32.mrf.mxu0  ;;  %v293_v36 = vpop.f32.mrf.mxu1 }
  0xfc   :  { %v377_v37 = vsel %vm372_vm2, %v355_v28, %v337_v24  ;;  %v385_v38 = vsel %vm372_vm2, %v363_v29, %v345_v25  ;;  %v338_v39 = vadd.f32 %v641_v33, %v315_v30  ;;  %v346_v40 = vadd.f32 %v641_v33, %v323_v32 }
  0xfd   :  { %394 = vst.msk [vmem:[%s779_s5 + $0x20] sm:$0xff] %vm389_vm3, %v377_v37  ;;  %402 = vst.msk [vmem:[%s779_s5 + $0x60] sm:$0xff] %vm389_vm3, %v385_v38  ;;  %v264_v41 = vpop.f32.mrf.mxu0  ;;  %v296_v42 = vpop.f32.mrf.mxu1 }
  0xfe   :  { %v356_v43 = vmax.f32 %v338_v39, 0.0  ;;  %v364_v44 = vmax.f32 %v346_v40, 0.0  ;;  %v316_v45 = vmul.f32 %v636_v31, %v264_v41  ;;  %v324_v46 = vmul.f32 %v636_v31, %v296_v42 }
  0xff   :  { %v266_v47 = vpop.f32.mrf.mxu0  ;;  %v298_v48 = vpop.f32.mrf.mxu1 }
 0x100   :  { %v378_v49 = vsel %vm372_vm2, %v356_v43, %v338_v39  ;;  %v386_v50 = vsel %vm372_vm2, %v364_v44, %v346_v40  ;;  %v339_v51 = vadd.f32 %v641_v33, %v316_v45  ;;  %v347_v52 = vadd.f32 %v641_v33, %v324_v46 }
 0x101   :  { %395 = vst.msk [vmem:[%s779_s5 + $0x28] sm:$0xff] %vm389_vm3, %v378_v49  ;;  %403 = vst.msk [vmem:[%s779_s5 + $0x68] sm:$0xff] %vm389_vm3, %v386_v50  ;;  %v267_v53 = vpop.f32.mrf.mxu0  ;;  %v299_v54 = vpop.f32.mrf.mxu1 }
 0x102   :  { %v357_v55 = vmax.f32 %v339_v51, 0.0  ;;  %v365_v56 = vmax.f32 %v347_v52, 0.0  ;;  %v317_v57 = vmul.f32 %v636_v31, %v267_v53  ;;  %v325_v58 = vmul.f32 %v636_v31, %v299_v54 }
 0x103   :  { %v269_v59 = vpop.f32.mrf.mxu0  ;;  %v301_v60 = vpop.f32.mrf.mxu1 }
 0x104   :  { %v379_v61 = vsel %vm372_vm2, %v357_v55, %v339_v51  ;;  %v387_v62 = vsel %vm372_vm2, %v365_v56, %v347_v52  ;;  %v340_v63 = vadd.f32 %v641_v33, %v317_v57  ;;  %v348_v0 = vadd.f32 %v641_v33, %v325_v58 }
 0x105   :  { %396 = vst.msk [vmem:[%s779_s5 + $0x30] sm:$0xff] %vm389_vm3, %v379_v61  ;;  %404 = vst.msk [vmem:[%s779_s5 + $0x70] sm:$0xff] %vm389_vm3, %v387_v62 }
 0x106   :  { %v358_v31 = vmax.f32 %v340_v63, 0.0  ;;  %v366_v1 = vmax.f32 %v348_v0, 0.0 }
 0x108   :  { %v380_v2 = vsel %vm372_vm2, %v358_v31, %v340_v63  ;;  %v388_v3 = vsel %vm372_vm2, %v366_v1, %v348_v0 }
 0x109   :  { %397 = vst.msk [vmem:[%s779_s5 + $0x38] sm:$0xff] %vm389_vm3, %v380_v2  ;;  %405 = vst.msk [vmem:[%s779_s5 + $0x78] sm:$0xff] %vm389_vm3, %v388_v3 }

// kernel: forward.72
= control target key start
LH: loop header
LB: loop body
LE: loop exit
PB: predicated region body
PF: predicated region fallthrough
CT: control target
= control target key end

     0   :  { %v269_v0 = vmov 0   ;;  %vm115_vm0 = vcmask 130048   ;;  %v200_v14 = vlaneseq  ;;  %vm209_vm3 = vcmask 523264   ;;  %s387_s1 = inlined_call_operand.vmem [shape: bf16[144,64], index: 1, kind: input, shape index: {}]   ;;  %s388_s0 = inlined_call_operand.vmem [shape: bf16[32,144], index: 0, kind: input, shape index: {}]   ;;  %s389_s4 = inlined_call_operand.vmem [shape: f32[1,64], index: 4, kind: input, shape index: {}]   ;;  %s390_s2 = inlined_call_operand.vmem [shape: f32[1,64], index: 2, kind: input, shape index: {}]   ;;  %s391_s3 = inlined_call_operand.vmem [shape: f32[1,64], index: 3, kind: input, shape index: {}]   ;;  %s392_s5 = inlined_call_operand.vmem [shape: f32[32,64], index: 5, kind: output, shape index: {}]  }
   0x1   :  { %122 = vmatprep.subr.bf16.mxu0 %v269_v0  ;;  %235 = vmatprep.subr.bf16.mxu1 %v269_v0  ;;  %v254_v1 = vld [vmem:[%s387_s1 + $0x38] sm:$0xff]   ;;  %v255_v2 = vld [vmem:[%s387_s1 + $0x30] sm:$0xff]   ;;  %v256_v3 = vld [vmem:[%s387_s1 + $0x28] sm:$0xff]  }
   0x2   :  { %123 = vmatpush1.bf16.msra.mxu0 %v254_v1  ;;  %244 = vmatpush1.bf16.msra.mxu1 %v254_v1  ;;  %v257_v4 = vld [vmem:[%s387_s1 + $0x20] sm:$0xff]   ;;  %v268_v6 = vld [vmem:[%s388_s0 + $0x14] ss:$8 sps:$4 sm:$0xff]   ;;  %v260_v9 = vld [vmem:[%s387_s1 + $0x8] sm:$0xff]   ;;  %v201_v16 = vshrl.u32 %v200_v14, 7 }
   0x3   :  { %124 = vmatprep.subr.bf16.mxu0 %v269_v0  ;;  %236 = vmatprep.subr.bf16.mxu1 %v269_v0  ;;  %v265_v5 = vld [vmem:[%s388_s0 + $0x4] ss:$8 sps:$4 sm:$0xff]   ;;  %v258_v7 = vld [vmem:[%s387_s1 + $0x18] sm:$0xff]   ;;  %v259_v8 = vld [vmem:[%s387_s1 + $0x10] sm:$0xff]  }
   0x4   :  { %231 = vmatprep.mubr.msk.bf16.mxu0 %vm115_vm0, %v265_v5  ;;  %232 = vmatprep.mubr.msk.bf16.mxu1 %vm115_vm0, %v268_v6  ;;  %v261_v10 = vld [vmem:[%s387_s1] sm:$0xff]   ;;  %v266_v13 = vld [vmem:[%s388_s0 + $0x10] ss:$8 sps:$4 sm:$0xff]   ;;  %v202_v17 = vsub.s32 0, %v201_v16 }
   0x5   :  { %v262_v11 = vld [vmem:[%s387_s1 + $0x40] sm:$0xff]  }
   0x6   :  { %125 = vmatpush1.bf16.msra.mxu0 %v255_v2  ;;  %245 = vmatpush1.bf16.msra.mxu1 %v255_v2  ;;  %v263_v12 = vld [vmem:[%s388_s0] ss:$8 sps:$4 sm:$0xff]  }
   0x7   :  { %126 = vmatprep.subr.bf16.mxu0 %v269_v0  ;;  %237 = vmatprep.subr.bf16.mxu1 %v269_v0  ;;  %v193_v15 = vld [vmem:[%s389_s4] sm:$0x1] }
   0x8   :  { %vm194_vm1 = vcmp.gt.f32.partialorder %v193_v15, 0.0  ;;  %v233_v19 = vld [vmem:[%s390_s2] ss:$0 sm:$0xff] }
   0x9   :  { %v199_v18 = vsel %vm194_vm1, 1, %v269_v0  ;;  %v234_v21 = vld [vmem:[%s391_s3] ss:$0 sm:$0xff] }
   0xa   :  { %127 = vmatpush1.bf16.msra.mxu0 %v256_v3  ;;  %246 = vmatpush1.bf16.msra.mxu1 %v256_v3  ;;  %v203_v22 = vrot.slane %v199_v18, %v202_v17 }
   0xb   :  { %128 = vmatprep.subr.bf16.mxu0 %v269_v0  ;;  %238 = vmatprep.subr.bf16.mxu1 %v269_v0 }
   0xc   :  { %vm204_vm2 = vcmp.eq.s32.totalorder %v203_v22, 1 }
   0xe   :  { %129 = vmatpush1.bf16.msra.mxu0 %v257_v4  ;;  %247 = vmatpush1.bf16.msra.mxu1 %v257_v4 }
   0xf   :  { %130 = vmatprep.subr.bf16.mxu0 %v269_v0  ;;  %239 = vmatprep.subr.bf16.mxu1 %v269_v0 }
  0x12   :  { %131 = vmatpush1.bf16.msra.mxu0 %v258_v7  ;;  %248 = vmatpush1.bf16.msra.mxu1 %v258_v7 }
  0x13   :  { %132 = vmatprep.subr.bf16.mxu0 %v269_v0  ;;  %240 = vmatprep.subr.bf16.mxu1 %v269_v0 }
  0x16   :  { %133 = vmatpush1.bf16.msra.mxu0 %v259_v8  ;;  %249 = vmatpush1.bf16.msra.mxu1 %v259_v8 }
  0x17   :  { %134 = vmatprep.subr.bf16.mxu0 %v269_v0  ;;  %241 = vmatprep.subr.bf16.mxu1 %v269_v0 }
  0x1a   :  { %135 = vmatpush1.bf16.msra.mxu0 %v260_v9  ;;  %250 = vmatpush1.bf16.msra.mxu1 %v260_v9 }
  0x1b   :  { %136 = vmatprep.subr.bf16.mxu0 %v269_v0  ;;  %242 = vmatprep.subr.bf16.mxu1 %v269_v0 }
  0x1e   :  { %137 = vmatpush1.bf16.msra.mxu0 %v261_v10  ;;  %251 = vmatpush1.bf16.msra.mxu1 %v261_v10 }
  0x1f   :  { %152 = vmatprep.subr.bf16.mxu0 %v269_v0  ;;  %243 = vmatprep.subr.bf16.mxu1 %v269_v0 }
  0x22   :  { %153 = vmatpush2.bf16.msra.mxu0 %v262_v11  ;;  %252 = vmatpush2.bf16.msra.mxu1 %v262_v11 }
  0x25   :  { %155 = vmatmul.mubr.bf16.vlgmr.msra.gmra.mxu0 %v263_v12  ;;  %163 = vmatmul.mubr.bf16.vlgmr.msra.gmra.mxu1 %v266_v13 }
  0xe5   :  { %v156_v20 = vpop.f32.mrf.mxu0  ;;  %v164_v23 = vpop.f32.mrf.mxu1 }
  0xe6   :  { %v178_v24 = vmul.f32 %v233_v19, %v156_v20  ;;  %v180_v25 = vmul.f32 %v233_v19, %v164_v23 }
  0xe7   :  { %v158_v26 = vpop.f32.mrf.mxu0  ;;  %v166_v27 = vpop.f32.mrf.mxu1 }
  0xe8   :  { %v189_v28 = vadd.f32 %v234_v21, %v178_v24  ;;  %v191_v29 = vadd.f32 %v234_v21, %v180_v25 }
  0xe9   :  { %v159_v30 = vpop.f32.mrf.mxu0  ;;  %v167_v31 = vpop.f32.mrf.mxu1 }
  0xea   :  { %v195_v32 = vmax.f32 %v189_v28, 0.0  ;;  %v197_v33 = vmax.f32 %v191_v29, 0.0  ;;  %v179_v34 = vmul.f32 %v233_v19, %v159_v30  ;;  %v181_v35 = vmul.f32 %v233_v19, %v167_v31 }
  0xeb   :  { %v161_v36 = vpop.f32.mrf.mxu0  ;;  %v169_v37 = vpop.f32.mrf.mxu1 }
  0xec   :  { %v205_v38 = vsel %vm204_vm2, %v195_v32, %v189_v28  ;;  %v207_v39 = vsel %vm204_vm2, %v197_v33, %v191_v29  ;;  %v190_v40 = vadd.f32 %v234_v21, %v179_v34  ;;  %v192_v41 = vadd.f32 %v234_v21, %v181_v35 }
  0xed   :  { %210 = vst.msk [vmem:[%s392_s5] sm:$0xff] %vm209_vm3, %v205_v38  ;;  %212 = vst.msk [vmem:[%s392_s5 + $0x10] sm:$0xff] %vm209_vm3, %v207_v39 }
  0xee   :  { %v196_v42 = vmax.f32 %v190_v40, 0.0  ;;  %v198_v43 = vmax.f32 %v192_v41, 0.0 }
  0xf0   :  { %v206_v44 = vsel %vm204_vm2, %v196_v42, %v190_v40  ;;  %v208_v45 = vsel %vm204_vm2, %v198_v43, %v192_v41 }
  0xf1   :  { %211 = vst.msk [vmem:[%s392_s5 + $0x8] sm:$0xff] %vm209_vm3, %v206_v44  ;;  %213 = vst.msk [vmem:[%s392_s5 + $0x18] sm:$0xff] %vm209_vm3, %v208_v45 }

// kernel: forward.73
= control target key start
LH: loop header
LB: loop body
LE: loop exit
PB: predicated region body
PF: predicated region fallthrough
CT: control target
= control target key end

     0   :  { %vm206_vm0 = vcmask 261120   ;;  %s601_s1 = inlined_call_operand.vmem [shape: bf16[288,32], index: 1, kind: input, shape index: {}]   ;;  %s602_s0 = inlined_call_operand.vmem [shape: bf16[32,288], index: 0, kind: input, shape index: {}]   ;;  %s603_s2 = inlined_call_operand.vmem [shape: f32[1,32], index: 2, kind: input, shape index: {}]   ;;  %s604_s3 = inlined_call_operand.vmem [shape: f32[1,32], index: 3, kind: input, shape index: {}]   ;;  %s605_s4 = inlined_call_operand.vmem [shape: f32[32,32], index: 4, kind: input, shape index: {}]   ;;  %s606_s5 = inlined_call_operand.vmem [shape: f32[1,32], index: 5, kind: input, shape index: {}]   ;;  %s607_s6 = inlined_call_operand.vmem [shape: f32[32,32], index: 6, kind: output, shape index: {}]  }
   0x1   :  { %v429_v0 = vld [vmem:[%s601_s1 + $0x78] sm:$0xff]   ;;  %v431_v2 = vld [vmem:[%s601_s1 + $0x70] sm:$0xff]   ;;  %v433_v4 = vld [vmem:[%s601_s1 + $0x68] sm:$0xff]  }
   0x2   :  { %v430_v1 = vld [vmem:[%s601_s1 + $0x38] sm:$0xff]   ;;  %389 = vmatprep.subr.bf16.mxu0 %v429_v0  ;;  %v432_v3 = vld [vmem:[%s601_s1 + $0x30] sm:$0xff]   ;;  %v434_v5 = vld [vmem:[%s601_s1 + $0x28] sm:$0xff]  }
   0x3   :  { %390 = vmatpush3.bf16.msra.mxu0 %v430_v1  ;;  %v435_v6 = vld [vmem:[%s601_s1 + $0x60] sm:$0xff]   ;;  %v437_v8 = vld [vmem:[%s601_s1 + $0x58] sm:$0xff]   ;;  %v443_v9 = vld [vmem:[%s601_s1 + $0x88] sm:$0xff]  }
   0x4   :  { %391 = vmatprep.subr.bf16.mxu0 %v431_v2  ;;  %v436_v7 = vld [vmem:[%s601_s1 + $0x20] sm:$0xff]   ;;  %v438_v10 = vld [vmem:[%s601_s1 + $0x18] sm:$0xff]   ;;  %v439_v11 = vld [vmem:[%s601_s1 + $0x50] sm:$0xff]   ;;  %421 = vmatprep.subr.bf16.mxu1 %v443_v9 }
   0x5   :  { %v440_v12 = vld [vmem:[%s601_s1 + $0x10] sm:$0xff]   ;;  %422 = vmatpush3.bf16.msra.mxu1 %v443_v9  ;;  %v446_v13 = vld [vmem:[%s601_s1 + $0x80] sm:$0xff]   ;;  %v441_v14 = vld [vmem:[%s601_s1 + $0x48] sm:$0xff]  }
   0x6   :  { %423 = vmatprep.subr.bf16.mxu1 %v446_v13  ;;  %v449_v15 = vld [vmem:[%s602_s0 + $0x4] ss:$12 sps:$4 sm:$0xff]   ;;  %v450_v16 = vld [vmem:[%s602_s0 + $0x8] ss:$12 sps:$4 sm:$0xff]   ;;  %v451_v17 = vld [vmem:[%s602_s0 + $0x20] ss:$12 sps:$4 sm:$0xff]  }
   0x7   :  { %392 = vmatpush3.bf16.msra.mxu0 %v432_v3  ;;  %245 = vmatprep.mubr.bf16.mxu0 %v449_v15  ;;  %v442_v18 = vld [vmem:[%s601_s1 + $0x8] sm:$0xff]   ;;  %v444_v19 = vld [vmem:[%s601_s1 + $0x40] sm:$0xff]   ;;  %v335_v56 = vld [vmem:[%s605_s4 + $0x10] sm:$0xff] }
   0x8   :  { %393 = vmatprep.subr.bf16.mxu0 %v433_v4  ;;  %425 = vmatprep.mubr.msk.bf16.mxu1 %vm206_vm0, %v450_v16  ;;  %v445_v20 = vld [vmem:[%s601_s1] sm:$0xff]   ;;  %v452_v22 = vld [vmem:[%s602_s0 + $0x1c] ss:$12 sps:$4 sm:$0xff]  }
   0x9   :  { %424 = vmatpush3.bf16.msra.mxu1 %v446_v13  ;;  %v447_v21 = vld [vmem:[%s602_s0] ss:$12 sps:$4 sm:$0xff]   ;;  %v454_v23 = vld [vmem:[%s602_s0 + $0x18] ss:$12 sps:$4 sm:$0xff]  }
   0xa   :  { %v386_v31 = vld [vmem:[%s603_s2] ss:$0 sm:$0xff]  ;;  %v334_v47 = vld [vmem:[%s605_s4 + $0x8] sm:$0xff]  ;;  %v336_v62 = vld [vmem:[%s605_s4 + $0x18] sm:$0xff] }
   0xb   :  { %394 = vmatpush3.bf16.msra.mxu0 %v434_v5  ;;  %v387_v33 = vld [vmem:[%s604_s3] ss:$0 sm:$0xff] }
   0xc   :  { %395 = vmatprep.subr.bf16.mxu0 %v435_v6  ;;  %426 = vmatmul.mubr.msk.bf16.vlgmr.msra.gmra.mxu1 %vm206_vm0, %v451_v17  ;;  %v333_v38 = vld [vmem:[%s605_s4] sm:$0xff] }
   0xd   :  { %v388_v42 = vld [vmem:[%s606_s5] ss:$0 sm:$0xff] }
   0xf   :  { %396 = vmatpush3.bf16.msra.mxu0 %v436_v7 }
  0x10   :  { %397 = vmatprep.subr.bf16.mxu0 %v437_v8 }
  0x13   :  { %398 = vmatpush3.bf16.msra.mxu0 %v438_v10 }
  0x14   :  { %399 = vmatprep.subr.bf16.mxu0 %v439_v11 }
  0x17   :  { %400 = vmatpush3.bf16.msra.mxu0 %v440_v12 }
  0x18   :  { %401 = vmatprep.subr.bf16.mxu0 %v441_v14 }
  0x1b   :  { %402 = vmatpush3.bf16.msra.mxu0 %v442_v18 }
  0x1c   :  { %403 = vmatprep.subr.bf16.mxu0 %v444_v19 }
  0x1f   :  { %404 = vmatpush3.bf16.msra.mxu0 %v445_v20 }
  0x22   :  { %246 = vmatmul.mubr.bf16.vlgmr.msra.gmra.mxu0 %v447_v21 }
  0x23   :  { %253 = vmatprep.mubr.bf16.mxu0 %v452_v22 }
  0x2a   :  { %254 = vmatmul.mubr.bf16.gmra.mxu0 %v454_v23 }
  0xcc   :  { %v427_v24 = vpop.f32.mrf.mxu1 }
  0xce   :  { %v296_v25 = vpop.f32.mrf.mxu1 }
  0xd0   :  { %v428_v28 = vpop.f32.mrf.mxu1 }
  0xd2   :  { %v299_v35 = vpop.f32.mrf.mxu1 }
  0xe2   :  { %v405_v26 = vpop.f32.mrf.mxu0 }
  0xe4   :  { %v406_v27 = vpop.f32.mrf.mxu0 }
  0xe5   :  { %v407_v29 = vadd.f32 %v406_v27, %v405_v26 }
  0xe6   :  { %v408_v30 = vpop.f32.mrf.mxu0 }
  0xe7   :  { %v297_v32 = vadd.f32 %v407_v29, %v296_v25 }
  0xe8   :  { %v409_v34 = vpop.f32.mrf.mxu0 }
  0xe9   :  { %v318_v36 = vmul.f32 %v386_v31, %v297_v32  ;;  %v410_v37 = vadd.f32 %v409_v34, %v408_v30 }
  0xea   :  { %v411_v39 = vpop.f32.mrf.mxu0 }
  0xeb   :  { %v329_v40 = vadd.f32 %v387_v33, %v318_v36  ;;  %v300_v41 = vadd.f32 %v410_v37, %v299_v35 }
  0xec   :  { %v412_v43 = vpop.f32.mrf.mxu0 }
  0xed   :  { %v337_v44 = vadd.f32 %v333_v38, %v329_v40  ;;  %v319_v45 = vmul.f32 %v386_v31, %v300_v41  ;;  %v413_v46 = vadd.f32 %v412_v43, %v411_v39 }
  0xee   :  { %v414_v48 = vpop.f32.mrf.mxu0 }
  0xef   :  { %v348_v49 = vmul.f32 %v388_v42, %v337_v44  ;;  %v330_v50 = vadd.f32 %v387_v33, %v319_v45  ;;  %v305_v51 = vadd.f32 %v427_v24, %v413_v46 }
  0xf0   :  { %v415_v52 = vpop.f32.mrf.mxu0 }
  0xf1   :  { %352 = vst.msk [vmem:[%s607_s6] sm:$0xff] %vm206_vm0, %v348_v49  ;;  %v338_v53 = vadd.f32 %v334_v47, %v330_v50  ;;  %v320_v54 = vmul.f32 %v386_v31, %v305_v51  ;;  %v416_v55 = vadd.f32 %v415_v52, %v414_v48 }
  0xf3   :  { %v349_v57 = vmul.f32 %v388_v42, %v338_v53  ;;  %v331_v58 = vadd.f32 %v387_v33, %v320_v54  ;;  %v308_v59 = vadd.f32 %v428_v28, %v416_v55 }
  0xf5   :  { %353 = vst.msk [vmem:[%s607_s6 + $0x8] sm:$0xff] %vm206_vm0, %v349_v57  ;;  %v339_v60 = vadd.f32 %v335_v56, %v331_v58  ;;  %v321_v61 = vmul.f32 %v386_v31, %v308_v59 }
  0xf7   :  { %v350_v63 = vmul.f32 %v388_v42, %v339_v60  ;;  %v332_v0 = vadd.f32 %v387_v33, %v321_v61 }
  0xf9   :  { %354 = vst.msk [vmem:[%s607_s6 + $0x10] sm:$0xff] %vm206_vm0, %v350_v63  ;;  %v340_v1 = vadd.f32 %v336_v62, %v332_v0 }
  0xfb   :  { %v351_v2 = vmul.f32 %v388_v42, %v340_v1 }
  0xfd   :  { %355 = vst.msk [vmem:[%s607_s6 + $0x18] sm:$0xff] %vm206_vm0, %v351_v2 }

// kernel: forward.74
= control target key start
LH: loop header
LB: loop body
LE: loop exit
PB: predicated region body
PF: predicated region fallthrough
CT: control target
= control target key end

     0   :  { %vm203_vm0 = vcmask 261120   ;;  %v337_v25 = vlaneseq  ;;  %v450_v34 = vmov 0   ;;  %vm346_vm3 = vcmask 523264   ;;  %s582_s1 = inlined_call_operand.vmem [shape: bf16[288,64], index: 1, kind: input, shape index: {}]   ;;  %s583_s0 = inlined_call_operand.vmem [shape: bf16[32,288], index: 0, kind: input, shape index: {}]   ;;  %s584_s4 = inlined_call_operand.vmem [shape: f32[1,64], index: 4, kind: input, shape index: {}]   ;;  %s585_s2 = inlined_call_operand.vmem [shape: f32[1,64], index: 2, kind: input, shape index: {}]   ;;  %s586_s3 = inlined_call_operand.vmem [shape: f32[1,64], index: 3, kind: input, shape index: {}]   ;;  %s587_s5 = inlined_call_operand.vmem [shape: f32[32,64], index: 5, kind: output, shape index: {}]  }
   0x1   :  { %v424_v0 = vld [vmem:[%s582_s1 + $0x78] sm:$0xff]   ;;  %v426_v2 = vld [vmem:[%s582_s1 + $0x70] sm:$0xff]   ;;  %v428_v4 = vld [vmem:[%s582_s1 + $0x68] sm:$0xff]  }
   0x2   :  { %v425_v1 = vld [vmem:[%s582_s1 + $0x38] sm:$0xff]   ;;  %383 = vmatprep.subr.bf16.mxu0 %v424_v0  ;;  %v427_v3 = vld [vmem:[%s582_s1 + $0x30] sm:$0xff]   ;;  %v429_v5 = vld [vmem:[%s582_s1 + $0x28] sm:$0xff]   ;;  %v338_v28 = vshrl.u32 %v337_v25, 7 }
   0x3   :  { %384 = vmatpush3.bf16.msra.mxu0 %v425_v1  ;;  %v430_v6 = vld [vmem:[%s582_s1 + $0x60] sm:$0xff]   ;;  %v432_v8 = vld [vmem:[%s582_s1 + $0x58] sm:$0xff]   ;;  %v438_v9 = vld [vmem:[%s582_s1 + $0x88] sm:$0xff]  }
   0x4   :  { %385 = vmatprep.subr.bf16.mxu0 %v426_v2  ;;  %v431_v7 = vld [vmem:[%s582_s1 + $0x20] sm:$0xff]   ;;  %v433_v10 = vld [vmem:[%s582_s1 + $0x18] sm:$0xff]   ;;  %v434_v11 = vld [vmem:[%s582_s1 + $0x50] sm:$0xff]   ;;  %415 = vmatprep.subr.bf16.mxu1 %v438_v9  ;;  %v339_v31 = vsub.s32 0, %v338_v28 }
   0x5   :  { %v435_v12 = vld [vmem:[%s582_s1 + $0x10] sm:$0xff]   ;;  %416 = vmatpush3.bf16.msra.mxu1 %v438_v9  ;;  %v441_v13 = vld [vmem:[%s582_s1 + $0x80] sm:$0xff]   ;;  %v436_v14 = vld [vmem:[%s582_s1 + $0x48] sm:$0xff]  }
   0x6   :  { %417 = vmatprep.subr.bf16.mxu1 %v441_v13  ;;  %v444_v15 = vld [vmem:[%s583_s0 + $0x4] ss:$12 sps:$4 sm:$0xff]   ;;  %v445_v16 = vld [vmem:[%s583_s0 + $0x8] ss:$12 sps:$4 sm:$0xff]   ;;  %v446_v17 = vld [vmem:[%s583_s0 + $0x20] ss:$12 sps:$4 sm:$0xff]  }
   0x7   :  { %386 = vmatpush3.bf16.msra.mxu0 %v427_v3  ;;  %242 = vmatprep.mubr.bf16.mxu0 %v444_v15  ;;  %v437_v18 = vld [vmem:[%s582_s1 + $0x8] sm:$0xff]   ;;  %v439_v19 = vld [vmem:[%s582_s1 + $0x40] sm:$0xff]  }
   0x8   :  { %387 = vmatprep.subr.bf16.mxu0 %v428_v4  ;;  %419 = vmatprep.mubr.msk.bf16.mxu1 %vm203_vm0, %v445_v16  ;;  %v440_v20 = vld [vmem:[%s582_s1] sm:$0xff]   ;;  %v447_v22 = vld [vmem:[%s583_s0 + $0x1c] ss:$12 sps:$4 sm:$0xff]  }
   0x9   :  { %418 = vmatpush3.bf16.msra.mxu1 %v441_v13  ;;  %v442_v21 = vld [vmem:[%s583_s0] ss:$12 sps:$4 sm:$0xff]   ;;  %v449_v23 = vld [vmem:[%s583_s0 + $0x18] ss:$12 sps:$4 sm:$0xff]  }
   0xa   :  { %v330_v26 = vld [vmem:[%s584_s4] sm:$0x1] }
   0xb   :  { %388 = vmatpush3.bf16.msra.mxu0 %v429_v5  ;;  %vm331_vm1 = vcmp.gt.f32.partialorder %v330_v26, 0.0  ;;  %v381_v37 = vld [vmem:[%s585_s2] ss:$0 sm:$0xff] }
   0xc   :  { %389 = vmatprep.subr.bf16.mxu0 %v430_v6  ;;  %420 = vmatmul.mubr.msk.bf16.vlgmr.msra.gmra.mxu1 %vm203_vm0, %v446_v17  ;;  %v336_v35 = vsel %vm331_vm1, 1, %v450_v34  ;;  %v382_v39 = vld [vmem:[%s586_s3] ss:$0 sm:$0xff] }
   0xd   :  { %v340_v40 = vrot.slane %v336_v35, %v339_v31 }
   0xf   :  { %390 = vmatpush3.bf16.msra.mxu0 %v431_v7  ;;  %vm341_vm2 = vcmp.eq.s32.totalorder %v340_v40, 1 }
  0x10   :  { %391 = vmatprep.subr.bf16.mxu0 %v432_v8 }
  0x13   :  { %392 = vmatpush3.bf16.msra.mxu0 %v433_v10 }
  0x14   :  { %393 = vmatprep.subr.bf16.mxu0 %v434_v11 }
  0x17   :  { %394 = vmatpush3.bf16.msra.mxu0 %v435_v12 }
  0x18   :  { %395 = vmatprep.subr.bf16.mxu0 %v436_v14 }
  0x1b   :  { %396 = vmatpush3.bf16.msra.mxu0 %v437_v18 }
  0x1c   :  { %397 = vmatprep.subr.bf16.mxu0 %v439_v19 }
  0x1f   :  { %398 = vmatpush3.bf16.msra.mxu0 %v440_v20 }
  0x22   :  { %243 = vmatmul.mubr.bf16.vlgmr.msra.gmra.mxu0 %v442_v21 }
  0x23   :  { %250 = vmatprep.mubr.bf16.mxu0 %v447_v22 }
  0x2a   :  { %251 = vmatmul.mubr.bf16.gmra.mxu0 %v449_v23 }
  0xcc   :  { %v421_v24 = vpop.f32.mrf.mxu1 }
  0xce   :  { %v293_v27 = vpop.f32.mrf.mxu1 }
  0xd0   :  { %v422_v32 = vpop.f32.mrf.mxu1 }
  0xd2   :  { %v296_v42 = vpop.f32.mrf.mxu1 }
  0xe2   :  { %v399_v29 = vpop.f32.mrf.mxu0 }
  0xe4   :  { %v400_v30 = vpop.f32.mrf.mxu0 }
  0xe5   :  { %v401_v33 = vadd.f32 %v400_v30, %v399_v29 }
  0xe6   :  { %v402_v36 = vpop.f32.mrf.mxu0 }
  0xe7   :  { %v294_v38 = vadd.f32 %v401_v33, %v293_v27 }
  0xe8   :  { %v403_v41 = vpop.f32.mrf.mxu0 }
  0xe9   :  { %v315_v43 = vmul.f32 %v381_v37, %v294_v38  ;;  %v404_v44 = vadd.f32 %v403_v41, %v402_v36 }
  0xea   :  { %v405_v45 = vpop.f32.mrf.mxu0 }
  0xeb   :  { %v326_v46 = vadd.f32 %v382_v39, %v315_v43  ;;  %v297_v47 = vadd.f32 %v404_v44, %v296_v42 }
  0xec   :  { %v406_v48 = vpop.f32.mrf.mxu0 }
  0xed   :  { %v332_v49 = vmax.f32 %v326_v46, 0.0  ;;  %v316_v50 = vmul.f32 %v381_v37, %v297_v47  ;;  %v407_v51 = vadd.f32 %v406_v48, %v405_v45 }
  0xee   :  { %v408_v52 = vpop.f32.mrf.mxu0 }
  0xef   :  { %v342_v53 = vsel %vm341_vm2, %v332_v49, %v326_v46  ;;  %v327_v54 = vadd.f32 %v382_v39, %v316_v50  ;;  %v302_v55 = vadd.f32 %v421_v24, %v407_v51 }
  0xf0   :  { %347 = vst.msk [vmem:[%s587_s5] sm:$0xff] %vm346_vm3, %v342_v53  ;;  %v409_v56 = vpop.f32.mrf.mxu0 }
  0xf1   :  { %v333_v57 = vmax.f32 %v327_v54, 0.0  ;;  %v317_v58 = vmul.f32 %v381_v37, %v302_v55  ;;  %v410_v59 = vadd.f32 %v409_v56, %v408_v52 }
  0xf3   :  { %v343_v60 = vsel %vm341_vm2, %v333_v57, %v327_v54  ;;  %v328_v61 = vadd.f32 %v382_v39, %v317_v58  ;;  %v305_v62 = vadd.f32 %v422_v32, %v410_v59 }
  0xf4   :  { %348 = vst.msk [vmem:[%s587_s5 + $0x8] sm:$0xff] %vm346_vm3, %v343_v60 }
  0xf5   :  { %v334_v63 = vmax.f32 %v328_v61, 0.0  ;;  %v318_v0 = vmul.f32 %v381_v37, %v305_v62 }
  0xf7   :  { %v344_v1 = vsel %vm341_vm2, %v334_v63, %v328_v61  ;;  %v329_v2 = vadd.f32 %v382_v39, %v318_v0 }
  0xf8   :  { %349 = vst.msk [vmem:[%s587_s5 + $0x10] sm:$0xff] %vm346_vm3, %v344_v1 }
  0xf9   :  { %v335_v3 = vmax.f32 %v329_v2, 0.0 }
  0xfb   :  { %v345_v4 = vsel %vm341_vm2, %v335_v3, %v329_v2 }
  0xfc   :  { %350 = vst.msk [vmem:[%s587_s5 + $0x18] sm:$0xff] %vm346_vm3, %v345_v4 }

// kernel: forward.84
= control target key start
LH: loop header
LB: loop body
LE: loop exit
PB: predicated region body
PF: predicated region fallthrough
CT: control target
= control target key end

     0   :  { %v373_v1 = vmov 0.0   ;;  %vm374_vm0 = vmmov 0   ;;  %vm177_vm1 = vcmask 261120   ;;  %v281_v27 = vlaneseq  ;;  %s478_s1 = inlined_call_operand.vmem [shape: bf16[288,128], index: 1, kind: input, shape index: {}]   ;;  %s479_s0 = inlined_call_operand.vmem [shape: bf16[8,288], index: 0, kind: input, shape index: {}]   ;;  %s480_s4 = inlined_call_operand.vmem [shape: f32[1,128], index: 4, kind: input, shape index: {}]   ;;  %s481_s2 = inlined_call_operand.vmem [shape: f32[1,128], index: 2, kind: input, shape index: {}]   ;;  %s482_s3 = inlined_call_operand.vmem [shape: f32[1,128], index: 3, kind: input, shape index: {}]   ;;  %s483_s5 = inlined_call_operand.vmem [shape: f32[8,128], index: 5, kind: output, shape index: {}]  }
   0x1   :  { %v352_v0 = vld [vmem:[%s478_s1 + $0x78] sm:$0xff]   ;;  %341 = vmatprep.subr.bf16.mxu1 %v373_v1  ;;  %345 = vmatprep.mubr.msk.bf16.mxu1 %vm374_vm0, %v373_v1  ;;  %v354_v3 = vld [vmem:[%s478_s1 + $0x70] sm:$0xff]   ;;  %v356_v5 = vld [vmem:[%s478_s1 + $0x68] sm:$0xff]   ;;  %v375_v34 = vmov 0  }
   0x2   :  { %v353_v2 = vld [vmem:[%s478_s1 + $0x38] sm:$0xff]   ;;  %316 = vmatprep.subr.bf16.mxu0 %v352_v0  ;;  %v355_v4 = vld [vmem:[%s478_s1 + $0x30] sm:$0xff]   ;;  %v357_v6 = vld [vmem:[%s478_s1 + $0x28] sm:$0xff]   ;;  %v282_v29 = vshrl.u32 %v281_v27, 7 }
   0x3   :  { %317 = vmatpush3.bf16.msra.mxu0 %v353_v2  ;;  %v358_v7 = vld [vmem:[%s478_s1 + $0x60] sm:$0xff]   ;;  %v360_v9 = vld [vmem:[%s478_s1 + $0x58] sm:$0xff]   ;;  %v364_v10 = vld [vmem:[%s478_s1 + $0x88] sm:$0xff]  }
   0x4   :  { %318 = vmatprep.subr.bf16.mxu0 %v354_v3  ;;  %v359_v8 = vld [vmem:[%s478_s1 + $0x20] sm:$0xff]   ;;  %v361_v11 = vld [vmem:[%s478_s1 + $0x18] sm:$0xff]   ;;  %342 = vmatpush3.bf16.msra.mxu1 %v364_v10  ;;  %v362_v13 = vld [vmem:[%s478_s1 + $0x50] sm:$0xff]   ;;  %v283_v32 = vsub.s32 0, %v282_v29 }
   0x5   :  { %343 = vmatprep.subr.bf16.mxu1 %v373_v1  ;;  %v367_v12 = vld [vmem:[%s478_s1 + $0x80] sm:$0xff]   ;;  %v370_v14 = vld [vmem:[%s479_s0 + $0x8] ss:$0 sps:$4 sm:$0xff]   ;;  %v363_v16 = vld [vmem:[%s478_s1 + $0x10] sm:$0xff]  }
   0x6   :  { %v21_v15 = vld [vmem:[%s479_s0] sm:$0xff]  ;;  %v365_v18 = vld [vmem:[%s478_s1 + $0x48] sm:$0xff]  }
   0x7   :  { %319 = vmatpush3.bf16.msra.mxu0 %v355_v4  ;;  %v293_v17 = vcombine.high %v21_v15, %v21_v15  ;;  %v366_v19 = vld [vmem:[%s478_s1 + $0x8] sm:$0xff]   ;;  %v368_v20 = vld [vmem:[%s478_s1 + $0x40] sm:$0xff]   ;;  %v292_v22 = vcombine.low %v21_v15, %v21_v15 }
   0x8   :  { %320 = vmatprep.subr.bf16.mxu0 %v356_v5  ;;  %344 = vmatpush3.bf16.msra.mxu1 %v367_v12  ;;  %v369_v21 = vld [vmem:[%s478_s1] sm:$0xff]  }
   0x9   :  { %213 = vmatprep.mubr.bf16.mxu0 %v293_v17  ;;  %v277_v28 = vld [vmem:[%s480_s4] sm:$0x1] }
   0xa   :  { %vm278_vm2 = vcmp.gt.f32.partialorder %v277_v28, 0.0  ;;  %v314_v36 = vld [vmem:[%s481_s2] ss:$0 sm:$0xff] }
   0xb   :  { %321 = vmatpush3.bf16.msra.mxu0 %v357_v6  ;;  %346 = vmatmul.mubr.msk.bf16.vlgmr.msra.gmra.mxu1 %vm177_vm1, %v370_v14  ;;  %v280_v35 = vsel %vm278_vm2, 1, %v375_v34  ;;  %v315_v39 = vld [vmem:[%s482_s3] ss:$0 sm:$0xff] }
   0xc   :  { %322 = vmatprep.subr.bf16.mxu0 %v358_v7  ;;  %v284_v40 = vrot.slane %v280_v35, %v283_v32 }
   0xe   :  { %vm285_vm3 = vcmp.eq.s32.totalorder %v284_v40, 1 }
   0xf   :  { %323 = vmatpush3.bf16.msra.mxu0 %v359_v8 }
  0x10   :  { %324 = vmatprep.subr.bf16.mxu0 %v360_v9 }
  0x13   :  { %325 = vmatpush3.bf16.msra.mxu0 %v361_v11 }
  0x14   :  { %326 = vmatprep.subr.bf16.mxu0 %v362_v13 }
  0x17   :  { %327 = vmatpush3.bf16.msra.mxu0 %v363_v16 }
  0x18   :  { %328 = vmatprep.subr.bf16.mxu0 %v365_v18 }
  0x1b   :  { %329 = vmatpush3.bf16.msra.mxu0 %v366_v19 }
  0x1c   :  { %330 = vmatprep.subr.bf16.mxu0 %v368_v20 }
  0x1f   :  { %331 = vmatpush3.bf16.msra.mxu0 %v369_v21 }
  0x22   :  { %214 = vmatmul.mubr.bf16.vlgmr.msra.gmra.mxu0 %v292_v22 }
  0xcb   :  { %v255_v23 = vpop.f32.mrf.mxu1 }
  0xcd   :  { %v347_v24 = vpop.f32.mrf.mxu1 }
  0xcf   :  { %v258_v25 = vpop.f32.mrf.mxu1 }
  0xd1   :  { %v348_v26 = vpop.f32.mrf.mxu1 }
  0xe2   :  { %v332_v30 = vpop.f32.mrf.mxu0 }
  0xe4   :  { %v333_v31 = vpop.f32.mrf.mxu0 }
  0xe5   :  { %v334_v33 = vadd.f32 %v333_v31, %v332_v30 }
  0xe6   :  { %v335_v37 = vpop.f32.mrf.mxu0 }
  0xe7   :  { %v256_v38 = vadd.f32 %v334_v33, %v255_v23 }
  0xe8   :  { %v336_v41 = vpop.f32.mrf.mxu0 }
  0xe9   :  { %v268_v42 = vmul.f32 %v314_v36, %v256_v38 }
  0xeb   :  { %v276_v43 = vadd.f32 %v315_v39, %v268_v42 }
  0xed   :  { %v279_v44 = vmax.f32 %v276_v43, 0.0 }
  0xef   :  { %v286_v45 = vsel %vm285_vm3, %v279_v44, %v276_v43 }
  0xf0   :  { %287 = vst [vmem:[%s483_s5] sm:$0xff] %v286_v45 }

// kernel: forward.85
= control target key start
LH: loop header
LB: loop body
LE: loop exit
PB: predicated region body
PF: predicated region fallthrough
CT: control target
= control target key end

     0   :  { %v636_v36 = vmov 0.0   ;;  %vm637_vm0 = vmmov 0   ;;  %vm332_vm1 = vcmask 523264   ;;  %s807_s1 = inlined_call_operand.vmem [shape: bf16[576,64], index: 1, kind: input, shape index: {}]   ;;  %s808_s0 = inlined_call_operand.vmem [shape: bf16[8,576], index: 0, kind: input, shape index: {}]   ;;  %s809_s2 = inlined_call_operand.vmem [shape: f32[1,64], index: 2, kind: input, shape index: {}]   ;;  %s810_s3 = inlined_call_operand.vmem [shape: f32[1,64], index: 3, kind: input, shape index: {}]   ;;  %s811_s4 = inlined_call_operand.vmem [shape: f32[8,64], index: 4, kind: input, shape index: {}]   ;;  %s812_s5 = inlined_call_operand.vmem [shape: f32[1,64], index: 5, kind: input, shape index: {}]   ;;  %s813_s6 = inlined_call_operand.vmem [shape: f32[8,64], index: 6, kind: output, shape index: {}]  }
   0x1   :  { %v595_v0 = vld [vmem:[%s807_s1 + $0x78] sm:$0xff]   ;;  %v599_v4 = vld [vmem:[%s807_s1 + $0x70] sm:$0xff]   ;;  %v603_v8 = vld [vmem:[%s807_s1 + $0x68] sm:$0xff]  }
   0x2   :  { %v596_v1 = vld [vmem:[%s807_s1 + $0xf8] sm:$0xff]   ;;  %532 = vmatprep.subr.bf16.mxu0 %v595_v0  ;;  %v600_v5 = vld [vmem:[%s807_s1 + $0xf0] sm:$0xff]   ;;  %v604_v9 = vld [vmem:[%s807_s1 + $0xe8] sm:$0xff]  }
   0x3   :  { %v597_v2 = vld [vmem:[%s807_s1 + $0x38] sm:$0xff]   ;;  %554 = vmatprep.subr.bf16.mxu1 %v596_v1  ;;  %v601_v6 = vld [vmem:[%s807_s1 + $0x30] sm:$0xff]   ;;  %v605_v10 = vld [vmem:[%s807_s1 + $0x28] sm:$0xff]  }
   0x4   :  { %v598_v3 = vld [vmem:[%s807_s1 + $0xb8] sm:$0xff]   ;;  %533 = vmatpush3.bf16.msra.mxu0 %v597_v2  ;;  %v602_v7 = vld [vmem:[%s807_s1 + $0xb0] sm:$0xff]   ;;  %v606_v11 = vld [vmem:[%s807_s1 + $0xa8] sm:$0xff]  }
   0x5   :  { %555 = vmatpush3.bf16.msra.mxu1 %v598_v3  ;;  %534 = vmatprep.subr.bf16.mxu0 %v599_v4  ;;  %v607_v12 = vld [vmem:[%s807_s1 + $0x60] sm:$0xff]   ;;  %v611_v16 = vld [vmem:[%s807_s1 + $0x58] sm:$0xff]   ;;  %v615_v20 = vld [vmem:[%s807_s1 + $0x50] sm:$0xff]  }
   0x6   :  { %556 = vmatprep.subr.bf16.mxu1 %v600_v5  ;;  %v608_v13 = vld [vmem:[%s807_s1 + $0xe0] sm:$0xff]   ;;  %v612_v17 = vld [vmem:[%s807_s1 + $0xd8] sm:$0xff]   ;;  %v616_v21 = vld [vmem:[%s807_s1 + $0xd0] sm:$0xff]  }
   0x7   :  { %v609_v14 = vld [vmem:[%s807_s1 + $0x20] sm:$0xff]   ;;  %v613_v18 = vld [vmem:[%s807_s1 + $0x18] sm:$0xff]   ;;  %v617_v22 = vld [vmem:[%s807_s1 + $0x10] sm:$0xff]  }
   0x8   :  { %535 = vmatpush3.bf16.msra.mxu0 %v601_v6  ;;  %v610_v15 = vld [vmem:[%s807_s1 + $0xa0] sm:$0xff]   ;;  %v614_v19 = vld [vmem:[%s807_s1 + $0x98] sm:$0xff]   ;;  %v618_v23 = vld [vmem:[%s807_s1 + $0x90] sm:$0xff]  }
   0x9   :  { %557 = vmatpush3.bf16.msra.mxu1 %v602_v7  ;;  %536 = vmatprep.subr.bf16.mxu0 %v603_v8  ;;  %v619_v24 = vld [vmem:[%s807_s1 + $0x48] sm:$0xff]   ;;  %v623_v28 = vld [vmem:[%s807_s1 + $0x40] sm:$0xff]   ;;  %v632_v39 = vld [vmem:[%s807_s1 + $0x118] sm:$0xff]  }
   0xa   :  { %558 = vmatprep.subr.bf16.mxu1 %v604_v9  ;;  %v620_v25 = vld [vmem:[%s807_s1 + $0xc8] sm:$0xff]   ;;  %v624_v29 = vld [vmem:[%s807_s1 + $0xc0] sm:$0xff]   ;;  %v633_v40 = vld [vmem:[%s807_s1 + $0x110] sm:$0xff]  }
   0xb   :  { %v621_v26 = vld [vmem:[%s807_s1 + $0x8] sm:$0xff]   ;;  %v625_v30 = vld [vmem:[%s807_s1] sm:$0xff]   ;;  %v629_v43 = vld [vmem:[%s808_s0 + $0x10] ss:$0 sps:$4 sm:$0xff]  }
   0xc   :  { %537 = vmatpush3.bf16.msra.mxu0 %v605_v10  ;;  %v622_v27 = vld [vmem:[%s807_s1 + $0x88] sm:$0xff]   ;;  %v626_v31 = vld [vmem:[%s807_s1 + $0x80] sm:$0xff]  }
   0xd   :  { %559 = vmatpush3.bf16.msra.mxu1 %v606_v11  ;;  %538 = vmatprep.subr.bf16.mxu0 %v607_v12  ;;  %v24_v32 = vld [vmem:[%s808_s0] sm:$0xff]  ;;  %v25_v35 = vld [vmem:[%s808_s0 + $0x8] sm:$0xff] }
   0xe   :  { %560 = vmatprep.subr.bf16.mxu1 %v608_v13  ;;  %v487_v33 = vcombine.low %v24_v32, %v24_v32  ;;  %v488_v34 = vcombine.high %v24_v32, %v24_v32  ;;  %v489_v37 = vcombine.low %v25_v35, %v25_v35  ;;  %v490_v38 = vcombine.high %v25_v35, %v25_v35  ;;  %v634_v41 = vld [vmem:[%s807_s1 + $0x108] sm:$0xff]   ;;  %v635_v42 = vld [vmem:[%s807_s1 + $0x100] sm:$0xff]  }
   0xf   :  { %v529_v56 = vld [vmem:[%s809_s2] ss:$0 sm:$0xff] }
  0x10   :  { %539 = vmatpush3.bf16.msra.mxu0 %v609_v14  ;;  %368 = vmatprep.mubr.bf16.mxu0 %v488_v34  ;;  %v530_v58 = vld [vmem:[%s810_s3] ss:$0 sm:$0xff] }
  0x11   :  { %561 = vmatpush3.bf16.msra.mxu1 %v610_v15  ;;  %540 = vmatprep.subr.bf16.mxu0 %v611_v16  ;;  %v472_v61 = vld [vmem:[%s811_s4] sm:$0xff] }
  0x12   :  { %562 = vmatprep.subr.bf16.mxu1 %v612_v17  ;;  %408 = vmatprep.mubr.bf16.mxu1 %v490_v38  ;;  %v531_v0 = vld [vmem:[%s812_s5] ss:$0 sm:$0xff] }
  0x14   :  { %541 = vmatpush3.bf16.msra.mxu0 %v613_v18 }
  0x15   :  { %563 = vmatpush3.bf16.msra.mxu1 %v614_v19  ;;  %542 = vmatprep.subr.bf16.mxu0 %v615_v20 }
  0x16   :  { %564 = vmatprep.subr.bf16.mxu1 %v616_v21 }
  0x18   :  { %543 = vmatpush3.bf16.msra.mxu0 %v617_v22 }
  0x19   :  { %565 = vmatpush3.bf16.msra.mxu1 %v618_v23  ;;  %544 = vmatprep.subr.bf16.mxu0 %v619_v24 }
  0x1a   :  { %566 = vmatprep.subr.bf16.mxu1 %v620_v25 }
  0x1c   :  { %545 = vmatpush3.bf16.msra.mxu0 %v621_v26 }
  0x1d   :  { %567 = vmatpush3.bf16.msra.mxu1 %v622_v27  ;;  %546 = vmatprep.subr.bf16.mxu0 %v623_v28 }
  0x1e   :  { %568 = vmatprep.subr.bf16.mxu1 %v624_v29 }
  0x20   :  { %547 = vmatpush3.bf16.msra.mxu0 %v625_v30 }
  0x21   :  { %569 = vmatpush3.bf16.msra.mxu1 %v626_v31  ;;  %581 = vmatprep.subr.bf16.mxu0 %v636_v36 }
  0x23   :  { %369 = vmatmul.mubr.bf16.vlgmr.msra.gmra.mxu0 %v487_v33 }
  0x24   :  { %409 = vmatmul.mubr.bf16.vlgmr.msra.gmra.mxu1 %v489_v37  ;;  %582 = vmatpush3.bf16.msra.mxu0 %v632_v39 }
  0x25   :  { %583 = vmatprep.subr.bf16.mxu0 %v636_v36  ;;  %589 = vmatprep.mubr.msk.bf16.mxu0 %vm637_vm0, %v636_v36 }
  0x28   :  { %584 = vmatpush3.bf16.msra.mxu0 %v633_v40 }
  0x29   :  { %585 = vmatprep.subr.bf16.mxu0 %v636_v36 }
  0x2c   :  { %586 = vmatpush3.bf16.msra.mxu0 %v634_v41 }
  0x2d   :  { %587 = vmatprep.subr.bf16.mxu0 %v636_v36 }
  0x30   :  { %588 = vmatpush3.bf16.msra.mxu0 %v635_v42 }
  0x33   :  { %590 = vmatmul.mubr.msk.bf16.vlgmr.msra.gmra.mxu0 %vm332_vm1, %v629_v43 }
  0xe3   :  { %v548_v44 = vpop.f32.mrf.mxu0 }
  0xe4   :  { %v570_v45 = vpop.f32.mrf.mxu1 }
  0xe5   :  { %v549_v46 = vpop.f32.mrf.mxu0 }
  0xe6   :  { %v571_v47 = vpop.f32.mrf.mxu1  ;;  %v550_v52 = vadd.f32 %v549_v46, %v548_v44 }
  0xe7   :  { %v551_v48 = vpop.f32.mrf.mxu0  ;;  %v572_v53 = vadd.f32 %v571_v47, %v570_v45 }
  0xe8   :  { %v573_v49 = vpop.f32.mrf.mxu1 }
  0xe9   :  { %v552_v50 = vpop.f32.mrf.mxu0  ;;  %v411_v54 = vadd.f32 %v572_v53, %v550_v52 }
  0xea   :  { %v574_v51 = vpop.f32.mrf.mxu1 }
  0xf3   :  { %v450_v55 = vpop.f32.mrf.mxu0 }
  0xf4   :  { %v451_v57 = vadd.f32 %v450_v55, %v411_v54 }
  0xf5   :  { %v591_v59 = vpop.f32.mrf.mxu0 }
  0xf6   :  { %v463_v60 = vmul.f32 %v529_v56, %v451_v57 }
  0xf7   :  { %v453_v62 = vpop.f32.mrf.mxu0 }
  0xf8   :  { %v471_v63 = vadd.f32 %v530_v58, %v463_v60 }
  0xf9   :  { %v592_v1 = vpop.f32.mrf.mxu0 }
  0xfa   :  { %v473_v2 = vadd.f32 %v472_v61, %v471_v63 }
  0xfc   :  { %v481_v3 = vmul.f32 %v531_v0, %v473_v2 }
  0xfe   :  { %482 = vst.msk [vmem:[%s813_s6] sm:$0xff] %vm332_vm1, %v481_v3 }

// kernel: forward.86
= control target key start
LH: loop header
LB: loop body
LE: loop exit
PB: predicated region body
PF: predicated region fallthrough
CT: control target
= control target key end

     0   :  { %v633_v36 = vmov 0.0   ;;  %vm634_vm0 = vmmov 0   ;;  %vm329_vm1 = vcmask 523264   ;;  %v473_v51 = vlaneseq  ;;  %s795_s1 = inlined_call_operand.vmem [shape: bf16[576,128], index: 1, kind: input, shape index: {}]   ;;  %s796_s0 = inlined_call_operand.vmem [shape: bf16[8,576], index: 0, kind: input, shape index: {}]   ;;  %s797_s4 = inlined_call_operand.vmem [shape: f32[1,128], index: 4, kind: input, shape index: {}]   ;;  %s798_s2 = inlined_call_operand.vmem [shape: f32[1,128], index: 2, kind: input, shape index: {}]   ;;  %s799_s3 = inlined_call_operand.vmem [shape: f32[1,128], index: 3, kind: input, shape index: {}]   ;;  %s800_s5 = inlined_call_operand.vmem [shape: f32[8,128], index: 5, kind: output, shape index: {}]  }
   0x1   :  { %v592_v0 = vld [vmem:[%s795_s1 + $0x78] sm:$0xff]   ;;  %v596_v4 = vld [vmem:[%s795_s1 + $0x70] sm:$0xff]   ;;  %v600_v8 = vld [vmem:[%s795_s1 + $0x68] sm:$0xff]   ;;  %v635_v59 = vmov 0  }
   0x2   :  { %v593_v1 = vld [vmem:[%s795_s1 + $0xf8] sm:$0xff]   ;;  %528 = vmatprep.subr.bf16.mxu0 %v592_v0  ;;  %v597_v5 = vld [vmem:[%s795_s1 + $0xf0] sm:$0xff]   ;;  %v601_v9 = vld [vmem:[%s795_s1 + $0xe8] sm:$0xff]   ;;  %v474_v54 = vshrl.u32 %v473_v51, 7 }
   0x3   :  { %v594_v2 = vld [vmem:[%s795_s1 + $0x38] sm:$0xff]   ;;  %550 = vmatprep.subr.bf16.mxu1 %v593_v1  ;;  %v598_v6 = vld [vmem:[%s795_s1 + $0x30] sm:$0xff]   ;;  %v602_v10 = vld [vmem:[%s795_s1 + $0x28] sm:$0xff]  }
   0x4   :  { %v595_v3 = vld [vmem:[%s795_s1 + $0xb8] sm:$0xff]   ;;  %529 = vmatpush3.bf16.msra.mxu0 %v594_v2  ;;  %v599_v7 = vld [vmem:[%s795_s1 + $0xb0] sm:$0xff]   ;;  %v603_v11 = vld [vmem:[%s795_s1 + $0xa8] sm:$0xff]   ;;  %v475_v57 = vsub.s32 0, %v474_v54 }
   0x5   :  { %551 = vmatpush3.bf16.msra.mxu1 %v595_v3  ;;  %530 = vmatprep.subr.bf16.mxu0 %v596_v4  ;;  %v604_v12 = vld [vmem:[%s795_s1 + $0x60] sm:$0xff]   ;;  %v608_v16 = vld [vmem:[%s795_s1 + $0x58] sm:$0xff]   ;;  %v612_v20 = vld [vmem:[%s795_s1 + $0x50] sm:$0xff]  }
   0x6   :  { %552 = vmatprep.subr.bf16.mxu1 %v597_v5  ;;  %v605_v13 = vld [vmem:[%s795_s1 + $0xe0] sm:$0xff]   ;;  %v609_v17 = vld [vmem:[%s795_s1 + $0xd8] sm:$0xff]   ;;  %v613_v21 = vld [vmem:[%s795_s1 + $0xd0] sm:$0xff]  }
   0x7   :  { %v606_v14 = vld [vmem:[%s795_s1 + $0x20] sm:$0xff]   ;;  %v610_v18 = vld [vmem:[%s795_s1 + $0x18] sm:$0xff]   ;;  %v614_v22 = vld [vmem:[%s795_s1 + $0x10] sm:$0xff]  }
   0x8   :  { %531 = vmatpush3.bf16.msra.mxu0 %v598_v6  ;;  %v607_v15 = vld [vmem:[%s795_s1 + $0xa0] sm:$0xff]   ;;  %v611_v19 = vld [vmem:[%s795_s1 + $0x98] sm:$0xff]   ;;  %v615_v23 = vld [vmem:[%s795_s1 + $0x90] sm:$0xff]  }
   0x9   :  { %553 = vmatpush3.bf16.msra.mxu1 %v599_v7  ;;  %532 = vmatprep.subr.bf16.mxu0 %v600_v8  ;;  %v616_v24 = vld [vmem:[%s795_s1 + $0x48] sm:$0xff]   ;;  %v620_v28 = vld [vmem:[%s795_s1 + $0x40] sm:$0xff]   ;;  %v629_v39 = vld [vmem:[%s795_s1 + $0x118] sm:$0xff]  }
   0xa   :  { %554 = vmatprep.subr.bf16.mxu1 %v601_v9  ;;  %v617_v25 = vld [vmem:[%s795_s1 + $0xc8] sm:$0xff]   ;;  %v621_v29 = vld [vmem:[%s795_s1 + $0xc0] sm:$0xff]   ;;  %v630_v40 = vld [vmem:[%s795_s1 + $0x110] sm:$0xff]  }
   0xb   :  { %v618_v26 = vld [vmem:[%s795_s1 + $0x8] sm:$0xff]   ;;  %v622_v30 = vld [vmem:[%s795_s1] sm:$0xff]   ;;  %v626_v43 = vld [vmem:[%s796_s0 + $0x10] ss:$0 sps:$4 sm:$0xff]  }
   0xc   :  { %533 = vmatpush3.bf16.msra.mxu0 %v602_v10  ;;  %v619_v27 = vld [vmem:[%s795_s1 + $0x88] sm:$0xff]   ;;  %v623_v31 = vld [vmem:[%s795_s1 + $0x80] sm:$0xff]  }
   0xd   :  { %555 = vmatpush3.bf16.msra.mxu1 %v603_v11  ;;  %534 = vmatprep.subr.bf16.mxu0 %v604_v12  ;;  %v21_v32 = vld [vmem:[%s796_s0] sm:$0xff]  ;;  %v22_v35 = vld [vmem:[%s796_s0 + $0x8] sm:$0xff] }
   0xe   :  { %556 = vmatprep.subr.bf16.mxu1 %v605_v13  ;;  %v484_v33 = vcombine.low %v21_v32, %v21_v32  ;;  %v485_v34 = vcombine.high %v21_v32, %v21_v32  ;;  %v486_v37 = vcombine.low %v22_v35, %v22_v35  ;;  %v487_v38 = vcombine.high %v22_v35, %v22_v35  ;;  %v631_v41 = vld [vmem:[%s795_s1 + $0x108] sm:$0xff]   ;;  %v632_v42 = vld [vmem:[%s795_s1 + $0x100] sm:$0xff]  }
   0xf   :  { %v469_v53 = vld [vmem:[%s797_s4] sm:$0x1] }
  0x10   :  { %535 = vmatpush3.bf16.msra.mxu0 %v606_v14  ;;  %365 = vmatprep.mubr.bf16.mxu0 %v485_v34  ;;  %vm470_vm2 = vcmp.gt.f32.partialorder %v469_v53, 0.0  ;;  %v526_v62 = vld [vmem:[%s798_s2] ss:$0 sm:$0xff] }
  0x11   :  { %557 = vmatpush3.bf16.msra.mxu1 %v607_v15  ;;  %536 = vmatprep.subr.bf16.mxu0 %v608_v16  ;;  %v472_v60 = vsel %vm470_vm2, 1, %v635_v59  ;;  %v527_v0 = vld [vmem:[%s799_s3] ss:$0 sm:$0xff] }
  0x12   :  { %558 = vmatprep.subr.bf16.mxu1 %v609_v17  ;;  %405 = vmatprep.mubr.bf16.mxu1 %v487_v38  ;;  %v476_v1 = vrot.slane %v472_v60, %v475_v57 }
  0x14   :  { %537 = vmatpush3.bf16.msra.mxu0 %v610_v18  ;;  %vm477_vm3 = vcmp.eq.s32.totalorder %v476_v1, 1 }
  0x15   :  { %559 = vmatpush3.bf16.msra.mxu1 %v611_v19  ;;  %538 = vmatprep.subr.bf16.mxu0 %v612_v20 }
  0x16   :  { %560 = vmatprep.subr.bf16.mxu1 %v613_v21 }
  0x18   :  { %539 = vmatpush3.bf16.msra.mxu0 %v614_v22 }
  0x19   :  { %561 = vmatpush3.bf16.msra.mxu1 %v615_v23  ;;  %540 = vmatprep.subr.bf16.mxu0 %v616_v24 }
  0x1a   :  { %562 = vmatprep.subr.bf16.mxu1 %v617_v25 }
  0x1c   :  { %541 = vmatpush3.bf16.msra.mxu0 %v618_v26 }
  0x1d   :  { %563 = vmatpush3.bf16.msra.mxu1 %v619_v27  ;;  %542 = vmatprep.subr.bf16.mxu0 %v620_v28 }
  0x1e   :  { %564 = vmatprep.subr.bf16.mxu1 %v621_v29 }
  0x20   :  { %543 = vmatpush3.bf16.msra.mxu0 %v622_v30 }
  0x21   :  { %565 = vmatpush3.bf16.msra.mxu1 %v623_v31  ;;  %577 = vmatprep.subr.bf16.mxu0 %v633_v36 }
  0x23   :  { %366 = vmatmul.mubr.bf16.vlgmr.msra.gmra.mxu0 %v484_v33 }
  0x24   :  { %406 = vmatmul.mubr.bf16.vlgmr.msra.gmra.mxu1 %v486_v37  ;;  %578 = vmatpush3.bf16.msra.mxu0 %v629_v39 }
  0x25   :  { %579 = vmatprep.subr.bf16.mxu0 %v633_v36  ;;  %585 = vmatprep.mubr.msk.bf16.mxu0 %vm634_vm0, %v633_v36 }
  0x28   :  { %580 = vmatpush3.bf16.msra.mxu0 %v630_v40 }
  0x29   :  { %581 = vmatprep.subr.bf16.mxu0 %v633_v36 }
  0x2c   :  { %582 = vmatpush3.bf16.msra.mxu0 %v631_v41 }
  0x2d   :  { %583 = vmatprep.subr.bf16.mxu0 %v633_v36 }
  0x30   :  { %584 = vmatpush3.bf16.msra.mxu0 %v632_v42 }
  0x33   :  { %586 = vmatmul.mubr.msk.bf16.vlgmr.msra.gmra.mxu0 %vm329_vm1, %v626_v43 }
  0xe3   :  { %v544_v44 = vpop.f32.mrf.mxu0 }
  0xe4   :  { %v566_v45 = vpop.f32.mrf.mxu1 }
  0xe5   :  { %v545_v46 = vpop.f32.mrf.mxu0 }
  0xe6   :  { %v567_v47 = vpop.f32.mrf.mxu1  ;;  %v546_v55 = vadd.f32 %v545_v46, %v544_v44 }
  0xe7   :  { %v547_v48 = vpop.f32.mrf.mxu0  ;;  %v568_v56 = vadd.f32 %v567_v47, %v566_v45 }
  0xe8   :  { %v569_v49 = vpop.f32.mrf.mxu1 }
  0xe9   :  { %v548_v50 = vpop.f32.mrf.mxu0  ;;  %v408_v58 = vadd.f32 %v568_v56, %v546_v55 }
  0xea   :  { %v570_v52 = vpop.f32.mrf.mxu1 }
  0xf3   :  { %v447_v61 = vpop.f32.mrf.mxu0 }
  0xf4   :  { %v448_v63 = vadd.f32 %v447_v61, %v408_v58 }
  0xf5   :  { %v587_v2 = vpop.f32.mrf.mxu0 }
  0xf6   :  { %v460_v3 = vmul.f32 %v526_v62, %v448_v63 }
  0xf7   :  { %v450_v4 = vpop.f32.mrf.mxu0 }
  0xf8   :  { %v468_v5 = vadd.f32 %v527_v0, %v460_v3 }
  0xf9   :  { %v588_v6 = vpop.f32.mrf.mxu0 }
  0xfa   :  { %v471_v7 = vmax.f32 %v468_v5, 0.0 }
  0xfc   :  { %v478_v8 = vsel %vm477_vm3, %v471_v7, %v468_v5 }
  0xfd   :  { %479 = vst [vmem:[%s800_s5] sm:$0xff] %v478_v8 }

// kernel: forward.89
= control target key start
LH: loop header
LB: loop body
LE: loop exit
PB: predicated region body
PF: predicated region fallthrough
CT: control target
= control target key end

     0   :  { %v670_v39 = vmov 0.0   ;;  %vm671_vm0 = vmmov 0   ;;  %s842_s0 = inlined_call_operand.vmem [shape: bf16[8,576], index: 0, kind: input, shape index: {}]   ;;  %s843_s1 = inlined_call_operand.vmem [shape: bf16[576,64], index: 1, kind: input, shape index: {}]   ;;  %s844_s2 = inlined_call_operand.vmem [shape: f32[1,64], index: 2, kind: input, shape index: {}]   ;;  %s845_s3 = inlined_call_operand.vmem [shape: f32[1,64], index: 3, kind: input, shape index: {}]   ;;  %s846_s4 = inlined_call_operand.vmem [shape: f32[8,64], index: 4, kind: input, shape index: {}]   ;;  %s847_s5 = inlined_call_operand.vmem [shape: f32[1,64], index: 5, kind: input, shape index: {}]   ;;  %s848_s6 = inlined_call_operand.hbm [shape: f32[8,64], index: 6, kind: output, shape index: {}]  }
   0x1   :  { %v607_v0 = vld [vmem:[%s843_s1 + $0x78] sm:$0xff]   ;;  %v611_v4 = vld [vmem:[%s843_s1 + $0x70] sm:$0xff]   ;;  %v615_v8 = vld [vmem:[%s843_s1 + $0x68] sm:$0xff]  }
   0x2   :  { %v608_v1 = vld [vmem:[%s843_s1 + $0xf8] sm:$0xff]   ;;  %543 = vmatprep.subr.bf16.mxu0 %v607_v0  ;;  %v612_v5 = vld [vmem:[%s843_s1 + $0xf0] sm:$0xff]   ;;  %v616_v9 = vld [vmem:[%s843_s1 + $0xe8] sm:$0xff]  }
   0x3   :  { %v609_v2 = vld [vmem:[%s843_s1 + $0x38] sm:$0xff]   ;;  %565 = vmatprep.subr.bf16.mxu1 %v608_v1  ;;  %v613_v6 = vld [vmem:[%s843_s1 + $0x30] sm:$0xff]   ;;  %v617_v10 = vld [vmem:[%s843_s1 + $0x28] sm:$0xff]  }
   0x4   :  { %v610_v3 = vld [vmem:[%s843_s1 + $0xb8] sm:$0xff]   ;;  %544 = vmatpush3.bf16.msra.mxu0 %v609_v2  ;;  %v614_v7 = vld [vmem:[%s843_s1 + $0xb0] sm:$0xff]   ;;  %v618_v11 = vld [vmem:[%s843_s1 + $0xa8] sm:$0xff]  }
   0x5   :  { %566 = vmatpush3.bf16.msra.mxu1 %v610_v3  ;;  %545 = vmatprep.subr.bf16.mxu0 %v611_v4  ;;  %v619_v12 = vld [vmem:[%s843_s1 + $0x60] sm:$0xff]   ;;  %v623_v16 = vld [vmem:[%s843_s1 + $0x58] sm:$0xff]   ;;  %v627_v20 = vld [vmem:[%s843_s1 + $0x50] sm:$0xff]  }
   0x6   :  { %567 = vmatprep.subr.bf16.mxu1 %v612_v5  ;;  %v620_v13 = vld [vmem:[%s843_s1 + $0xe0] sm:$0xff]   ;;  %v624_v17 = vld [vmem:[%s843_s1 + $0xd8] sm:$0xff]   ;;  %v628_v21 = vld [vmem:[%s843_s1 + $0xd0] sm:$0xff]  }
   0x7   :  { %v621_v14 = vld [vmem:[%s843_s1 + $0x20] sm:$0xff]   ;;  %v625_v18 = vld [vmem:[%s843_s1 + $0x18] sm:$0xff]   ;;  %v629_v22 = vld [vmem:[%s843_s1 + $0x10] sm:$0xff]  }
   0x8   :  { %546 = vmatpush3.bf16.msra.mxu0 %v613_v6  ;;  %v622_v15 = vld [vmem:[%s843_s1 + $0xa0] sm:$0xff]   ;;  %v626_v19 = vld [vmem:[%s843_s1 + $0x98] sm:$0xff]   ;;  %v630_v23 = vld [vmem:[%s843_s1 + $0x90] sm:$0xff]  }
   0x9   :  { %568 = vmatpush3.bf16.msra.mxu1 %v614_v7  ;;  %547 = vmatprep.subr.bf16.mxu0 %v615_v8  ;;  %v631_v24 = vld [vmem:[%s843_s1 + $0x48] sm:$0xff]   ;;  %v635_v28 = vld [vmem:[%s843_s1 + $0x40] sm:$0xff]   ;;  %v643_v38 = vld [vmem:[%s843_s1 + $0x118] sm:$0xff]  }
   0xa   :  { %569 = vmatprep.subr.bf16.mxu1 %v616_v9  ;;  %v632_v25 = vld [vmem:[%s843_s1 + $0xc8] sm:$0xff]   ;;  %v636_v29 = vld [vmem:[%s843_s1 + $0xc0] sm:$0xff]   ;;  %v644_v40 = vld [vmem:[%s843_s1 + $0x110] sm:$0xff]  }
   0xb   :  { %v633_v26 = vld [vmem:[%s843_s1 + $0x8] sm:$0xff]   ;;  %v637_v30 = vld [vmem:[%s843_s1] sm:$0xff]  }
   0xc   :  { %548 = vmatpush3.bf16.msra.mxu0 %v617_v10  ;;  %v634_v27 = vld [vmem:[%s843_s1 + $0x88] sm:$0xff]   ;;  %v638_v31 = vld [vmem:[%s843_s1 + $0x80] sm:$0xff]  }
   0xd   :  { %570 = vmatpush3.bf16.msra.mxu1 %v618_v11  ;;  %549 = vmatprep.subr.bf16.mxu0 %v619_v12  ;;  %v25_v32 = vld [vmem:[%s842_s0] sm:$0xff]  ;;  %v26_v33 = vld [vmem:[%s842_s0 + $0x8] sm:$0xff] }
   0xe   :  { %571 = vmatprep.subr.bf16.mxu1 %v620_v13  ;;  %v498_v34 = vcombine.low %v25_v32, %v25_v32  ;;  %v499_v35 = vcombine.high %v25_v32, %v25_v32  ;;  %v500_v36 = vcombine.low %v26_v33, %v26_v33  ;;  %v501_v37 = vcombine.high %v26_v33, %v26_v33 }
  0x10   :  { %550 = vmatpush3.bf16.msra.mxu0 %v621_v14  ;;  %369 = vmatprep.mubr.bf16.mxu0 %v499_v35 }
  0x11   :  { %572 = vmatpush3.bf16.msra.mxu1 %v622_v15  ;;  %551 = vmatprep.subr.bf16.mxu0 %v623_v16 }
  0x12   :  { %573 = vmatprep.subr.bf16.mxu1 %v624_v17  ;;  %409 = vmatprep.mubr.bf16.mxu1 %v501_v37 }
  0x14   :  { %552 = vmatpush3.bf16.msra.mxu0 %v625_v18 }
  0x15   :  { %574 = vmatpush3.bf16.msra.mxu1 %v626_v19  ;;  %553 = vmatprep.subr.bf16.mxu0 %v627_v20 }
  0x16   :  { %575 = vmatprep.subr.bf16.mxu1 %v628_v21 }
  0x18   :  { %554 = vmatpush3.bf16.msra.mxu0 %v629_v22 }
  0x19   :  { %576 = vmatpush3.bf16.msra.mxu1 %v630_v23  ;;  %555 = vmatprep.subr.bf16.mxu0 %v631_v24 }
  0x1a   :  { %577 = vmatprep.subr.bf16.mxu1 %v632_v25 }
  0x1c   :  { %556 = vmatpush3.bf16.msra.mxu0 %v633_v26 }
  0x1d   :  { %578 = vmatpush3.bf16.msra.mxu1 %v634_v27  ;;  %557 = vmatprep.subr.bf16.mxu0 %v635_v28 }
  0x1e   :  { %579 = vmatprep.subr.bf16.mxu1 %v636_v29 }
  0x20   :  { %558 = vmatpush3.bf16.msra.mxu0 %v637_v30 }
  0x21   :  { %580 = vmatpush3.bf16.msra.mxu1 %v638_v31  ;;  %592 = vmatprep.subr.bf16.mxu0 %v670_v39 }
  0x23   :  { %370 = vmatmul.mubr.bf16.vlgmr.msra.gmra.mxu0 %v498_v34 }
  0x24   :  { %410 = vmatmul.mubr.bf16.vlgmr.msra.gmra.mxu1 %v500_v36  ;;  %593 = vmatpush3.bf16.msra.mxu0 %v643_v38 }
  0x25   :  { %600 = vmatprep.mubr.msk.bf16.mxu0 %vm671_vm0, %v670_v39 }
  0x26   :  { %11 = vsyncpa [#allocation3], 0  ;;  %594 = vmatprep.subr.bf16.mxu0 %v670_v39  ;;  %v645_v41 = vld [vmem:[%s843_s1 + $0x108] sm:$0xff]   ;;  %v646_v42 = vld [vmem:[%s843_s1 + $0x100] sm:$0xff]   ;;  %vm333_vm1 = vcmask 523264   ;;  %s672_s9 = smov [#allocation2]  }
  0x27   :  { %v647_v43 = vld [vmem:[%s842_s0 + $0x10] ss:$0 sps:$4 sm:$0xff]   ;;  %v540_v56 = vld [vmem:[%s844_s2] ss:$0 sm:$0xff]  ;;  %s490_s2 = sshll.u32 %s672_s9, 4  ;;  %s491_s2 = int_to_ptr.vmem [resolvable:$true] %s490_s2 }
  0x28   :  { %595 = vmatpush3.bf16.msra.mxu0 %v644_v40  ;;  %v541_v58 = vld [vmem:[%s845_s3] ss:$0 sm:$0xff]  ;;  %s648_s3 = scalar_lea.vmem %s491_s2, 128  ;;  %p653_p1 = scmp.lt.s32.totalorder %s491_s2, %s491_s2 }
  0x29   :  { %596 = vmatprep.subr.bf16.mxu0 %v670_v39  ;;  %v473_v62 = vld [vmem:[%s846_s4] sm:$0xff]  ;;  %p649_p0 = scmp.ne.s32.totalorder %s491_s2, %s648_s3  ;;  %p654_p2 = scmp.lt.s32.totalorder %s648_s3, %s648_s3 }
  0x2a   :  { %v542_v1 = vld [vmem:[%s847_s5] ss:$0 sm:$0xff] }
  0x2b   :  { %p655_p3 = por %p654_p2, %p653_p1 }
  0x2c   :  { %597 = vmatpush3.bf16.msra.mxu0 %v645_v41 }
  0x2d   :  { %598 = vmatprep.subr.bf16.mxu0 %v670_v39  ;;  %p656_p4 = pnand %p655_p3, %p649_p0 }
  0x30   :  { %599 = vmatpush3.bf16.msra.mxu0 %v646_v42 }
  0x33   :  { %601 = vmatmul.mubr.msk.bf16.vlgmr.msra.gmra.mxu0 %vm333_vm1, %v647_v43 }
  0xe3   :  { %v559_v44 = vpop.f32.mrf.mxu0 }
  0xe4   :  { %v581_v45 = vpop.f32.mrf.mxu1 }
  0xe5   :  { %v560_v46 = vpop.f32.mrf.mxu0 }
  0xe6   :  { %v582_v47 = vpop.f32.mrf.mxu1  ;;  %v561_v52 = vadd.f32 %v560_v46, %v559_v44 }
  0xe7   :  { %v562_v48 = vpop.f32.mrf.mxu0  ;;  %v583_v53 = vadd.f32 %v582_v47, %v581_v45 }
  0xe8   :  { %v584_v49 = vpop.f32.mrf.mxu1 }
  0xe9   :  { %v563_v50 = vpop.f32.mrf.mxu0  ;;  %v412_v54 = vadd.f32 %v583_v53, %v561_v52 }
  0xea   :  { %v585_v51 = vpop.f32.mrf.mxu1 }
  0xf3   :  { %v451_v55 = vpop.f32.mrf.mxu0 }
  0xf4   :  { %v452_v57 = vadd.f32 %v451_v55, %v412_v54 }
  0xf5   :  { %v602_v59 = vpop.f32.mrf.mxu0 }
  0xf6   :  { %v464_v60 = vmul.f32 %v540_v56, %v452_v57 }
  0xf7   :  { %v454_v61 = vpop.f32.mrf.mxu0 }
  0xf8   :  { %v472_v63 = vadd.f32 %v541_v58, %v464_v60 }
  0xf9   :  { %v603_v0 = vpop.f32.mrf.mxu0 }
  0xfa   :  { %v474_v2 = vadd.f32 %v473_v62, %v472_v63 }
  0xfc   :  { %v482_v3 = vmul.f32 %v542_v1, %v474_v2 }
  0xfe   :  { %483 = vst.msk [vmem:[#allocation2] sm:$0xff] %vm333_vm1, %v482_v3 }
  0xff   :  { %659 = shalt.err (!%p656_p4)
}
 0x100   :  { %493 = dma.vmem_to_hbm [thread:$0]  %s491_s2, 128, %s848_s6, [#allocation3]  }
 0x101   :  { %668 = dma.done.wait [#allocation3], 128  }
 0x102   :  { %669 = vsyncadd [#allocation3], 4294967168 }
 0x103   :  { %497 = vsyncpa [#allocation3], 1 }

</bundles_post_ra>
